<compile_context>
chip_gen: v6e
topology: v6e:2x2x1
jax: 0.10.0
libtpu: 0.0.40
codegen_flags: <defaults>
</compile_context>

<pallas_src>
import numpy as np
import jax
import jax.numpy as jnp
from jax.experimental import pallas as pl
from jax.experimental.pallas import tpu as pltpu


# ------------------------------ in-kernel helpers ------------------------------

def _conv3_rows(srcs, ts, b_ref, H):
    """3x3 'same' conv in folded-row layout.

    srcs: list of padded (H+2, (W+2)*Cin_part) bf16 refs (channel-concatenated parts);
    ts:   matching list of (3, (W+2)*Cin_part, (W+2)*Cout) banded bf16 weights;
    b_ref: (1, (W+2)*Cout) f32 bias row (zero at pad lane-blocks).
    One matmul per kernel row ky; the dx taps live inside the band and the pad
    lane-blocks are all-zero columns, so the result's pads are exactly zero.
    Returns f32 rows 1..H of the padded output."""
    acc = b_ref[...]
    for src, t in zip(srcs, ts):
        for ky in range(3):
            acc = acc + jnp.dot(src[pl.ds(ky, H), :], t[ky],
                                preferred_element_type=jnp.float32)
    return acc


def _conv_block(srcs, t1s, b1_ref, t2_ref, b2_ref, h1_ref):
    """ConvBlock (bn=False): conv1 -> relu -> conv2 (no final activation).
    relu(conv1) is staged in the zero-haloed VMEM scratch h1_ref so conv2 sees its
    1-pixel halo with no HBM round trip."""
    H = h1_ref.shape[0] - 2
    a1 = _conv3_rows(srcs, t1s, b1_ref, H)
    h1_ref[pl.ds(1, H), :] = jnp.maximum(a1, 0.0).astype(jnp.bfloat16)
    return _conv3_rows([h1_ref], [t2_ref], b2_ref, H)


def _pool(src_ref, r_ref, s_ref, dst_ref):
    """dnpool = relu(max_pool2d(x, 2)); relu already folded into the producer, so this
    is a pure 2x2 max.  h-pairing = 2 row-selection matmuls, w-pairing + stride-2 lane
    compaction + re-padding = 2 lane-selection matmuls (exact bf16 copies)."""
    Hc = dst_ref.shape[0] - 2
    x = src_ref[...]
    a = jnp.dot(r_ref[0], x, preferred_element_type=jnp.float32)
    b = jnp.dot(r_ref[1], x, preferred_element_type=jnp.float32)
    hm = jnp.maximum(a, b).astype(jnp.bfloat16)
    p0 = jnp.dot(hm, s_ref[0], preferred_element_type=jnp.float32)
    p1 = jnp.dot(hm, s_ref[1], preferred_element_type=jnp.float32)
    dst_ref[pl.ds(1, Hc), :] = jnp.maximum(p0, p1).astype(jnp.bfloat16)


def _upsample(slab, u_ref, ub_ref, p_ref, dst_ref):
    """UpPool: relu -> 2x2 stride-2 ConvTranspose2d -> scatter to the fine grid ->
    relu (the post-concat relu, folded into this producer).  The dx interleave and
    zero re-padding live in the banded weights U[dy]; the dy row interleave is two
    0/1 row-placement matmuls."""
    Hf = dst_ref.shape[0] - 2
    r = jnp.maximum(slab, 0.0).astype(jnp.bfloat16)        # F.relu before ConvTranspose2d
    rows0 = jnp.dot(r, u_ref[0], preferred_element_type=jnp.float32).astype(jnp.bfloat16)
    rows1 = jnp.dot(r, u_ref[1], preferred_element_type=jnp.float32).astype(jnp.bfloat16)
    u = (jnp.dot(p_ref[0], rows0, preferred_element_type=jnp.float32)
         + jnp.dot(p_ref[1], rows1, preferred_element_type=jnp.float32)
         + ub_ref[...])
    dst_ref[pl.ds(1, Hf), :] = jnp.maximum(u, 0.0).astype(jnp.bfloat16)


def _make_kernel(names):
    n_w = len(names)

    def kernel(x_ref, *refs):
        w = {k: refs[i] for i, k in enumerate(names)}
        out_ref = refs[n_w]
        (h1_1, h1_2, h1_3, h1_4,
         skip1, skip2, skip3,
         in2, in3, in4,
         u3, u2, u1) = refs[n_w + 1:]

        # Zero ONLY the top/bottom halo rows (2 tiny row stores per buffer).  Left/
        # right pad lanes are rewritten with exact zeros by every store and interiors
        # are fully overwritten each step, so there are no full zero-fill passes.
        for buf in (h1_1, h1_2, h1_3, h1_4, skip1, skip2, skip3,
                    in2, in3, in4, u3, u2, u1):
            z = jnp.zeros((1, buf.shape[1]), jnp.bfloat16)
            buf[pl.ds(0, 1), :] = z
            buf[pl.ds(buf.shape[0] - 1, 1), :] = z

        # ------------------------------- down path -------------------------------
        s = _conv_block([x_ref], [w['dn1_t1']], w['dn1_b1'],
                        w['dn1_t2'], w['dn1_b2'], h1_1)
        skip1[pl.ds(1, h1_1.shape[0] - 2), :] = jnp.maximum(s, 0.0).astype(jnp.bfloat16)
        _pool(skip1, w['pool1_r'], w['pool1_s'], in2)

        s = _conv_block([in2], [w['dn2_t1']], w['dn2_b1'],
                        w['dn2_t2'], w['dn2_b2'], h1_2)
        skip2[pl.ds(1, h1_2.shape[0] - 2), :] = jnp.maximum(s, 0.0).astype(jnp.bfloat16)
        _pool(skip2, w['pool2_r'], w['pool2_s'], in3)

        s = _conv_block([in3], [w['dn3_t1']], w['dn3_b1'],
                        w['dn3_t2'], w['dn3_b2'], h1_3)
        skip3[pl.ds(1, h1_3.shape[0] - 2), :] = jnp.maximum(s, 0.0).astype(jnp.bfloat16)
        _pool(skip3, w['pool3_r'], w['pool3_s'], in4)

        # --------------------------- bottom + up path ----------------------------
        s = _conv_block([in4], [w['bot_t1']], w['bot_b1'],
                        w['bot_t2'], w['bot_b2'], h1_4)
        _upsample(s, w['upc1_u'], w['upc1_ub'], w['upc1_p'], u3)

        # torch.cat([f, x_up]) never materializes: conv1 weight is split along Cin.
        s = _conv_block([skip3, u3], [w['up1_t1f'], w['up1_t1u']], w['up1_b1'],
                        w['up1_t2'], w['up1_b2'], h1_3)
        _upsample(s, w['upc2_u'], w['upc2_ub'], w['upc2_p'], u2)

        s = _conv_block([skip2, u2], [w['up2_t1f'], w['up2_t1u']], w['up2_b1'],
                        w['up2_t2'], w['up2_b2'], h1_2)
        _upsample(s, w['upc3_u'], w['upc3_ub'], w['upc3_p'], u1)

        s = _conv_block([skip1, u1], [w['up3_t1f'], w['up3_t1u']], w['up3_b1'],
                        w['up3_t2'], w['up3_b2'], h1_1)

        # final 1x1 outconv on relu(up_blk3 out), emitted directly as NCHW (c, h, w)
        r = jnp.maximum(s, 0.0).astype(jnp.bfloat16)
        y = jnp.dot(r, w['out_o'][...], preferred_element_type=jnp.float32) + w['out_b'][...]
        W1 = out_ref.shape[2]
        out_ref[0] = y[:, :W1]
        out_ref[1] = y[:, W1:2 * W1]

    return kernel


# ------------------------------- host-side params -------------------------------

def init_params(n_filters, size=16, seed=0):
    """Random Unet3 weights in native PyTorch layouts, folded into the banded /
    selection matrices consumed by the fused kernel.  Returns an ordered list of
    (name, jnp.ndarray)."""
    nf = n_filters
    rng = np.random.default_rng(seed)

    def conv_w(cout, cin, k=3):
        w = rng.standard_normal((cout, cin, k, k)).astype(np.float32) / np.sqrt(k * k * cin)
        b = 0.01 * rng.standard_normal((cout,)).astype(np.float32)
        return w, b

    def t_mats(w, s):                       # w: PyTorch Conv2d weight (Cout, Cin, 3, 3)
        cout, cin = w.shape[0], w.shape[1]
        wp = s + 2
        t = np.zeros((3, wp * cin, wp * cout), np.float32)
        for ky in range(3):
            for kx in range(3):
                blk = w[:, :, ky, kx].T     # (cin, cout)
                for xo in range(1, s + 1):
                    xi = xo - 1 + kx
                    t[ky, xi * cin:(xi + 1) * cin, xo * cout:(xo + 1) * cout] = blk
        return jnp.asarray(t, jnp.bfloat16)

    def bias_row(b, s):
        c = b.shape[0]
        r = np.zeros((1, (s + 2) * c), np.float32)
        for xo in range(1, s + 1):
            r[0, xo * c:(xo + 1) * c] = b
        return jnp.asarray(r)

    def pool_mats(sf, c):
        sc = sf // 2
        R = np.zeros((2, sc, sf + 2), np.float32)
        S = np.zeros((2, (sf + 2) * c, (sc + 2) * c), np.float32)
        for i in range(sc):
            R[0, i, 2 * i + 1] = 1.0
            R[1, i, 2 * i + 2] = 1.0
        for dx in range(2):
            for j in range(sc):
                for ch in range(c):
                    S[dx, (2 * j + 1 + dx) * c + ch, (j + 1) * c + ch] = 1.0
        return jnp.asarray(R, jnp.bfloat16), jnp.asarray(S, jnp.bfloat16)

    def upconv_mats(cin, sc):               # PyTorch ConvTranspose2d weight (Cin, Cu, 2, 2)
        cu = cin // 2
        w = rng.standard_normal((cin, cu, 2, 2)).astype(np.float32) / np.sqrt(cin)
        b = 0.01 * rng.standard_normal((cu,)).astype(np.float32)
        sf = 2 * sc
        U = np.zeros((2, (sc + 2) * cin, (sf + 2) * cu), np.float32)
        for dy in range(2):
            for dx in range(2):
                blk = w[:, :, dy, dx]       # (cin, cu)
                for j in range(sc):
                    xo = 2 * j + dx + 1
                    U[dy, (j + 1) * cin:(j + 2) * cin, xo * cu:(xo + 1) * cu] = blk
        P = np.zeros((2, sf, sc), np.float32)
        for dy in range(2):
            for i in range(sc):
                P[dy, 2 * i + dy, i] = 1.0
        return jnp.asarray(U, jnp.bfloat16), bias_row(b, sf), jnp.asarray(P, jnp.bfloat16)

    def out_mats(cin, s):                   # PyTorch 1x1 Conv2d weight (2, Cin, 1, 1)
        w = rng.standard_normal((2, cin, 1, 1)).astype(np.float32) / np.sqrt(cin)
        b = 0.01 * rng.standard_normal((2,)).astype(np.float32)
        O = np.zeros(((s + 2) * cin, 2 * s), np.float32)
        for c in range(2):
            for x in range(s):
                for ci in range(cin):
                    O[(x + 1) * cin + ci, c * s + x] = w[c, ci, 0, 0]
        Bo = np.zeros((1, 2 * s), np.float32)
        Bo[0, :s] = b[0]
        Bo[0, s:] = b[1]
        return jnp.asarray(O, jnp.bfloat16), jnp.asarray(Bo)

    sizes = [size, size // 2, size // 4, size // 8]
    chans = [nf, 2 * nf, 4 * nf, 8 * nf]
    params = []

    def add_block(prefix, cin, cout, s):
        w1, b1 = conv_w(cout, cin)
        w2, b2 = conv_w(cout, cout)
        params.extend([(prefix + '_t1', t_mats(w1, s)), (prefix + '_b1', bias_row(b1, s)),
                       (prefix + '_t2', t_mats(w2, s)), (prefix + '_b2', bias_row(b2, s))])

    def add_up_block(prefix, cout, s):
        # ConvBlock(2*cout, cout): conv1 split along Cin; torch.cat([f, x_up]) puts the
        # skip (f) channels first, the upsampled (x_up) channels second.
        w1, b1 = conv_w(cout, 2 * cout)
        w2, b2 = conv_w(cout, cout)
        params.extend([(prefix + '_t1f', t_mats(w1[:, :cout], s)),
                       (prefix + '_t1u', t_mats(w1[:, cout:], s)),
                       (prefix + '_b1', bias_row(b1, s)),
                       (prefix + '_t2', t_mats(w2, s)),
                       (prefix + '_b2', bias_row(b2, s))])

    def add_upconv(prefix, cin, sc):
        u, ub, p = upconv_mats(cin, sc)
        params.extend([(prefix + '_u', u), (prefix + '_ub', ub), (prefix + '_p', p)])

    add_block('dn1', 1, chans[0], sizes[0])
    params.extend([('pool1_' + k, v) for k, v in zip(('r', 's'), pool_mats(sizes[0], chans[0]))])
    add_block('dn2', chans[0], chans[1], sizes[1])
    params.extend([('pool2_' + k, v) for k, v in zip(('r', 's'), pool_mats(sizes[1], chans[1]))])
    add_block('dn3', chans[1], chans[2], sizes[2])
    params.extend([('pool3_' + k, v) for k, v in zip(('r', 's'), pool_mats(sizes[2], chans[2]))])
    add_block('bot', chans[2], chans[3], sizes[3])
    add_upconv('upc1', chans[3], sizes[3])
    add_up_block('up1', chans[2], sizes[2])
    add_upconv('upc2', chans[2], sizes[2])
    add_up_block('up2', chans[1], sizes[1])
    add_upconv('upc3', chans[1], sizes[1])
    add_up_block('up3', chans[0], sizes[0])
    o, bo = out_mats(nf, sizes[0])
    params.extend([('out_o', o), ('out_b', bo)])
    return params


# ----------------------------------- wrapper ------------------------------------

def make_forward(params, n_filters, size=16):
    names = [k for k, _ in params]
    arrs = [a for _, a in params]
    nf = n_filters
    sizes = [size, size // 2, size // 4, size // 8]
    chans = [nf, 2 * nf, 4 * nf, 8 * nf]

    def scr(lvl, c):   # padded, W-folded activation scratch at a given level
        return pltpu.VMEM((sizes[lvl] + 2, (sizes[lvl] + 2) * c), jnp.bfloat16)

    scratch_shapes = [scr(0, chans[0]), scr(1, chans[1]), scr(2, chans[2]), scr(3, chans[3]),  # h1
                      scr(0, chans[0]), scr(1, chans[1]), scr(2, chans[2]),                    # skips
                      scr(1, chans[0]), scr(2, chans[1]), scr(3, chans[2]),                    # pooled ins
                      scr(2, chans[2]), scr(1, chans[1]), scr(0, chans[0])]                    # u3, u2, u1

    kernel = _make_kernel(names)

    def const_spec(a):
        nd = a.ndim
        return pl.BlockSpec(a.shape, lambda b, _nd=nd: (0,) * _nd)

    @jax.jit
    def forward(x_nchw):
        n = x_nchw.shape[0]
        xpad = jnp.pad(x_nchw[:, 0].astype(jnp.bfloat16), ((0, 0), (1, 1), (1, 1)))
        return pl.pallas_call(
            kernel,
            out_shape=jax.ShapeDtypeStruct((n, 2, size, size), jnp.float32),
            grid=(n,),
            in_specs=[pl.BlockSpec((None, size + 2, size + 2), lambda b: (b, 0, 0))]
                     + [const_spec(a) for a in arrs],
            out_specs=pl.BlockSpec((None, 2, size, size), lambda b: (b, 0, 0, 0)),
            scratch_shapes=scratch_shapes,
            compiler_params=pltpu.CompilerParams(
                dimension_semantics=("parallel",),
                vmem_limit_bytes=32 * 1024 * 1024),
        )(xpad, *arrs)

    return forward


if __name__ == "__main__":
    key = jax.random.PRNGKey(0)
    n_filters = 8
    # Depth-3 U-Net pools spatial by 2^3 -> 16x16 input; Unet3 takes 1 input channel.
    x = jax.random.normal(key, (2, 1, 16, 16), jnp.float32)          # NCHW like PyTorch
    params = init_params(n_filters, size=16, seed=0)
    forward = make_forward(params, n_filters, size=16)
    y = jax.block_until_ready(forward(x))
    assert y.shape == (2, 2, 16, 16), y.shape
    assert bool(jnp.all(jnp.isfinite(y)))
    print("KERNEL_OK")
</pallas_src>

<mosaic_0001>
module attributes {stable_mosaic.version = 11 : i64} {
  func.func @kernel(%arg0: i32, %arg1: memref<1x18x18xbf16, #tpu.memory_space<vmem>>, %arg2: memref<3x18x144xbf16, #tpu.memory_space<vmem>>, %arg3: memref<1x144xf32, #tpu.memory_space<vmem>>, %arg4: memref<3x144x144xbf16, #tpu.memory_space<vmem>>, %arg5: memref<1x144xf32, #tpu.memory_space<vmem>>, %arg6: memref<2x8x18xbf16, #tpu.memory_space<vmem>>, %arg7: memref<2x144x80xbf16, #tpu.memory_space<vmem>>, %arg8: memref<3x80x160xbf16, #tpu.memory_space<vmem>>, %arg9: memref<1x160xf32, #tpu.memory_space<vmem>>, %arg10: memref<3x160x160xbf16, #tpu.memory_space<vmem>>, %arg11: memref<1x160xf32, #tpu.memory_space<vmem>>, %arg12: memref<2x4x10xbf16, #tpu.memory_space<vmem>>, %arg13: memref<2x160x96xbf16, #tpu.memory_space<vmem>>, %arg14: memref<3x96x192xbf16, #tpu.memory_space<vmem>>, %arg15: memref<1x192xf32, #tpu.memory_space<vmem>>, %arg16: memref<3x192x192xbf16, #tpu.memory_space<vmem>>, %arg17: memref<1x192xf32, #tpu.memory_space<vmem>>, %arg18: memref<2x2x6xbf16, #tpu.memory_space<vmem>>, %arg19: memref<2x192x128xbf16, #tpu.memory_space<vmem>>, %arg20: memref<3x128x256xbf16, #tpu.memory_space<vmem>>, %arg21: memref<1x256xf32, #tpu.memory_space<vmem>>, %arg22: memref<3x256x256xbf16, #tpu.memory_space<vmem>>, %arg23: memref<1x256xf32, #tpu.memory_space<vmem>>, %arg24: memref<2x256x192xbf16, #tpu.memory_space<vmem>>, %arg25: memref<1x192xf32, #tpu.memory_space<vmem>>, %arg26: memref<2x4x2xbf16, #tpu.memory_space<vmem>>, %arg27: memref<3x192x192xbf16, #tpu.memory_space<vmem>>, %arg28: memref<3x192x192xbf16, #tpu.memory_space<vmem>>, %arg29: memref<1x192xf32, #tpu.memory_space<vmem>>, %arg30: memref<3x192x192xbf16, #tpu.memory_space<vmem>>, %arg31: memref<1x192xf32, #tpu.memory_space<vmem>>, %arg32: memref<2x192x160xbf16, #tpu.memory_space<vmem>>, %arg33: memref<1x160xf32, #tpu.memory_space<vmem>>, %arg34: memref<2x8x4xbf16, #tpu.memory_space<vmem>>, %arg35: memref<3x160x160xbf16, #tpu.memory_space<vmem>>, %arg36: memref<3x160x160xbf16, #tpu.memory_space<vmem>>, %arg37: memref<1x160xf32, #tpu.memory_space<vmem>>, %arg38: memref<3x160x160xbf16, #tpu.memory_space<vmem>>, %arg39: memref<1x160xf32, #tpu.memory_space<vmem>>, %arg40: memref<2x160x144xbf16, #tpu.memory_space<vmem>>, %arg41: memref<1x144xf32, #tpu.memory_space<vmem>>, %arg42: memref<2x16x8xbf16, #tpu.memory_space<vmem>>, %arg43: memref<3x144x144xbf16, #tpu.memory_space<vmem>>, %arg44: memref<3x144x144xbf16, #tpu.memory_space<vmem>>, %arg45: memref<1x144xf32, #tpu.memory_space<vmem>>, %arg46: memref<3x144x144xbf16, #tpu.memory_space<vmem>>, %arg47: memref<1x144xf32, #tpu.memory_space<vmem>>, %arg48: memref<144x32xbf16, #tpu.memory_space<vmem>>, %arg49: memref<1x32xf32, #tpu.memory_space<vmem>>, %arg50: memref<1x2x16x16xf32, #tpu.memory_space<vmem>>, %arg51: memref<18x144xbf16, #tpu.memory_space<vmem>>, %arg52: memref<10x160xbf16, #tpu.memory_space<vmem>>, %arg53: memref<6x192xbf16, #tpu.memory_space<vmem>>, %arg54: memref<4x256xbf16, #tpu.memory_space<vmem>>, %arg55: memref<18x144xbf16, #tpu.memory_space<vmem>>, %arg56: memref<10x160xbf16, #tpu.memory_space<vmem>>, %arg57: memref<6x192xbf16, #tpu.memory_space<vmem>>, %arg58: memref<10x80xbf16, #tpu.memory_space<vmem>>, %arg59: memref<6x96xbf16, #tpu.memory_space<vmem>>, %arg60: memref<4x128xbf16, #tpu.memory_space<vmem>>, %arg61: memref<6x192xbf16, #tpu.memory_space<vmem>>, %arg62: memref<10x160xbf16, #tpu.memory_space<vmem>>, %arg63: memref<18x144xbf16, #tpu.memory_space<vmem>>) attributes {dimension_semantics = [#tpu.dimension_semantics<parallel>], iteration_bounds = array<i64: 2>, scalar_prefetch = 0 : i64, scratch_operands = 13 : i64, tpu.core_type = #tpu.core_type<tc>, window_params = [{transform_indices = @transform_0, window_bounds = array<i64: 1, 18, 18>}, {pipeline_mode = #tpu.pipeline_mode<synchronous>, transform_indices = @transform_1, window_bounds = array<i64: 3, 18, 144>}, {pipeline_mode = #tpu.pipeline_mode<synchronous>, transform_indices = @transform_2, window_bounds = array<i64: 1, 144>}, {pipeline_mode = #tpu.pipeline_mode<synchronous>, transform_indices = @transform_3, window_bounds = array<i64: 3, 144, 144>}, {pipeline_mode = #tpu.pipeline_mode<synchronous>, transform_indices = @transform_4, window_bounds = array<i64: 1, 144>}, {pipeline_mode = #tpu.pipeline_mode<synchronous>, transform_indices = @transform_5, window_bounds = array<i64: 2, 8, 18>}, {pipeline_mode = #tpu.pipeline_mode<synchronous>, transform_indices = @transform_6, window_bounds = array<i64: 2, 144, 80>}, {pipeline_mode = #tpu.pipeline_mode<synchronous>, transform_indices = @transform_7, window_bounds = array<i64: 3, 80, 160>}, {pipeline_mode = #tpu.pipeline_mode<synchronous>, transform_indices = @transform_8, window_bounds = array<i64: 1, 160>}, {pipeline_mode = #tpu.pipeline_mode<synchronous>, transform_indices = @transform_9, window_bounds = array<i64: 3, 160, 160>}, {pipeline_mode = #tpu.pipeline_mode<synchronous>, transform_indices = @transform_10, window_bounds = array<i64: 1, 160>}, {pipeline_mode = #tpu.pipeline_mode<synchronous>, transform_indices = @transform_11, window_bounds = array<i64: 2, 4, 10>}, {pipeline_mode = #tpu.pipeline_mode<synchronous>, transform_indices = @transform_12, window_bounds = array<i64: 2, 160, 96>}, {pipeline_mode = #tpu.pipeline_mode<synchronous>, transform_indices = @transform_13, window_bounds = array<i64: 3, 96, 192>}, {pipeline_mode = #tpu.pipeline_mode<synchronous>, transform_indices = @transform_14, window_bounds = array<i64: 1, 192>}, {pipeline_mode = #tpu.pipeline_mode<synchronous>, transform_indices = @transform_15, window_bounds = array<i64: 3, 192, 192>}, {pipeline_mode = #tpu.pipeline_mode<synchronous>, transform_indices = @transform_16, window_bounds = array<i64: 1, 192>}, {pipeline_mode = #tpu.pipeline_mode<synchronous>, transform_indices = @transform_17, window_bounds = array<i64: 2, 2, 6>}, {pipeline_mode = #tpu.pipeline_mode<synchronous>, transform_indices = @transform_18, window_bounds = array<i64: 2, 192, 128>}, {pipeline_mode = #tpu.pipeline_mode<synchronous>, transform_indices = @transform_19, window_bounds = array<i64: 3, 128, 256>}, {pipeline_mode = #tpu.pipeline_mode<synchronous>, transform_indices = @transform_20, window_bounds = array<i64: 1, 256>}, {pipeline_mode = #tpu.pipeline_mode<synchronous>, transform_indices = @transform_21, window_bounds = array<i64: 3, 256, 256>}, {pipeline_mode = #tpu.pipeline_mode<synchronous>, transform_indices = @transform_22, window_bounds = array<i64: 1, 256>}, {pipeline_mode = #tpu.pipeline_mode<synchronous>, transform_indices = @transform_23, window_bounds = array<i64: 2, 256, 192>}, {pipeline_mode = #tpu.pipeline_mode<synchronous>, transform_indices = @transform_24, window_bounds = array<i64: 1, 192>}, {pipeline_mode = #tpu.pipeline_mode<synchronous>, transform_indices = @transform_25, window_bounds = array<i64: 2, 4, 2>}, {pipeline_mode = #tpu.pipeline_mode<synchronous>, transform_indices = @transform_26, window_bounds = array<i64: 3, 192, 192>}, {pipeline_mode = #tpu.pipeline_mode<synchronous>, transform_indices = @transform_27, window_bounds = array<i64: 3, 192, 192>}, {pipeline_mode = #tpu.pipeline_mode<synchronous>, transform_indices = @transform_28, window_bounds = array<i64: 1, 192>}, {pipeline_mode = #tpu.pipeline_mode<synchronous>, transform_indices = @transform_29, window_bounds = array<i64: 3, 192, 192>}, {pipeline_mode = #tpu.pipeline_mode<synchronous>, transform_indices = @transform_30, window_bounds = array<i64: 1, 192>}, {pipeline_mode = #tpu.pipeline_mode<synchronous>, transform_indices = @transform_31, window_bounds = array<i64: 2, 192, 160>}, {pipeline_mode = #tpu.pipeline_mode<synchronous>, transform_indices = @transform_32, window_bounds = array<i64: 1, 160>}, {pipeline_mode = #tpu.pipeline_mode<synchronous>, transform_indices = @transform_33, window_bounds = array<i64: 2, 8, 4>}, {pipeline_mode = #tpu.pipeline_mode<synchronous>, transform_indices = @transform_34, window_bounds = array<i64: 3, 160, 160>}, {pipeline_mode = #tpu.pipeline_mode<synchronous>, transform_indices = @transform_35, window_bounds = array<i64: 3, 160, 160>}, {pipeline_mode = #tpu.pipeline_mode<synchronous>, transform_indices = @transform_36, window_bounds = array<i64: 1, 160>}, {pipeline_mode = #tpu.pipeline_mode<synchronous>, transform_indices = @transform_37, window_bounds = array<i64: 3, 160, 160>}, {pipeline_mode = #tpu.pipeline_mode<synchronous>, transform_indices = @transform_38, window_bounds = array<i64: 1, 160>}, {pipeline_mode = #tpu.pipeline_mode<synchronous>, transform_indices = @transform_39, window_bounds = array<i64: 2, 160, 144>}, {pipeline_mode = #tpu.pipeline_mode<synchronous>, transform_indices = @transform_40, window_bounds = array<i64: 1, 144>}, {pipeline_mode = #tpu.pipeline_mode<synchronous>, transform_indices = @transform_41, window_bounds = array<i64: 2, 16, 8>}, {pipeline_mode = #tpu.pipeline_mode<synchronous>, transform_indices = @transform_42, window_bounds = array<i64: 3, 144, 144>}, {pipeline_mode = #tpu.pipeline_mode<synchronous>, transform_indices = @transform_43, window_bounds = array<i64: 3, 144, 144>}, {pipeline_mode = #tpu.pipeline_mode<synchronous>, transform_indices = @transform_44, window_bounds = array<i64: 1, 144>}, {pipeline_mode = #tpu.pipeline_mode<synchronous>, transform_indices = @transform_45, window_bounds = array<i64: 3, 144, 144>}, {pipeline_mode = #tpu.pipeline_mode<synchronous>, transform_indices = @transform_46, window_bounds = array<i64: 1, 144>}, {pipeline_mode = #tpu.pipeline_mode<synchronous>, transform_indices = @transform_47, window_bounds = array<i64: 144, 32>}, {pipeline_mode = #tpu.pipeline_mode<synchronous>, transform_indices = @transform_48, window_bounds = array<i64: 1, 32>}, {transform_indices = @transform_49, window_bounds = array<i64: 1, 2, 16, 16>}]} {
    %cst = arith.constant 0.000000e+00 : bf16
    %0 = vector.broadcast %cst : bf16 to vector<1x144xbf16>
    %c0 = arith.constant 0 : index
    %c0_0 = arith.constant 0 : index
    %1 = vector.load %arg51[%c0, %c0_0] : memref<18x144xbf16, #tpu.memory_space<vmem>>, vector<1x144xbf16>
    tpu.vector_store %arg51[%c0, %c0_0], %0 {strides = array<i32>} : memref<18x144xbf16, #tpu.memory_space<vmem>>, vector<1x144xbf16>,
    %c17 = arith.constant 17 : index
    %c0_1 = arith.constant 0 : index
    %2 = vector.load %arg51[%c17, %c0_1] : memref<18x144xbf16, #tpu.memory_space<vmem>>, vector<1x144xbf16>
    tpu.vector_store %arg51[%c17, %c0_1], %0 {strides = array<i32>} : memref<18x144xbf16, #tpu.memory_space<vmem>>, vector<1x144xbf16>,
    %cst_2 = arith.constant 0.000000e+00 : bf16
    %3 = vector.broadcast %cst_2 : bf16 to vector<1x160xbf16>
    %c0_3 = arith.constant 0 : index
    %c0_4 = arith.constant 0 : index
    %4 = vector.load %arg52[%c0_3, %c0_4] : memref<10x160xbf16, #tpu.memory_space<vmem>>, vector<1x160xbf16>
    tpu.vector_store %arg52[%c0_3, %c0_4], %3 {strides = array<i32>} : memref<10x160xbf16, #tpu.memory_space<vmem>>, vector<1x160xbf16>,
    %c9 = arith.constant 9 : index
    %c0_5 = arith.constant 0 : index
    %5 = vector.load %arg52[%c9, %c0_5] : memref<10x160xbf16, #tpu.memory_space<vmem>>, vector<1x160xbf16>
    tpu.vector_store %arg52[%c9, %c0_5], %3 {strides = array<i32>} : memref<10x160xbf16, #tpu.memory_space<vmem>>, vector<1x160xbf16>,
    %cst_6 = arith.constant 0.000000e+00 : bf16
    %6 = vector.broadcast %cst_6 : bf16 to vector<1x192xbf16>
    %c0_7 = arith.constant 0 : index
    %c0_8 = arith.constant 0 : index
    %7 = vector.load %arg53[%c0_7, %c0_8] : memref<6x192xbf16, #tpu.memory_space<vmem>>, vector<1x192xbf16>
    tpu.vector_store %arg53[%c0_7, %c0_8], %6 {strides = array<i32>} : memref<6x192xbf16, #tpu.memory_space<vmem>>, vector<1x192xbf16>,
    %c5 = arith.constant 5 : index
    %c0_9 = arith.constant 0 : index
    %8 = vector.load %arg53[%c5, %c0_9] : memref<6x192xbf16, #tpu.memory_space<vmem>>, vector<1x192xbf16>
    tpu.vector_store %arg53[%c5, %c0_9], %6 {strides = array<i32>} : memref<6x192xbf16, #tpu.memory_space<vmem>>, vector<1x192xbf16>,
    %cst_10 = arith.constant 0.000000e+00 : bf16
    %9 = vector.broadcast %cst_10 : bf16 to vector<1x256xbf16>
    %c0_11 = arith.constant 0 : index
    %c0_12 = arith.constant 0 : index
    %10 = vector.load %arg54[%c0_11, %c0_12] : memref<4x256xbf16, #tpu.memory_space<vmem>>, vector<1x256xbf16>
    tpu.vector_store %arg54[%c0_11, %c0_12], %9 {strides = array<i32>} : memref<4x256xbf16, #tpu.memory_space<vmem>>, vector<1x256xbf16>,
    %c3 = arith.constant 3 : index
    %c0_13 = arith.constant 0 : index
    %11 = vector.load %arg54[%c3, %c0_13] : memref<4x256xbf16, #tpu.memory_space<vmem>>, vector<1x256xbf16>
    tpu.vector_store %arg54[%c3, %c0_13], %9 {strides = array<i32>} : memref<4x256xbf16, #tpu.memory_space<vmem>>, vector<1x256xbf16>,
    %cst_14 = arith.constant 0.000000e+00 : bf16
    %12 = vector.broadcast %cst_14 : bf16 to vector<1x144xbf16>
    %c0_15 = arith.constant 0 : index
    %c0_16 = arith.constant 0 : index
    %13 = vector.load %arg55[%c0_15, %c0_16] : memref<18x144xbf16, #tpu.memory_space<vmem>>, vector<1x144xbf16>
    tpu.vector_store %arg55[%c0_15, %c0_16], %12 {strides = array<i32>} : memref<18x144xbf16, #tpu.memory_space<vmem>>, vector<1x144xbf16>,
    %c17_17 = arith.constant 17 : index
    %c0_18 = arith.constant 0 : index
    %14 = vector.load %arg55[%c17_17, %c0_18] : memref<18x144xbf16, #tpu.memory_space<vmem>>, vector<1x144xbf16>
    tpu.vector_store %arg55[%c17_17, %c0_18], %12 {strides = array<i32>} : memref<18x144xbf16, #tpu.memory_space<vmem>>, vector<1x144xbf16>,
    %cst_19 = arith.constant 0.000000e+00 : bf16
    %15 = vector.broadcast %cst_19 : bf16 to vector<1x160xbf16>
    %c0_20 = arith.constant 0 : index
    %c0_21 = arith.constant 0 : index
    %16 = vector.load %arg56[%c0_20, %c0_21] : memref<10x160xbf16, #tpu.memory_space<vmem>>, vector<1x160xbf16>
    tpu.vector_store %arg56[%c0_20, %c0_21], %15 {strides = array<i32>} : memref<10x160xbf16, #tpu.memory_space<vmem>>, vector<1x160xbf16>,
    %c9_22 = arith.constant 9 : index
    %c0_23 = arith.constant 0 : index
    %17 = vector.load %arg56[%c9_22, %c0_23] : memref<10x160xbf16, #tpu.memory_space<vmem>>, vector<1x160xbf16>
    tpu.vector_store %arg56[%c9_22, %c0_23], %15 {strides = array<i32>} : memref<10x160xbf16, #tpu.memory_space<vmem>>, vector<1x160xbf16>,
    %cst_24 = arith.constant 0.000000e+00 : bf16
    %18 = vector.broadcast %cst_24 : bf16 to vector<1x192xbf16>
    %c0_25 = arith.constant 0 : index
    %c0_26 = arith.constant 0 : index
    %19 = vector.load %arg57[%c0_25, %c0_26] : memref<6x192xbf16, #tpu.memory_space<vmem>>, vector<1x192xbf16>
    tpu.vector_store %arg57[%c0_25, %c0_26], %18 {strides = array<i32>} : memref<6x192xbf16, #tpu.memory_space<vmem>>, vector<1x192xbf16>,
    %c5_27 = arith.constant 5 : index
    %c0_28 = arith.constant 0 : index
    %20 = vector.load %arg57[%c5_27, %c0_28] : memref<6x192xbf16, #tpu.memory_space<vmem>>, vector<1x192xbf16>
    tpu.vector_store %arg57[%c5_27, %c0_28], %18 {strides = array<i32>} : memref<6x192xbf16, #tpu.memory_space<vmem>>, vector<1x192xbf16>,
    %cst_29 = arith.constant 0.000000e+00 : bf16
    %21 = vector.broadcast %cst_29 : bf16 to vector<1x80xbf16>
    %c0_30 = arith.constant 0 : index
    %c0_31 = arith.constant 0 : index
    %22 = vector.load %arg58[%c0_30, %c0_31] : memref<10x80xbf16, #tpu.memory_space<vmem>>, vector<1x80xbf16>
    tpu.vector_store %arg58[%c0_30, %c0_31], %21 {strides = array<i32>} : memref<10x80xbf16, #tpu.memory_space<vmem>>, vector<1x80xbf16>,
    %c9_32 = arith.constant 9 : index
    %c0_33 = arith.constant 0 : index
    %23 = vector.load %arg58[%c9_32, %c0_33] : memref<10x80xbf16, #tpu.memory_space<vmem>>, vector<1x80xbf16>
    tpu.vector_store %arg58[%c9_32, %c0_33], %21 {strides = array<i32>} : memref<10x80xbf16, #tpu.memory_space<vmem>>, vector<1x80xbf16>,
    %cst_34 = arith.constant 0.000000e+00 : bf16
    %24 = vector.broadcast %cst_34 : bf16 to vector<1x96xbf16>
    %c0_35 = arith.constant 0 : index
    %c0_36 = arith.constant 0 : index
    %25 = vector.load %arg59[%c0_35, %c0_36] : memref<6x96xbf16, #tpu.memory_space<vmem>>, vector<1x96xbf16>
    tpu.vector_store %arg59[%c0_35, %c0_36], %24 {strides = array<i32>} : memref<6x96xbf16, #tpu.memory_space<vmem>>, vector<1x96xbf16>,
    %c5_37 = arith.constant 5 : index
    %c0_38 = arith.constant 0 : index
    %26 = vector.load %arg59[%c5_37, %c0_38] : memref<6x96xbf16, #tpu.memory_space<vmem>>, vector<1x96xbf16>
    tpu.vector_store %arg59[%c5_37, %c0_38], %24 {strides = array<i32>} : memref<6x96xbf16, #tpu.memory_space<vmem>>, vector<1x96xbf16>,
    %cst_39 = arith.constant 0.000000e+00 : bf16
    %27 = vector.broadcast %cst_39 : bf16 to vector<1x128xbf16>
    %c0_40 = arith.constant 0 : index
    %c0_41 = arith.constant 0 : index
    %28 = vector.load %arg60[%c0_40, %c0_41] : memref<4x128xbf16, #tpu.memory_space<vmem>>, vector<1x128xbf16>
    tpu.vector_store %arg60[%c0_40, %c0_41], %27 {strides = array<i32>} : memref<4x128xbf16, #tpu.memory_space<vmem>>, vector<1x128xbf16>,
    %c3_42 = arith.constant 3 : index
    %c0_43 = arith.constant 0 : index
    %29 = vector.load %arg60[%c3_42, %c0_43] : memref<4x128xbf16, #tpu.memory_space<vmem>>, vector<1x128xbf16>
    tpu.vector_store %arg60[%c3_42, %c0_43], %27 {strides = array<i32>} : memref<4x128xbf16, #tpu.memory_space<vmem>>, vector<1x128xbf16>,
    %cst_44 = arith.constant 0.000000e+00 : bf16
    %30 = vector.broadcast %cst_44 : bf16 to vector<1x192xbf16>
    %c0_45 = arith.constant 0 : index
    %c0_46 = arith.constant 0 : index
    %31 = vector.load %arg61[%c0_45, %c0_46] : memref<6x192xbf16, #tpu.memory_space<vmem>>, vector<1x192xbf16>
    tpu.vector_store %arg61[%c0_45, %c0_46], %30 {strides = array<i32>} : memref<6x192xbf16, #tpu.memory_space<vmem>>, vector<1x192xbf16>,
    %c5_47 = arith.constant 5 : index
    %c0_48 = arith.constant 0 : index
    %32 = vector.load %arg61[%c5_47, %c0_48] : memref<6x192xbf16, #tpu.memory_space<vmem>>, vector<1x192xbf16>
    tpu.vector_store %arg61[%c5_47, %c0_48], %30 {strides = array<i32>} : memref<6x192xbf16, #tpu.memory_space<vmem>>, vector<1x192xbf16>,
    %cst_49 = arith.constant 0.000000e+00 : bf16
    %33 = vector.broadcast %cst_49 : bf16 to vector<1x160xbf16>
    %c0_50 = arith.constant 0 : index
    %c0_51 = arith.constant 0 : index
    %34 = vector.load %arg62[%c0_50, %c0_51] : memref<10x160xbf16, #tpu.memory_space<vmem>>, vector<1x160xbf16>
    tpu.vector_store %arg62[%c0_50, %c0_51], %33 {strides = array<i32>} : memref<10x160xbf16, #tpu.memory_space<vmem>>, vector<1x160xbf16>,
    %c9_52 = arith.constant 9 : index
    %c0_53 = arith.constant 0 : index
    %35 = vector.load %arg62[%c9_52, %c0_53] : memref<10x160xbf16, #tpu.memory_space<vmem>>, vector<1x160xbf16>
    tpu.vector_store %arg62[%c9_52, %c0_53], %33 {strides = array<i32>} : memref<10x160xbf16, #tpu.memory_space<vmem>>, vector<1x160xbf16>,
    %cst_54 = arith.constant 0.000000e+00 : bf16
    %36 = vector.broadcast %cst_54 : bf16 to vector<1x144xbf16>
    %c0_55 = arith.constant 0 : index
    %c0_56 = arith.constant 0 : index
    %37 = vector.load %arg63[%c0_55, %c0_56] : memref<18x144xbf16, #tpu.memory_space<vmem>>, vector<1x144xbf16>
    tpu.vector_store %arg63[%c0_55, %c0_56], %36 {strides = array<i32>} : memref<18x144xbf16, #tpu.memory_space<vmem>>, vector<1x144xbf16>,
    %c17_57 = arith.constant 17 : index
    %c0_58 = arith.constant 0 : index
    %38 = vector.load %arg63[%c17_57, %c0_58] : memref<18x144xbf16, #tpu.memory_space<vmem>>, vector<1x144xbf16>
    tpu.vector_store %arg63[%c17_57, %c0_58], %36 {strides = array<i32>} : memref<18x144xbf16, #tpu.memory_space<vmem>>, vector<1x144xbf16>,
    %c0_59 = arith.constant 0 : index
    %c0_60 = arith.constant 0 : index
    %39 = vector.load %arg3[%c0_59, %c0_60] : memref<1x144xf32, #tpu.memory_space<vmem>>, vector<1x144xf32>
    %c0_61 = arith.constant 0 : index
    %c0_62 = arith.constant 0 : index
    %c0_63 = arith.constant 0 : index
    %40 = vector.load %arg1[%c0_61, %c0_62, %c0_63] : memref<1x18x18xbf16, #tpu.memory_space<vmem>>, vector<1x16x18xbf16>
    %41 = vector.shape_cast %40 : vector<1x16x18xbf16> to vector<16x18xbf16>
    %c0_64 = arith.constant 0 : index
    %c0_65 = arith.constant 0 : index
    %c0_66 = arith.constant 0 : index
    %42 = vector.load %arg2[%c0_64, %c0_65, %c0_66] : memref<3x18x144xbf16, #tpu.memory_space<vmem>>, vector<1x18x144xbf16>
    %43 = vector.shape_cast %42 : vector<1x18x144xbf16> to vector<18x144xbf16>
    %cst_67 = arith.constant dense<0.000000e+00> : vector<16x144xf32>
    %44 = tpu.matmul %41, %43, %cst_67 {dimension_numbers = #tpu.dot_dimension_numbers<[1], [0], [0], [1], [0, 0, 1, 1], [], []>} : vector<16x18xbf16>, vector<18x144xbf16>, vector<16x144xf32> -> vector<16x144xf32>
    %45 = vector.broadcast %39 : vector<1x144xf32> to vector<16x144xf32>
    %46 = arith.addf %45, %44 : vector<16x144xf32>
    %c0_68 = arith.constant 0 : index
    %c1 = arith.constant 1 : index
    %c0_69 = arith.constant 0 : index
    %47 = vector.load %arg1[%c0_68, %c1, %c0_69] : memref<1x18x18xbf16, #tpu.memory_space<vmem>>, vector<1x16x18xbf16>
    %48 = vector.shape_cast %47 : vector<1x16x18xbf16> to vector<16x18xbf16>
    %c1_70 = arith.constant 1 : index
    %c0_71 = arith.constant 0 : index
    %c0_72 = arith.constant 0 : index
    %49 = vector.load %arg2[%c1_70, %c0_71, %c0_72] : memref<3x18x144xbf16, #tpu.memory_space<vmem>>, vector<1x18x144xbf16>
    %50 = vector.shape_cast %49 : vector<1x18x144xbf16> to vector<18x144xbf16>
    %cst_73 = arith.constant dense<0.000000e+00> : vector<16x144xf32>
    %51 = tpu.matmul %48, %50, %cst_73 {dimension_numbers = #tpu.dot_dimension_numbers<[1], [0], [0], [1], [0, 0, 1, 1], [], []>} : vector<16x18xbf16>, vector<18x144xbf16>, vector<16x144xf32> -> vector<16x144xf32>
    %52 = arith.addf %46, %51 : vector<16x144xf32>
    %c0_74 = arith.constant 0 : index
    %c2 = arith.constant 2 : index
    %c0_75 = arith.constant 0 : index
    %53 = vector.load %arg1[%c0_74, %c2, %c0_75] : memref<1x18x18xbf16, #tpu.memory_space<vmem>>, vector<1x16x18xbf16>
    %54 = vector.shape_cast %53 : vector<1x16x18xbf16> to vector<16x18xbf16>
    %c2_76 = arith.constant 2 : index
    %c0_77 = arith.constant 0 : index
    %c0_78 = arith.constant 0 : index
    %55 = vector.load %arg2[%c2_76, %c0_77, %c0_78] : memref<3x18x144xbf16, #tpu.memory_space<vmem>>, vector<1x18x144xbf16>
    %56 = vector.shape_cast %55 : vector<1x18x144xbf16> to vector<18x144xbf16>
    %cst_79 = arith.constant dense<0.000000e+00> : vector<16x144xf32>
    %57 = tpu.matmul %54, %56, %cst_79 {dimension_numbers = #tpu.dot_dimension_numbers<[1], [0], [0], [1], [0, 0, 1, 1], [], []>} : vector<16x18xbf16>, vector<18x144xbf16>, vector<16x144xf32> -> vector<16x144xf32>
    %58 = arith.addf %52, %57 : vector<16x144xf32>
    %cst_80 = arith.constant 0.000000e+00 : f32
    %59 = vector.broadcast %cst_80 : f32 to vector<16x144xf32>
    %60 = arith.maximumf %58, %59 : vector<16x144xf32>
    %61 = arith.truncf %60 : vector<16x144xf32> to vector<16x144xbf16>
    %c1_81 = arith.constant 1 : index
    %c0_82 = arith.constant 0 : index
    %62 = vector.load %arg51[%c1_81, %c0_82] : memref<18x144xbf16, #tpu.memory_space<vmem>>, vector<16x144xbf16>
    tpu.vector_store %arg51[%c1_81, %c0_82], %61 {strides = array<i32>} : memref<18x144xbf16, #tpu.memory_space<vmem>>, vector<16x144xbf16>,
    %c0_83 = arith.constant 0 : index
    %c0_84 = arith.constant 0 : index
    %63 = vector.load %arg5[%c0_83, %c0_84] : memref<1x144xf32, #tpu.memory_space<vmem>>, vector<1x144xf32>
    %c0_85 = arith.constant 0 : index
    %c0_86 = arith.constant 0 : index
    %64 = vector.load %arg51[%c0_85, %c0_86] : memref<18x144xbf16, #tpu.memory_space<vmem>>, vector<16x144xbf16>
    %c0_87 = arith.constant 0 : index
    %c0_88 = arith.constant 0 : index
    %c0_89 = arith.constant 0 : index
    %65 = vector.load %arg4[%c0_87, %c0_88, %c0_89] : memref<3x144x144xbf16, #tpu.memory_space<vmem>>, vector<1x144x144xbf16>
    %66 = vector.shape_cast %65 : vector<1x144x144xbf16> to vector<144x144xbf16>
    %cst_90 = arith.constant dense<0.000000e+00> : vector<16x144xf32>
    %67 = tpu.matmul %64, %66, %cst_90 {dimension_numbers = #tpu.dot_dimension_numbers<[1], [0], [0], [1], [0, 0, 1, 1], [], []>} : vector<16x144xbf16>, vector<144x144xbf16>, vector<16x144xf32> -> vector<16x144xf32>
    %68 = vector.broadcast %63 : vector<1x144xf32> to vector<16x144xf32>
    %69 = arith.addf %68, %67 : vector<16x144xf32>
    %c1_91 = arith.constant 1 : index
    %c0_92 = arith.constant 0 : index
    %70 = vector.load %arg51[%c1_91, %c0_92] : memref<18x144xbf16, #tpu.memory_space<vmem>>, vector<16x144xbf16>
    %c1_93 = arith.constant 1 : index
    %c0_94 = arith.constant 0 : index
    %c0_95 = arith.constant 0 : index
    %71 = vector.load %arg4[%c1_93, %c0_94, %c0_95] : memref<3x144x144xbf16, #tpu.memory_space<vmem>>, vector<1x144x144xbf16>
    %72 = vector.shape_cast %71 : vector<1x144x144xbf16> to vector<144x144xbf16>
    %cst_96 = arith.constant dense<0.000000e+00> : vector<16x144xf32>
    %73 = tpu.matmul %70, %72, %cst_96 {dimension_numbers = #tpu.dot_dimension_numbers<[1], [0], [0], [1], [0, 0, 1, 1], [], []>} : vector<16x144xbf16>, vector<144x144xbf16>, vector<16x144xf32> -> vector<16x144xf32>
    %74 = arith.addf %69, %73 : vector<16x144xf32>
    %c2_97 = arith.constant 2 : index
    %c0_98 = arith.constant 0 : index
    %75 = vector.load %arg51[%c2_97, %c0_98] : memref<18x144xbf16, #tpu.memory_space<vmem>>, vector<16x144xbf16>
    %c2_99 = arith.constant 2 : index
    %c0_100 = arith.constant 0 : index
    %c0_101 = arith.constant 0 : index
    %76 = vector.load %arg4[%c2_99, %c0_100, %c0_101] : memref<3x144x144xbf16, #tpu.memory_space<vmem>>, vector<1x144x144xbf16>
    %77 = vector.shape_cast %76 : vector<1x144x144xbf16> to vector<144x144xbf16>
    %cst_102 = arith.constant dense<0.000000e+00> : vector<16x144xf32>
    %78 = tpu.matmul %75, %77, %cst_102 {dimension_numbers = #tpu.dot_dimension_numbers<[1], [0], [0], [1], [0, 0, 1, 1], [], []>} : vector<16x144xbf16>, vector<144x144xbf16>, vector<16x144xf32> -> vector<16x144xf32>
    %79 = arith.addf %74, %78 : vector<16x144xf32>
    %cst_103 = arith.constant 0.000000e+00 : f32
    %80 = vector.broadcast %cst_103 : f32 to vector<16x144xf32>
    %81 = arith.maximumf %79, %80 : vector<16x144xf32>
    %82 = arith.truncf %81 : vector<16x144xf32> to vector<16x144xbf16>
    %c1_104 = arith.constant 1 : index
    %c0_105 = arith.constant 0 : index
    %83 = vector.load %arg55[%c1_104, %c0_105] : memref<18x144xbf16, #tpu.memory_space<vmem>>, vector<16x144xbf16>
    tpu.vector_store %arg55[%c1_104, %c0_105], %82 {strides = array<i32>} : memref<18x144xbf16, #tpu.memory_space<vmem>>, vector<16x144xbf16>,
    %c0_106 = arith.constant 0 : index
    %c0_107 = arith.constant 0 : index
    %84 = vector.load %arg55[%c0_106, %c0_107] : memref<18x144xbf16, #tpu.memory_space<vmem>>, vector<18x144xbf16>
    %c0_108 = arith.constant 0 : index
    %c0_109 = arith.constant 0 : index
    %c0_110 = arith.constant 0 : index
    %85 = vector.load %arg6[%c0_108, %c0_109, %c0_110] : memref<2x8x18xbf16, #tpu.memory_space<vmem>>, vector<1x8x18xbf16>
    %86 = vector.shape_cast %85 : vector<1x8x18xbf16> to vector<8x18xbf16>
    %cst_111 = arith.constant dense<0.000000e+00> : vector<8x144xf32>
    %87 = tpu.matmul %86, %84, %cst_111 {dimension_numbers = #tpu.dot_dimension_numbers<[1], [0], [0], [1], [0, 0, 1, 1], [], []>} : vector<8x18xbf16>, vector<18x144xbf16>, vector<8x144xf32> -> vector<8x144xf32>
    %c1_112 = arith.constant 1 : index
    %c0_113 = arith.constant 0 : index
    %c0_114 = arith.constant 0 : index
    %88 = vector.load %arg6[%c1_112, %c0_113, %c0_114] : memref<2x8x18xbf16, #tpu.memory_space<vmem>>, vector<1x8x18xbf16>
    %89 = vector.shape_cast %88 : vector<1x8x18xbf16> to vector<8x18xbf16>
    %cst_115 = arith.constant dense<0.000000e+00> : vector<8x144xf32>
    %90 = tpu.matmul %89, %84, %cst_115 {dimension_numbers = #tpu.dot_dimension_numbers<[1], [0], [0], [1], [0, 0, 1, 1], [], []>} : vector<8x18xbf16>, vector<18x144xbf16>, vector<8x144xf32> -> vector<8x144xf32>
    %91 = arith.maximumf %87, %90 : vector<8x144xf32>
    %92 = arith.truncf %91 : vector<8x144xf32> to vector<8x144xbf16>
    %c0_116 = arith.constant 0 : index
    %c0_117 = arith.constant 0 : index
    %c0_118 = arith.constant 0 : index
    %93 = vector.load %arg7[%c0_116, %c0_117, %c0_118] : memref<2x144x80xbf16, #tpu.memory_space<vmem>>, vector<1x144x80xbf16>
    %94 = vector.shape_cast %93 : vector<1x144x80xbf16> to vector<144x80xbf16>
    %cst_119 = arith.constant dense<0.000000e+00> : vector<8x80xf32>
    %95 = tpu.matmul %92, %94, %cst_119 {dimension_numbers = #tpu.dot_dimension_numbers<[1], [0], [0], [1], [0, 0, 1, 1], [], []>} : vector<8x144xbf16>, vector<144x80xbf16>, vector<8x80xf32> -> vector<8x80xf32>
    %c1_120 = arith.constant 1 : index
    %c0_121 = arith.constant 0 : index
    %c0_122 = arith.constant 0 : index
    %96 = vector.load %arg7[%c1_120, %c0_121, %c0_122] : memref<2x144x80xbf16, #tpu.memory_space<vmem>>, vector<1x144x80xbf16>
    %97 = vector.shape_cast %96 : vector<1x144x80xbf16> to vector<144x80xbf16>
    %cst_123 = arith.constant dense<0.000000e+00> : vector<8x80xf32>
    %98 = tpu.matmul %92, %97, %cst_123 {dimension_numbers = #tpu.dot_dimension_numbers<[1], [0], [0], [1], [0, 0, 1, 1], [], []>} : vector<8x144xbf16>, vector<144x80xbf16>, vector<8x80xf32> -> vector<8x80xf32>
    %99 = arith.maximumf %95, %98 : vector<8x80xf32>
    %100 = arith.truncf %99 : vector<8x80xf32> to vector<8x80xbf16>
    %c1_124 = arith.constant 1 : index
    %c0_125 = arith.constant 0 : index
    %101 = vector.load %arg58[%c1_124, %c0_125] : memref<10x80xbf16, #tpu.memory_space<vmem>>, vector<8x80xbf16>
    tpu.vector_store %arg58[%c1_124, %c0_125], %100 {strides = array<i32>} : memref<10x80xbf16, #tpu.memory_space<vmem>>, vector<8x80xbf16>,
    %c0_126 = arith.constant 0 : index
    %c0_127 = arith.constant 0 : index
    %102 = vector.load %arg9[%c0_126, %c0_127] : memref<1x160xf32, #tpu.memory_space<vmem>>, vector<1x160xf32>
    %c0_128 = arith.constant 0 : index
    %c0_129 = arith.constant 0 : index
    %103 = vector.load %arg58[%c0_128, %c0_129] : memref<10x80xbf16, #tpu.memory_space<vmem>>, vector<8x80xbf16>
    %c0_130 = arith.constant 0 : index
    %c0_131 = arith.constant 0 : index
    %c0_132 = arith.constant 0 : index
    %104 = vector.load %arg8[%c0_130, %c0_131, %c0_132] : memref<3x80x160xbf16, #tpu.memory_space<vmem>>, vector<1x80x160xbf16>
    %105 = vector.shape_cast %104 : vector<1x80x160xbf16> to vector<80x160xbf16>
    %cst_133 = arith.constant dense<0.000000e+00> : vector<8x160xf32>
    %106 = tpu.matmul %103, %105, %cst_133 {dimension_numbers = #tpu.dot_dimension_numbers<[1], [0], [0], [1], [0, 0, 1, 1], [], []>} : vector<8x80xbf16>, vector<80x160xbf16>, vector<8x160xf32> -> vector<8x160xf32>
    %107 = vector.broadcast %102 : vector<1x160xf32> to vector<8x160xf32>
    %108 = arith.addf %107, %106 : vector<8x160xf32>
    %c1_134 = arith.constant 1 : index
    %c0_135 = arith.constant 0 : index
    %109 = vector.load %arg58[%c1_134, %c0_135] : memref<10x80xbf16, #tpu.memory_space<vmem>>, vector<8x80xbf16>
    %c1_136 = arith.constant 1 : index
    %c0_137 = arith.constant 0 : index
    %c0_138 = arith.constant 0 : index
    %110 = vector.load %arg8[%c1_136, %c0_137, %c0_138] : memref<3x80x160xbf16, #tpu.memory_space<vmem>>, vector<1x80x160xbf16>
    %111 = vector.shape_cast %110 : vector<1x80x160xbf16> to vector<80x160xbf16>
    %cst_139 = arith.constant dense<0.000000e+00> : vector<8x160xf32>
    %112 = tpu.matmul %109, %111, %cst_139 {dimension_numbers = #tpu.dot_dimension_numbers<[1], [0], [0], [1], [0, 0, 1, 1], [], []>} : vector<8x80xbf16>, vector<80x160xbf16>, vector<8x160xf32> -> vector<8x160xf32>
    %113 = arith.addf %108, %112 : vector<8x160xf32>
    %c2_140 = arith.constant 2 : index
    %c0_141 = arith.constant 0 : index
    %114 = vector.load %arg58[%c2_140, %c0_141] : memref<10x80xbf16, #tpu.memory_space<vmem>>, vector<8x80xbf16>
    %c2_142 = arith.constant 2 : index
    %c0_143 = arith.constant 0 : index
    %c0_144 = arith.constant 0 : index
    %115 = vector.load %arg8[%c2_142, %c0_143, %c0_144] : memref<3x80x160xbf16, #tpu.memory_space<vmem>>, vector<1x80x160xbf16>
    %116 = vector.shape_cast %115 : vector<1x80x160xbf16> to vector<80x160xbf16>
    %cst_145 = arith.constant dense<0.000000e+00> : vector<8x160xf32>
    %117 = tpu.matmul %114, %116, %cst_145 {dimension_numbers = #tpu.dot_dimension_numbers<[1], [0], [0], [1], [0, 0, 1, 1], [], []>} : vector<8x80xbf16>, vector<80x160xbf16>, vector<8x160xf32> -> vector<8x160xf32>
    %118 = arith.addf %113, %117 : vector<8x160xf32>
    %cst_146 = arith.constant 0.000000e+00 : f32
    %119 = vector.broadcast %cst_146 : f32 to vector<8x160xf32>
    %120 = arith.maximumf %118, %119 : vector<8x160xf32>
    %121 = arith.truncf %120 : vector<8x160xf32> to vector<8x160xbf16>
    %c1_147 = arith.constant 1 : index
    %c0_148 = arith.constant 0 : index
    %122 = vector.load %arg52[%c1_147, %c0_148] : memref<10x160xbf16, #tpu.memory_space<vmem>>, vector<8x160xbf16>
    tpu.vector_store %arg52[%c1_147, %c0_148], %121 {strides = array<i32>} : memref<10x160xbf16, #tpu.memory_space<vmem>>, vector<8x160xbf16>,
    %c0_149 = arith.constant 0 : index
    %c0_150 = arith.constant 0 : index
    %123 = vector.load %arg11[%c0_149, %c0_150] : memref<1x160xf32, #tpu.memory_space<vmem>>, vector<1x160xf32>
    %c0_151 = arith.constant 0 : index
    %c0_152 = arith.constant 0 : index
    %124 = vector.load %arg52[%c0_151, %c0_152] : memref<10x160xbf16, #tpu.memory_space<vmem>>, vector<8x160xbf16>
    %c0_153 = arith.constant 0 : index
    %c0_154 = arith.constant 0 : index
    %c0_155 = arith.constant 0 : index
    %125 = vector.load %arg10[%c0_153, %c0_154, %c0_155] : memref<3x160x160xbf16, #tpu.memory_space<vmem>>, vector<1x160x160xbf16>
    %126 = vector.shape_cast %125 : vector<1x160x160xbf16> to vector<160x160xbf16>
    %cst_156 = arith.constant dense<0.000000e+00> : vector<8x160xf32>
    %127 = tpu.matmul %124, %126, %cst_156 {dimension_numbers = #tpu.dot_dimension_numbers<[1], [0], [0], [1], [0, 0, 1, 1], [], []>} : vector<8x160xbf16>, vector<160x160xbf16>, vector<8x160xf32> -> vector<8x160xf32>
    %128 = vector.broadcast %123 : vector<1x160xf32> to vector<8x160xf32>
    %129 = arith.addf %128, %127 : vector<8x160xf32>
    %c1_157 = arith.constant 1 : index
    %c0_158 = arith.constant 0 : index
    %130 = vector.load %arg52[%c1_157, %c0_158] : memref<10x160xbf16, #tpu.memory_space<vmem>>, vector<8x160xbf16>
    %c1_159 = arith.constant 1 : index
    %c0_160 = arith.constant 0 : index
    %c0_161 = arith.constant 0 : index
    %131 = vector.load %arg10[%c1_159, %c0_160, %c0_161] : memref<3x160x160xbf16, #tpu.memory_space<vmem>>, vector<1x160x160xbf16>
    %132 = vector.shape_cast %131 : vector<1x160x160xbf16> to vector<160x160xbf16>
    %cst_162 = arith.constant dense<0.000000e+00> : vector<8x160xf32>
    %133 = tpu.matmul %130, %132, %cst_162 {dimension_numbers = #tpu.dot_dimension_numbers<[1], [0], [0], [1], [0, 0, 1, 1], [], []>} : vector<8x160xbf16>, vector<160x160xbf16>, vector<8x160xf32> -> vector<8x160xf32>
    %134 = arith.addf %129, %133 : vector<8x160xf32>
    %c2_163 = arith.constant 2 : index
    %c0_164 = arith.constant 0 : index
    %135 = vector.load %arg52[%c2_163, %c0_164] : memref<10x160xbf16, #tpu.memory_space<vmem>>, vector<8x160xbf16>
    %c2_165 = arith.constant 2 : index
    %c0_166 = arith.constant 0 : index
    %c0_167 = arith.constant 0 : index
    %136 = vector.load %arg10[%c2_165, %c0_166, %c0_167] : memref<3x160x160xbf16, #tpu.memory_space<vmem>>, vector<1x160x160xbf16>
    %137 = vector.shape_cast %136 : vector<1x160x160xbf16> to vector<160x160xbf16>
    %cst_168 = arith.constant dense<0.000000e+00> : vector<8x160xf32>
    %138 = tpu.matmul %135, %137, %cst_168 {dimension_numbers = #tpu.dot_dimension_numbers<[1], [0], [0], [1], [0, 0, 1, 1], [], []>} : vector<8x160xbf16>, vector<160x160xbf16>, vector<8x160xf32> -> vector<8x160xf32>
    %139 = arith.addf %134, %138 : vector<8x160xf32>
    %cst_169 = arith.constant 0.000000e+00 : f32
    %140 = vector.broadcast %cst_169 : f32 to vector<8x160xf32>
    %141 = arith.maximumf %139, %140 : vector<8x160xf32>
    %142 = arith.truncf %141 : vector<8x160xf32> to vector<8x160xbf16>
    %c1_170 = arith.constant 1 : index
    %c0_171 = arith.constant 0 : index
    %143 = vector.load %arg56[%c1_170, %c0_171] : memref<10x160xbf16, #tpu.memory_space<vmem>>, vector<8x160xbf16>
    tpu.vector_store %arg56[%c1_170, %c0_171], %142 {strides = array<i32>} : memref<10x160xbf16, #tpu.memory_space<vmem>>, vector<8x160xbf16>,
    %c0_172 = arith.constant 0 : index
    %c0_173 = arith.constant 0 : index
    %144 = vector.load %arg56[%c0_172, %c0_173] : memref<10x160xbf16, #tpu.memory_space<vmem>>, vector<10x160xbf16>
    %c0_174 = arith.constant 0 : index
    %c0_175 = arith.constant 0 : index
    %c0_176 = arith.constant 0 : index
    %145 = vector.load %arg12[%c0_174, %c0_175, %c0_176] : memref<2x4x10xbf16, #tpu.memory_space<vmem>>, vector<1x4x10xbf16>
    %146 = vector.shape_cast %145 : vector<1x4x10xbf16> to vector<4x10xbf16>
    %cst_177 = arith.constant dense<0.000000e+00> : vector<4x160xf32>
    %147 = tpu.matmul %146, %144, %cst_177 {dimension_numbers = #tpu.dot_dimension_numbers<[1], [0], [0], [1], [0, 0, 1, 1], [], []>} : vector<4x10xbf16>, vector<10x160xbf16>, vector<4x160xf32> -> vector<4x160xf32>
    %c1_178 = arith.constant 1 : index
    %c0_179 = arith.constant 0 : index
    %c0_180 = arith.constant 0 : index
    %148 = vector.load %arg12[%c1_178, %c0_179, %c0_180] : memref<2x4x10xbf16, #tpu.memory_space<vmem>>, vector<1x4x10xbf16>
    %149 = vector.shape_cast %148 : vector<1x4x10xbf16> to vector<4x10xbf16>
    %cst_181 = arith.constant dense<0.000000e+00> : vector<4x160xf32>
    %150 = tpu.matmul %149, %144, %cst_181 {dimension_numbers = #tpu.dot_dimension_numbers<[1], [0], [0], [1], [0, 0, 1, 1], [], []>} : vector<4x10xbf16>, vector<10x160xbf16>, vector<4x160xf32> -> vector<4x160xf32>
    %151 = arith.maximumf %147, %150 : vector<4x160xf32>
    %152 = arith.truncf %151 : vector<4x160xf32> to vector<4x160xbf16>
    %c0_182 = arith.constant 0 : index
    %c0_183 = arith.constant 0 : index
    %c0_184 = arith.constant 0 : index
    %153 = vector.load %arg13[%c0_182, %c0_183, %c0_184] : memref<2x160x96xbf16, #tpu.memory_space<vmem>>, vector<1x160x96xbf16>
    %154 = vector.shape_cast %153 : vector<1x160x96xbf16> to vector<160x96xbf16>
    %cst_185 = arith.constant dense<0.000000e+00> : vector<4x96xf32>
    %155 = tpu.matmul %152, %154, %cst_185 {dimension_numbers = #tpu.dot_dimension_numbers<[1], [0], [0], [1], [0, 0, 1, 1], [], []>} : vector<4x160xbf16>, vector<160x96xbf16>, vector<4x96xf32> -> vector<4x96xf32>
    %c1_186 = arith.constant 1 : index
    %c0_187 = arith.constant 0 : index
    %c0_188 = arith.constant 0 : index
    %156 = vector.load %arg13[%c1_186, %c0_187, %c0_188] : memref<2x160x96xbf16, #tpu.memory_space<vmem>>, vector<1x160x96xbf16>
    %157 = vector.shape_cast %156 : vector<1x160x96xbf16> to vector<160x96xbf16>
    %cst_189 = arith.constant dense<0.000000e+00> : vector<4x96xf32>
    %158 = tpu.matmul %152, %157, %cst_189 {dimension_numbers = #tpu.dot_dimension_numbers<[1], [0], [0], [1], [0, 0, 1, 1], [], []>} : vector<4x160xbf16>, vector<160x96xbf16>, vector<4x96xf32> -> vector<4x96xf32>
    %159 = arith.maximumf %155, %158 : vector<4x96xf32>
    %160 = arith.truncf %159 : vector<4x96xf32> to vector<4x96xbf16>
    %c1_190 = arith.constant 1 : index
    %c0_191 = arith.constant 0 : index
    %161 = vector.load %arg59[%c1_190, %c0_191] : memref<6x96xbf16, #tpu.memory_space<vmem>>, vector<4x96xbf16>
    tpu.vector_store %arg59[%c1_190, %c0_191], %160 {strides = array<i32>} : memref<6x96xbf16, #tpu.memory_space<vmem>>, vector<4x96xbf16>,
    %c0_192 = arith.constant 0 : index
    %c0_193 = arith.constant 0 : index
    %162 = vector.load %arg15[%c0_192, %c0_193] : memref<1x192xf32, #tpu.memory_space<vmem>>, vector<1x192xf32>
    %c0_194 = arith.constant 0 : index
    %c0_195 = arith.constant 0 : index
    %163 = vector.load %arg59[%c0_194, %c0_195] : memref<6x96xbf16, #tpu.memory_space<vmem>>, vector<4x96xbf16>
    %c0_196 = arith.constant 0 : index
    %c0_197 = arith.constant 0 : index
    %c0_198 = arith.constant 0 : index
    %164 = vector.load %arg14[%c0_196, %c0_197, %c0_198] : memref<3x96x192xbf16, #tpu.memory_space<vmem>>, vector<1x96x192xbf16>
    %165 = vector.shape_cast %164 : vector<1x96x192xbf16> to vector<96x192xbf16>
    %cst_199 = arith.constant dense<0.000000e+00> : vector<4x192xf32>
    %166 = tpu.matmul %163, %165, %cst_199 {dimension_numbers = #tpu.dot_dimension_numbers<[1], [0], [0], [1], [0, 0, 1, 1], [], []>} : vector<4x96xbf16>, vector<96x192xbf16>, vector<4x192xf32> -> vector<4x192xf32>
    %167 = vector.broadcast %162 : vector<1x192xf32> to vector<4x192xf32>
    %168 = arith.addf %167, %166 : vector<4x192xf32>
    %c1_200 = arith.constant 1 : index
    %c0_201 = arith.constant 0 : index
    %169 = vector.load %arg59[%c1_200, %c0_201] : memref<6x96xbf16, #tpu.memory_space<vmem>>, vector<4x96xbf16>
    %c1_202 = arith.constant 1 : index
    %c0_203 = arith.constant 0 : index
    %c0_204 = arith.constant 0 : index
    %170 = vector.load %arg14[%c1_202, %c0_203, %c0_204] : memref<3x96x192xbf16, #tpu.memory_space<vmem>>, vector<1x96x192xbf16>
    %171 = vector.shape_cast %170 : vector<1x96x192xbf16> to vector<96x192xbf16>
    %cst_205 = arith.constant dense<0.000000e+00> : vector<4x192xf32>
    %172 = tpu.matmul %169, %171, %cst_205 {dimension_numbers = #tpu.dot_dimension_numbers<[1], [0], [0], [1], [0, 0, 1, 1], [], []>} : vector<4x96xbf16>, vector<96x192xbf16>, vector<4x192xf32> -> vector<4x192xf32>
    %173 = arith.addf %168, %172 : vector<4x192xf32>
    %c2_206 = arith.constant 2 : index
    %c0_207 = arith.constant 0 : index
    %174 = vector.load %arg59[%c2_206, %c0_207] : memref<6x96xbf16, #tpu.memory_space<vmem>>, vector<4x96xbf16>
    %c2_208 = arith.constant 2 : index
    %c0_209 = arith.constant 0 : index
    %c0_210 = arith.constant 0 : index
    %175 = vector.load %arg14[%c2_208, %c0_209, %c0_210] : memref<3x96x192xbf16, #tpu.memory_space<vmem>>, vector<1x96x192xbf16>
    %176 = vector.shape_cast %175 : vector<1x96x192xbf16> to vector<96x192xbf16>
    %cst_211 = arith.constant dense<0.000000e+00> : vector<4x192xf32>
    %177 = tpu.matmul %174, %176, %cst_211 {dimension_numbers = #tpu.dot_dimension_numbers<[1], [0], [0], [1], [0, 0, 1, 1], [], []>} : vector<4x96xbf16>, vector<96x192xbf16>, vector<4x192xf32> -> vector<4x192xf32>
    %178 = arith.addf %173, %177 : vector<4x192xf32>
    %cst_212 = arith.constant 0.000000e+00 : f32
    %179 = vector.broadcast %cst_212 : f32 to vector<4x192xf32>
    %180 = arith.maximumf %178, %179 : vector<4x192xf32>
    %181 = arith.truncf %180 : vector<4x192xf32> to vector<4x192xbf16>
    %c1_213 = arith.constant 1 : index
    %c0_214 = arith.constant 0 : index
    %182 = vector.load %arg53[%c1_213, %c0_214] : memref<6x192xbf16, #tpu.memory_space<vmem>>, vector<4x192xbf16>
    tpu.vector_store %arg53[%c1_213, %c0_214], %181 {strides = array<i32>} : memref<6x192xbf16, #tpu.memory_space<vmem>>, vector<4x192xbf16>,
    %c0_215 = arith.constant 0 : index
    %c0_216 = arith.constant 0 : index
    %183 = vector.load %arg17[%c0_215, %c0_216] : memref<1x192xf32, #tpu.memory_space<vmem>>, vector<1x192xf32>
    %c0_217 = arith.constant 0 : index
    %c0_218 = arith.constant 0 : index
    %184 = vector.load %arg53[%c0_217, %c0_218] : memref<6x192xbf16, #tpu.memory_space<vmem>>, vector<4x192xbf16>
    %c0_219 = arith.constant 0 : index
    %c0_220 = arith.constant 0 : index
    %c0_221 = arith.constant 0 : index
    %185 = vector.load %arg16[%c0_219, %c0_220, %c0_221] : memref<3x192x192xbf16, #tpu.memory_space<vmem>>, vector<1x192x192xbf16>
    %186 = vector.shape_cast %185 : vector<1x192x192xbf16> to vector<192x192xbf16>
    %cst_222 = arith.constant dense<0.000000e+00> : vector<4x192xf32>
    %187 = tpu.matmul %184, %186, %cst_222 {dimension_numbers = #tpu.dot_dimension_numbers<[1], [0], [0], [1], [0, 0, 1, 1], [], []>} : vector<4x192xbf16>, vector<192x192xbf16>, vector<4x192xf32> -> vector<4x192xf32>
    %188 = vector.broadcast %183 : vector<1x192xf32> to vector<4x192xf32>
    %189 = arith.addf %188, %187 : vector<4x192xf32>
    %c1_223 = arith.constant 1 : index
    %c0_224 = arith.constant 0 : index
    %190 = vector.load %arg53[%c1_223, %c0_224] : memref<6x192xbf16, #tpu.memory_space<vmem>>, vector<4x192xbf16>
    %c1_225 = arith.constant 1 : index
    %c0_226 = arith.constant 0 : index
    %c0_227 = arith.constant 0 : index
    %191 = vector.load %arg16[%c1_225, %c0_226, %c0_227] : memref<3x192x192xbf16, #tpu.memory_space<vmem>>, vector<1x192x192xbf16>
    %192 = vector.shape_cast %191 : vector<1x192x192xbf16> to vector<192x192xbf16>
    %cst_228 = arith.constant dense<0.000000e+00> : vector<4x192xf32>
    %193 = tpu.matmul %190, %192, %cst_228 {dimension_numbers = #tpu.dot_dimension_numbers<[1], [0], [0], [1], [0, 0, 1, 1], [], []>} : vector<4x192xbf16>, vector<192x192xbf16>, vector<4x192xf32> -> vector<4x192xf32>
    %194 = arith.addf %189, %193 : vector<4x192xf32>
    %c2_229 = arith.constant 2 : index
    %c0_230 = arith.constant 0 : index
    %195 = vector.load %arg53[%c2_229, %c0_230] : memref<6x192xbf16, #tpu.memory_space<vmem>>, vector<4x192xbf16>
    %c2_231 = arith.constant 2 : index
    %c0_232 = arith.constant 0 : index
    %c0_233 = arith.constant 0 : index
    %196 = vector.load %arg16[%c2_231, %c0_232, %c0_233] : memref<3x192x192xbf16, #tpu.memory_space<vmem>>, vector<1x192x192xbf16>
    %197 = vector.shape_cast %196 : vector<1x192x192xbf16> to vector<192x192xbf16>
    %cst_234 = arith.constant dense<0.000000e+00> : vector<4x192xf32>
    %198 = tpu.matmul %195, %197, %cst_234 {dimension_numbers = #tpu.dot_dimension_numbers<[1], [0], [0], [1], [0, 0, 1, 1], [], []>} : vector<4x192xbf16>, vector<192x192xbf16>, vector<4x192xf32> -> vector<4x192xf32>
    %199 = arith.addf %194, %198 : vector<4x192xf32>
    %cst_235 = arith.constant 0.000000e+00 : f32
    %200 = vector.broadcast %cst_235 : f32 to vector<4x192xf32>
    %201 = arith.maximumf %199, %200 : vector<4x192xf32>
    %202 = arith.truncf %201 : vector<4x192xf32> to vector<4x192xbf16>
    %c1_236 = arith.constant 1 : index
    %c0_237 = arith.constant 0 : index
    %203 = vector.load %arg57[%c1_236, %c0_237] : memref<6x192xbf16, #tpu.memory_space<vmem>>, vector<4x192xbf16>
    tpu.vector_store %arg57[%c1_236, %c0_237], %202 {strides = array<i32>} : memref<6x192xbf16, #tpu.memory_space<vmem>>, vector<4x192xbf16>,
    %c0_238 = arith.constant 0 : index
    %c0_239 = arith.constant 0 : index
    %204 = vector.load %arg57[%c0_238, %c0_239] : memref<6x192xbf16, #tpu.memory_space<vmem>>, vector<6x192xbf16>
    %c0_240 = arith.constant 0 : index
    %c0_241 = arith.constant 0 : index
    %c0_242 = arith.constant 0 : index
    %205 = vector.load %arg18[%c0_240, %c0_241, %c0_242] : memref<2x2x6xbf16, #tpu.memory_space<vmem>>, vector<1x2x6xbf16>
    %206 = vector.shape_cast %205 : vector<1x2x6xbf16> to vector<2x6xbf16>
    %cst_243 = arith.constant dense<0.000000e+00> : vector<2x192xf32>
    %207 = tpu.matmul %206, %204, %cst_243 {dimension_numbers = #tpu.dot_dimension_numbers<[1], [0], [0], [1], [0, 0, 1, 1], [], []>} : vector<2x6xbf16>, vector<6x192xbf16>, vector<2x192xf32> -> vector<2x192xf32>
    %c1_244 = arith.constant 1 : index
    %c0_245 = arith.constant 0 : index
    %c0_246 = arith.constant 0 : index
    %208 = vector.load %arg18[%c1_244, %c0_245, %c0_246] : memref<2x2x6xbf16, #tpu.memory_space<vmem>>, vector<1x2x6xbf16>
    %209 = vector.shape_cast %208 : vector<1x2x6xbf16> to vector<2x6xbf16>
    %cst_247 = arith.constant dense<0.000000e+00> : vector<2x192xf32>
    %210 = tpu.matmul %209, %204, %cst_247 {dimension_numbers = #tpu.dot_dimension_numbers<[1], [0], [0], [1], [0, 0, 1, 1], [], []>} : vector<2x6xbf16>, vector<6x192xbf16>, vector<2x192xf32> -> vector<2x192xf32>
    %211 = arith.maximumf %207, %210 : vector<2x192xf32>
    %212 = arith.truncf %211 : vector<2x192xf32> to vector<2x192xbf16>
    %c0_248 = arith.constant 0 : index
    %c0_249 = arith.constant 0 : index
    %c0_250 = arith.constant 0 : index
    %213 = vector.load %arg19[%c0_248, %c0_249, %c0_250] : memref<2x192x128xbf16, #tpu.memory_space<vmem>>, vector<1x192x128xbf16>
    %214 = vector.shape_cast %213 : vector<1x192x128xbf16> to vector<192x128xbf16>
    %cst_251 = arith.constant dense<0.000000e+00> : vector<2x128xf32>
    %215 = tpu.matmul %212, %214, %cst_251 {dimension_numbers = #tpu.dot_dimension_numbers<[1], [0], [0], [1], [0, 0, 1, 1], [], []>} : vector<2x192xbf16>, vector<192x128xbf16>, vector<2x128xf32> -> vector<2x128xf32>
    %c1_252 = arith.constant 1 : index
    %c0_253 = arith.constant 0 : index
    %c0_254 = arith.constant 0 : index
    %216 = vector.load %arg19[%c1_252, %c0_253, %c0_254] : memref<2x192x128xbf16, #tpu.memory_space<vmem>>, vector<1x192x128xbf16>
    %217 = vector.shape_cast %216 : vector<1x192x128xbf16> to vector<192x128xbf16>
    %cst_255 = arith.constant dense<0.000000e+00> : vector<2x128xf32>
    %218 = tpu.matmul %212, %217, %cst_255 {dimension_numbers = #tpu.dot_dimension_numbers<[1], [0], [0], [1], [0, 0, 1, 1], [], []>} : vector<2x192xbf16>, vector<192x128xbf16>, vector<2x128xf32> -> vector<2x128xf32>
    %219 = arith.maximumf %215, %218 : vector<2x128xf32>
    %220 = arith.truncf %219 : vector<2x128xf32> to vector<2x128xbf16>
    %c1_256 = arith.constant 1 : index
    %c0_257 = arith.constant 0 : index
    %221 = vector.load %arg60[%c1_256, %c0_257] : memref<4x128xbf16, #tpu.memory_space<vmem>>, vector<2x128xbf16>
    tpu.vector_store %arg60[%c1_256, %c0_257], %220 {strides = array<i32>} : memref<4x128xbf16, #tpu.memory_space<vmem>>, vector<2x128xbf16>,
    %c0_258 = arith.constant 0 : index
    %c0_259 = arith.constant 0 : index
    %222 = vector.load %arg21[%c0_258, %c0_259] : memref<1x256xf32, #tpu.memory_space<vmem>>, vector<1x256xf32>
    %c0_260 = arith.constant 0 : index
    %c0_261 = arith.constant 0 : index
    %223 = vector.load %arg60[%c0_260, %c0_261] : memref<4x128xbf16, #tpu.memory_space<vmem>>, vector<2x128xbf16>
    %c0_262 = arith.constant 0 : index
    %c0_263 = arith.constant 0 : index
    %c0_264 = arith.constant 0 : index
    %224 = vector.load %arg20[%c0_262, %c0_263, %c0_264] : memref<3x128x256xbf16, #tpu.memory_space<vmem>>, vector<1x128x256xbf16>
    %225 = vector.shape_cast %224 : vector<1x128x256xbf16> to vector<128x256xbf16>
    %cst_265 = arith.constant dense<0.000000e+00> : vector<2x256xf32>
    %226 = tpu.matmul %223, %225, %cst_265 {dimension_numbers = #tpu.dot_dimension_numbers<[1], [0], [0], [1], [0, 0, 1, 1], [], []>} : vector<2x128xbf16>, vector<128x256xbf16>, vector<2x256xf32> -> vector<2x256xf32>
    %227 = vector.broadcast %222 : vector<1x256xf32> to vector<2x256xf32>
    %228 = arith.addf %227, %226 : vector<2x256xf32>
    %c1_266 = arith.constant 1 : index
    %c0_267 = arith.constant 0 : index
    %229 = vector.load %arg60[%c1_266, %c0_267] : memref<4x128xbf16, #tpu.memory_space<vmem>>, vector<2x128xbf16>
    %c1_268 = arith.constant 1 : index
    %c0_269 = arith.constant 0 : index
    %c0_270 = arith.constant 0 : index
    %230 = vector.load %arg20[%c1_268, %c0_269, %c0_270] : memref<3x128x256xbf16, #tpu.memory_space<vmem>>, vector<1x128x256xbf16>
    %231 = vector.shape_cast %230 : vector<1x128x256xbf16> to vector<128x256xbf16>
    %cst_271 = arith.constant dense<0.000000e+00> : vector<2x256xf32>
    %232 = tpu.matmul %229, %231, %cst_271 {dimension_numbers = #tpu.dot_dimension_numbers<[1], [0], [0], [1], [0, 0, 1, 1], [], []>} : vector<2x128xbf16>, vector<128x256xbf16>, vector<2x256xf32> -> vector<2x256xf32>
    %233 = arith.addf %228, %232 : vector<2x256xf32>
    %c2_272 = arith.constant 2 : index
    %c0_273 = arith.constant 0 : index
    %234 = vector.load %arg60[%c2_272, %c0_273] : memref<4x128xbf16, #tpu.memory_space<vmem>>, vector<2x128xbf16>
    %c2_274 = arith.constant 2 : index
    %c0_275 = arith.constant 0 : index
    %c0_276 = arith.constant 0 : index
    %235 = vector.load %arg20[%c2_274, %c0_275, %c0_276] : memref<3x128x256xbf16, #tpu.memory_space<vmem>>, vector<1x128x256xbf16>
    %236 = vector.shape_cast %235 : vector<1x128x256xbf16> to vector<128x256xbf16>
    %cst_277 = arith.constant dense<0.000000e+00> : vector<2x256xf32>
    %237 = tpu.matmul %234, %236, %cst_277 {dimension_numbers = #tpu.dot_dimension_numbers<[1], [0], [0], [1], [0, 0, 1, 1], [], []>} : vector<2x128xbf16>, vector<128x256xbf16>, vector<2x256xf32> -> vector<2x256xf32>
    %238 = arith.addf %233, %237 : vector<2x256xf32>
    %cst_278 = arith.constant 0.000000e+00 : f32
    %239 = vector.broadcast %cst_278 : f32 to vector<2x256xf32>
    %240 = arith.maximumf %238, %239 : vector<2x256xf32>
    %241 = arith.truncf %240 : vector<2x256xf32> to vector<2x256xbf16>
    %c1_279 = arith.constant 1 : index
    %c0_280 = arith.constant 0 : index
    %242 = vector.load %arg54[%c1_279, %c0_280] : memref<4x256xbf16, #tpu.memory_space<vmem>>, vector<2x256xbf16>
    tpu.vector_store %arg54[%c1_279, %c0_280], %241 {strides = array<i32>} : memref<4x256xbf16, #tpu.memory_space<vmem>>, vector<2x256xbf16>,
    %c0_281 = arith.constant 0 : index
    %c0_282 = arith.constant 0 : index
    %243 = vector.load %arg23[%c0_281, %c0_282] : memref<1x256xf32, #tpu.memory_space<vmem>>, vector<1x256xf32>
    %c0_283 = arith.constant 0 : index
    %c0_284 = arith.constant 0 : index
    %244 = vector.load %arg54[%c0_283, %c0_284] : memref<4x256xbf16, #tpu.memory_space<vmem>>, vector<2x256xbf16>
    %c0_285 = arith.constant 0 : index
    %c0_286 = arith.constant 0 : index
    %c0_287 = arith.constant 0 : index
    %245 = vector.load %arg22[%c0_285, %c0_286, %c0_287] : memref<3x256x256xbf16, #tpu.memory_space<vmem>>, vector<1x256x256xbf16>
    %246 = vector.shape_cast %245 : vector<1x256x256xbf16> to vector<256x256xbf16>
    %cst_288 = arith.constant dense<0.000000e+00> : vector<2x256xf32>
    %247 = tpu.matmul %244, %246, %cst_288 {dimension_numbers = #tpu.dot_dimension_numbers<[1], [0], [0], [1], [0, 0, 1, 1], [], []>} : vector<2x256xbf16>, vector<256x256xbf16>, vector<2x256xf32> -> vector<2x256xf32>
    %248 = vector.broadcast %243 : vector<1x256xf32> to vector<2x256xf32>
    %249 = arith.addf %248, %247 : vector<2x256xf32>
    %c1_289 = arith.constant 1 : index
    %c0_290 = arith.constant 0 : index
    %250 = vector.load %arg54[%c1_289, %c0_290] : memref<4x256xbf16, #tpu.memory_space<vmem>>, vector<2x256xbf16>
    %c1_291 = arith.constant 1 : index
    %c0_292 = arith.constant 0 : index
    %c0_293 = arith.constant 0 : index
    %251 = vector.load %arg22[%c1_291, %c0_292, %c0_293] : memref<3x256x256xbf16, #tpu.memory_space<vmem>>, vector<1x256x256xbf16>
    %252 = vector.shape_cast %251 : vector<1x256x256xbf16> to vector<256x256xbf16>
    %cst_294 = arith.constant dense<0.000000e+00> : vector<2x256xf32>
    %253 = tpu.matmul %250, %252, %cst_294 {dimension_numbers = #tpu.dot_dimension_numbers<[1], [0], [0], [1], [0, 0, 1, 1], [], []>} : vector<2x256xbf16>, vector<256x256xbf16>, vector<2x256xf32> -> vector<2x256xf32>
    %254 = arith.addf %249, %253 : vector<2x256xf32>
    %c2_295 = arith.constant 2 : index
    %c0_296 = arith.constant 0 : index
    %255 = vector.load %arg54[%c2_295, %c0_296] : memref<4x256xbf16, #tpu.memory_space<vmem>>, vector<2x256xbf16>
    %c2_297 = arith.constant 2 : index
    %c0_298 = arith.constant 0 : index
    %c0_299 = arith.constant 0 : index
    %256 = vector.load %arg22[%c2_297, %c0_298, %c0_299] : memref<3x256x256xbf16, #tpu.memory_space<vmem>>, vector<1x256x256xbf16>
    %257 = vector.shape_cast %256 : vector<1x256x256xbf16> to vector<256x256xbf16>
    %cst_300 = arith.constant dense<0.000000e+00> : vector<2x256xf32>
    %258 = tpu.matmul %255, %257, %cst_300 {dimension_numbers = #tpu.dot_dimension_numbers<[1], [0], [0], [1], [0, 0, 1, 1], [], []>} : vector<2x256xbf16>, vector<256x256xbf16>, vector<2x256xf32> -> vector<2x256xf32>
    %259 = arith.addf %254, %258 : vector<2x256xf32>
    %cst_301 = arith.constant 0.000000e+00 : f32
    %260 = vector.broadcast %cst_301 : f32 to vector<2x256xf32>
    %261 = arith.maximumf %259, %260 : vector<2x256xf32>
    %262 = arith.truncf %261 : vector<2x256xf32> to vector<2x256xbf16>
    %c0_302 = arith.constant 0 : index
    %c0_303 = arith.constant 0 : index
    %c0_304 = arith.constant 0 : index
    %263 = vector.load %arg24[%c0_302, %c0_303, %c0_304] : memref<2x256x192xbf16, #tpu.memory_space<vmem>>, vector<1x256x192xbf16>
    %264 = vector.shape_cast %263 : vector<1x256x192xbf16> to vector<256x192xbf16>
    %cst_305 = arith.constant dense<0.000000e+00> : vector<2x192xf32>
    %265 = tpu.matmul %262, %264, %cst_305 {dimension_numbers = #tpu.dot_dimension_numbers<[1], [0], [0], [1], [0, 0, 1, 1], [], []>} : vector<2x256xbf16>, vector<256x192xbf16>, vector<2x192xf32> -> vector<2x192xf32>
    %266 = arith.truncf %265 : vector<2x192xf32> to vector<2x192xbf16>
    %c1_306 = arith.constant 1 : index
    %c0_307 = arith.constant 0 : index
    %c0_308 = arith.constant 0 : index
    %267 = vector.load %arg24[%c1_306, %c0_307, %c0_308] : memref<2x256x192xbf16, #tpu.memory_space<vmem>>, vector<1x256x192xbf16>
    %268 = vector.shape_cast %267 : vector<1x256x192xbf16> to vector<256x192xbf16>
    %cst_309 = arith.constant dense<0.000000e+00> : vector<2x192xf32>
    %269 = tpu.matmul %262, %268, %cst_309 {dimension_numbers = #tpu.dot_dimension_numbers<[1], [0], [0], [1], [0, 0, 1, 1], [], []>} : vector<2x256xbf16>, vector<256x192xbf16>, vector<2x192xf32> -> vector<2x192xf32>
    %270 = arith.truncf %269 : vector<2x192xf32> to vector<2x192xbf16>
    %c0_310 = arith.constant 0 : index
    %c0_311 = arith.constant 0 : index
    %c0_312 = arith.constant 0 : index
    %271 = vector.load %arg26[%c0_310, %c0_311, %c0_312] : memref<2x4x2xbf16, #tpu.memory_space<vmem>>, vector<1x4x2xbf16>
    %272 = vector.shape_cast %271 : vector<1x4x2xbf16> to vector<4x2xbf16>
    %cst_313 = arith.constant dense<0.000000e+00> : vector<4x192xf32>
    %273 = tpu.matmul %272, %266, %cst_313 {dimension_numbers = #tpu.dot_dimension_numbers<[1], [0], [0], [1], [0, 0, 1, 1], [], []>} : vector<4x2xbf16>, vector<2x192xbf16>, vector<4x192xf32> -> vector<4x192xf32>
    %c1_314 = arith.constant 1 : index
    %c0_315 = arith.constant 0 : index
    %c0_316 = arith.constant 0 : index
    %274 = vector.load %arg26[%c1_314, %c0_315, %c0_316] : memref<2x4x2xbf16, #tpu.memory_space<vmem>>, vector<1x4x2xbf16>
    %275 = vector.shape_cast %274 : vector<1x4x2xbf16> to vector<4x2xbf16>
    %cst_317 = arith.constant dense<0.000000e+00> : vector<4x192xf32>
    %276 = tpu.matmul %275, %270, %cst_317 {dimension_numbers = #tpu.dot_dimension_numbers<[1], [0], [0], [1], [0, 0, 1, 1], [], []>} : vector<4x2xbf16>, vector<2x192xbf16>, vector<4x192xf32> -> vector<4x192xf32>
    %277 = arith.addf %273, %276 : vector<4x192xf32>
    %c0_318 = arith.constant 0 : index
    %c0_319 = arith.constant 0 : index
    %278 = vector.load %arg25[%c0_318, %c0_319] : memref<1x192xf32, #tpu.memory_space<vmem>>, vector<1x192xf32>
    %279 = vector.broadcast %278 : vector<1x192xf32> to vector<4x192xf32>
    %280 = arith.addf %277, %279 : vector<4x192xf32>
    %cst_320 = arith.constant 0.000000e+00 : f32
    %281 = vector.broadcast %cst_320 : f32 to vector<4x192xf32>
    %282 = arith.maximumf %280, %281 : vector<4x192xf32>
    %283 = arith.truncf %282 : vector<4x192xf32> to vector<4x192xbf16>
    %c1_321 = arith.constant 1 : index
    %c0_322 = arith.constant 0 : index
    %284 = vector.load %arg61[%c1_321, %c0_322] : memref<6x192xbf16, #tpu.memory_space<vmem>>, vector<4x192xbf16>
    tpu.vector_store %arg61[%c1_321, %c0_322], %283 {strides = array<i32>} : memref<6x192xbf16, #tpu.memory_space<vmem>>, vector<4x192xbf16>,
    %c0_323 = arith.constant 0 : index
    %c0_324 = arith.constant 0 : index
    %285 = vector.load %arg29[%c0_323, %c0_324] : memref<1x192xf32, #tpu.memory_space<vmem>>, vector<1x192xf32>
    %c0_325 = arith.constant 0 : index
    %c0_326 = arith.constant 0 : index
    %286 = vector.load %arg57[%c0_325, %c0_326] : memref<6x192xbf16, #tpu.memory_space<vmem>>, vector<4x192xbf16>
    %c0_327 = arith.constant 0 : index
    %c0_328 = arith.constant 0 : index
    %c0_329 = arith.constant 0 : index
    %287 = vector.load %arg27[%c0_327, %c0_328, %c0_329] : memref<3x192x192xbf16, #tpu.memory_space<vmem>>, vector<1x192x192xbf16>
    %288 = vector.shape_cast %287 : vector<1x192x192xbf16> to vector<192x192xbf16>
    %cst_330 = arith.constant dense<0.000000e+00> : vector<4x192xf32>
    %289 = tpu.matmul %286, %288, %cst_330 {dimension_numbers = #tpu.dot_dimension_numbers<[1], [0], [0], [1], [0, 0, 1, 1], [], []>} : vector<4x192xbf16>, vector<192x192xbf16>, vector<4x192xf32> -> vector<4x192xf32>
    %290 = vector.broadcast %285 : vector<1x192xf32> to vector<4x192xf32>
    %291 = arith.addf %290, %289 : vector<4x192xf32>
    %c1_331 = arith.constant 1 : index
    %c0_332 = arith.constant 0 : index
    %292 = vector.load %arg57[%c1_331, %c0_332] : memref<6x192xbf16, #tpu.memory_space<vmem>>, vector<4x192xbf16>
    %c1_333 = arith.constant 1 : index
    %c0_334 = arith.constant 0 : index
    %c0_335 = arith.constant 0 : index
    %293 = vector.load %arg27[%c1_333, %c0_334, %c0_335] : memref<3x192x192xbf16, #tpu.memory_space<vmem>>, vector<1x192x192xbf16>
    %294 = vector.shape_cast %293 : vector<1x192x192xbf16> to vector<192x192xbf16>
    %cst_336 = arith.constant dense<0.000000e+00> : vector<4x192xf32>
    %295 = tpu.matmul %292, %294, %cst_336 {dimension_numbers = #tpu.dot_dimension_numbers<[1], [0], [0], [1], [0, 0, 1, 1], [], []>} : vector<4x192xbf16>, vector<192x192xbf16>, vector<4x192xf32> -> vector<4x192xf32>
    %296 = arith.addf %291, %295 : vector<4x192xf32>
    %c2_337 = arith.constant 2 : index
    %c0_338 = arith.constant 0 : index
    %297 = vector.load %arg57[%c2_337, %c0_338] : memref<6x192xbf16, #tpu.memory_space<vmem>>, vector<4x192xbf16>
    %c2_339 = arith.constant 2 : index
    %c0_340 = arith.constant 0 : index
    %c0_341 = arith.constant 0 : index
    %298 = vector.load %arg27[%c2_339, %c0_340, %c0_341] : memref<3x192x192xbf16, #tpu.memory_space<vmem>>, vector<1x192x192xbf16>
    %299 = vector.shape_cast %298 : vector<1x192x192xbf16> to vector<192x192xbf16>
    %cst_342 = arith.constant dense<0.000000e+00> : vector<4x192xf32>
    %300 = tpu.matmul %297, %299, %cst_342 {dimension_numbers = #tpu.dot_dimension_numbers<[1], [0], [0], [1], [0, 0, 1, 1], [], []>} : vector<4x192xbf16>, vector<192x192xbf16>, vector<4x192xf32> -> vector<4x192xf32>
    %301 = arith.addf %296, %300 : vector<4x192xf32>
    %c0_343 = arith.constant 0 : index
    %c0_344 = arith.constant 0 : index
    %302 = vector.load %arg61[%c0_343, %c0_344] : memref<6x192xbf16, #tpu.memory_space<vmem>>, vector<4x192xbf16>
    %c0_345 = arith.constant 0 : index
    %c0_346 = arith.constant 0 : index
    %c0_347 = arith.constant 0 : index
    %303 = vector.load %arg28[%c0_345, %c0_346, %c0_347] : memref<3x192x192xbf16, #tpu.memory_space<vmem>>, vector<1x192x192xbf16>
    %304 = vector.shape_cast %303 : vector<1x192x192xbf16> to vector<192x192xbf16>
    %cst_348 = arith.constant dense<0.000000e+00> : vector<4x192xf32>
    %305 = tpu.matmul %302, %304, %cst_348 {dimension_numbers = #tpu.dot_dimension_numbers<[1], [0], [0], [1], [0, 0, 1, 1], [], []>} : vector<4x192xbf16>, vector<192x192xbf16>, vector<4x192xf32> -> vector<4x192xf32>
    %306 = arith.addf %301, %305 : vector<4x192xf32>
    %c1_349 = arith.constant 1 : index
    %c0_350 = arith.constant 0 : index
    %307 = vector.load %arg61[%c1_349, %c0_350] : memref<6x192xbf16, #tpu.memory_space<vmem>>, vector<4x192xbf16>
    %c1_351 = arith.constant 1 : index
    %c0_352 = arith.constant 0 : index
    %c0_353 = arith.constant 0 : index
    %308 = vector.load %arg28[%c1_351, %c0_352, %c0_353] : memref<3x192x192xbf16, #tpu.memory_space<vmem>>, vector<1x192x192xbf16>
    %309 = vector.shape_cast %308 : vector<1x192x192xbf16> to vector<192x192xbf16>
    %cst_354 = arith.constant dense<0.000000e+00> : vector<4x192xf32>
    %310 = tpu.matmul %307, %309, %cst_354 {dimension_numbers = #tpu.dot_dimension_numbers<[1], [0], [0], [1], [0, 0, 1, 1], [], []>} : vector<4x192xbf16>, vector<192x192xbf16>, vector<4x192xf32> -> vector<4x192xf32>
    %311 = arith.addf %306, %310 : vector<4x192xf32>
    %c2_355 = arith.constant 2 : index
    %c0_356 = arith.constant 0 : index
    %312 = vector.load %arg61[%c2_355, %c0_356] : memref<6x192xbf16, #tpu.memory_space<vmem>>, vector<4x192xbf16>
    %c2_357 = arith.constant 2 : index
    %c0_358 = arith.constant 0 : index
    %c0_359 = arith.constant 0 : index
    %313 = vector.load %arg28[%c2_357, %c0_358, %c0_359] : memref<3x192x192xbf16, #tpu.memory_space<vmem>>, vector<1x192x192xbf16>
    %314 = vector.shape_cast %313 : vector<1x192x192xbf16> to vector<192x192xbf16>
    %cst_360 = arith.constant dense<0.000000e+00> : vector<4x192xf32>
    %315 = tpu.matmul %312, %314, %cst_360 {dimension_numbers = #tpu.dot_dimension_numbers<[1], [0], [0], [1], [0, 0, 1, 1], [], []>} : vector<4x192xbf16>, vector<192x192xbf16>, vector<4x192xf32> -> vector<4x192xf32>
    %316 = arith.addf %311, %315 : vector<4x192xf32>
    %cst_361 = arith.constant 0.000000e+00 : f32
    %317 = vector.broadcast %cst_361 : f32 to vector<4x192xf32>
    %318 = arith.maximumf %316, %317 : vector<4x192xf32>
    %319 = arith.truncf %318 : vector<4x192xf32> to vector<4x192xbf16>
    %c1_362 = arith.constant 1 : index
    %c0_363 = arith.constant 0 : index
    %320 = vector.load %arg53[%c1_362, %c0_363] : memref<6x192xbf16, #tpu.memory_space<vmem>>, vector<4x192xbf16>
    tpu.vector_store %arg53[%c1_362, %c0_363], %319 {strides = array<i32>} : memref<6x192xbf16, #tpu.memory_space<vmem>>, vector<4x192xbf16>,
    %c0_364 = arith.constant 0 : index
    %c0_365 = arith.constant 0 : index
    %321 = vector.load %arg31[%c0_364, %c0_365] : memref<1x192xf32, #tpu.memory_space<vmem>>, vector<1x192xf32>
    %c0_366 = arith.constant 0 : index
    %c0_367 = arith.constant 0 : index
    %322 = vector.load %arg53[%c0_366, %c0_367] : memref<6x192xbf16, #tpu.memory_space<vmem>>, vector<4x192xbf16>
    %c0_368 = arith.constant 0 : index
    %c0_369 = arith.constant 0 : index
    %c0_370 = arith.constant 0 : index
    %323 = vector.load %arg30[%c0_368, %c0_369, %c0_370] : memref<3x192x192xbf16, #tpu.memory_space<vmem>>, vector<1x192x192xbf16>
    %324 = vector.shape_cast %323 : vector<1x192x192xbf16> to vector<192x192xbf16>
    %cst_371 = arith.constant dense<0.000000e+00> : vector<4x192xf32>
    %325 = tpu.matmul %322, %324, %cst_371 {dimension_numbers = #tpu.dot_dimension_numbers<[1], [0], [0], [1], [0, 0, 1, 1], [], []>} : vector<4x192xbf16>, vector<192x192xbf16>, vector<4x192xf32> -> vector<4x192xf32>
    %326 = vector.broadcast %321 : vector<1x192xf32> to vector<4x192xf32>
    %327 = arith.addf %326, %325 : vector<4x192xf32>
    %c1_372 = arith.constant 1 : index
    %c0_373 = arith.constant 0 : index
    %328 = vector.load %arg53[%c1_372, %c0_373] : memref<6x192xbf16, #tpu.memory_space<vmem>>, vector<4x192xbf16>
    %c1_374 = arith.constant 1 : index
    %c0_375 = arith.constant 0 : index
    %c0_376 = arith.constant 0 : index
    %329 = vector.load %arg30[%c1_374, %c0_375, %c0_376] : memref<3x192x192xbf16, #tpu.memory_space<vmem>>, vector<1x192x192xbf16>
    %330 = vector.shape_cast %329 : vector<1x192x192xbf16> to vector<192x192xbf16>
    %cst_377 = arith.constant dense<0.000000e+00> : vector<4x192xf32>
    %331 = tpu.matmul %328, %330, %cst_377 {dimension_numbers = #tpu.dot_dimension_numbers<[1], [0], [0], [1], [0, 0, 1, 1], [], []>} : vector<4x192xbf16>, vector<192x192xbf16>, vector<4x192xf32> -> vector<4x192xf32>
    %332 = arith.addf %327, %331 : vector<4x192xf32>
    %c2_378 = arith.constant 2 : index
    %c0_379 = arith.constant 0 : index
    %333 = vector.load %arg53[%c2_378, %c0_379] : memref<6x192xbf16, #tpu.memory_space<vmem>>, vector<4x192xbf16>
    %c2_380 = arith.constant 2 : index
    %c0_381 = arith.constant 0 : index
    %c0_382 = arith.constant 0 : index
    %334 = vector.load %arg30[%c2_380, %c0_381, %c0_382] : memref<3x192x192xbf16, #tpu.memory_space<vmem>>, vector<1x192x192xbf16>
    %335 = vector.shape_cast %334 : vector<1x192x192xbf16> to vector<192x192xbf16>
    %cst_383 = arith.constant dense<0.000000e+00> : vector<4x192xf32>
    %336 = tpu.matmul %333, %335, %cst_383 {dimension_numbers = #tpu.dot_dimension_numbers<[1], [0], [0], [1], [0, 0, 1, 1], [], []>} : vector<4x192xbf16>, vector<192x192xbf16>, vector<4x192xf32> -> vector<4x192xf32>
    %337 = arith.addf %332, %336 : vector<4x192xf32>
    %cst_384 = arith.constant 0.000000e+00 : f32
    %338 = vector.broadcast %cst_384 : f32 to vector<4x192xf32>
    %339 = arith.maximumf %337, %338 : vector<4x192xf32>
    %340 = arith.truncf %339 : vector<4x192xf32> to vector<4x192xbf16>
    %c0_385 = arith.constant 0 : index
    %c0_386 = arith.constant 0 : index
    %c0_387 = arith.constant 0 : index
    %341 = vector.load %arg32[%c0_385, %c0_386, %c0_387] : memref<2x192x160xbf16, #tpu.memory_space<vmem>>, vector<1x192x160xbf16>
    %342 = vector.shape_cast %341 : vector<1x192x160xbf16> to vector<192x160xbf16>
    %cst_388 = arith.constant dense<0.000000e+00> : vector<4x160xf32>
    %343 = tpu.matmul %340, %342, %cst_388 {dimension_numbers = #tpu.dot_dimension_numbers<[1], [0], [0], [1], [0, 0, 1, 1], [], []>} : vector<4x192xbf16>, vector<192x160xbf16>, vector<4x160xf32> -> vector<4x160xf32>
    %344 = arith.truncf %343 : vector<4x160xf32> to vector<4x160xbf16>
    %c1_389 = arith.constant 1 : index
    %c0_390 = arith.constant 0 : index
    %c0_391 = arith.constant 0 : index
    %345 = vector.load %arg32[%c1_389, %c0_390, %c0_391] : memref<2x192x160xbf16, #tpu.memory_space<vmem>>, vector<1x192x160xbf16>
    %346 = vector.shape_cast %345 : vector<1x192x160xbf16> to vector<192x160xbf16>
    %cst_392 = arith.constant dense<0.000000e+00> : vector<4x160xf32>
    %347 = tpu.matmul %340, %346, %cst_392 {dimension_numbers = #tpu.dot_dimension_numbers<[1], [0], [0], [1], [0, 0, 1, 1], [], []>} : vector<4x192xbf16>, vector<192x160xbf16>, vector<4x160xf32> -> vector<4x160xf32>
    %348 = arith.truncf %347 : vector<4x160xf32> to vector<4x160xbf16>
    %c0_393 = arith.constant 0 : index
    %c0_394 = arith.constant 0 : index
    %c0_395 = arith.constant 0 : index
    %349 = vector.load %arg34[%c0_393, %c0_394, %c0_395] : memref<2x8x4xbf16, #tpu.memory_space<vmem>>, vector<1x8x4xbf16>
    %350 = vector.shape_cast %349 : vector<1x8x4xbf16> to vector<8x4xbf16>
    %cst_396 = arith.constant dense<0.000000e+00> : vector<8x160xf32>
    %351 = tpu.matmul %350, %344, %cst_396 {dimension_numbers = #tpu.dot_dimension_numbers<[1], [0], [0], [1], [0, 0, 1, 1], [], []>} : vector<8x4xbf16>, vector<4x160xbf16>, vector<8x160xf32> -> vector<8x160xf32>
    %c1_397 = arith.constant 1 : index
    %c0_398 = arith.constant 0 : index
    %c0_399 = arith.constant 0 : index
    %352 = vector.load %arg34[%c1_397, %c0_398, %c0_399] : memref<2x8x4xbf16, #tpu.memory_space<vmem>>, vector<1x8x4xbf16>
    %353 = vector.shape_cast %352 : vector<1x8x4xbf16> to vector<8x4xbf16>
    %cst_400 = arith.constant dense<0.000000e+00> : vector<8x160xf32>
    %354 = tpu.matmul %353, %348, %cst_400 {dimension_numbers = #tpu.dot_dimension_numbers<[1], [0], [0], [1], [0, 0, 1, 1], [], []>} : vector<8x4xbf16>, vector<4x160xbf16>, vector<8x160xf32> -> vector<8x160xf32>
    %355 = arith.addf %351, %354 : vector<8x160xf32>
    %c0_401 = arith.constant 0 : index
    %c0_402 = arith.constant 0 : index
    %356 = vector.load %arg33[%c0_401, %c0_402] : memref<1x160xf32, #tpu.memory_space<vmem>>, vector<1x160xf32>
    %357 = vector.broadcast %356 : vector<1x160xf32> to vector<8x160xf32>
    %358 = arith.addf %355, %357 : vector<8x160xf32>
    %cst_403 = arith.constant 0.000000e+00 : f32
    %359 = vector.broadcast %cst_403 : f32 to vector<8x160xf32>
    %360 = arith.maximumf %358, %359 : vector<8x160xf32>
    %361 = arith.truncf %360 : vector<8x160xf32> to vector<8x160xbf16>
    %c1_404 = arith.constant 1 : index
    %c0_405 = arith.constant 0 : index
    %362 = vector.load %arg62[%c1_404, %c0_405] : memref<10x160xbf16, #tpu.memory_space<vmem>>, vector<8x160xbf16>
    tpu.vector_store %arg62[%c1_404, %c0_405], %361 {strides = array<i32>} : memref<10x160xbf16, #tpu.memory_space<vmem>>, vector<8x160xbf16>,
    %c0_406 = arith.constant 0 : index
    %c0_407 = arith.constant 0 : index
    %363 = vector.load %arg37[%c0_406, %c0_407] : memref<1x160xf32, #tpu.memory_space<vmem>>, vector<1x160xf32>
    %c0_408 = arith.constant 0 : index
    %c0_409 = arith.constant 0 : index
    %364 = vector.load %arg56[%c0_408, %c0_409] : memref<10x160xbf16, #tpu.memory_space<vmem>>, vector<8x160xbf16>
    %c0_410 = arith.constant 0 : index
    %c0_411 = arith.constant 0 : index
    %c0_412 = arith.constant 0 : index
    %365 = vector.load %arg35[%c0_410, %c0_411, %c0_412] : memref<3x160x160xbf16, #tpu.memory_space<vmem>>, vector<1x160x160xbf16>
    %366 = vector.shape_cast %365 : vector<1x160x160xbf16> to vector<160x160xbf16>
    %cst_413 = arith.constant dense<0.000000e+00> : vector<8x160xf32>
    %367 = tpu.matmul %364, %366, %cst_413 {dimension_numbers = #tpu.dot_dimension_numbers<[1], [0], [0], [1], [0, 0, 1, 1], [], []>} : vector<8x160xbf16>, vector<160x160xbf16>, vector<8x160xf32> -> vector<8x160xf32>
    %368 = vector.broadcast %363 : vector<1x160xf32> to vector<8x160xf32>
    %369 = arith.addf %368, %367 : vector<8x160xf32>
    %c1_414 = arith.constant 1 : index
    %c0_415 = arith.constant 0 : index
    %370 = vector.load %arg56[%c1_414, %c0_415] : memref<10x160xbf16, #tpu.memory_space<vmem>>, vector<8x160xbf16>
    %c1_416 = arith.constant 1 : index
    %c0_417 = arith.constant 0 : index
    %c0_418 = arith.constant 0 : index
    %371 = vector.load %arg35[%c1_416, %c0_417, %c0_418] : memref<3x160x160xbf16, #tpu.memory_space<vmem>>, vector<1x160x160xbf16>
    %372 = vector.shape_cast %371 : vector<1x160x160xbf16> to vector<160x160xbf16>
    %cst_419 = arith.constant dense<0.000000e+00> : vector<8x160xf32>
    %373 = tpu.matmul %370, %372, %cst_419 {dimension_numbers = #tpu.dot_dimension_numbers<[1], [0], [0], [1], [0, 0, 1, 1], [], []>} : vector<8x160xbf16>, vector<160x160xbf16>, vector<8x160xf32> -> vector<8x160xf32>
    %374 = arith.addf %369, %373 : vector<8x160xf32>
    %c2_420 = arith.constant 2 : index
    %c0_421 = arith.constant 0 : index
    %375 = vector.load %arg56[%c2_420, %c0_421] : memref<10x160xbf16, #tpu.memory_space<vmem>>, vector<8x160xbf16>
    %c2_422 = arith.constant 2 : index
    %c0_423 = arith.constant 0 : index
    %c0_424 = arith.constant 0 : index
    %376 = vector.load %arg35[%c2_422, %c0_423, %c0_424] : memref<3x160x160xbf16, #tpu.memory_space<vmem>>, vector<1x160x160xbf16>
    %377 = vector.shape_cast %376 : vector<1x160x160xbf16> to vector<160x160xbf16>
    %cst_425 = arith.constant dense<0.000000e+00> : vector<8x160xf32>
    %378 = tpu.matmul %375, %377, %cst_425 {dimension_numbers = #tpu.dot_dimension_numbers<[1], [0], [0], [1], [0, 0, 1, 1], [], []>} : vector<8x160xbf16>, vector<160x160xbf16>, vector<8x160xf32> -> vector<8x160xf32>
    %379 = arith.addf %374, %378 : vector<8x160xf32>
    %c0_426 = arith.constant 0 : index
    %c0_427 = arith.constant 0 : index
    %380 = vector.load %arg62[%c0_426, %c0_427] : memref<10x160xbf16, #tpu.memory_space<vmem>>, vector<8x160xbf16>
    %c0_428 = arith.constant 0 : index
    %c0_429 = arith.constant 0 : index
    %c0_430 = arith.constant 0 : index
    %381 = vector.load %arg36[%c0_428, %c0_429, %c0_430] : memref<3x160x160xbf16, #tpu.memory_space<vmem>>, vector<1x160x160xbf16>
    %382 = vector.shape_cast %381 : vector<1x160x160xbf16> to vector<160x160xbf16>
    %cst_431 = arith.constant dense<0.000000e+00> : vector<8x160xf32>
    %383 = tpu.matmul %380, %382, %cst_431 {dimension_numbers = #tpu.dot_dimension_numbers<[1], [0], [0], [1], [0, 0, 1, 1], [], []>} : vector<8x160xbf16>, vector<160x160xbf16>, vector<8x160xf32> -> vector<8x160xf32>
    %384 = arith.addf %379, %383 : vector<8x160xf32>
    %c1_432 = arith.constant 1 : index
    %c0_433 = arith.constant 0 : index
    %385 = vector.load %arg62[%c1_432, %c0_433] : memref<10x160xbf16, #tpu.memory_space<vmem>>, vector<8x160xbf16>
    %c1_434 = arith.constant 1 : index
    %c0_435 = arith.constant 0 : index
    %c0_436 = arith.constant 0 : index
    %386 = vector.load %arg36[%c1_434, %c0_435, %c0_436] : memref<3x160x160xbf16, #tpu.memory_space<vmem>>, vector<1x160x160xbf16>
    %387 = vector.shape_cast %386 : vector<1x160x160xbf16> to vector<160x160xbf16>
    %cst_437 = arith.constant dense<0.000000e+00> : vector<8x160xf32>
    %388 = tpu.matmul %385, %387, %cst_437 {dimension_numbers = #tpu.dot_dimension_numbers<[1], [0], [0], [1], [0, 0, 1, 1], [], []>} : vector<8x160xbf16>, vector<160x160xbf16>, vector<8x160xf32> -> vector<8x160xf32>
    %389 = arith.addf %384, %388 : vector<8x160xf32>
    %c2_438 = arith.constant 2 : index
    %c0_439 = arith.constant 0 : index
    %390 = vector.load %arg62[%c2_438, %c0_439] : memref<10x160xbf16, #tpu.memory_space<vmem>>, vector<8x160xbf16>
    %c2_440 = arith.constant 2 : index
    %c0_441 = arith.constant 0 : index
    %c0_442 = arith.constant 0 : index
    %391 = vector.load %arg36[%c2_440, %c0_441, %c0_442] : memref<3x160x160xbf16, #tpu.memory_space<vmem>>, vector<1x160x160xbf16>
    %392 = vector.shape_cast %391 : vector<1x160x160xbf16> to vector<160x160xbf16>
    %cst_443 = arith.constant dense<0.000000e+00> : vector<8x160xf32>
    %393 = tpu.matmul %390, %392, %cst_443 {dimension_numbers = #tpu.dot_dimension_numbers<[1], [0], [0], [1], [0, 0, 1, 1], [], []>} : vector<8x160xbf16>, vector<160x160xbf16>, vector<8x160xf32> -> vector<8x160xf32>
    %394 = arith.addf %389, %393 : vector<8x160xf32>
    %cst_444 = arith.constant 0.000000e+00 : f32
    %395 = vector.broadcast %cst_444 : f32 to vector<8x160xf32>
    %396 = arith.maximumf %394, %395 : vector<8x160xf32>
    %397 = arith.truncf %396 : vector<8x160xf32> to vector<8x160xbf16>
    %c1_445 = arith.constant 1 : index
    %c0_446 = arith.constant 0 : index
    %398 = vector.load %arg52[%c1_445, %c0_446] : memref<10x160xbf16, #tpu.memory_space<vmem>>, vector<8x160xbf16>
    tpu.vector_store %arg52[%c1_445, %c0_446], %397 {strides = array<i32>} : memref<10x160xbf16, #tpu.memory_space<vmem>>, vector<8x160xbf16>,
    %c0_447 = arith.constant 0 : index
    %c0_448 = arith.constant 0 : index
    %399 = vector.load %arg39[%c0_447, %c0_448] : memref<1x160xf32, #tpu.memory_space<vmem>>, vector<1x160xf32>
    %c0_449 = arith.constant 0 : index
    %c0_450 = arith.constant 0 : index
    %400 = vector.load %arg52[%c0_449, %c0_450] : memref<10x160xbf16, #tpu.memory_space<vmem>>, vector<8x160xbf16>
    %c0_451 = arith.constant 0 : index
    %c0_452 = arith.constant 0 : index
    %c0_453 = arith.constant 0 : index
    %401 = vector.load %arg38[%c0_451, %c0_452, %c0_453] : memref<3x160x160xbf16, #tpu.memory_space<vmem>>, vector<1x160x160xbf16>
    %402 = vector.shape_cast %401 : vector<1x160x160xbf16> to vector<160x160xbf16>
    %cst_454 = arith.constant dense<0.000000e+00> : vector<8x160xf32>
    %403 = tpu.matmul %400, %402, %cst_454 {dimension_numbers = #tpu.dot_dimension_numbers<[1], [0], [0], [1], [0, 0, 1, 1], [], []>} : vector<8x160xbf16>, vector<160x160xbf16>, vector<8x160xf32> -> vector<8x160xf32>
    %404 = vector.broadcast %399 : vector<1x160xf32> to vector<8x160xf32>
    %405 = arith.addf %404, %403 : vector<8x160xf32>
    %c1_455 = arith.constant 1 : index
    %c0_456 = arith.constant 0 : index
    %406 = vector.load %arg52[%c1_455, %c0_456] : memref<10x160xbf16, #tpu.memory_space<vmem>>, vector<8x160xbf16>
    %c1_457 = arith.constant 1 : index
    %c0_458 = arith.constant 0 : index
    %c0_459 = arith.constant 0 : index
    %407 = vector.load %arg38[%c1_457, %c0_458, %c0_459] : memref<3x160x160xbf16, #tpu.memory_space<vmem>>, vector<1x160x160xbf16>
    %408 = vector.shape_cast %407 : vector<1x160x160xbf16> to vector<160x160xbf16>
    %cst_460 = arith.constant dense<0.000000e+00> : vector<8x160xf32>
    %409 = tpu.matmul %406, %408, %cst_460 {dimension_numbers = #tpu.dot_dimension_numbers<[1], [0], [0], [1], [0, 0, 1, 1], [], []>} : vector<8x160xbf16>, vector<160x160xbf16>, vector<8x160xf32> -> vector<8x160xf32>
    %410 = arith.addf %405, %409 : vector<8x160xf32>
    %c2_461 = arith.constant 2 : index
    %c0_462 = arith.constant 0 : index
    %411 = vector.load %arg52[%c2_461, %c0_462] : memref<10x160xbf16, #tpu.memory_space<vmem>>, vector<8x160xbf16>
    %c2_463 = arith.constant 2 : index
    %c0_464 = arith.constant 0 : index
    %c0_465 = arith.constant 0 : index
    %412 = vector.load %arg38[%c2_463, %c0_464, %c0_465] : memref<3x160x160xbf16, #tpu.memory_space<vmem>>, vector<1x160x160xbf16>
    %413 = vector.shape_cast %412 : vector<1x160x160xbf16> to vector<160x160xbf16>
    %cst_466 = arith.constant dense<0.000000e+00> : vector<8x160xf32>
    %414 = tpu.matmul %411, %413, %cst_466 {dimension_numbers = #tpu.dot_dimension_numbers<[1], [0], [0], [1], [0, 0, 1, 1], [], []>} : vector<8x160xbf16>, vector<160x160xbf16>, vector<8x160xf32> -> vector<8x160xf32>
    %415 = arith.addf %410, %414 : vector<8x160xf32>
    %cst_467 = arith.constant 0.000000e+00 : f32
    %416 = vector.broadcast %cst_467 : f32 to vector<8x160xf32>
    %417 = arith.maximumf %415, %416 : vector<8x160xf32>
    %418 = arith.truncf %417 : vector<8x160xf32> to vector<8x160xbf16>
    %c0_468 = arith.constant 0 : index
    %c0_469 = arith.constant 0 : index
    %c0_470 = arith.constant 0 : index
    %419 = vector.load %arg40[%c0_468, %c0_469, %c0_470] : memref<2x160x144xbf16, #tpu.memory_space<vmem>>, vector<1x160x144xbf16>
    %420 = vector.shape_cast %419 : vector<1x160x144xbf16> to vector<160x144xbf16>
    %cst_471 = arith.constant dense<0.000000e+00> : vector<8x144xf32>
    %421 = tpu.matmul %418, %420, %cst_471 {dimension_numbers = #tpu.dot_dimension_numbers<[1], [0], [0], [1], [0, 0, 1, 1], [], []>} : vector<8x160xbf16>, vector<160x144xbf16>, vector<8x144xf32> -> vector<8x144xf32>
    %422 = arith.truncf %421 : vector<8x144xf32> to vector<8x144xbf16>
    %c1_472 = arith.constant 1 : index
    %c0_473 = arith.constant 0 : index
    %c0_474 = arith.constant 0 : index
    %423 = vector.load %arg40[%c1_472, %c0_473, %c0_474] : memref<2x160x144xbf16, #tpu.memory_space<vmem>>, vector<1x160x144xbf16>
    %424 = vector.shape_cast %423 : vector<1x160x144xbf16> to vector<160x144xbf16>
    %cst_475 = arith.constant dense<0.000000e+00> : vector<8x144xf32>
    %425 = tpu.matmul %418, %424, %cst_475 {dimension_numbers = #tpu.dot_dimension_numbers<[1], [0], [0], [1], [0, 0, 1, 1], [], []>} : vector<8x160xbf16>, vector<160x144xbf16>, vector<8x144xf32> -> vector<8x144xf32>
    %426 = arith.truncf %425 : vector<8x144xf32> to vector<8x144xbf16>
    %c0_476 = arith.constant 0 : index
    %c0_477 = arith.constant 0 : index
    %c0_478 = arith.constant 0 : index
    %427 = vector.load %arg42[%c0_476, %c0_477, %c0_478] : memref<2x16x8xbf16, #tpu.memory_space<vmem>>, vector<1x16x8xbf16>
    %428 = vector.shape_cast %427 : vector<1x16x8xbf16> to vector<16x8xbf16>
    %cst_479 = arith.constant dense<0.000000e+00> : vector<16x144xf32>
    %429 = tpu.matmul %428, %422, %cst_479 {dimension_numbers = #tpu.dot_dimension_numbers<[1], [0], [0], [1], [0, 0, 1, 1], [], []>} : vector<16x8xbf16>, vector<8x144xbf16>, vector<16x144xf32> -> vector<16x144xf32>
    %c1_480 = arith.constant 1 : index
    %c0_481 = arith.constant 0 : index
    %c0_482 = arith.constant 0 : index
    %430 = vector.load %arg42[%c1_480, %c0_481, %c0_482] : memref<2x16x8xbf16, #tpu.memory_space<vmem>>, vector<1x16x8xbf16>
    %431 = vector.shape_cast %430 : vector<1x16x8xbf16> to vector<16x8xbf16>
    %cst_483 = arith.constant dense<0.000000e+00> : vector<16x144xf32>
    %432 = tpu.matmul %431, %426, %cst_483 {dimension_numbers = #tpu.dot_dimension_numbers<[1], [0], [0], [1], [0, 0, 1, 1], [], []>} : vector<16x8xbf16>, vector<8x144xbf16>, vector<16x144xf32> -> vector<16x144xf32>
    %433 = arith.addf %429, %432 : vector<16x144xf32>
    %c0_484 = arith.constant 0 : index
    %c0_485 = arith.constant 0 : index
    %434 = vector.load %arg41[%c0_484, %c0_485] : memref<1x144xf32, #tpu.memory_space<vmem>>, vector<1x144xf32>
    %435 = vector.broadcast %434 : vector<1x144xf32> to vector<16x144xf32>
    %436 = arith.addf %433, %435 : vector<16x144xf32>
    %cst_486 = arith.constant 0.000000e+00 : f32
    %437 = vector.broadcast %cst_486 : f32 to vector<16x144xf32>
    %438 = arith.maximumf %436, %437 : vector<16x144xf32>
    %439 = arith.truncf %438 : vector<16x144xf32> to vector<16x144xbf16>
    %c1_487 = arith.constant 1 : index
    %c0_488 = arith.constant 0 : index
    %440 = vector.load %arg63[%c1_487, %c0_488] : memref<18x144xbf16, #tpu.memory_space<vmem>>, vector<16x144xbf16>
    tpu.vector_store %arg63[%c1_487, %c0_488], %439 {strides = array<i32>} : memref<18x144xbf16, #tpu.memory_space<vmem>>, vector<16x144xbf16>,
    %c0_489 = arith.constant 0 : index
    %c0_490 = arith.constant 0 : index
    %441 = vector.load %arg45[%c0_489, %c0_490] : memref<1x144xf32, #tpu.memory_space<vmem>>, vector<1x144xf32>
    %c0_491 = arith.constant 0 : index
    %c0_492 = arith.constant 0 : index
    %442 = vector.load %arg55[%c0_491, %c0_492] : memref<18x144xbf16, #tpu.memory_space<vmem>>, vector<16x144xbf16>
    %c0_493 = arith.constant 0 : index
    %c0_494 = arith.constant 0 : index
    %c0_495 = arith.constant 0 : index
    %443 = vector.load %arg43[%c0_493, %c0_494, %c0_495] : memref<3x144x144xbf16, #tpu.memory_space<vmem>>, vector<1x144x144xbf16>
    %444 = vector.shape_cast %443 : vector<1x144x144xbf16> to vector<144x144xbf16>
    %cst_496 = arith.constant dense<0.000000e+00> : vector<16x144xf32>
    %445 = tpu.matmul %442, %444, %cst_496 {dimension_numbers = #tpu.dot_dimension_numbers<[1], [0], [0], [1], [0, 0, 1, 1], [], []>} : vector<16x144xbf16>, vector<144x144xbf16>, vector<16x144xf32> -> vector<16x144xf32>
    %446 = vector.broadcast %441 : vector<1x144xf32> to vector<16x144xf32>
    %447 = arith.addf %446, %445 : vector<16x144xf32>
    %c1_497 = arith.constant 1 : index
    %c0_498 = arith.constant 0 : index
    %448 = vector.load %arg55[%c1_497, %c0_498] : memref<18x144xbf16, #tpu.memory_space<vmem>>, vector<16x144xbf16>
    %c1_499 = arith.constant 1 : index
    %c0_500 = arith.constant 0 : index
    %c0_501 = arith.constant 0 : index
    %449 = vector.load %arg43[%c1_499, %c0_500, %c0_501] : memref<3x144x144xbf16, #tpu.memory_space<vmem>>, vector<1x144x144xbf16>
    %450 = vector.shape_cast %449 : vector<1x144x144xbf16> to vector<144x144xbf16>
    %cst_502 = arith.constant dense<0.000000e+00> : vector<16x144xf32>
    %451 = tpu.matmul %448, %450, %cst_502 {dimension_numbers = #tpu.dot_dimension_numbers<[1], [0], [0], [1], [0, 0, 1, 1], [], []>} : vector<16x144xbf16>, vector<144x144xbf16>, vector<16x144xf32> -> vector<16x144xf32>
    %452 = arith.addf %447, %451 : vector<16x144xf32>
    %c2_503 = arith.constant 2 : index
    %c0_504 = arith.constant 0 : index
    %453 = vector.load %arg55[%c2_503, %c0_504] : memref<18x144xbf16, #tpu.memory_space<vmem>>, vector<16x144xbf16>
    %c2_505 = arith.constant 2 : index
    %c0_506 = arith.constant 0 : index
    %c0_507 = arith.constant 0 : index
    %454 = vector.load %arg43[%c2_505, %c0_506, %c0_507] : memref<3x144x144xbf16, #tpu.memory_space<vmem>>, vector<1x144x144xbf16>
    %455 = vector.shape_cast %454 : vector<1x144x144xbf16> to vector<144x144xbf16>
    %cst_508 = arith.constant dense<0.000000e+00> : vector<16x144xf32>
    %456 = tpu.matmul %453, %455, %cst_508 {dimension_numbers = #tpu.dot_dimension_numbers<[1], [0], [0], [1], [0, 0, 1, 1], [], []>} : vector<16x144xbf16>, vector<144x144xbf16>, vector<16x144xf32> -> vector<16x144xf32>
    %457 = arith.addf %452, %456 : vector<16x144xf32>
    %c0_509 = arith.constant 0 : index
    %c0_510 = arith.constant 0 : index
    %458 = vector.load %arg63[%c0_509, %c0_510] : memref<18x144xbf16, #tpu.memory_space<vmem>>, vector<16x144xbf16>
    %c0_511 = arith.constant 0 : index
    %c0_512 = arith.constant 0 : index
    %c0_513 = arith.constant 0 : index
    %459 = vector.load %arg44[%c0_511, %c0_512, %c0_513] : memref<3x144x144xbf16, #tpu.memory_space<vmem>>, vector<1x144x144xbf16>
    %460 = vector.shape_cast %459 : vector<1x144x144xbf16> to vector<144x144xbf16>
    %cst_514 = arith.constant dense<0.000000e+00> : vector<16x144xf32>
    %461 = tpu.matmul %458, %460, %cst_514 {dimension_numbers = #tpu.dot_dimension_numbers<[1], [0], [0], [1], [0, 0, 1, 1], [], []>} : vector<16x144xbf16>, vector<144x144xbf16>, vector<16x144xf32> -> vector<16x144xf32>
    %462 = arith.addf %457, %461 : vector<16x144xf32>
    %c1_515 = arith.constant 1 : index
    %c0_516 = arith.constant 0 : index
    %463 = vector.load %arg63[%c1_515, %c0_516] : memref<18x144xbf16, #tpu.memory_space<vmem>>, vector<16x144xbf16>
    %c1_517 = arith.constant 1 : index
    %c0_518 = arith.constant 0 : index
    %c0_519 = arith.constant 0 : index
    %464 = vector.load %arg44[%c1_517, %c0_518, %c0_519] : memref<3x144x144xbf16, #tpu.memory_space<vmem>>, vector<1x144x144xbf16>
    %465 = vector.shape_cast %464 : vector<1x144x144xbf16> to vector<144x144xbf16>
    %cst_520 = arith.constant dense<0.000000e+00> : vector<16x144xf32>
    %466 = tpu.matmul %463, %465, %cst_520 {dimension_numbers = #tpu.dot_dimension_numbers<[1], [0], [0], [1], [0, 0, 1, 1], [], []>} : vector<16x144xbf16>, vector<144x144xbf16>, vector<16x144xf32> -> vector<16x144xf32>
    %467 = arith.addf %462, %466 : vector<16x144xf32>
    %c2_521 = arith.constant 2 : index
    %c0_522 = arith.constant 0 : index
    %468 = vector.load %arg63[%c2_521, %c0_522] : memref<18x144xbf16, #tpu.memory_space<vmem>>, vector<16x144xbf16>
    %c2_523 = arith.constant 2 : index
    %c0_524 = arith.constant 0 : index
    %c0_525 = arith.constant 0 : index
    %469 = vector.load %arg44[%c2_523, %c0_524, %c0_525] : memref<3x144x144xbf16, #tpu.memory_space<vmem>>, vector<1x144x144xbf16>
    %470 = vector.shape_cast %469 : vector<1x144x144xbf16> to vector<144x144xbf16>
    %cst_526 = arith.constant dense<0.000000e+00> : vector<16x144xf32>
    %471 = tpu.matmul %468, %470, %cst_526 {dimension_numbers = #tpu.dot_dimension_numbers<[1], [0], [0], [1], [0, 0, 1, 1], [], []>} : vector<16x144xbf16>, vector<144x144xbf16>, vector<16x144xf32> -> vector<16x144xf32>
    %472 = arith.addf %467, %471 : vector<16x144xf32>
    %cst_527 = arith.constant 0.000000e+00 : f32
    %473 = vector.broadcast %cst_527 : f32 to vector<16x144xf32>
    %474 = arith.maximumf %472, %473 : vector<16x144xf32>
    %475 = arith.truncf %474 : vector<16x144xf32> to vector<16x144xbf16>
    %c1_528 = arith.constant 1 : index
    %c0_529 = arith.constant 0 : index
    %476 = vector.load %arg51[%c1_528, %c0_529] : memref<18x144xbf16, #tpu.memory_space<vmem>>, vector<16x144xbf16>
    tpu.vector_store %arg51[%c1_528, %c0_529], %475 {strides = array<i32>} : memref<18x144xbf16, #tpu.memory_space<vmem>>, vector<16x144xbf16>,
    %c0_530 = arith.constant 0 : index
    %c0_531 = arith.constant 0 : index
    %477 = vector.load %arg47[%c0_530, %c0_531] : memref<1x144xf32, #tpu.memory_space<vmem>>, vector<1x144xf32>
    %c0_532 = arith.constant 0 : index
    %c0_533 = arith.constant 0 : index
    %478 = vector.load %arg51[%c0_532, %c0_533] : memref<18x144xbf16, #tpu.memory_space<vmem>>, vector<16x144xbf16>
    %c0_534 = arith.constant 0 : index
    %c0_535 = arith.constant 0 : index
    %c0_536 = arith.constant 0 : index
    %479 = vector.load %arg46[%c0_534, %c0_535, %c0_536] : memref<3x144x144xbf16, #tpu.memory_space<vmem>>, vector<1x144x144xbf16>
    %480 = vector.shape_cast %479 : vector<1x144x144xbf16> to vector<144x144xbf16>
    %cst_537 = arith.constant dense<0.000000e+00> : vector<16x144xf32>
    %481 = tpu.matmul %478, %480, %cst_537 {dimension_numbers = #tpu.dot_dimension_numbers<[1], [0], [0], [1], [0, 0, 1, 1], [], []>} : vector<16x144xbf16>, vector<144x144xbf16>, vector<16x144xf32> -> vector<16x144xf32>
    %482 = vector.broadcast %477 : vector<1x144xf32> to vector<16x144xf32>
    %483 = arith.addf %482, %481 : vector<16x144xf32>
    %c1_538 = arith.constant 1 : index
    %c0_539 = arith.constant 0 : index
    %484 = vector.load %arg51[%c1_538, %c0_539] : memref<18x144xbf16, #tpu.memory_space<vmem>>, vector<16x144xbf16>
    %c1_540 = arith.constant 1 : index
    %c0_541 = arith.constant 0 : index
    %c0_542 = arith.constant 0 : index
    %485 = vector.load %arg46[%c1_540, %c0_541, %c0_542] : memref<3x144x144xbf16, #tpu.memory_space<vmem>>, vector<1x144x144xbf16>
    %486 = vector.shape_cast %485 : vector<1x144x144xbf16> to vector<144x144xbf16>
    %cst_543 = arith.constant dense<0.000000e+00> : vector<16x144xf32>
    %487 = tpu.matmul %484, %486, %cst_543 {dimension_numbers = #tpu.dot_dimension_numbers<[1], [0], [0], [1], [0, 0, 1, 1], [], []>} : vector<16x144xbf16>, vector<144x144xbf16>, vector<16x144xf32> -> vector<16x144xf32>
    %488 = arith.addf %483, %487 : vector<16x144xf32>
    %c2_544 = arith.constant 2 : index
    %c0_545 = arith.constant 0 : index
    %489 = vector.load %arg51[%c2_544, %c0_545] : memref<18x144xbf16, #tpu.memory_space<vmem>>, vector<16x144xbf16>
    %c2_546 = arith.constant 2 : index
    %c0_547 = arith.constant 0 : index
    %c0_548 = arith.constant 0 : index
    %490 = vector.load %arg46[%c2_546, %c0_547, %c0_548] : memref<3x144x144xbf16, #tpu.memory_space<vmem>>, vector<1x144x144xbf16>
    %491 = vector.shape_cast %490 : vector<1x144x144xbf16> to vector<144x144xbf16>
    %cst_549 = arith.constant dense<0.000000e+00> : vector<16x144xf32>
    %492 = tpu.matmul %489, %491, %cst_549 {dimension_numbers = #tpu.dot_dimension_numbers<[1], [0], [0], [1], [0, 0, 1, 1], [], []>} : vector<16x144xbf16>, vector<144x144xbf16>, vector<16x144xf32> -> vector<16x144xf32>
    %493 = arith.addf %488, %492 : vector<16x144xf32>
    %cst_550 = arith.constant 0.000000e+00 : f32
    %494 = vector.broadcast %cst_550 : f32 to vector<16x144xf32>
    %495 = arith.maximumf %493, %494 : vector<16x144xf32>
    %496 = arith.truncf %495 : vector<16x144xf32> to vector<16x144xbf16>
    %c0_551 = arith.constant 0 : index
    %c0_552 = arith.constant 0 : index
    %497 = vector.load %arg48[%c0_551, %c0_552] : memref<144x32xbf16, #tpu.memory_space<vmem>>, vector<144x32xbf16>
    %cst_553 = arith.constant dense<0.000000e+00> : vector<16x32xf32>
    %498 = tpu.matmul %496, %497, %cst_553 {dimension_numbers = #tpu.dot_dimension_numbers<[1], [0], [0], [1], [0, 0, 1, 1], [], []>} : vector<16x144xbf16>, vector<144x32xbf16>, vector<16x32xf32> -> vector<16x32xf32>
    %c0_554 = arith.constant 0 : index
    %c0_555 = arith.constant 0 : index
    %499 = vector.load %arg49[%c0_554, %c0_555] : memref<1x32xf32, #tpu.memory_space<vmem>>, vector<1x32xf32>
    %500 = vector.broadcast %499 : vector<1x32xf32> to vector<16x32xf32>
    %501 = arith.addf %498, %500 : vector<16x32xf32>
    %502 = vector.extract_strided_slice %501 {offsets = [0, 0], sizes = [16, 16], strides = [1, 1]} : vector<16x32xf32> to vector<16x16xf32>
    %c0_556 = arith.constant 0 : index
    %c0_557 = arith.constant 0 : index
    %c0_558 = arith.constant 0 : index
    %c0_559 = arith.constant 0 : index
    %503 = vector.load %arg50[%c0_556, %c0_557, %c0_558, %c0_559] : memref<1x2x16x16xf32, #tpu.memory_space<vmem>>, vector<1x1x16x16xf32>
    %504 = vector.shape_cast %503 : vector<1x1x16x16xf32> to vector<16x16xf32>
    %505 = vector.shape_cast %502 : vector<16x16xf32> to vector<1x1x16x16xf32>
    tpu.vector_store %arg50[%c0_556, %c0_557, %c0_558, %c0_559], %505 {strides = array<i32>} : memref<1x2x16x16xf32, #tpu.memory_space<vmem>>, vector<1x1x16x16xf32>,
    %506 = vector.extract_strided_slice %501 {offsets = [0, 16], sizes = [16, 16], strides = [1, 1]} : vector<16x32xf32> to vector<16x16xf32>
    %c0_560 = arith.constant 0 : index
    %c1_561 = arith.constant 1 : index
    %c0_562 = arith.constant 0 : index
    %c0_563 = arith.constant 0 : index
    %507 = vector.load %arg50[%c0_560, %c1_561, %c0_562, %c0_563] : memref<1x2x16x16xf32, #tpu.memory_space<vmem>>, vector<1x1x16x16xf32>
    %508 = vector.shape_cast %507 : vector<1x1x16x16xf32> to vector<16x16xf32>
    %509 = vector.shape_cast %506 : vector<16x16xf32> to vector<1x1x16x16xf32>
    tpu.vector_store %arg50[%c0_560, %c1_561, %c0_562, %c0_563], %509 {strides = array<i32>} : memref<1x2x16x16xf32, #tpu.memory_space<vmem>>, vector<1x1x16x16xf32>,
    return
  }
  func.func @transform_0(%arg0: i32) -> (i32, i32, i32) {
    %c0_i32 = arith.constant 0 : i32
    %c0_i32_0 = arith.constant 0 : i32
    %c0_i32_1 = arith.constant 0 : i32
    return %arg0, %c0_i32, %c0_i32_0 : i32, i32, i32
  }
  func.func @transform_1(%arg0: i32) -> (i32, i32, i32) {
    %c0_i32 = arith.constant 0 : i32
    %c0_i32_0 = arith.constant 0 : i32
    %c0_i32_1 = arith.constant 0 : i32
    %c0_i32_2 = arith.constant 0 : i32
    return %c0_i32, %c0_i32_0, %c0_i32_1 : i32, i32, i32
  }
  func.func @transform_2(%arg0: i32) -> (i32, i32) {
    %c0_i32 = arith.constant 0 : i32
    %c0_i32_0 = arith.constant 0 : i32
    %c0_i32_1 = arith.constant 0 : i32
    return %c0_i32, %c0_i32_0 : i32, i32
  }
  func.func @transform_3(%arg0: i32) -> (i32, i32, i32) {
    %c0_i32 = arith.constant 0 : i32
    %c0_i32_0 = arith.constant 0 : i32
    %c0_i32_1 = arith.constant 0 : i32
    %c0_i32_2 = arith.constant 0 : i32
    return %c0_i32, %c0_i32_0, %c0_i32_1 : i32, i32, i32
  }
  func.func @transform_4(%arg0: i32) -> (i32, i32) {
    %c0_i32 = arith.constant 0 : i32
    %c0_i32_0 = arith.constant 0 : i32
    %c0_i32_1 = arith.constant 0 : i32
    return %c0_i32, %c0_i32_0 : i32, i32
  }
  func.func @transform_5(%arg0: i32) -> (i32, i32, i32) {
    %c0_i32 = arith.constant 0 : i32
    %c0_i32_0 = arith.constant 0 : i32
    %c0_i32_1 = arith.constant 0 : i32
    %c0_i32_2 = arith.constant 0 : i32
    return %c0_i32, %c0_i32_0, %c0_i32_1 : i32, i32, i32
  }
  func.func @transform_6(%arg0: i32) -> (i32, i32, i32) {
    %c0_i32 = arith.constant 0 : i32
    %c0_i32_0 = arith.constant 0 : i32
    %c0_i32_1 = arith.constant 0 : i32
    %c0_i32_2 = arith.constant 0 : i32
    return %c0_i32, %c0_i32_0, %c0_i32_1 : i32, i32, i32
  }
  func.func @transform_7(%arg0: i32) -> (i32, i32, i32) {
    %c0_i32 = arith.constant 0 : i32
    %c0_i32_0 = arith.constant 0 : i32
    %c0_i32_1 = arith.constant 0 : i32
    %c0_i32_2 = arith.constant 0 : i32
    return %c0_i32, %c0_i32_0, %c0_i32_1 : i32, i32, i32
  }
  func.func @transform_8(%arg0: i32) -> (i32, i32) {
    %c0_i32 = arith.constant 0 : i32
    %c0_i32_0 = arith.constant 0 : i32
    %c0_i32_1 = arith.constant 0 : i32
    return %c0_i32, %c0_i32_0 : i32, i32
  }
  func.func @transform_9(%arg0: i32) -> (i32, i32, i32) {
    %c0_i32 = arith.constant 0 : i32
    %c0_i32_0 = arith.constant 0 : i32
    %c0_i32_1 = arith.constant 0 : i32
    %c0_i32_2 = arith.constant 0 : i32
    return %c0_i32, %c0_i32_0, %c0_i32_1 : i32, i32, i32
  }
  func.func @transform_10(%arg0: i32) -> (i32, i32) {
    %c0_i32 = arith.constant 0 : i32
    %c0_i32_0 = arith.constant 0 : i32
    %c0_i32_1 = arith.constant 0 : i32
    return %c0_i32, %c0_i32_0 : i32, i32
  }
  func.func @transform_11(%arg0: i32) -> (i32, i32, i32) {
    %c0_i32 = arith.constant 0 : i32
    %c0_i32_0 = arith.constant 0 : i32
    %c0_i32_1 = arith.constant 0 : i32
    %c0_i32_2 = arith.constant 0 : i32
    return %c0_i32, %c0_i32_0, %c0_i32_1 : i32, i32, i32
  }
  func.func @transform_12(%arg0: i32) -> (i32, i32, i32) {
    %c0_i32 = arith.constant 0 : i32
    %c0_i32_0 = arith.constant 0 : i32
    %c0_i32_1 = arith.constant 0 : i32
    %c0_i32_2 = arith.constant 0 : i32
    return %c0_i32, %c0_i32_0, %c0_i32_1 : i32, i32, i32
  }
  func.func @transform_13(%arg0: i32) -> (i32, i32, i32) {
    %c0_i32 = arith.constant 0 : i32
    %c0_i32_0 = arith.constant 0 : i32
    %c0_i32_1 = arith.constant 0 : i32
    %c0_i32_2 = arith.constant 0 : i32
    return %c0_i32, %c0_i32_0, %c0_i32_1 : i32, i32, i32
  }
  func.func @transform_14(%arg0: i32) -> (i32, i32) {
    %c0_i32 = arith.constant 0 : i32
    %c0_i32_0 = arith.constant 0 : i32
    %c0_i32_1 = arith.constant 0 : i32
    return %c0_i32, %c0_i32_0 : i32, i32
  }
  func.func @transform_15(%arg0: i32) -> (i32, i32, i32) {
    %c0_i32 = arith.constant 0 : i32
    %c0_i32_0 = arith.constant 0 : i32
    %c0_i32_1 = arith.constant 0 : i32
    %c0_i32_2 = arith.constant 0 : i32
    return %c0_i32, %c0_i32_0, %c0_i32_1 : i32, i32, i32
  }
  func.func @transform_16(%arg0: i32) -> (i32, i32) {
    %c0_i32 = arith.constant 0 : i32
    %c0_i32_0 = arith.constant 0 : i32
    %c0_i32_1 = arith.constant 0 : i32
    return %c0_i32, %c0_i32_0 : i32, i32
  }
  func.func @transform_17(%arg0: i32) -> (i32, i32, i32) {
    %c0_i32 = arith.constant 0 : i32
    %c0_i32_0 = arith.constant 0 : i32
    %c0_i32_1 = arith.constant 0 : i32
    %c0_i32_2 = arith.constant 0 : i32
    return %c0_i32, %c0_i32_0, %c0_i32_1 : i32, i32, i32
  }
  func.func @transform_18(%arg0: i32) -> (i32, i32, i32) {
    %c0_i32 = arith.constant 0 : i32
    %c0_i32_0 = arith.constant 0 : i32
    %c0_i32_1 = arith.constant 0 : i32
    %c0_i32_2 = arith.constant 0 : i32
    return %c0_i32, %c0_i32_0, %c0_i32_1 : i32, i32, i32
  }
  func.func @transform_19(%arg0: i32) -> (i32, i32, i32) {
    %c0_i32 = arith.constant 0 : i32
    %c0_i32_0 = arith.constant 0 : i32
    %c0_i32_1 = arith.constant 0 : i32
    %c0_i32_2 = arith.constant 0 : i32
    return %c0_i32, %c0_i32_0, %c0_i32_1 : i32, i32, i32
  }
  func.func @transform_20(%arg0: i32) -> (i32, i32) {
    %c0_i32 = arith.constant 0 : i32
    %c0_i32_0 = arith.constant 0 : i32
    %c0_i32_1 = arith.constant 0 : i32
    return %c0_i32, %c0_i32_0 : i32, i32
  }
  func.func @transform_21(%arg0: i32) -> (i32, i32, i32) {
    %c0_i32 = arith.constant 0 : i32
    %c0_i32_0 = arith.constant 0 : i32
    %c0_i32_1 = arith.constant 0 : i32
    %c0_i32_2 = arith.constant 0 : i32
    return %c0_i32, %c0_i32_0, %c0_i32_1 : i32, i32, i32
  }
  func.func @transform_22(%arg0: i32) -> (i32, i32) {
    %c0_i32 = arith.constant 0 : i32
    %c0_i32_0 = arith.constant 0 : i32
    %c0_i32_1 = arith.constant 0 : i32
    return %c0_i32, %c0_i32_0 : i32, i32
  }
  func.func @transform_23(%arg0: i32) -> (i32, i32, i32) {
    %c0_i32 = arith.constant 0 : i32
    %c0_i32_0 = arith.constant 0 : i32
    %c0_i32_1 = arith.constant 0 : i32
    %c0_i32_2 = arith.constant 0 : i32
    return %c0_i32, %c0_i32_0, %c0_i32_1 : i32, i32, i32
  }
  func.func @transform_24(%arg0: i32) -> (i32, i32) {
    %c0_i32 = arith.constant 0 : i32
    %c0_i32_0 = arith.constant 0 : i32
    %c0_i32_1 = arith.constant 0 : i32
    return %c0_i32, %c0_i32_0 : i32, i32
  }
  func.func @transform_25(%arg0: i32) -> (i32, i32, i32) {
    %c0_i32 = arith.constant 0 : i32
    %c0_i32_0 = arith.constant 0 : i32
    %c0_i32_1 = arith.constant 0 : i32
    %c0_i32_2 = arith.constant 0 : i32
    return %c0_i32, %c0_i32_0, %c0_i32_1 : i32, i32, i32
  }
  func.func @transform_26(%arg0: i32) -> (i32, i32, i32) {
    %c0_i32 = arith.constant 0 : i32
    %c0_i32_0 = arith.constant 0 : i32
    %c0_i32_1 = arith.constant 0 : i32
    %c0_i32_2 = arith.constant 0 : i32
    return %c0_i32, %c0_i32_0, %c0_i32_1 : i32, i32, i32
  }
  func.func @transform_27(%arg0: i32) -> (i32, i32, i32) {
    %c0_i32 = arith.constant 0 : i32
    %c0_i32_0 = arith.constant 0 : i32
    %c0_i32_1 = arith.constant 0 : i32
    %c0_i32_2 = arith.constant 0 : i32
    return %c0_i32, %c0_i32_0, %c0_i32_1 : i32, i32, i32
  }
  func.func @transform_28(%arg0: i32) -> (i32, i32) {
    %c0_i32 = arith.constant 0 : i32
    %c0_i32_0 = arith.constant 0 : i32
    %c0_i32_1 = arith.constant 0 : i32
    return %c0_i32, %c0_i32_0 : i32, i32
  }
  func.func @transform_29(%arg0: i32) -> (i32, i32, i32) {
    %c0_i32 = arith.constant 0 : i32
    %c0_i32_0 = arith.constant 0 : i32
    %c0_i32_1 = arith.constant 0 : i32
    %c0_i32_2 = arith.constant 0 : i32
    return %c0_i32, %c0_i32_0, %c0_i32_1 : i32, i32, i32
  }
  func.func @transform_30(%arg0: i32) -> (i32, i32) {
    %c0_i32 = arith.constant 0 : i32
    %c0_i32_0 = arith.constant 0 : i32
    %c0_i32_1 = arith.constant 0 : i32
    return %c0_i32, %c0_i32_0 : i32, i32
  }
  func.func @transform_31(%arg0: i32) -> (i32, i32, i32) {
    %c0_i32 = arith.constant 0 : i32
    %c0_i32_0 = arith.constant 0 : i32
    %c0_i32_1 = arith.constant 0 : i32
    %c0_i32_2 = arith.constant 0 : i32
    return %c0_i32, %c0_i32_0, %c0_i32_1 : i32, i32, i32
  }
  func.func @transform_32(%arg0: i32) -> (i32, i32) {
    %c0_i32 = arith.constant 0 : i32
    %c0_i32_0 = arith.constant 0 : i32
    %c0_i32_1 = arith.constant 0 : i32
    return %c0_i32, %c0_i32_0 : i32, i32
  }
  func.func @transform_33(%arg0: i32) -> (i32, i32, i32) {
    %c0_i32 = arith.constant 0 : i32
    %c0_i32_0 = arith.constant 0 : i32
    %c0_i32_1 = arith.constant 0 : i32
    %c0_i32_2 = arith.constant 0 : i32
    return %c0_i32, %c0_i32_0, %c0_i32_1 : i32, i32, i32
  }
  func.func @transform_34(%arg0: i32) -> (i32, i32, i32) {
    %c0_i32 = arith.constant 0 : i32
    %c0_i32_0 = arith.constant 0 : i32
    %c0_i32_1 = arith.constant 0 : i32
    %c0_i32_2 = arith.constant 0 : i32
    return %c0_i32, %c0_i32_0, %c0_i32_1 : i32, i32, i32
  }
  func.func @transform_35(%arg0: i32) -> (i32, i32, i32) {
    %c0_i32 = arith.constant 0 : i32
    %c0_i32_0 = arith.constant 0 : i32
    %c0_i32_1 = arith.constant 0 : i32
    %c0_i32_2 = arith.constant 0 : i32
    return %c0_i32, %c0_i32_0, %c0_i32_1 : i32, i32, i32
  }
  func.func @transform_36(%arg0: i32) -> (i32, i32) {
    %c0_i32 = arith.constant 0 : i32
    %c0_i32_0 = arith.constant 0 : i32
    %c0_i32_1 = arith.constant 0 : i32
    return %c0_i32, %c0_i32_0 : i32, i32
  }
  func.func @transform_37(%arg0: i32) -> (i32, i32, i32) {
    %c0_i32 = arith.constant 0 : i32
    %c0_i32_0 = arith.constant 0 : i32
    %c0_i32_1 = arith.constant 0 : i32
    %c0_i32_2 = arith.constant 0 : i32
    return %c0_i32, %c0_i32_0, %c0_i32_1 : i32, i32, i32
  }
  func.func @transform_38(%arg0: i32) -> (i32, i32) {
    %c0_i32 = arith.constant 0 : i32
    %c0_i32_0 = arith.constant 0 : i32
    %c0_i32_1 = arith.constant 0 : i32
    return %c0_i32, %c0_i32_0 : i32, i32
  }
  func.func @transform_39(%arg0: i32) -> (i32, i32, i32) {
    %c0_i32 = arith.constant 0 : i32
    %c0_i32_0 = arith.constant 0 : i32
    %c0_i32_1 = arith.constant 0 : i32
    %c0_i32_2 = arith.constant 0 : i32
    return %c0_i32, %c0_i32_0, %c0_i32_1 : i32, i32, i32
  }
  func.func @transform_40(%arg0: i32) -> (i32, i32) {
    %c0_i32 = arith.constant 0 : i32
    %c0_i32_0 = arith.constant 0 : i32
    %c0_i32_1 = arith.constant 0 : i32
    return %c0_i32, %c0_i32_0 : i32, i32
  }
  func.func @transform_41(%arg0: i32) -> (i32, i32, i32) {
    %c0_i32 = arith.constant 0 : i32
    %c0_i32_0 = arith.constant 0 : i32
    %c0_i32_1 = arith.constant 0 : i32
    %c0_i32_2 = arith.constant 0 : i32
    return %c0_i32, %c0_i32_0, %c0_i32_1 : i32, i32, i32
  }
  func.func @transform_42(%arg0: i32) -> (i32, i32, i32) {
    %c0_i32 = arith.constant 0 : i32
    %c0_i32_0 = arith.constant 0 : i32
    %c0_i32_1 = arith.constant 0 : i32
    %c0_i32_2 = arith.constant 0 : i32
    return %c0_i32, %c0_i32_0, %c0_i32_1 : i32, i32, i32
  }
  func.func @transform_43(%arg0: i32) -> (i32, i32, i32) {
    %c0_i32 = arith.constant 0 : i32
    %c0_i32_0 = arith.constant 0 : i32
    %c0_i32_1 = arith.constant 0 : i32
    %c0_i32_2 = arith.constant 0 : i32
    return %c0_i32, %c0_i32_0, %c0_i32_1 : i32, i32, i32
  }
  func.func @transform_44(%arg0: i32) -> (i32, i32) {
    %c0_i32 = arith.constant 0 : i32
    %c0_i32_0 = arith.constant 0 : i32
    %c0_i32_1 = arith.constant 0 : i32
    return %c0_i32, %c0_i32_0 : i32, i32
  }
  func.func @transform_45(%arg0: i32) -> (i32, i32, i32) {
    %c0_i32 = arith.constant 0 : i32
    %c0_i32_0 = arith.constant 0 : i32
    %c0_i32_1 = arith.constant 0 : i32
    %c0_i32_2 = arith.constant 0 : i32
    return %c0_i32, %c0_i32_0, %c0_i32_1 : i32, i32, i32
  }
  func.func @transform_46(%arg0: i32) -> (i32, i32) {
    %c0_i32 = arith.constant 0 : i32
    %c0_i32_0 = arith.constant 0 : i32
    %c0_i32_1 = arith.constant 0 : i32
    return %c0_i32, %c0_i32_0 : i32, i32
  }
  func.func @transform_47(%arg0: i32) -> (i32, i32) {
    %c0_i32 = arith.constant 0 : i32
    %c0_i32_0 = arith.constant 0 : i32
    %c0_i32_1 = arith.constant 0 : i32
    return %c0_i32, %c0_i32_0 : i32, i32
  }
  func.func @transform_48(%arg0: i32) -> (i32, i32) {
    %c0_i32 = arith.constant 0 : i32
    %c0_i32_0 = arith.constant 0 : i32
    %c0_i32_1 = arith.constant 0 : i32
    return %c0_i32, %c0_i32_0 : i32, i32
  }
  func.func @transform_49(%arg0: i32) -> (i32, i32, i32, i32) {
    %c0_i32 = arith.constant 0 : i32
    %c0_i32_0 = arith.constant 0 : i32
    %c0_i32_1 = arith.constant 0 : i32
    %c0_i32_2 = arith.constant 0 : i32
    return %arg0, %c0_i32, %c0_i32_0, %c0_i32_1 : i32, i32, i32, i32
  }
}

</mosaic_0001>

<bundles_post_ra>
// kernel: forward.1
= control target key start
LH: loop header
LB: loop body
LE: loop exit
PB: predicated region body
PF: predicated region fallthrough
CT: control target
= control target key end

     0   :  { %s19159_s6 = smov 1   ;;  %s19160_s10 = smov 2   ;;  %s20524_s0 = inlined_call_operand.smem [shape: u32[50], index: -1, kind: input, shape index: {}] }
   0x1   :  { %s19252_s5 = sld [smem:[%s20524_s0]]   ;;  %s19161_s14 = smov 3  }
   0x2   :  { %s19257_s9 = sld [smem:[%s20524_s0 + %s19159_s6]]   ;;  %s19162_s18 = smov 4  }
   0x3   :  { %s19262_s13 = sld [smem:[%s20524_s0 + %s19160_s10]]   ;;  %s19163_s22 = smov 5  }
   0x4   :  { %s19267_s17 = sld [smem:[%s20524_s0 + %s19161_s14]]   ;;  %s19164_s26 = smov 6  }
   0x5   :  { %s19272_s21 = sld [smem:[%s20524_s0 + %s19162_s18]]   ;;  %s19165_s30 = smov 7  }
   0x6   :  { %s19277_s25 = sld [smem:[%s20524_s0 + %s19163_s22]]   ;;  %s19166_s4 = smov 8  }
   0x7   :  { %20570 = sst [smem:[#allocation72_spill]] %s19252_s5  ;;  %s19167_s10 = smov 9  }
   0x8   :  { %s19282_s29 = sld [smem:[%s20524_s0 + %s19164_s26]]   ;;  %s19168_s15 = smov 10  }
   0x9   :  { %20571 = sst [smem:[#allocation73_spill]] %s19262_s13  ;;  %s19169_s20 = smov 11  }
   0xa   :  { %s19287_s3 = sld [smem:[%s20524_s0 + %s19165_s30]]   ;;  %s19170_s26 = smov 12  }
   0xb   :  { %20572 = sst [smem:[#allocation74_spill]] %s19272_s21  ;;  %s19171_s1 = smov 13  }
   0xc   :  { %20573 = sst [smem:[#allocation75_spill]] %s19277_s25  ;;  %s19172_s7 = smov 14  }
   0xd   :  { %s19292_s8 = sld [smem:[%s20524_s0 + %s19166_s4]]   ;;  %s19174_s22 = smov 16  }
   0xe   :  { %20574 = sst [smem:[#allocation76_spill]] %s19282_s29  ;;  %s19175_s28 = smov 17  }
   0xf   :  { %s19297_s14 = sld [smem:[%s20524_s0 + %s19167_s10]]  }
  0x10   :  { %20575 = sst [smem:[#allocation77_spill]] %s19287_s3 }
  0x11   :  { %s19302_s19 = sld [smem:[%s20524_s0 + %s19168_s15]]   ;;  %s19173_s15 = smov 15  }
  0x12   :  { %s19307_s24 = sld [smem:[%s20524_s0 + %s19169_s20]]  }
  0x13   :  { %20576 = sst [smem:[#allocation78_spill]] %s19292_s8 }
  0x14   :  { %s19312_s30 = sld [smem:[%s20524_s0 + %s19170_s26]]  }
  0x15   :  { %s19317_s6 = sld [smem:[%s20524_s0 + %s19171_s1]]  }
  0x16   :  { %s19322_s12 = sld [smem:[%s20524_s0 + %s19172_s7]]   ;;  %s19176_s7 = smov 18  }
  0x17   :  { %20577 = sst [smem:[#allocation79_spill]] %s19302_s19 }
  0x18   :  { %20578 = sst [smem:[#allocation80_spill]] %s19307_s24 }
  0x19   :  { %s19327_s20 = sld [smem:[%s20524_s0 + %s19173_s15]]   ;;  %s19177_s15 = smov 19  }
  0x1a   :  { %20579 = sst [smem:[#allocation81_spill]] %s19312_s30 }
  0x1b   :  { %s19332_s27 = sld [smem:[%s20524_s0 + %s19174_s22]]   ;;  %s19178_s22 = smov 20  }
  0x1c   :  { %20580 = sst [smem:[#allocation82_spill]] %s19322_s12 }
  0x1d   :  { %s19337_s4 = sld [smem:[%s20524_s0 + %s19175_s28]]   ;;  %s19179_s28 = smov 21  }
  0x1e   :  { %s19342_s12 = sld [smem:[%s20524_s0 + %s19176_s7]]   ;;  %s19180_s7 = smov 22  }
  0x1f   :  { %20581 = sst [smem:[#allocation83_spill]] %s19327_s20 }
  0x20   :  { %s19347_s24 = sld [smem:[%s20524_s0 + %s19177_s15]]   ;;  %s19181_s15 = smov 23  }
  0x21   :  { %20582 = sst [smem:[#allocation84_spill]] %s19332_s27 }
  0x22   :  { %s19352_s27 = sld [smem:[%s20524_s0 + %s19178_s22]]   ;;  %s19182_s22 = smov 24  }
  0x23   :  { %20583 = sst [smem:[#allocation85_spill]] %s19337_s4 }
  0x24   :  { %s19357_s4 = sld [smem:[%s20524_s0 + %s19179_s28]]   ;;  %s19183_s28 = smov 25  }
  0x25   :  { %s19362_s19 = sld [smem:[%s20524_s0 + %s19180_s7]]   ;;  %s19184_s7 = smov 26  }
  0x26   :  { %20584 = sst [smem:[#allocation86_spill]] %s19347_s24 }
  0x27   :  { %s19367_s25 = sld [smem:[%s20524_s0 + %s19181_s15]]   ;;  %s19185_s15 = smov 27  }
  0x28   :  { %20585 = sst [smem:[#allocation87_spill]] %s19352_s27 }
  0x29   :  { %s19372_s27 = sld [smem:[%s20524_s0 + %s19182_s22]]   ;;  %s19186_s22 = smov 28  }
  0x2a   :  { %20586 = sst [smem:[#allocation88_spill]] %s19357_s4 }
  0x2b   :  { %20587 = sst [smem:[#allocation89_spill]] %s19362_s19 }
  0x2c   :  { %s19377_s5 = sld [smem:[%s20524_s0 + %s19183_s28]]   ;;  %s19187_s28 = smov 29  }
  0x2d   :  { %20588 = sst [smem:[#allocation90_spill]] %s19367_s25 }
  0x2e   :  { %s19382_s19 = sld [smem:[%s20524_s0 + %s19184_s7]]   ;;  %s19188_s7 = smov 30  }
  0x2f   :  { %20589 = sst [smem:[#allocation91_spill]] %s19372_s27 }
  0x30   :  { %s19387_s25 = sld [smem:[%s20524_s0 + %s19185_s15]]   ;;  %s19189_s15 = smov 31  }
  0x31   :  { %s19392_s27 = sld [smem:[%s20524_s0 + %s19186_s22]]   ;;  %s19190_s22 = smov 32  }
  0x32   :  { %20590 = sst [smem:[#allocation92_spill]] %s19377_s5 }
  0x33   :  { %s19397_s5 = sld [smem:[%s20524_s0 + %s19187_s28]]   ;;  %s19191_s28 = smov 33  }
  0x34   :  { %s19402_s24 = sld [smem:[%s20524_s0 + %s19188_s7]]   ;;  %s19192_s7 = smov 34  }
  0x35   :  { %s19417_s20 = sld [smem:[%s20524_s0 + %s19191_s28]]   ;;  %s19195_s28 = smov 37  }
  0x36   :  { %20591 = sst [smem:[#allocation93_spill]] %s19387_s25 }
  0x37   :  { %20592 = sst [smem:[#allocation94_spill]] %s19392_s27 }
  0x38   :  { %s19407_s25 = sld [smem:[%s20524_s0 + %s19189_s15]]   ;;  %s19193_s15 = smov 35  }
  0x39   :  { %20593 = sst [smem:[#allocation95_spill]] %s19397_s5 }
  0x3a   :  { %20594 = sst [smem:[#allocation96_spill]] %s19402_s24 }
  0x3b   :  { %s19412_s27 = sld [smem:[%s20524_s0 + %s19190_s22]]   ;;  %s19194_s22 = smov 36  }
  0x3c   :  { %20597 = sst [smem:[#allocation99_spill]] %s19417_s20 }
  0x3d   :  { %s19422_s24 = sld [smem:[%s20524_s0 + %s19192_s7]]   ;;  %s19196_s7 = smov 38  }
  0x3e   :  { %20595 = sst [smem:[#allocation97_spill]] %s19407_s25 }
  0x3f   :  { %s19427_s25 = sld [smem:[%s20524_s0 + %s19193_s15]]   ;;  %s19197_s15 = smov 39  }
  0x40   :  { %s19437_s20 = sld [smem:[%s20524_s0 + %s19195_s28]]   ;;  %s19199_s28 = smov 41  }
  0x41   :  { %20596 = sst [smem:[#allocation98_spill]] %s19412_s27 }
  0x42   :  { %s19432_s27 = sld [smem:[%s20524_s0 + %s19194_s22]]   ;;  %s19198_s22 = smov 40  }
  0x43   :  { %s19442_s30 = sld [smem:[%s20524_s0 + %s19196_s7]]   ;;  %s19200_s7 = smov 42  }
  0x44   :  { %s19457_s8 = sld [smem:[%s20524_s0 + %s19199_s28]]   ;;  %s19203_s28 = smov 45  }
  0x45   :  { %20598 = sst [smem:[#allocation100_spill]] %s19427_s25 }
  0x46   :  { %s19447_s25 = sld [smem:[%s20524_s0 + %s19197_s15]]   ;;  %s19201_s15 = smov 43  }
  0x48   :  { %20599 = sst [smem:[#allocation101_spill]] %s19432_s27 }
  0x49   :  { %20600 = sst [smem:[#allocation102_spill]] %s19442_s30 }
  0x4a   :  { %s19452_s27 = sld [smem:[%s20524_s0 + %s19198_s22]]   ;;  %s19202_s22 = smov 44  }
  0x4b   :  { %20603 = sst [smem:[#allocation105_spill]] %s19457_s8 }
  0x4c   :  { %20601 = sst [smem:[#allocation103_spill]] %s19447_s25 }
  0x4d   :  { %s19462_s30 = sld [smem:[%s20524_s0 + %s19200_s7]]   ;;  %s19204_s7 = smov 46  }
  0x4e   :  { %s19467_s25 = sld [smem:[%s20524_s0 + %s19201_s15]]   ;;  %s19205_s15 = smov 47  }
  0x4f   :  { %s19477_s8 = sld [smem:[%s20524_s0 + %s19203_s28]]   ;;  %s19207_s28 = smov 49  }
  0x50   :  { %20602 = sst [smem:[#allocation104_spill]] %s19452_s27 }
  0x51   :  { %s19472_s27 = sld [smem:[%s20524_s0 + %s19202_s22]]   ;;  %s19206_s22 = smov 48  }
  0x52   :  { %s19482_s29 = sld [smem:[%s20524_s0 + %s19204_s7]]  }
  0x54   :  { %20604 = sst [smem:[#allocation106_spill]] %s19467_s25 }
  0x55   :  { %20606 = sst [smem:[#allocation108_spill]] %s19477_s8 }
  0x56   :  { %s19487_s25 = sld [smem:[%s20524_s0 + %s19205_s15]]  }
  0x57   :  { %20605 = sst [smem:[#allocation107_spill]] %s19472_s27 }
  0x58   :  { %s19492_s27 = sld [smem:[%s20524_s0 + %s19206_s22]]  }
  0x59   :  { %s19497_s8 = sld [smem:[%s20524_s0 + %s19207_s28]]  }
  0x5a   :  { %104 = vsyncpa [#allocation16], 0 }
  0x5b   :  { %105 = vsyncpa [#allocation19], 0 }
  0x5c   :  { %106 = vsyncpa [#allocation22], 0 }
  0x5d   :  { %107 = vsyncpa [#allocation25], 0 }
  0x5e   :  { %108 = vsyncpa [#allocation28], 0 }
  0x5f   :  { %109 = vsyncpa [#allocation31], 0 }
  0x60   :  { %110 = vsyncpa [#allocation34], 0 }
  0x61   :  { %111 = vsyncpa [#allocation37], 0 }
  0x62   :  { %112 = vsyncpa [#allocation40], 0 }
  0x63   :  { %113 = vsyncpa [#allocation43], 0 }
  0x64   :  { %114 = vsyncpa [#allocation46], 0 }
  0x65   :  { %115 = vsyncpa [#allocation49], 0 }
  0x66   :  { %116 = vsyncpa [#allocation52], 0 }
  0x67   :  { %117 = vsyncpa [#allocation55], 0 }
  0x68   :  { %118 = vsyncpa [#allocation17], 0 }
  0x69   :  { %120 = vsyncpa [#allocation17 + $0x1], 0  ;;  %s19499_s7 = smov 0   ;;  %s19501_s0 = smov 0  }
  0x6a   :  { %s19503_s10 = smov 0   ;;  %s19505_s11 = smov 0  }
  0x6b LB: > { %20607 = sst [smem:[#allocation109_spill]] %s19145_s7  ;;  %s19520_s15 = sadd.s32 4294967295, %s19157_s11   ;;  %s19157_s11 = sphi %s19505_s11, %s20799_s11   ;;  %s19153_s10 = sphi %s19503_s10, %s20804_s10   ;;  %s19149_s0 = sphi %s19501_s0, %s20803_s0   ;;  %s19145_s7 = sphi %s19499_s7, %s20802_s7  }
  0x6c   : > { %20608 = sst [smem:[#allocation110_spill]] %s19153_s10  ;;  %s14706_s16 = sadd.s32 4294967294, %s19157_s11  }
  0x6d   : > { %20609 = sst [smem:[#allocation111_spill]] %s19157_s11  ;;  %s19524_s18 = sadd.s32 1, %s19157_s11  }
  0x6e   : > { %20610 = sst [smem:[#allocation112_spill]] %s19524_s18  ;;  %s1167_s22 = sadd.s32 1, %s19153_s10 }
  0x6f   : > { %s1164_s23 = ssub.s32 %s19157_s11, %s19524_s18  ;;  %p1177_p0 = scmp.ne.s32.totalorder %s19153_s10, %s19149_s0 }
  0x70   : > { %p1165_p1 = scmp.eq.s32.totalorder %s1164_s23, 0  ;;  %p1178_p2 = scmp.eq.s32.totalorder %s19520_s15, 1 }
  0x71   : > { %p1183_p3 = scmp.ne.s32.totalorder %s19149_s0, %s19145_s7  ;;  %p1184_p4 = scmp.eq.s32.totalorder %s14706_s16, 1 }
  0x72   : > { %s19535_s26 = scalar_select %p1165_p1, %s19153_s10, %s1167_s22  }
  0x73   : > { %p19537_p5 = por %p1178_p2, %p1177_p0  ;;  %p19541_p6 = por %p1184_p4, %p1183_p3 }
  0x74   : > { %20611 = sst [smem:[#allocation113_spill]] %s19535_s26  ;;  %p14707_p7 = scmp.ge.s32.totalorder %s19157_s11, 1 }
  0x75   : > { %s20612_s28 = scalar_select %p19537_p5, 1, 0 }
  0x76   : > { %s20613_s1 = scalar_select %p19541_p6, 1, 0 }
  0x77   : > { %p1191_p8 = scmp.lt.s32.totalorder %s19157_s11, 3  ;;  %p20536_p9 = scmp.eq.s32.totalorder %s19520_s15, 0 }
  0x78   : > { %20614 = sst [smem:[#allocation114_spill]] %s20613_s1  ;;  %s19208_s23 = smov [#allocation18]  }
  0x79   : > { %p19548_p10 = pnand %p14707_p7, %p1191_p8  ;;  %s1217_s16 = sshll.u32 %s19208_s23, 4  ;;  %s1218_s16 = int_to_ptr.vmem [resolvable:$true] %s1217_s16 }
  0x7a   : > { %s19209_s22 = smov [#allocation21]   ;;  %s19210_s18 = smov [#allocation24]  }
  0x7b   : > { %s20615_s2 = scalar_select %p19548_p10, 1, 0 }
  0x7c   : > { %p16299_p11 = pneg %p19548_p10  ;;  %s1241_s26 = sshll.u32 %s19209_s22, 4  ;;  %s1242_s26 = int_to_ptr.vmem [resolvable:$true] %s1241_s26 }
  0x7d   : > { %s1267_s1 = sshll.u32 %s19210_s18, 4  ;;  %s18376_s23 = scalar_lea.vmem %s1218_s16, 32  ;;  %s1268_s1 = int_to_ptr.vmem [resolvable:$true] %s1267_s1 }
  0x7e   : > { %p19556_p12 = pnand %p20536_p9, %p16299_p11  ;;  %p18377_p0 = scmp.ne.s32.totalorder %s1218_s16, %s18376_s23 }
  0x7f   : > { %p18384_p3 = scmp.lt.s32.totalorder %s1218_s16, %s1218_s16  ;;  %p18385_p4 = scmp.lt.s32.totalorder %s18376_s23, %s18376_s23 }
  0x80   : > { %p19562_p13 = pneg %p19556_p12 }
  0x81   : > { %p18386_p7 = por %p18385_p4, %p18384_p3 }
  0x82   : > { %p18379_p1 = pnand %p18377_p0, %p19562_p13 }
  0x84   : > { %p18380_p2 = pneg %p18379_p1 }
  0x86   : > { %p18387_p8 = pnand %p18386_p7, %p18380_p2 }
  0x88   : > { %18390 = shalt.err (!%p18387_p8)
}
  0x89   : > { %s20618_s13 = sld [smem:[#allocation73_spill]]  ;;  %s18402_s18 = scalar_lea.vmem %s1242_s26, 32 }
  0x8a   : > { %p18403_p11 = scmp.ne.s32.totalorder %s1242_s26, %s18402_s18  ;;  %p18410_p5 = scmp.lt.s32.totalorder %s1242_s26, %s1242_s26 }
  0x8b   : > { %p18411_p10 = scmp.lt.s32.totalorder %s18402_s18, %s18402_s18 }
  0x8c   : > { %p18405_p9 = pnand %p18403_p11, %p19562_p13 }
  0x8d   : > { %p18412_p0 = por %p18411_p10, %p18410_p5 }
  0x8e   : > { %p18406_p6 = pneg %p18405_p9 }
  0x8f   : > { %16305 = dma.hbm_to_vmem [thread:$0]  (!%p19556_p12), %s20618_s13, 32, %s1218_s16, [#allocation19]  }
  0x90   : > { %p18413_p1 = pnand %p18412_p0, %p18406_p6 }
  0x92   : > { %18416 = shalt.err (!%p18413_p1)
}
  0x93   : > { %s20619_s21 = sld [smem:[#allocation74_spill]]  ;;  %s18428_s22 = scalar_lea.vmem %s1268_s1, 3840 }
  0x94   : > { %p18429_p2 = scmp.ne.s32.totalorder %s1268_s1, %s18428_s22  ;;  %p18436_p7 = scmp.lt.s32.totalorder %s1268_s1, %s1268_s1 }
  0x95   : > { %p18437_p8 = scmp.lt.s32.totalorder %s18428_s22, %s18428_s22 }
  0x96   : > { %p18431_p3 = pnand %p18429_p2, %p19562_p13 }
  0x97   : > { %p18438_p11 = por %p18437_p8, %p18436_p7 }
  0x98   : > { %p18432_p4 = pneg %p18431_p3 }
  0x99   : > { %16311 = dma.hbm_to_vmem [thread:$0]  (!%p19556_p12), %s20619_s21, 32, %s1242_s26, [#allocation22]  }
  0x9a   : > { %p18439_p9 = pnand %p18438_p11, %p18432_p4 }
  0x9c   : > { %18442 = shalt.err (!%p18439_p9)
}
  0x9d   : > { %s20544_s16 = smov 128   ;;  %s20620_s3 = sld [smem:[#allocation77_spill]] }
  0x9e   : > { %s20546_s23 = smov 8   ;;  %s19213_s26 = smov [#allocation27]  }
  0x9f   : > { %s1291_s18 = sshll.u32 %s19213_s26, 4  ;;  %s19214_s13 = smov [#allocation30]   ;;  %s1292_s18 = int_to_ptr.vmem [resolvable:$true] %s1291_s18 }
  0xa0   : > { %s1323_s21 = sshll.u32 %s19214_s13, 4  ;;  %s18454_s11 = scalar_lea.vmem %s1292_s18, 7680  ;;  %s1324_s21 = int_to_ptr.vmem [resolvable:$true] %s1323_s21 }
  0xa1   : > { %p18455_p5 = scmp.ne.s32.totalorder %s1292_s18, %s18454_s11  ;;  %p18462_p0 = scmp.lt.s32.totalorder %s1292_s18, %s1292_s18 }
  0xa2   : > { %p18463_p1 = scmp.lt.s32.totalorder %s18454_s11, %s18454_s11 }
  0xa3   : > { %16317 = dma.hbm_to_vmem [thread:$0]  (!%p19556_p12), %s20620_s3, 3840, %s1268_s1, [#allocation25], %s20544_s16, %s20544_s16, %s20546_s23  }
  0xa4   : > { %p18457_p6 = pnand %p18455_p5, %p19562_p13  ;;  %p18464_p2 = por %p18463_p1, %p18462_p0 }
  0xa6   : > { %p18458_p10 = pneg %p18457_p6 }
  0xa8   : > { %p18465_p3 = pnand %p18464_p2, %p18458_p10 }
  0xaa   : > { %18468 = shalt.err (!%p18465_p3)
}
  0xab   : > { %16323 = dma.hbm_to_vmem [thread:$0]  (!%p19556_p12), %s19297_s14, 7680, %s1292_s18, [#allocation28], %s20544_s16, %s20544_s16, %s20546_s23  }
  0xac   : > { %s18480_s13 = scalar_lea.vmem %s1324_s21, 4608  ;;  %p18488_p11 = scmp.lt.s32.totalorder %s1324_s21, %s1324_s21 }
  0xad   : > { %p18481_p4 = scmp.ne.s32.totalorder %s1324_s21, %s18480_s13  ;;  %p18489_p9 = scmp.lt.s32.totalorder %s18480_s13, %s18480_s13 }
  0xaf   : > { %p18483_p7 = pnand %p18481_p4, %p19562_p13  ;;  %p18490_p5 = por %p18489_p9, %p18488_p11 }
  0xb1   : > { %p18484_p8 = pneg %p18483_p7 }
  0xb3   : > { %p18491_p6 = pnand %p18490_p5, %p18484_p8 }
  0xb5   : > { %18494 = shalt.err (!%p18491_p6)
}
  0xb6   : > { %16329 = dma.hbm_to_vmem [thread:$0]  (!%p19556_p12), %s19317_s6, 4608, %s1324_s21, [#allocation31], %s20544_s16, %s20544_s16, %s20546_s23  }
  0xb7   : > { %s19215_s11 = smov [#allocation33]   ;;  %s19216_s22 = smov [#allocation36]  }
  0xb8   : > { %s1358_s1 = sshll.u32 %s19215_s11, 4  ;;  %s1387_s26 = sshll.u32 %s19216_s22, 4  ;;  %s1359_s1 = int_to_ptr.vmem [resolvable:$true] %s1358_s1  ;;  %s1388_s26 = int_to_ptr.vmem [resolvable:$true] %s1387_s26 }
  0xb9   : > { %s18506_s18 = scalar_lea.vmem %s1359_s1, 3072  ;;  %p18514_p2 = scmp.lt.s32.totalorder %s1359_s1, %s1359_s1 }
  0xba   : > { %p18507_p10 = scmp.ne.s32.totalorder %s1359_s1, %s18506_s18  ;;  %p18515_p3 = scmp.lt.s32.totalorder %s18506_s18, %s18506_s18 }
  0xbc   : > { %p18509_p0 = pnand %p18507_p10, %p19562_p13  ;;  %p18516_p4 = por %p18515_p3, %p18514_p2 }
  0xbe   : > { %p18510_p1 = pneg %p18509_p0 }
  0xc0   : > { %p18517_p7 = pnand %p18516_p4, %p18510_p1 }
  0xc2   : > { %18520 = shalt.err (!%p18517_p7)
}
  0xc3   : > { %s20540_s13 = smov 64   ;;  %s20542_s21 = smov 4  }
  0xc4   : > { %16335 = dma.hbm_to_vmem [thread:$0]  (!%p19556_p12), %s19342_s12, 3072, %s1359_s1, [#allocation34], %s20540_s13, %s20540_s13, %s20542_s21  }
  0xc5   : > { %s18532_s11 = scalar_lea.vmem %s1388_s26, 12288  ;;  %p18540_p5 = scmp.lt.s32.totalorder %s1388_s26, %s1388_s26 }
  0xc6   : > { %p18533_p8 = scmp.ne.s32.totalorder %s1388_s26, %s18532_s11  ;;  %p18541_p6 = scmp.lt.s32.totalorder %s18532_s11, %s18532_s11 }
  0xc8   : > { %p18535_p11 = pnand %p18533_p8, %p19562_p13  ;;  %p18542_p10 = por %p18541_p6, %p18540_p5 }
  0xca   : > { %p18536_p9 = pneg %p18535_p11 }
  0xcc   : > { %p18543_p0 = pnand %p18542_p10, %p18536_p9 }
  0xce   : > { %18546 = shalt.err (!%p18543_p0)
}
  0xcf   : > { %s20621_s4 = sld [smem:[#allocation88_spill]]  ;;  %s19219_s1 = smov [#allocation39]  }
  0xd0   : > { %s1422_s22 = sshll.u32 %s19219_s1, 4  ;;  %s19220_s18 = smov [#allocation42]   ;;  %s1423_s22 = int_to_ptr.vmem [resolvable:$true] %s1422_s22 }
  0xd1   : > { %s1451_s13 = sshll.u32 %s19220_s18, 4  ;;  %s18558_s21 = scalar_lea.vmem %s1423_s22, 9216  ;;  %s1452_s13 = int_to_ptr.vmem [resolvable:$true] %s1451_s13 }
  0xd2   : > { %p18559_p1 = scmp.ne.s32.totalorder %s1423_s22, %s18558_s21  ;;  %p18566_p4 = scmp.lt.s32.totalorder %s1423_s22, %s1423_s22 }
  0xd3   : > { %p18567_p7 = scmp.lt.s32.totalorder %s18558_s21, %s18558_s21 }
  0xd4   : > { %p18561_p2 = pnand %p18559_p1, %p19562_p13 }
  0xd5   : > { %16341 = dma.hbm_to_vmem [thread:$0]  (!%p19556_p12), %s20621_s4, 12288, %s1388_s26, [#allocation37], %s20544_s16, %s20544_s16, %s20546_s23  }
  0xd6   : > { %p18562_p3 = pneg %p18561_p2  ;;  %p18568_p8 = por %p18567_p7, %p18566_p4 }
  0xd8   : > { %p18569_p11 = pnand %p18568_p8, %p18562_p3 }
  0xda   : > { %18572 = shalt.err (!%p18569_p11)
}
  0xdb   : > { %16347 = dma.hbm_to_vmem [thread:$0]  (!%p19556_p12), %s19382_s19, 9216, %s1423_s22, [#allocation40], %s20544_s16, %s20544_s16, %s20546_s23  }
  0xdc   : > { %s18584_s26 = scalar_lea.vmem %s1452_s13, 9216  ;;  %p18592_p10 = scmp.lt.s32.totalorder %s1452_s13, %s1452_s13 }
  0xdd   : > { %p18585_p9 = scmp.ne.s32.totalorder %s1452_s13, %s18584_s26  ;;  %p18593_p0 = scmp.lt.s32.totalorder %s18584_s26, %s18584_s26 }
  0xdf   : > { %p18587_p5 = pnand %p18585_p9, %p19562_p13  ;;  %p18594_p1 = por %p18593_p0, %p18592_p10 }
  0xe1   : > { %p18588_p6 = pneg %p18587_p5 }
  0xe3   : > { %p18595_p2 = pnand %p18594_p1, %p18588_p6 }
  0xe5   : > { %18598 = shalt.err (!%p18595_p2)
}
  0xe6   : > { %s20622_s5 = sld [smem:[#allocation95_spill]]  ;;  %s19221_s21 = smov [#allocation45]  }
  0xe7   : > { %s1486_s11 = sshll.u32 %s19221_s21, 4  ;;  %s19222_s1 = smov [#allocation48]   ;;  %s1487_s11 = int_to_ptr.vmem [resolvable:$true] %s1486_s11 }
  0xe8   : > { %s1515_s22 = sshll.u32 %s19222_s1, 4  ;;  %s18610_s18 = scalar_lea.vmem %s1487_s11, 7680  ;;  %s1516_s22 = int_to_ptr.vmem [resolvable:$true] %s1515_s22 }
  0xe9   : > { %p18611_p3 = scmp.ne.s32.totalorder %s1487_s11, %s18610_s18  ;;  %p18618_p8 = scmp.lt.s32.totalorder %s1487_s11, %s1487_s11 }
  0xea   : > { %p18619_p11 = scmp.lt.s32.totalorder %s18610_s18, %s18610_s18 }
  0xeb   : > { %p18613_p4 = pnand %p18611_p3, %p19562_p13 }
  0xec   : > { %16353 = dma.hbm_to_vmem [thread:$0]  (!%p19556_p12), %s20622_s5, 9216, %s1452_s13, [#allocation43], %s20544_s16, %s20544_s16, %s20546_s23  }
  0xed   : > { %p18614_p7 = pneg %p18613_p4  ;;  %p18620_p9 = por %p18619_p11, %p18618_p8 }
  0xef   : > { %p18621_p5 = pnand %p18620_p9, %p18614_p7 }
  0xf1   : > { %18624 = shalt.err (!%p18621_p5)
}
  0xf2   : > { %16359 = dma.hbm_to_vmem [thread:$0]  (!%p19556_p12), %s19422_s24, 7680, %s1487_s11, [#allocation46], %s20544_s16, %s20544_s16, %s20546_s23  }
  0xf3   : > { %s18636_s13 = scalar_lea.vmem %s1516_s22, 7680  ;;  %p18644_p1 = scmp.lt.s32.totalorder %s1516_s22, %s1516_s22 }
  0xf4   : > { %p18637_p6 = scmp.ne.s32.totalorder %s1516_s22, %s18636_s13  ;;  %p18645_p2 = scmp.lt.s32.totalorder %s18636_s13, %s18636_s13 }
  0xf6   : > { %p18639_p10 = pnand %p18637_p6, %p19562_p13  ;;  %p18646_p3 = por %p18645_p2, %p18644_p1 }
  0xf8   : > { %p18640_p0 = pneg %p18639_p10 }
  0xfa   : > { %p18647_p4 = pnand %p18646_p3, %p18640_p0 }
  0xfc   : > { %18650 = shalt.err (!%p18647_p4)
}
  0xfd   : > { %16365 = dma.hbm_to_vmem [thread:$0]  (!%p19556_p12), %s19437_s20, 7680, %s1516_s22, [#allocation49], %s20544_s16, %s20544_s16, %s20546_s23  }
  0xfe   : > { %s19223_s26 = smov [#allocation51]   ;;  %s19224_s11 = smov [#allocation15]  }
  0xff   : > { %s1550_s21 = sshll.u32 %s19223_s26, 4  ;;  %s1203_s1 = sshll.u32 %s19224_s11, 4  ;;  %s1551_s21 = int_to_ptr.vmem [resolvable:$true] %s1550_s21  ;;  %s1204_s1 = int_to_ptr.vmem [resolvable:$true] %s1203_s1 }
 0x100   : > { %s18662_s18 = scalar_lea.vmem %s1551_s21, 6912  ;;  %p18670_p9 = scmp.lt.s32.totalorder %s1551_s21, %s1551_s21 }
 0x101   : > { %p18663_p7 = scmp.ne.s32.totalorder %s1551_s21, %s18662_s18  ;;  %p18671_p5 = scmp.lt.s32.totalorder %s18662_s18, %s18662_s18 }
 0x103   : > { %p18665_p8 = pnand %p18663_p7, %p19562_p13  ;;  %p18672_p6 = por %p18671_p5, %p18670_p9 }
 0x105   : > { %p18666_p11 = pneg %p18665_p8 }
 0x107   : > { %p18673_p10 = pnand %p18672_p6, %p18666_p11 }
 0x109   : > { %18676 = shalt.err (!%p18673_p10)
}
 0x10a   : > { %16371 = dma.hbm_to_vmem [thread:$0]  (!%p19556_p12), %s19462_s30, 6912, %s1551_s21, [#allocation52], %s20544_s16, %s20544_s16, %s20546_s23  }
 0x10b   : > { %s18688_s22 = scalar_lea.vmem %s1204_s1, 1152  ;;  %p18696_p3 = scmp.lt.s32.totalorder %s1204_s1, %s1204_s1 }
 0x10c   : > { %p18689_p0 = scmp.ne.s32.totalorder %s1204_s1, %s18688_s22  ;;  %p18697_p4 = scmp.lt.s32.totalorder %s18688_s22, %s18688_s22 }
 0x10e   : > { %p18691_p1 = pnand %p18689_p0, %p19562_p13  ;;  %p18698_p7 = por %p18697_p4, %p18696_p3 }
 0x110   : > { %p18692_p2 = pneg %p18691_p1 }
 0x112   : > { %p18699_p8 = pnand %p18698_p7, %p18692_p2 }
 0x114   : > { %18702 = shalt.err (!%p18699_p8)
}
 0x115   : > { %16302 = dma.hbm_to_vmem [thread:$0]  (!%p19556_p12), %s19257_s9, 1152, %s1204_s1, [#allocation16], %s20544_s16, %s20544_s16, %s20546_s23  }
 0x116   : > { %s19225_s13 = smov [#allocation20]   ;;  %s19226_s21 = smov [#allocation23]  }
 0x117   : > { %s1227_s26 = sshll.u32 %s19225_s13, 4  ;;  %s1254_s11 = sshll.u32 %s19226_s21, 4  ;;  %s1228_s26 = int_to_ptr.vmem [resolvable:$true] %s1227_s26  ;;  %s1255_s11 = int_to_ptr.vmem [resolvable:$true] %s1254_s11 }
 0x118   : > { %s18714_s18 = scalar_lea.vmem %s1228_s26, 6912  ;;  %p18722_p6 = scmp.lt.s32.totalorder %s1228_s26, %s1228_s26 }
 0x119   : > { %p18715_p11 = scmp.ne.s32.totalorder %s1228_s26, %s18714_s18  ;;  %p18723_p10 = scmp.lt.s32.totalorder %s18714_s18, %s18714_s18 }
 0x11b   : > { %p18717_p9 = pnand %p18715_p11, %p19562_p13  ;;  %p18724_p0 = por %p18723_p10, %p18722_p6 }
 0x11d   : > { %p18718_p5 = pneg %p18717_p9 }
 0x11f   : > { %p18725_p1 = pnand %p18724_p0, %p18718_p5 }
 0x121   : > { %18728 = shalt.err (!%p18725_p1)
}
 0x122   : > { %16308 = dma.hbm_to_vmem [thread:$0]  (!%p19556_p12), %s19267_s17, 6912, %s1228_s26, [#allocation19], %s20544_s16, %s20544_s16, %s20546_s23  }
 0x123   : > { %s18740_s1 = scalar_lea.vmem %s1255_s11, 2304  ;;  %p18748_p7 = scmp.lt.s32.totalorder %s1255_s11, %s1255_s11 }
 0x124   : > { %p18741_p2 = scmp.ne.s32.totalorder %s1255_s11, %s18740_s1  ;;  %p18749_p8 = scmp.lt.s32.totalorder %s18740_s1, %s18740_s1 }
 0x126   : > { %p18743_p3 = pnand %p18741_p2, %p19562_p13  ;;  %p18750_p11 = por %p18749_p8, %p18748_p7 }
 0x128   : > { %p18744_p4 = pneg %p18743_p3 }
 0x12a   : > { %p18751_p9 = pnand %p18750_p11, %p18744_p4 }
 0x12c   : > { %18754 = shalt.err (!%p18751_p9)
}
 0x12d   : > { %s20623_s22 = smov 4   ;;  %s20624_s13 = smov 64  }
 0x12e   : > { %s20625_s21 = sld [smem:[#allocation76_spill]]  ;;  %s19227_s26 = smov [#allocation26]  }
 0x12f   : > { %s1281_s18 = sshll.u32 %s19227_s26, 4  ;;  %s19228_s16 = smov [#allocation29]   ;;  %s1282_s18 = int_to_ptr.vmem [resolvable:$true] %s1281_s18 }
 0x130   : > { %s1310_s23 = sshll.u32 %s19228_s16, 4  ;;  %s18766_s3 = scalar_lea.vmem %s1282_s18, 32  ;;  %s1311_s23 = int_to_ptr.vmem [resolvable:$true] %s1310_s23 }
 0x131   : > { %p18767_p5 = scmp.ne.s32.totalorder %s1282_s18, %s18766_s3  ;;  %p18774_p0 = scmp.lt.s32.totalorder %s1282_s18, %s1282_s18 }
 0x132   : > { %p18775_p1 = scmp.lt.s32.totalorder %s18766_s3, %s18766_s3 }
 0x133   : > { %p18769_p6 = pnand %p18767_p5, %p19562_p13 }
 0x134   : > { %16314 = dma.hbm_to_vmem [thread:$0]  (!%p19556_p12), %s20625_s21, 2304, %s1255_s11, [#allocation22], %s20624_s13, %s20624_s13, %s20623_s22  }
 0x135   : > { %p18770_p10 = pneg %p18769_p6  ;;  %p18776_p2 = por %p18775_p1, %p18774_p0 }
 0x137   : > { %p18777_p3 = pnand %p18776_p2, %p18770_p10 }
 0x139   : > { %18780 = shalt.err (!%p18777_p3)
}
 0x13a   : > { %s20626_s1 = sld [smem:[#allocation78_spill]]  ;;  %s18792_s11 = scalar_lea.vmem %s1311_s23, 2560 }
 0x13b   : > { %p18793_p4 = scmp.ne.s32.totalorder %s1311_s23, %s18792_s11  ;;  %p18800_p11 = scmp.lt.s32.totalorder %s1311_s23, %s1311_s23 }
 0x13c   : > { %p18801_p9 = scmp.lt.s32.totalorder %s18792_s11, %s18792_s11 }
 0x13d   : > { %p18795_p7 = pnand %p18793_p4, %p19562_p13 }
 0x13e   : > { %p18802_p5 = por %p18801_p9, %p18800_p11 }
 0x13f   : > { %p18796_p8 = pneg %p18795_p7 }
 0x140   : > { %16320 = dma.hbm_to_vmem [thread:$0]  (!%p19556_p12), %s20626_s1, 32, %s1282_s18, [#allocation25]  }
 0x141   : > { %p18803_p6 = pnand %p18802_p5, %p18796_p8 }
 0x143   : > { %18806 = shalt.err (!%p18803_p6)
}
 0x144   : > { %s20627_s3 = sld [smem:[#allocation81_spill]]  ;;  %s19229_s16 = smov [#allocation32]  }
 0x145   : > { %s1339_s21 = sshll.u32 %s19229_s16, 4  ;;  %s19230_s26 = smov [#allocation35]   ;;  %s1340_s21 = int_to_ptr.vmem [resolvable:$true] %s1339_s21 }
 0x146   : > { %s1371_s18 = sshll.u32 %s19230_s26, 4  ;;  %s18818_s1 = scalar_lea.vmem %s1340_s21, 9216  ;;  %s1372_s18 = int_to_ptr.vmem [resolvable:$true] %s1371_s18 }
 0x147   : > { %p18819_p10 = scmp.ne.s32.totalorder %s1340_s21, %s18818_s1  ;;  %p18826_p2 = scmp.lt.s32.totalorder %s1340_s21, %s1340_s21 }
 0x148   : > { %p18827_p3 = scmp.lt.s32.totalorder %s18818_s1, %s18818_s1 }
 0x149   : > { %p18821_p0 = pnand %p18819_p10, %p19562_p13 }
 0x14a   : > { %16326 = dma.hbm_to_vmem [thread:$0]  (!%p19556_p12), %s20627_s3, 2560, %s1311_s23, [#allocation28], %s20624_s13, %s20624_s13, %s20623_s22  }
 0x14b   : > { %p18822_p1 = pneg %p18821_p0  ;;  %p18828_p4 = por %p18827_p3, %p18826_p2 }
 0x14d   : > { %p18829_p7 = pnand %p18828_p4, %p18822_p1 }
 0x14f   : > { %18832 = shalt.err (!%p18829_p7)
}
 0x150   : > { %s20628_s11 = smov 8   ;;  %s20629_s4 = smov 128  }
 0x151   : > { %s20630_s23 = sld [smem:[#allocation83_spill]]  ;;  %s18844_s22 = scalar_lea.vmem %s1372_s18, 6144 }
 0x152   : > { %p18845_p8 = scmp.ne.s32.totalorder %s1372_s18, %s18844_s22  ;;  %p18852_p5 = scmp.lt.s32.totalorder %s1372_s18, %s1372_s18 }
 0x153   : > { %p18853_p6 = scmp.lt.s32.totalorder %s18844_s22, %s18844_s22 }
 0x154   : > { %p18847_p11 = pnand %p18845_p8, %p19562_p13 }
 0x155   : > { %p18854_p10 = por %p18853_p6, %p18852_p5 }
 0x156   : > { %p18848_p9 = pneg %p18847_p11 }
 0x157   : > { %16332 = dma.hbm_to_vmem [thread:$0]  (!%p19556_p12), %s20630_s23, 9216, %s1340_s21, [#allocation31], %s20629_s4, %s20629_s4, %s20628_s11  }
 0x158   : > { %p18855_p0 = pnand %p18854_p10, %p18848_p9 }
 0x15a   : > { %18858 = shalt.err (!%p18855_p0)
}
 0x15b   : > { %s20631_s13 = sld [smem:[#allocation86_spill]]  ;;  %s19231_s3 = smov [#allocation38]  }
 0x15c   : > { %s1403_s16 = sshll.u32 %s19231_s3, 4  ;;  %s19232_s21 = smov [#allocation41]   ;;  %s1404_s16 = int_to_ptr.vmem [resolvable:$true] %s1403_s16 }
 0x15d   : > { %s1435_s26 = sshll.u32 %s19232_s21, 4  ;;  %s18870_s1 = scalar_lea.vmem %s1404_s16, 8192  ;;  %s1436_s26 = int_to_ptr.vmem [resolvable:$true] %s1435_s26 }
 0x15e   : > { %p18871_p1 = scmp.ne.s32.totalorder %s1404_s16, %s18870_s1  ;;  %p18878_p4 = scmp.lt.s32.totalorder %s1404_s16, %s1404_s16 }
 0x15f   : > { %p18879_p7 = scmp.lt.s32.totalorder %s18870_s1, %s18870_s1 }
 0x160   : > { %p18873_p2 = pnand %p18871_p1, %p19562_p13 }
 0x161   : > { %16338 = dma.hbm_to_vmem [thread:$0]  (!%p19556_p12), %s20631_s13, 6144, %s1372_s18, [#allocation34], %s20629_s4, %s20629_s4, %s20628_s11  }
 0x162   : > { %p18874_p3 = pneg %p18873_p2  ;;  %p18880_p8 = por %p18879_p7, %p18878_p4 }
 0x164   : > { %p18881_p11 = pnand %p18880_p8, %p18874_p3 }
 0x166   : > { %18884 = shalt.err (!%p18881_p11)
}
 0x167   : > { %s20632_s18 = sld [smem:[#allocation90_spill]]  ;;  %s18896_s23 = scalar_lea.vmem %s1436_s26, 9216 }
 0x168   : > { %p18897_p9 = scmp.ne.s32.totalorder %s1436_s26, %s18896_s23  ;;  %p18904_p10 = scmp.lt.s32.totalorder %s1436_s26, %s1436_s26 }
 0x169   : > { %p18905_p0 = scmp.lt.s32.totalorder %s18896_s23, %s18896_s23 }
 0x16a   : > { %p18899_p5 = pnand %p18897_p9, %p19562_p13 }
 0x16b   : > { %p18906_p1 = por %p18905_p0, %p18904_p10 }
 0x16c   : > { %p18900_p6 = pneg %p18899_p5 }
 0x16d   : > { %16344 = dma.hbm_to_vmem [thread:$0]  (!%p19556_p12), %s20632_s18, 8192, %s1404_s16, [#allocation37], %s20629_s4, %s20629_s4, %s20628_s11  }
 0x16e   : > { %p18907_p2 = pnand %p18906_p1, %p18900_p6 }
 0x170   : > { %18910 = shalt.err (!%p18907_p2)
}
 0x171   : > { %s20633_s22 = sld [smem:[#allocation93_spill]]  ;;  %s19233_s13 = smov [#allocation44]  }
 0x172   : > { %s1467_s3 = sshll.u32 %s19233_s13, 4  ;;  %s19234_s16 = smov [#allocation47]   ;;  %s1468_s3 = int_to_ptr.vmem [resolvable:$true] %s1467_s3 }
 0x173   : > { %s1499_s21 = sshll.u32 %s19234_s16, 4  ;;  %s18922_s1 = scalar_lea.vmem %s1468_s3, 6144  ;;  %s1500_s21 = int_to_ptr.vmem [resolvable:$true] %s1499_s21 }
 0x174   : > { %p18923_p3 = scmp.ne.s32.totalorder %s1468_s3, %s18922_s1  ;;  %p18930_p8 = scmp.lt.s32.totalorder %s1468_s3, %s1468_s3 }
 0x175   : > { %p18931_p11 = scmp.lt.s32.totalorder %s18922_s1, %s18922_s1 }
 0x176   : > { %p18925_p4 = pnand %p18923_p3, %p19562_p13 }
 0x177   : > { %16350 = dma.hbm_to_vmem [thread:$0]  (!%p19556_p12), %s20633_s22, 9216, %s1436_s26, [#allocation40], %s20629_s4, %s20629_s4, %s20628_s11  }
 0x178   : > { %p18926_p7 = pneg %p18925_p4  ;;  %p18932_p9 = por %p18931_p11, %p18930_p8 }
 0x17a   : > { %p18933_p5 = pnand %p18932_p9, %p18926_p7 }
 0x17c   : > { %18936 = shalt.err (!%p18933_p5)
}
 0x17d   : > { %s20634_s26 = sld [smem:[#allocation97_spill]]  ;;  %s18948_s18 = scalar_lea.vmem %s1500_s21, 7680 }
 0x17e   : > { %p18949_p6 = scmp.ne.s32.totalorder %s1500_s21, %s18948_s18  ;;  %p18956_p1 = scmp.lt.s32.totalorder %s1500_s21, %s1500_s21 }
 0x17f   : > { %p18957_p2 = scmp.lt.s32.totalorder %s18948_s18, %s18948_s18 }
 0x180   : > { %p18951_p10 = pnand %p18949_p6, %p19562_p13 }
 0x181   : > { %p18958_p3 = por %p18957_p2, %p18956_p1 }
 0x182   : > { %p18952_p0 = pneg %p18951_p10 }
 0x183   : > { %16356 = dma.hbm_to_vmem [thread:$0]  (!%p19556_p12), %s20634_s26, 6144, %s1468_s3, [#allocation43], %s20629_s4, %s20629_s4, %s20628_s11  }
 0x184   : > { %p18959_p4 = pnand %p18958_p3, %p18952_p0 }
 0x186   : > { %18962 = shalt.err (!%p18959_p4)
}
 0x187   : > { %s20635_s23 = sld [smem:[#allocation100_spill]]  ;;  %s19235_s22 = smov [#allocation50]  }
 0x188   : > { %s1531_s13 = sshll.u32 %s19235_s22, 4  ;;  %s19236_s3 = smov [#allocation53]   ;;  %s1532_s13 = int_to_ptr.vmem [resolvable:$true] %s1531_s13 }
 0x189   : > { %s1563_s16 = sshll.u32 %s19236_s3, 4  ;;  %s18974_s1 = scalar_lea.vmem %s1532_s13, 5120  ;;  %s1564_s16 = int_to_ptr.vmem [resolvable:$true] %s1563_s16 }
 0x18a   : > { %p18975_p7 = scmp.ne.s32.totalorder %s1532_s13, %s18974_s1  ;;  %p18982_p9 = scmp.lt.s32.totalorder %s1532_s13, %s1532_s13 }
 0x18b   : > { %p18983_p5 = scmp.lt.s32.totalorder %s18974_s1, %s18974_s1 }
 0x18c   : > { %p18977_p8 = pnand %p18975_p7, %p19562_p13 }
 0x18d   : > { %16362 = dma.hbm_to_vmem [thread:$0]  (!%p19556_p12), %s20635_s23, 7680, %s1500_s21, [#allocation46], %s20629_s4, %s20629_s4, %s20628_s11  }
 0x18e   : > { %p18978_p11 = pneg %p18977_p8  ;;  %p18984_p6 = por %p18983_p5, %p18982_p9 }
 0x190   : > { %p18985_p10 = pnand %p18984_p6, %p18978_p11 }
 0x192   : > { %18988 = shalt.err (!%p18985_p10)
}
 0x193   : > { %s20636_s21 = sld [smem:[#allocation103_spill]]  ;;  %s19000_s26 = scalar_lea.vmem %s1564_s16, 6912 }
 0x194   : > { %p19001_p0 = scmp.ne.s32.totalorder %s1564_s16, %s19000_s26  ;;  %p19008_p3 = scmp.lt.s32.totalorder %s1564_s16, %s1564_s16 }
 0x195   : > { %p19009_p4 = scmp.lt.s32.totalorder %s19000_s26, %s19000_s26 }
 0x196   : > { %p19003_p1 = pnand %p19001_p0, %p19562_p13 }
 0x197   : > { %p19010_p7 = por %p19009_p4, %p19008_p3 }
 0x198   : > { %p19004_p2 = pneg %p19003_p1 }
 0x199   : > { %16368 = dma.hbm_to_vmem [thread:$0]  (!%p19556_p12), %s20636_s21, 5120, %s1532_s13, [#allocation49], %s20629_s4, %s20629_s4, %s20628_s11  }
 0x19a   : > { %p19011_p8 = pnand %p19010_p7, %p19004_p2 }
 0x19c   : > { %19014 = shalt.err (!%p19011_p8)
}
 0x19d   : > { %s20637_s18 = sld [smem:[#allocation106_spill]]  ;;  %s19237_s23 = smov [#allocation54]  }
 0x19e   : > { %s1579_s22 = sshll.u32 %s19237_s23, 4  ;;  %s1580_s22 = int_to_ptr.vmem [resolvable:$true] %s1579_s22 }
 0x19f   : > { %s19026_s13 = scalar_lea.vmem %s1580_s22, 6912  ;;  %p19034_p6 = scmp.lt.s32.totalorder %s1580_s22, %s1580_s22 }
 0x1a0   : > { %p19027_p11 = scmp.ne.s32.totalorder %s1580_s22, %s19026_s13  ;;  %p19035_p10 = scmp.lt.s32.totalorder %s19026_s13, %s19026_s13 }
 0x1a2   : > { %p19029_p9 = pnand %p19027_p11, %p19562_p13  ;;  %p19036_p0 = por %p19035_p10, %p19034_p6 }
 0x1a3   : > { %16374 = dma.hbm_to_vmem [thread:$0]  (!%p19556_p12), %s20637_s18, 6912, %s1564_s16, [#allocation52], %s20629_s4, %s20629_s4, %s20628_s11  }
 0x1a4   : > { %p19030_p5 = pneg %p19029_p9 }
 0x1a6   : > { %p19037_p1 = pnand %p19036_p0, %p19030_p5 }
 0x1a8   : > { %19040 = shalt.err (!%p19037_p1)
}
 0x1a9   : > { %s20638_s3 = sld [smem:[#allocation108_spill]]  ;;  %p20639_p2 = scmp.ne.s32.totalorder %s20615_s2, 0 }
 0x1aa   : > { %p20640_p3 = scmp.eq.s32.totalorder (!%p20639_p2), %s19520_s15, 0 }
 0x1ab   : > { %1612 = sbr.rel (%p20639_p2) target bundleno = 6894 (0x1aee), region = 216 }
 0x1af   : > { %16377 = dma.hbm_to_vmem [thread:$0]  (!%p19556_p12), %s20638_s3, 6912, %s1580_s22, [#allocation55], %s20629_s4, %s20629_s4, %s20628_s11  }
 0x1b0   : > { %19084 = dma.done.wait (%p20640_p3), [#allocation16], 1152   ;;  %p20641_p13 = pmov %p20640_p3 }
 0x1b1   : > { %p20642_p4 = pmov %p20640_p3 }
 0x1b2   : > { %19086 = vsyncadd (%p20641_p13), [#allocation16], 4294966144 }
 0x1b3   : > { %19088 = dma.done.wait (%p20642_p4), [#allocation19], 6944   ;;  %p20643_p7 = pmov %p20640_p3 }
 0x1b4   : > { %p20644_p8 = pmov %p20640_p3 }
 0x1b5   : > { %19090 = vsyncadd (%p20643_p7), [#allocation19], 4294960352 }
 0x1b6   : > { %19092 = dma.done.wait (%p20644_p8), [#allocation22], 2336   ;;  %p20645_p12 = pmov %p20640_p3 }
 0x1b7   : > { %p20646_p11 = pmov %p20640_p3 }
 0x1b8   : > { %19094 = vsyncadd (%p20645_p12), [#allocation22], 4294964960 }
 0x1b9   : > { %19096 = dma.done.wait (%p20646_p11), [#allocation25], 3872   ;;  %p20647_p9 = pmov %p20640_p3 }
 0x1ba   : > { %p20648_p5 = pmov %p20640_p3 }
 0x1bb   : > { %19098 = vsyncadd (%p20647_p9), [#allocation25], 4294963424 }
 0x1bc   : > { %19100 = dma.done.wait (%p20648_p5), [#allocation28], 10240   ;;  %p20649_p6 = pmov %p20640_p3 }
 0x1bd   : > { %p20650_p10 = pmov %p20640_p3 }
 0x1be   : > { %19102 = vsyncadd (%p20649_p6), [#allocation28], 4294957056 }
 0x1bf   : > { %19104 = dma.done.wait (%p20650_p10), [#allocation31], 13824   ;;  %p20651_p0 = pmov %p20640_p3 }
 0x1c1   : > { %19106 = vsyncadd (%p20651_p0), [#allocation31], 4294953472  ;;  %p20652_p1 = pmov %p20651_p0 }
 0x1c2   : > { %p20653_p2 = pmov %p20651_p0 }
 0x1c3   : > { %19108 = dma.done.wait (%p20652_p1), [#allocation34], 9216  }
 0x1c4   : > { %19110 = vsyncadd (%p20653_p2), [#allocation34], 4294958080  ;;  %p20654_p3 = pmov %p20651_p0 }
 0x1c5   : > { %p20655_p13 = pmov %p20651_p0 }
 0x1c6   : > { %19112 = dma.done.wait (%p20654_p3), [#allocation37], 20480  }
 0x1c7   : > { %19114 = vsyncadd (%p20655_p13), [#allocation37], 4294946816  ;;  %p20656_p4 = pmov %p20651_p0 }
 0x1c8   : > { %p20657_p7 = pmov %p20651_p0 }
 0x1c9   : > { %19116 = dma.done.wait (%p20656_p4), [#allocation40], 18432  }
 0x1ca   : > { %19118 = vsyncadd (%p20657_p7), [#allocation40], 4294948864  ;;  %p20658_p8 = pmov %p20651_p0 }
 0x1cb   : > { %p20659_p12 = pmov %p20651_p0 }
 0x1cc   : > { %19120 = dma.done.wait (%p20658_p8), [#allocation43], 15360  }
 0x1cd   : > { %19122 = vsyncadd (%p20659_p12), [#allocation43], 4294951936  ;;  %p20660_p11 = pmov %p20651_p0 }
 0x1ce   : > { %p20661_p9 = pmov %p20651_p0 }
 0x1cf   : > { %19124 = dma.done.wait (%p20660_p11), [#allocation46], 15360  }
 0x1d0   : > { %19126 = vsyncadd (%p20661_p9), [#allocation46], 4294951936  ;;  %p20662_p5 = pmov %p20651_p0 }
 0x1d1   : > { %p20663_p6 = pmov %p20651_p0 }
 0x1d2   : > { %19128 = dma.done.wait (%p20662_p5), [#allocation49], 12800  }
 0x1d3   : > { %19130 = vsyncadd (%p20663_p6), [#allocation49], 4294954496  ;;  %p20664_p10 = pmov %p20651_p0 }
 0x1d5   : > { %19132 = dma.done.wait (%p20664_p10), [#allocation52], 13824  }
 0x1d6   : > { %19134 = vsyncadd (%p20651_p0), [#allocation52], 4294953472  ;;  %p20665_p1 = pmov %p20651_p0 }
 0x1d7   : > { %p20666_p2 = pmov %p20651_p0 }
 0x1d8   : > { %19136 = dma.done.wait (%p20665_p1), [#allocation55], 6912  }
 0x1d9   : > { %19138 = vsyncadd (%p20666_p2), [#allocation55], 4294960384  ;;  %s20667_s4 = sld [smem:[#allocation72_spill]]  ;;  %p1828_p3 = scmp.lt.s32.totalorder %s19520_s15, 1  ;;  %v19238_v0 = vmov 0   ;;  %vm20556_vm0 = vcmask 1040384  }
 0x1da   : > { %2025 = vmatprep.mubr.bf16.mxu0 %v19238_v0  ;;  %v1961_v1 = vld [vmem:[#allocation15 + $0x10] sm:$0x11]  ;;  %v16553_v4 = vld [vmem:[#allocation15 + $0x4] ss:$8 sps:$4 sm:$0xff]   ;;  %v16555_v7 = vld [vmem:[#allocation15] ss:$8 sps:$4 sm:$0xff]  }
 0x1db   : > { %s1829_s7 = scalar_select %p1828_p3, %s19520_s15, 1  ;;  %v14768_v2 = vcombine.high %v1961_v1, %v1961_v1  ;;  %v14767_v3 = vcombine.low %v1961_v1, %v1961_v1  ;;  %v2057_v5 = vld [vmem:[#allocation15 + $0x28] sm:$0x11]  ;;  %vm1982_vm1 = vcmask 146432   ;;  %v16561_v16 = vld [vmem:[#allocation15 + $0x1c] ss:$8 sps:$4 sm:$0xff]  }
 0x1dc   : > { %v14776_v10 = vcombine.high %v2057_v5, %v2057_v5  ;;  %v14775_v11 = vcombine.low %v2057_v5, %v2057_v5  ;;  %v2154_v21 = vld [vmem:[#allocation15 + $0x40] sm:$0x11]  ;;  %vm20554_vm2 = vsmask.f32 7424  ;;  %v16568_v28 = vld [vmem:[#allocation15 + $0x34] ss:$8 sps:$4 sm:$0xff]  }
 0x1dd   : > { %s16192_s10 = smul.u32 12, %s1829_s7  ;;  %14769 = vmatprep.subr.msk.bf16.mxu0 %vm20556_vm0, %v14768_v2  ;;  %v1988_v6 = vsel %vm20556_vm0, %v14767_v3, 0  ;;  %v16559_v22 = vld [vmem:[#allocation15 + $0x18] ss:$8 sps:$4 sm:$0xff]   ;;  %v14783_v26 = vcombine.high %v2154_v21, %v2154_v21  ;;  %v14782_v27 = vcombine.low %v2154_v21, %v2154_v21  ;;  %vm20551_vm3 = vcmask 1046528   ;;  %s20686_s11 = sld [smem:[#allocation75_spill]] }
 0x1de   : > { %2006 = vmatpush1.bf16.msra.mxu0 %v1988_v6  ;;  %v2098_v19 = vsel %vm20556_vm0, %v14775_v11, 0  ;;  %v16566_v32 = vld [vmem:[#allocation15 + $0x30] ss:$8 sps:$4 sm:$0xff]   ;;  %v16570_v36 = vld [vmem:[#allocation20 + $0x74] ss:$8 sps:$4 sm:$0xff]   ;;  %vm1837_vm5 = vcmask 126980  }
 0x1df   : > { %s1832_s2 = scalar_lea.vmem %s20667_s4, %s16192_s10  ;;  %2007 = vmatprep.subr.bf16.mxu0 %v16553_v4  ;;  %v2181_v31 = vsel %vm20556_vm0, %v14782_v27, 0  ;;  %v16572_v37 = vld [vmem:[#allocation20 + $0x70] ss:$8 sps:$4 sm:$0xff]   ;;  %2408 = vmatprep.subr.bf16.mxu1 %v16570_v36  ;;  %v16573_v38 = vld [vmem:[#allocation20 + $0x64] ss:$8 sps:$4 sm:$0xff]   ;;  %v20674_v53 = vmov 0 }
 0x1e0   : > { %v2051_v8 = vld [vmem:[%s1832_s2] sm:$0xf]  ;;  %v2052_v9 = vld [vmem:[%s1832_s2 + $0x4] sm:$0xf]  ;;  %2409 = vmatpush1.bf16.msra.mxu1 %v16572_v37  ;;  %v16575_v39 = vld [vmem:[#allocation20 + $0x60] ss:$8 sps:$4 sm:$0xff]  }
 0x1e1   : > { %v14771_v12 = vcombine.low %v2051_v8, %v2052_v9  ;;  %v16563_v13 = vld [vmem:[%s1832_s2 + $0x8] ss:$0 sps:$4 sm:$0x11]   ;;  %v16556_v14 = vld [vmem:[%s1832_s2] sm:$0xff]   ;;  %2410 = vmatprep.subr.bf16.mxu1 %v16573_v38  ;;  %v16578_v42 = vld [vmem:[#allocation20 + $0x100] ss:$8 sps:$4 sm:$0xff]  }
 0x1e2   : > { %2008 = vmatpush1.bf16.msra.mxu0 %v16555_v7  ;;  %v2075_v18 = vshll.u32 %v16563_v13, 16  ;;  %v2150_v23 = vld [vmem:[%s1832_s2] sm:$0xe]  ;;  %v2160_v34 = vrot.slane %v16563_v13, 1  ;;  %v16576_v40 = vld [vmem:[#allocation20 + $0x54] ss:$8 sps:$4 sm:$0xff]  }
 0x1e3   : > { %v2070_v15 = vshll.u32 %v14771_v12, 16  ;;  %v2068_v17 = vshrl.u32 %v14771_v12, 16  ;;  %14777 = vmatprep.subr.msk.bf16.mxu0 %vm20556_vm0, %v14776_v10  ;;  %v14779_v30 = vcombine.low %v2150_v23, %v2052_v9  ;;  %v16580_v41 = vld [vmem:[#allocation20 + $0x104] ss:$8 sps:$4 sm:$0xff]   ;;  %v16581_v43 = vld [vmem:[#allocation20 + $0x50] ss:$8 sps:$4 sm:$0xff]   ;;  %s20687_s16 = smov %s20686_s11 }
 0x1e4   : > { %v2077_v25 = vrot.slane %v2075_v18, 1  ;;  %2411 = vmatpush1.bf16.msra.mxu1 %v16575_v39  ;;  %vm1835_vm4 = vsmask.f32 256  ;;  %vm20548_vm6 = vsmask.f32 4352  ;;  %vm1863_vm15 = vcmask 520196  }
 0x1e5   : > { %v2072_v20 = vrot.slane %v2070_v15, 1  ;;  %14770 = vmatmul.mubr.msk.bf16.vlgmr.msra.gmra.mxu0 %vm1982_vm1, %v16556_v14  ;;  %v2159_v33 = vrot.slane %v14779_v30, 1  ;;  %2412 = vmatprep.subr.bf16.mxu1 %v16576_v40  ;;  %vm19842_vm7 = vmand %vm20556_vm0, %vm1835_vm4  ;;  %v1841_v45 = vld [vmem:[#allocation2] sm:$0x11]  ;;  %vm20550_vm8 = vsmask.f32 7938 }
 0x1e6   : > { %2116 = vmatpush1.bf16.msra.mxu0 %v2098_v19  ;;  %2135 = vmatprep.mubr.bf16.mxu0 %v19238_v0  ;;  %vm1839_vm9 = vmand %vm1837_vm5, %vm20548_vm6  ;;  %vm20549_vm10 = vsmask.f32 7954  ;;  %v16582_v49 = vld [vmem:[#allocation20 + $0x44] ss:$8 sps:$4 sm:$0xff]   ;;  %v16584_v50 = vld [vmem:[#allocation20 + $0xf0] ss:$8 sps:$4 sm:$0xff]  }
 0x1e7   : > { %v2073_v24 = vor.u32 %v2072_v20, %v2068_v17  ;;  %2117 = vmatprep.subr.bf16.mxu0 %v16561_v16  ;;  %v2161_v35 = vsel %vm20551_vm3, %v2159_v33, %v2160_v34  ;;  %vm19850_vm11 = vmor %vm1839_vm9, %vm19842_vm7  ;;  %v16586_v51 = vld [vmem:[#allocation20 + $0xf4] ss:$8 sps:$4 sm:$0xff]   ;;  %v16587_v52 = vld [vmem:[#allocation20 + $0x40] ss:$8 sps:$4 sm:$0xff]   ;;  %s20701_s1 = sld [smem:[#allocation79_spill]]  ;;  %p20794_p4 = scmp.ne.s32.totalorder %s20612_s28, 0 }
 0x1e8   : > { %2413 = vmatpush1.bf16.msra.mxu1 %v16581_v43  ;;  %v1842_v47 = vsel %vm19850_vm11, 0, %v1841_v45  ;;  %vm19858_vm12 = vmand %vm20556_vm0, %vm20550_vm8  ;;  %v1866_v54 = vld [vmem:[#allocation4] sm:$0x11]  ;;  %v1907_v55 = vld [vmem:[#allocation8] sm:$0x11]  ;;  %s20702_s21 = sld [smem:[#allocation80_spill]] }
 0x1e9   : > { %v2078_v29 = vsel %vm20554_vm2, %v2073_v24, %v2077_v25  ;;  %1843 = vst [vmem:[#allocation2] sm:$0x11] %v1842_v47  ;;  %vm1847_vm13 = vmand %vm1837_vm5, %vm20549_vm10  ;;  %v1849_v56 = vld [vmem:[#allocation2 + $0x10] sm:$0x11]  ;;  %2414 = vmatprep.subr.bf16.mxu1 %v16582_v49  ;;  %v16588_v57 = vld [vmem:[#allocation20 + $0x34] ss:$8 sps:$4 sm:$0xff]   ;;  %v2037_v24 = vlaneseq }
 0x1ea   : > { %2118 = vmatpush1.bf16.msra.mxu0 %v16559_v22  ;;  %vm19866_vm14 = vmor %vm1847_vm13, %vm19858_vm12  ;;  %v1938_v58 = vld [vmem:[#allocation12] sm:$0x11]  ;;  %v16593_v62 = vld [vmem:[#allocation20 + $0x30] ss:$8 sps:$4 sm:$0xff]   ;;  %vm20552_vm13 = vcmask 1043456   ;;  %s20705_s26 = sld [smem:[#allocation82_spill]] }
 0x1eb   : > { %14784 = vmatprep.subr.msk.bf16.mxu0 %vm20556_vm0, %v14783_v26  ;;  %v20675_v53 = vsel %vm19866_vm14, 4294967295, %v20674_v53  ;;  %v1850_v59 = vsel %vm19866_vm14, 0, %v1849_v56  ;;  %v16592_v60 = vld [vmem:[#allocation20 + $0xe4] ss:$8 sps:$4 sm:$0xff]   ;;  %v16590_v61 = vld [vmem:[#allocation20 + $0xe0] ss:$8 sps:$4 sm:$0xff]   ;;  %vm1864_vm5 = vmand %vm1863_vm15, %vm20548_vm6 }
 0x1ec   : > { %2415 = vmatpush1.bf16.msra.mxu1 %v16587_v52  ;;  %1851 = vst [vmem:[#allocation2 + $0x10] sm:$0x11] %v1850_v59  ;;  %v16594_v63 = vld [vmem:[#allocation20 + $0x24] ss:$8 sps:$4 sm:$0xff]   ;;  %v16598_v1 = vld [vmem:[#allocation20 + $0xd4] ss:$8 sps:$4 sm:$0xff]   ;;  %vm1865_vm9 = vmor %vm1864_vm5, %vm19842_vm7 }
 0x1ed   : > { %14778 = vmatmul.mubr.msk.bf16.vlgmr.msra.gmra.mxu0 %vm1982_vm1, %v2078_v29  ;;  %2416 = vmatprep.subr.bf16.mxu1 %v16588_v57  ;;  %v16599_v2 = vld [vmem:[#allocation20 + $0x20] ss:$8 sps:$4 sm:$0xff]   ;;  %v1867_v3 = vsel %vm1865_vm9, 0, %v1866_v54  ;;  %v1908_v4 = vsel %vm1865_vm9, 0, %v1907_v55  ;;  %v1939_v5 = vsel %vm1865_vm9, 0, %v1938_v58  ;;  %v19876_v26 = vshrl.u32 %v2037_v24, 7  ;;  %vm19887_vm5 = vmand %vm20552_vm13, %vm20550_vm8 }
 0x1ee   : > { %2199 = vmatpush1.bf16.msra.mxu0 %v2181_v31  ;;  %2218 = vmatprep.mubr.bf16.mxu0 %v19238_v0  ;;  %1940 = vst [vmem:[#allocation12] sm:$0x11] %v1939_v5  ;;  %1868 = vst [vmem:[#allocation4] sm:$0x11] %v1867_v3  ;;  %v16596_v6 = vld [vmem:[#allocation20 + $0xd0] ss:$8 sps:$4 sm:$0xff]  }
 0x1ef   : > { %2200 = vmatprep.subr.bf16.mxu0 %v16568_v28  ;;  %1909 = vst [vmem:[#allocation8] sm:$0x11] %v1908_v4  ;;  %v16600_v7 = vld [vmem:[#allocation20 + $0x14] ss:$8 sps:$4 sm:$0xff]   ;;  %v16604_v8 = vld [vmem:[#allocation20 + $0xc4] ss:$8 sps:$4 sm:$0xff]  }
 0x1f0   : > { %2417 = vmatpush1.bf16.msra.mxu1 %v16593_v62  ;;  %v16605_v9 = vld [vmem:[#allocation20 + $0x10] ss:$8 sps:$4 sm:$0xff]   ;;  %v16602_v10 = vld [vmem:[#allocation20 + $0xc0] ss:$8 sps:$4 sm:$0xff]   ;;  %v16606_v11 = vld [vmem:[#allocation20 + $0x4] ss:$8 sps:$4 sm:$0xff]  }
 0x1f1   : > { %2418 = vmatprep.subr.bf16.mxu1 %v16594_v63  ;;  %v16608_v12 = vld [vmem:[#allocation20 + $0xb0] ss:$8 sps:$4 sm:$0xff]   ;;  %v16610_v13 = vld [vmem:[#allocation20 + $0xb4] ss:$8 sps:$4 sm:$0xff]   ;;  %v16611_v14 = vld [vmem:[#allocation20] ss:$8 sps:$4 sm:$0xff]  }
 0x1f2   : > { %2201 = vmatpush1.bf16.msra.mxu0 %v16566_v32  ;;  %v16612_v15 = vld [vmem:[#allocation20 + $0x84] ss:$8 sps:$4 sm:$0xff]   ;;  %v16617_v17 = vld [vmem:[#allocation20 + $0x80] ss:$8 sps:$4 sm:$0xff]   ;;  %v16620_v19 = vld [vmem:[#allocation20 + $0x94] ss:$8 sps:$4 sm:$0xff]  }
 0x1f3   : > { %2619 = vmatprep.subr.bf16.mxu0 %v16580_v41  ;;  %v16616_v16 = vld [vmem:[#allocation20 + $0xa4] ss:$8 sps:$4 sm:$0xff]   ;;  %v16614_v18 = vld [vmem:[#allocation20 + $0xa0] ss:$8 sps:$4 sm:$0xff]   ;;  %v16623_v20 = vld [vmem:[#allocation20 + $0x194] ss:$8 sps:$4 sm:$0xff]  }
 0x1f4   : > { %2419 = vmatpush1.bf16.msra.mxu1 %v16599_v2  ;;  %v16618_v21 = vld [vmem:[#allocation20 + $0x90] ss:$8 sps:$4 sm:$0xff]   ;;  %v16628_v22 = vld [vmem:[#allocation20 + $0x114] ss:$8 sps:$4 sm:$0xff]   ;;  %v19879_v30 = vsub.s32 0, %v19876_v26  ;;  %vm2271_vm15 = vcmask 130052  }
 0x1f5   : > { %14785 = vmatmul.mubr.msk.bf16.vlgmr.msra.gmra.mxu0 %vm1982_vm1, %v2161_v35  ;;  %2420 = vmatprep.subr.bf16.mxu1 %v16600_v7  ;;  %v16626_v23 = vld [vmem:[#allocation20 + $0x110] ss:$8 sps:$4 sm:$0xff]   ;;  %v1956_v28 = vld [vmem:[#allocation18] sm:$0x3]  ;;  %v19882_v32 = vsub.s32 1, %v19876_v26  ;;  %vm19893_vm9 = vmand %vm2271_vm15, %vm20549_vm10  ;;  %v20680_v56 = vmov 0 }
 0x1f6   : > { %2620 = vmatpush1.bf16.msra.mxu0 %v16578_v42  ;;  %v2040_v34 = vrot.slane %v1956_v28, %v19879_v30  ;;  %vm19902_vm6 = vmor %vm19893_vm9, %vm19887_vm5  ;;  %vm2247_vm10 = vsmask.f32 4368  ;;  %v20682_v2 = vmov 0  ;;  %v20684_v4 = vmov 0  ;;  %v2274_v7 = vld [vmem:[#allocation2] sm:$0xff]  ;;  %s20709_s18 = sld [smem:[#allocation84_spill]] }
 0x1f7   : > { %2621 = vmatprep.subr.bf16.mxu0 %v16586_v51  ;;  %v2044_v38 = vrot.slane %v1956_v28, %v19882_v32  ;;  %v20681_v56 = vsel %vm19902_vm6, 4294967295, %v20680_v56  ;;  %vm19907_vm8 = vmor %vm1835_vm4, %vm2247_vm10  ;;  %vm20553_vm10 = vcmask 130048   ;;  %s20710_s23 = sld [smem:[#allocation85_spill]]  ;;  %v18333_v46 = vld [vmem:[#allocation54 + $0x184] ss:$8 sps:$4 sm:$0xff]  }
 0x1f8   : > { %2421 = vmatpush1.bf16.msra.mxu1 %v16605_v9  ;;  %v20683_v2 = vsel %vm19907_vm8, 4294967295, %v20682_v2  ;;  %vm19913_vm9 = vmor %vm2271_vm15, %vm20552_vm13  ;;  %s20720_s22 = sld [smem:[#allocation87_spill]] }
 0x1f9   : > { %2422 = vmatprep.subr.bf16.mxu1 %v16606_v11  ;;  %v20685_v4 = vsel %vm19913_vm9, 4294967295, %v20684_v4  ;;  %s20721_s13 = sld [smem:[#allocation89_spill]] }
 0x1fa   : > { %2622 = vmatpush1.bf16.msra.mxu0 %v16584_v50  ;;  %s20723_s3 = sld [smem:[#allocation92_spill]] }
 0x1fb   : > { %2623 = vmatprep.subr.bf16.mxu0 %v16592_v60  ;;  %s20730_s4 = sld [smem:[#allocation91_spill]] }
 0x1fc   : > { %2423 = vmatpush1.bf16.msra.mxu1 %v16611_v14  ;;  %s20734_s7 = sld [smem:[#allocation94_spill]] }
 0x1fd   : > { %2438 = vmatprep.subr.bf16.mxu1 %v16612_v15  ;;  %s20738_s10 = sld [smem:[#allocation96_spill]] }
 0x1fe   : > { %2624 = vmatpush1.bf16.msra.mxu0 %v16590_v61  ;;  %s20741_s2 = sld [smem:[#allocation99_spill]] }
 0x1ff   : > { %2625 = vmatprep.subr.bf16.mxu0 %v16598_v1 }
 0x200   : > { %2439 = vmatpush2.bf16.msra.mxu1 %v16617_v17 }
 0x201   : > { %2791 = vmatprep.subr.bf16.mxu1 %v16623_v20 }
 0x202   : > { %2626 = vmatpush1.bf16.msra.mxu0 %v16596_v6 }
 0x203   : > { %2627 = vmatprep.subr.bf16.mxu0 %v16604_v8 }
 0x206   : > { %2628 = vmatpush1.bf16.msra.mxu0 %v16602_v10 }
 0x207   : > { %2629 = vmatprep.subr.bf16.mxu0 %v16610_v13  ;;  %v2281_v13 = vld [vmem:[#allocation2 + $0x10] sm:$0x11] }
 0x20a   : > { %2630 = vmatpush1.bf16.msra.mxu0 %v16608_v12 }
 0x20b   : > { %2631 = vmatprep.subr.bf16.mxu0 %v16616_v16 }
 0x20e   : > { %2632 = vmatpush1.bf16.msra.mxu0 %v16614_v18 }
 0x20f   : > { %2633 = vmatprep.subr.bf16.mxu0 %v16620_v19 }
 0x212   : > { %2634 = vmatpush1.bf16.msra.mxu0 %v16618_v21 }
 0x213   : > { %2649 = vmatprep.subr.bf16.mxu0 %v16628_v22 }
 0x216   : > { %2650 = vmatpush2.bf16.msra.mxu0 %v16626_v23  ;;  %v16621_v23 = vld [vmem:[#allocation20 + $0x190] ss:$8 sps:$4 sm:$0xff]  }
 0x2a5   : > { %v2027_v25 = vpop.f32.mrf.mxu0 }
 0x2a6   : > { %v2047_v40 = vadd.f32 %v2040_v34, %v2027_v25 }
 0x2a7   : > { %v2029_v27 = vpop.f32.mrf.mxu0 }
 0x2a8   : > { %v2048_v42 = vadd.f32 %v2044_v38, %v2029_v27  ;;  %v16631_v27 = vld [vmem:[#allocation20 + $0x184] ss:$8 sps:$4 sm:$0xff]  }
 0x2a9   : > { %v2031_v29 = vpop.f32.mrf.mxu0 }
 0x2aa   : > { %v2049_v47 = vadd.f32 %v2040_v34, %v2031_v29 }
 0x2ab   : > { %v2033_v31 = vpop.f32.mrf.mxu0 }
 0x2ac   : > { %v2050_v52 = vadd.f32 %v2044_v38, %v2033_v31  ;;  %v16629_v38 = vld [vmem:[#allocation20 + $0x180] ss:$8 sps:$4 sm:$0xff]  }
 0x2ad   : > { %v2137_v33 = vpop.f32.mrf.mxu0 }
 0x2ae   : > { %v2146_v43 = vadd.f32 %v2137_v33, %v2047_v40 }
 0x2af   : > { %v2139_v37 = vpop.f32.mrf.mxu0 }
 0x2b0   : > { %v2147_v49 = vadd.f32 %v2139_v37, %v2048_v42 }
 0x2b1   : > { %v2141_v39 = vpop.f32.mrf.mxu0 }
 0x2b2   : > { %v2148_v54 = vadd.f32 %v2141_v39, %v2049_v47 }
 0x2b3   : > { %v2143_v41 = vpop.f32.mrf.mxu0 }
 0x2b4   : > { %v2149_v58 = vadd.f32 %v2143_v41, %v2050_v52 }
 0x2b5   : > { %v2220_v45 = vpop.f32.mrf.mxu0 }
 0x2b6   : > { %v2229_v50 = vadd.f32 %v2220_v45, %v2146_v43  ;;  %v16635_v43 = vld [vmem:[#allocation20 + $0x174] ss:$8 sps:$4 sm:$0xff]  }
 0x2b7   : > { %v2222_v51 = vpop.f32.mrf.mxu0 }
 0x2b8   : > { %v2230_v55 = vadd.f32 %v2222_v51, %v2147_v49  ;;  %v2233_v59 = vmax.f32 %v2229_v50, 0.0 }
 0x2b9   : > { %v2224_v57 = vpop.f32.mrf.mxu0 }
 0x2ba   : > { %v2234_v60 = vmax.f32 %v2230_v55, 0.0  ;;  %v2231_v61 = vadd.f32 %v2224_v57, %v2148_v54  ;;  %v16633_v55 = vld [vmem:[#allocation20 + $0x170] ss:$8 sps:$4 sm:$0xff]  }
 0x2bb   : > { %v2226_v62 = vpop.f32.mrf.mxu0 }
 0x2bc   : > { %v16173_v63 = vpack.c.bf16 %v2234_v60, %v2233_v59  ;;  %v2232_v1 = vadd.f32 %v2226_v62, %v2149_v58  ;;  %v2235_v5 = vmax.f32 %v2231_v61, 0.0  ;;  %v16638_v59 = vld [vmem:[#allocation20 + $0x164] ss:$8 sps:$4 sm:$0xff]   ;;  %v16636_v62 = vld [vmem:[#allocation20 + $0x160] ss:$8 sps:$4 sm:$0xff]  }
 0x2be   : > { %v2250_v3 = vshrl.u32 %v16173_v63, 16  ;;  %v2236_v6 = vmax.f32 %v2232_v1, 0.0  ;;  %v2253_v9 = vshll.u32 %v16173_v63, 16  ;;  %v16641_v63 = vld [vmem:[#allocation20 + $0x154] ss:$8 sps:$4 sm:$0xff]  }
 0x2bf   : > { %v16639_v1 = vld [vmem:[#allocation20 + $0x150] ss:$8 sps:$4 sm:$0xff]  }
 0x2c0   : > { %v2252_v8 = vrot.slane %v2250_v3, 7  ;;  %v16174_v10 = vpack.c.bf16 %v2236_v6, %v2235_v5  ;;  %v16644_v3 = vld [vmem:[#allocation20 + $0x144] ss:$8 sps:$4 sm:$0xff]   ;;  %v16642_v5 = vld [vmem:[#allocation20 + $0x140] ss:$8 sps:$4 sm:$0xff]  }
 0x2c1   : > { %v16647_v6 = vld [vmem:[#allocation20 + $0x134] ss:$8 sps:$4 sm:$0xff]  }
 0x2c2   : > { %v2255_v11 = vor.u32 %v2253_v9, %v2252_v8  ;;  %v2258_v12 = vshrl.u32 %v16174_v10, 16  ;;  %v2261_v16 = vshll.u32 %v16174_v10, 16  ;;  %v2256_v17 = vrot.slane %v2252_v8, 4  ;;  %v16650_v8 = vld [vmem:[#allocation20 + $0x124] ss:$8 sps:$4 sm:$0xff]  }
 0x2c3   : > { %v16648_v9 = vld [vmem:[#allocation20 + $0x120] ss:$8 sps:$4 sm:$0xff]   ;;  %v16653_v10 = vld [vmem:[#allocation20 + $0x1a4] ss:$8 sps:$4 sm:$0xff]  }
 0x2c4   : > { %v2275_v14 = vsel %vm19902_vm6, %v2255_v11, %v2274_v7  ;;  %v2260_v15 = vrot.slane %v2258_v12, 7  ;;  %v16645_v7 = vld [vmem:[#allocation20 + $0x130] ss:$8 sps:$4 sm:$0xff]   ;;  %v16651_v11 = vld [vmem:[#allocation20 + $0x1a0] ss:$8 sps:$4 sm:$0xff]  }
 0x2c5   : > { %2276 = vst [vmem:[#allocation2] sm:$0xff] %v2275_v14 }
 0x2c6   : > { %v2263_v18 = vor.u32 %v2261_v16, %v2260_v15  ;;  %v2265_v19 = vrot.slane %v2260_v15, 4  ;;  %v1895_v16 = vld [vmem:[#allocation6] sm:$0x11] }
 0x2c8   : > { %v2264_v20 = vsel %vm19907_vm8, %v2256_v17, %v2263_v18  ;;  %v2282_v21 = vsel %vm19850_vm11, %v2265_v19, %v2281_v13  ;;  %v1896_v17 = vsel %vm19850_vm11, 0, %v1895_v16  ;;  %v1898_v18 = vld [vmem:[#allocation6 + $0x10] sm:$0x11] }
 0x2c9   : > { %2280 = vst.msk [vmem:[#allocation2 + $0x8] sm:$0xff] %vm19913_vm9, %v2264_v20  ;;  %2283 = vst [vmem:[#allocation2 + $0x10] sm:$0x11] %v2282_v21  ;;  %v1899_v19 = vsel %vm19866_vm14, 0, %v1898_v18  ;;  %v16658_v20 = vld [vmem:[#allocation23 + $0x80] sm:$0xff]   ;;  %v16660_v21 = vld [vmem:[#allocation23 + $0x78] sm:$0xff]  }
 0x2ca   : > { %1897 = vst [vmem:[#allocation6] sm:$0x11] %v1896_v17  ;;  %1900 = vst [vmem:[#allocation6 + $0x10] sm:$0x11] %v1899_v19 }
 0x2cc   : > { %v19925_v22 = vld [vmem:[#allocation2] sm:$0xee] }
 0x2d0   : > { %v19927_v24 = vld [vmem:[#allocation2 + $0x8] sm:$0xff]  ;;  %v2468_v25 = vld [vmem:[#allocation2 + $0x10] sm:$0x11] }
 0x2d1   : > { %v14789_v28 = vcombine.high %v2275_v14, %v19927_v24  ;;  %v14788_v29 = vcombine.low %v2275_v14, %v19927_v24  ;;  %v14812_v31 = vcombine.high %v2468_v25, %v2468_v25  ;;  %v14833_v33 = vcombine.high %v19925_v22, %v19927_v24 }
 0x2d2   : > { %v14811_v34 = vcombine.low %v2468_v25, %v2468_v25  ;;  %v14832_v12 = vcombine.low %v19925_v22, %v19927_v24  ;;  %v16662_v22 = vld [vmem:[#allocation23 + $0x70] sm:$0xff]   ;;  %v16666_v24 = vld [vmem:[#allocation23 + $0x60] sm:$0xff]  }
 0x2d3   : > { %14808 = vmatprep.mubr.msk.bf16.mxu1 %vm20553_vm10, %v14789_v28  ;;  %v2694_v36 = vrot.slane %v14833_v33, 1  ;;  %v2695_v37 = vrot.slane %v14812_v31, 1  ;;  %v2516_v39 = vshll.u32 %v14789_v28, 16  ;;  %v2521_v40 = vshll.u32 %v14812_v31, 16 }
 0x2d4   : > { %2441 = vmatmul.mubr.bf16.vlgmr.msra.gmra.mxu1 %v14788_v29  ;;  %v2504_v41 = vshll.u32 %v14788_v29, 16  ;;  %v2509_v42 = vshll.u32 %v14811_v34, 16  ;;  %v2514_v47 = vshrl.u32 %v14789_v28, 16  ;;  %v2502_v50 = vshrl.u32 %v14788_v29, 16 }
 0x2d5   : > { %2792 = vmatpush1.bf16.msra.mxu1 %v16621_v23  ;;  %v2696_v45 = vsel %vm20551_vm3, %v2694_v36, %v2695_v37  ;;  %v2518_v49 = vrot.slane %v2516_v39, 1  ;;  %v2523_v54 = vrot.slane %v2521_v40, 1  ;;  %v2691_v13 = vrot.slane %v14832_v12, 1  ;;  %v16664_v23 = vld [vmem:[#allocation23 + $0x68] sm:$0xff]  }
 0x2d6   : > { %14852 = vmatprep.mubr.msk.bf16.mxu1 %vm20553_vm10, %v2696_v45  ;;  %2793 = vmatprep.subr.bf16.mxu1 %v16631_v27  ;;  %v2506_v51 = vrot.slane %v2504_v41, 1  ;;  %v2511_v58 = vrot.slane %v2509_v42, 1  ;;  %v2692_v14 = vrot.slane %v14811_v34, 1  ;;  %v2284_v27 = vld [vmem:[#allocation21] sm:$0x3] }
 0x2d7   : > { %v2519_v52 = vor.u32 %v2518_v49, %v2514_v47  ;;  %v2455_v31 = vrot.slane %v2284_v27, %v19879_v30  ;;  %v2459_v36 = vrot.slane %v2284_v27, %v19882_v32 }
 0x2d8   : > { %v2507_v57 = vor.u32 %v2506_v51, %v2502_v50  ;;  %v2693_v15 = vsel %vm20551_vm3, %v2691_v13, %v2692_v14 }
 0x2d9   : > { %2794 = vmatpush1.bf16.msra.mxu1 %v16629_v38  ;;  %v2524_v60 = vsel %vm20554_vm2, %v2519_v52, %v2523_v54 }
 0x2da   : > { %14831 = vmatprep.mubr.msk.bf16.mxu0 %vm20553_vm10, %v2524_v60  ;;  %v2512_v61 = vsel %vm20554_vm2, %v2507_v57, %v2511_v58  ;;  %2795 = vmatprep.subr.bf16.mxu1 %v16635_v43 }
 0x2db   : > { %2652 = vmatmul.mubr.bf16.vlgmr.msra.gmra.mxu0 %v2512_v61 }
 0x2dc   : > { %2939 = vmatprep.mubr.bf16.mxu0 %v19238_v0 }
 0x2dd   : > { %2796 = vmatpush1.bf16.msra.mxu1 %v16633_v55 }
 0x2de   : > { %2797 = vmatprep.subr.bf16.mxu1 %v16638_v59 }
 0x2e1   : > { %2798 = vmatpush1.bf16.msra.mxu1 %v16636_v62 }
 0x2e2   : > { %2799 = vmatprep.subr.bf16.mxu1 %v16641_v63 }
 0x2e5   : > { %2800 = vmatpush1.bf16.msra.mxu1 %v16639_v1 }
 0x2e6   : > { %2801 = vmatprep.subr.bf16.mxu1 %v16644_v3 }
 0x2e9   : > { %2802 = vmatpush1.bf16.msra.mxu1 %v16642_v5 }
 0x2ea   : > { %2803 = vmatprep.subr.bf16.mxu1 %v16647_v6 }
 0x2ed   : > { %2804 = vmatpush1.bf16.msra.mxu1 %v16645_v7 }
 0x2ee   : > { %2805 = vmatprep.subr.bf16.mxu1 %v16650_v8 }
 0x2f1   : > { %2806 = vmatpush1.bf16.msra.mxu1 %v16648_v9  ;;  %v2872_v9 = vld [vmem:[#allocation6] sm:$0xff] }
 0x2f2   : > { %2821 = vmatprep.subr.bf16.mxu1 %v16653_v10 }
 0x2f5   : > { %2822 = vmatpush2.bf16.msra.mxu1 %v16651_v11 }
 0x2f6   : > { %3186 = vmatprep.subr.bf16.mxu1 %v19238_v0 }
 0x2f8   : > { %2824 = vmatmul.mubr.bf16.vlgmr.msra.gmra.mxu1 %v2693_v15  ;;  %v2876_v15 = vld [vmem:[#allocation6 + $0x10] sm:$0x11] }
 0x2f9   : > { %3187 = vmatpush1.bf16.msra.mxu1 %v16658_v20 }
 0x2fa   : > { %3188 = vmatprep.subr.bf16.mxu1 %v19238_v0 }
 0x2fd   : > { %3189 = vmatpush1.bf16.msra.mxu1 %v16660_v21 }
 0x2fe   : > { %3190 = vmatprep.subr.bf16.mxu1 %v19238_v0 }
 0x301   : > { %3191 = vmatpush1.bf16.msra.mxu1 %v16662_v22 }
 0x302   : > { %3192 = vmatprep.subr.bf16.mxu1 %v19238_v0 }
 0x305   : > { %3193 = vmatpush1.bf16.msra.mxu1 %v16664_v23 }
 0x306   : > { %3194 = vmatprep.subr.bf16.mxu1 %v19238_v0 }
 0x309   : > { %3195 = vmatpush1.bf16.msra.mxu1 %v16666_v24 }
 0x30a   : > { %3196 = vmatprep.subr.bf16.mxu1 %v19238_v0 }
 0x394   : > { %v2442_v25 = vpop.f32.mrf.mxu1 }
 0x395   : > { %v2462_v37 = vadd.f32 %v2455_v31, %v2442_v25 }
 0x396   : > { %v2444_v28 = vpop.f32.mrf.mxu1 }
 0x397   : > { %v2463_v40 = vadd.f32 %v2459_v36, %v2444_v28 }
 0x398   : > { %v2446_v33 = vpop.f32.mrf.mxu1 }
 0x399   : > { %v2464_v43 = vadd.f32 %v2455_v31, %v2446_v33 }
 0x39a   : > { %v2448_v38 = vpop.f32.mrf.mxu1 }
 0x39b   : > { %v2653_v29 = vpop.f32.mrf.mxu0  ;;  %v2465_v51 = vadd.f32 %v2459_v36, %v2448_v38 }
 0x39c   : > { %v2662_v41 = vadd.f32 %v2653_v29, %v2462_v37 }
 0x39d   : > { %v2655_v34 = vpop.f32.mrf.mxu0 }
 0x39e   : > { %v2663_v45 = vadd.f32 %v2655_v34, %v2463_v40 }
 0x39f   : > { %v2657_v39 = vpop.f32.mrf.mxu0 }
 0x3a0   : > { %v2664_v52 = vadd.f32 %v2657_v39, %v2464_v43 }
 0x3a1   : > { %v2659_v49 = vpop.f32.mrf.mxu0 }
 0x3a2   : > { %v2665_v57 = vadd.f32 %v2659_v49, %v2465_v51  ;;  %v14861_v49 = vld [vmem:[%s20687_s16 + $0x4] sm:$0xf]  ;;  %v16659_v51 = vld [vmem:[#allocation23 + $0x30] sm:$0xff]  }
 0x3b8   : > { %v2825_v42 = vpop.f32.mrf.mxu1 }
 0x3b9   : > { %v2834_v47 = vadd.f32 %v2825_v42, %v2662_v41 }
 0x3ba   : > { %v2827_v50 = vpop.f32.mrf.mxu1 }
 0x3bb   : > { %v2835_v54 = vadd.f32 %v2827_v50, %v2663_v45  ;;  %v2838_v58 = vmax.f32 %v2834_v47, 0.0  ;;  %v2882_v45 = vld [vmem:[%s20686_s11] sm:$0xf]  ;;  %s20749_s11 = sld [smem:[#allocation98_spill]] }
 0x3bc   : > { %v2829_v55 = vpop.f32.mrf.mxu1  ;;  %v16657_v50 = vld [vmem:[#allocation23 + $0x38] sm:$0xff]  }
 0x3bd   : > { %v2839_v59 = vmax.f32 %v2835_v54, 0.0  ;;  %v2836_v60 = vadd.f32 %v2829_v55, %v2664_v52  ;;  %v16661_v52 = vld [vmem:[#allocation23 + $0x28] sm:$0xff]   ;;  %v16663_v54 = vld [vmem:[#allocation23 + $0x20] sm:$0xff]   ;;  %v16665_v55 = vld [vmem:[#allocation23 + $0x18] sm:$0xff]  }
 0x3be   : > { %v2831_v61 = vpop.f32.mrf.mxu1 }
 0x3bf   : > { %v16175_v62 = vpack.c.bf16 %v2839_v59, %v2838_v58  ;;  %v2837_v63 = vadd.f32 %v2831_v61, %v2665_v57  ;;  %v2840_v3 = vmax.f32 %v2836_v60, 0.0  ;;  %v16667_v57 = vld [vmem:[#allocation23 + $0x10] sm:$0xff]   ;;  %v16668_v58 = vld [vmem:[#allocation23 + $0x58] sm:$0xff]   ;;  %v16669_v59 = vld [vmem:[#allocation23 + $0x8] sm:$0xff]  }
 0x3c0   : > { %3197 = vmatpush1.bf16.msra.mxu1 %v16668_v58  ;;  %v16670_v60 = vld [vmem:[#allocation23 + $0x50] sm:$0xff]   ;;  %v16671_v61 = vld [vmem:[#allocation23] sm:$0xff]  }
 0x3c1   : > { %v2853_v1 = vshrl.u32 %v16175_v62, 16  ;;  %v2841_v5 = vmax.f32 %v2837_v63, 0.0  ;;  %v2856_v7 = vshll.u32 %v16175_v62, 16  ;;  %3198 = vmatprep.subr.bf16.mxu1 %v19238_v0  ;;  %v16672_v62 = vld [vmem:[#allocation23 + $0x48] sm:$0xff]   ;;  %v16673_v63 = vld [vmem:[#allocation23 + $0x40] sm:$0xff]  }
 0x3c3   : > { %v2855_v6 = vrot.slane %v2853_v1, 7  ;;  %v16176_v8 = vpack.c.bf16 %v2841_v5, %v2840_v3  ;;  %v16674_v1 = vld [vmem:[#allocation23 + $0x88] sm:$0xff]   ;;  %v16677_v3 = vld [vmem:[#allocation24 + $0x44] ss:$8 sps:$4 sm:$0xff]  }
 0x3c4   : > { %3199 = vmatpush1.bf16.msra.mxu1 %v16670_v60 }
 0x3c5   : > { %v2858_v10 = vor.u32 %v2856_v7, %v2855_v6  ;;  %v2861_v11 = vshrl.u32 %v16176_v8, 16  ;;  %v2864_v14 = vshll.u32 %v16176_v8, 16  ;;  %v2859_v16 = vrot.slane %v2855_v6, 4  ;;  %3200 = vmatprep.subr.bf16.mxu1 %v19238_v0 }
 0x3c7   : > { %v2873_v12 = vsel %vm19902_vm6, %v2858_v10, %v2872_v9  ;;  %v2863_v13 = vrot.slane %v2861_v11, 7 }
 0x3c8   : > { %2874 = vst [vmem:[#allocation6] sm:$0xff] %v2873_v12  ;;  %3201 = vmatpush1.bf16.msra.mxu1 %v16672_v62 }
 0x3c9   : > { %v2866_v17 = vor.u32 %v2864_v14, %v2863_v13  ;;  %v2868_v18 = vrot.slane %v2863_v13, 4  ;;  %3216 = vmatprep.subr.bf16.mxu1 %v19238_v0 }
 0x3cb   : > { %v2867_v19 = vsel %vm19907_vm8, %v2859_v16, %v2866_v17  ;;  %v2877_v20 = vsel %vm19850_vm11, %v2868_v18, %v2876_v15  ;;  %v16675_v15 = vld [vmem:[#allocation24 + $0x40] ss:$8 sps:$4 sm:$0xff]   ;;  %v1915_v18 = vld [vmem:[#allocation9] sm:$0x1]  ;;  %vm20564_vm8 = vcmask 523264  }
 0x3cc   : > { %2875 = vst.msk [vmem:[#allocation6 + $0x8] sm:$0xff] %vm19913_vm9, %v2867_v19  ;;  %2878 = vst [vmem:[#allocation6 + $0x10] sm:$0x11] %v2877_v20  ;;  %3217 = vmatpush2.bf16.msra.mxu1 %v16674_v1  ;;  %v1919_v19 = vld [vmem:[#allocation9 + $0x4] sm:$0x1] }
 0x3cf   : > { %v12882_v31 = vld [vmem:[#allocation6] sm:$0xee] }
 0x3d3   : > { %v2881_v21 = vld [vmem:[#allocation6 + $0x10] sm:$0x11]  ;;  %v2880_v22 = vld [vmem:[#allocation6 + $0x8] sm:$0xff] }
 0x3d4   : > { %v12683_v23 = vld [vmem:[#allocation6 + $0x8] sm:$0xff]  ;;  %v14858_v24 = vcombine.high %v2881_v21, %v2881_v21  ;;  %v14857_v25 = vcombine.low %v2881_v21, %v2881_v21  ;;  %v12684_v27 = vld [vmem:[#allocation6 + $0x10] sm:$0x11]  ;;  %v14856_v34 = vcombine.high %v2873_v12, %v2880_v22  ;;  %v14855_v40 = vcombine.low %v2873_v12, %v2880_v22 }
 0x3d5   : > { %v19963_v28 = vcombine.high %v12684_v27, %v12684_v27  ;;  %v19965_v29 = vcombine.low %v12684_v27, %v12684_v27  ;;  %v16002_v36 = vcombine.low %v12882_v31, %v12683_v23  ;;  %v16003_v37 = vcombine.high %v12882_v31, %v12683_v23  ;;  %v16680_v22 = vld [vmem:[#allocation24 + $0x34] ss:$8 sps:$4 sm:$0xff]   ;;  %v16681_v27 = vld [vmem:[#allocation24 + $0x20] ss:$8 sps:$4 sm:$0xff]  }
 0x3d6   : > { %14859 = vmatprep.subr.msk.bf16.mxu0 %vm20556_vm0, %v14858_v24  ;;  %v2902_v33 = vsel %vm20556_vm0, %v14857_v25, 0  ;;  %v16683_v25 = vld [vmem:[#allocation24 + $0x24] ss:$8 sps:$4 sm:$0xff]   ;;  %v16686_v31 = vld [vmem:[#allocation24 + $0x94] ss:$8 sps:$4 sm:$0xff]  }
 0x3d7   : > { %2920 = vmatpush1.bf16.msra.mxu0 %v2902_v33  ;;  %v12910_v38 = vrot.slane %v16003_v37, 1  ;;  %v12911_v39 = vrot.slane %v19963_v28, 1  ;;  %v12907_v41 = vrot.slane %v16002_v36, 1  ;;  %v12908_v42 = vrot.slane %v19965_v29, 1  ;;  %3453 = vmatprep.subr.bf16.mxu1 %v16686_v31  ;;  %v16687_v36 = vld [vmem:[#allocation24 + $0x10] ss:$8 sps:$4 sm:$0xff]  }
 0x3d8   : > { %2921 = vmatprep.subr.bf16.mxu0 %v14856_v34  ;;  %v16692_v37 = vld [vmem:[#allocation24 + $0x84] ss:$8 sps:$4 sm:$0xff]   ;;  %v16715_v31 = vld [vmem:[#allocation24 + $0xb0] ss:$8 sps:$4 sm:$0xff]  }
 0x3d9   : > { %v19972_v43 = vsel %vm20551_vm3, %v12910_v38, %v12911_v39  ;;  %v19976_v47 = vsel %vm20551_vm3, %v12907_v41, %v12908_v42  ;;  %vm20690_vm3 = vsmask.f32 7938  ;;  %v16690_v38 = vld [vmem:[#allocation24 + $0x80] ss:$8 sps:$4 sm:$0xff]   ;;  %v16695_v39 = vld [vmem:[#allocation24 + $0x4] ss:$8 sps:$4 sm:$0xff]  }
 0x3da   : > { %v16698_v41 = vld [vmem:[#allocation24 + $0x74] ss:$8 sps:$4 sm:$0xff]   ;;  %v16696_v42 = vld [vmem:[#allocation24 + $0x70] ss:$8 sps:$4 sm:$0xff]  }
 0x3db   : > { %2922 = vmatpush1.bf16.msra.mxu0 %v14855_v40 }
 0x3dc   : > { %14862 = vmatprep.subr.msk.bf16.mxu0 %vm20556_vm0, %v14858_v24  ;;  %v16678_v24 = vld [vmem:[#allocation24 + $0x30] ss:$8 sps:$4 sm:$0xff]  }
 0x3de   : > { %14860 = vmatmul.mubr.msk.bf16.vlgmr.msra.gmra.mxu0 %vm1982_vm1, %v2882_v45  ;;  %v16701_v45 = vld [vmem:[#allocation24 + $0xe4] ss:$8 sps:$4 sm:$0xff]  }
 0x3df   : > { %2966 = vmatpush1.bf16.msra.mxu0 %v2902_v33  ;;  %2985 = vmatprep.mubr.bf16.mxu0 %v19238_v0  ;;  %v16684_v33 = vld [vmem:[#allocation24 + $0x90] ss:$8 sps:$4 sm:$0xff]  }
 0x3e0   : > { %2967 = vmatprep.subr.bf16.mxu0 %v14856_v34  ;;  %v16689_v34 = vld [vmem:[#allocation24 + $0x14] ss:$8 sps:$4 sm:$0xff]  }
 0x3e3   : > { %2968 = vmatpush1.bf16.msra.mxu0 %v14855_v40  ;;  %v16693_v40 = vld [vmem:[#allocation24] ss:$8 sps:$4 sm:$0xff]  }
 0x3e4   : > { %3073 = vmatprep.subr.bf16.mxu0 %v19238_v0 }
 0x3e6   : > { %14863 = vmatmul.mubr.msk.bf16.vlgmr.msra.gmra.mxu0 %vm1982_vm1, %v14861_v49  ;;  %vm1913_vm1 = vcmask 647168   ;;  %v16704_v49 = vld [vmem:[#allocation24 + $0x64] ss:$8 sps:$4 sm:$0xff]  }
 0x3e7   : > { %3074 = vmatpush1.bf16.msra.mxu0 %v16657_v50  ;;  %vm20000_vm15 = vmand %vm1913_vm1, %vm1835_vm4  ;;  %v16702_v50 = vld [vmem:[#allocation24 + $0x60] ss:$8 sps:$4 sm:$0xff]  }
 0x3e8   : > { %3075 = vmatprep.subr.bf16.mxu0 %v19238_v0  ;;  %v1916_v21 = vsel %vm20000_vm15, 0, %v1915_v18  ;;  %vm1918_vm13 = vmand %vm1913_vm1, %vm20690_vm3  ;;  %vm3241_vm3 = vcmask 650240  }
 0x3e9   : > { %1917 = vst [vmem:[#allocation9] sm:$0x1] %v1916_v21  ;;  %v1920_v23 = vsel %vm1918_vm13, 0, %v1919_v19  ;;  %vm20691_vm13 = vsmask.f32 7938 }
 0x3ea   : > { %1921 = vst [vmem:[#allocation9 + $0x4] sm:$0x1] %v1920_v23  ;;  %vm3242_vm1 = vmand %vm3241_vm3, %vm20691_vm13  ;;  %v16705_v19 = vld [vmem:[#allocation24 + $0xd0] ss:$8 sps:$4 sm:$0xff]   ;;  %v16713_v21 = vld [vmem:[#allocation24 + $0xc4] ss:$8 sps:$4 sm:$0xff]  }
 0x3eb   : > { %3076 = vmatpush1.bf16.msra.mxu0 %v16659_v51  ;;  %v16708_v51 = vld [vmem:[#allocation24 + $0x50] ss:$8 sps:$4 sm:$0xff]  }
 0x3ec   : > { %3077 = vmatprep.subr.bf16.mxu0 %v19238_v0 }
 0x3ef   : > { %3078 = vmatpush1.bf16.msra.mxu0 %v16661_v52  ;;  %v16710_v52 = vld [vmem:[#allocation24 + $0x54] ss:$8 sps:$4 sm:$0xff]  }
 0x3f0   : > { %3079 = vmatprep.subr.bf16.mxu0 %v19238_v0 }
 0x3f3   : > { %3080 = vmatpush1.bf16.msra.mxu0 %v16663_v54 }
 0x3f4   : > { %3081 = vmatprep.subr.bf16.mxu0 %v19238_v0 }
 0x3f7   : > { %3082 = vmatpush1.bf16.msra.mxu0 %v16665_v55 }
 0x3f8   : > { %3083 = vmatprep.subr.bf16.mxu0 %v19238_v0 }
 0x3fb   : > { %3084 = vmatpush1.bf16.msra.mxu0 %v16667_v57 }
 0x3fc   : > { %3085 = vmatprep.subr.bf16.mxu0 %v19238_v0 }
 0x3ff   : > { %3086 = vmatpush1.bf16.msra.mxu0 %v16669_v59 }
 0x400   : > { %3087 = vmatprep.subr.bf16.mxu0 %v19238_v0 }
 0x403   : > { %3088 = vmatpush1.bf16.msra.mxu0 %v16671_v61 }
 0x404   : > { %3103 = vmatprep.subr.bf16.mxu0 %v19238_v0 }
 0x407   : > { %3104 = vmatpush2.bf16.msra.mxu0 %v16673_v63 }
 0x408   : > { %3321 = vmatprep.subr.bf16.mxu0 %v16677_v3 }
 0x49e   : > { %v2941_v5 = vpop.f32.mrf.mxu0 }
 0x4a0   : > { %v2943_v6 = vpop.f32.mrf.mxu0 }
 0x4a2   : > { %v2945_v7 = vpop.f32.mrf.mxu0 }
 0x4a3   : > { %v3243_v7 = vld [vmem:[#allocation9] sm:$0xf] }
 0x4a4   : > { %v2946_v8 = vpop.f32.mrf.mxu0 }
 0x4a5   : > { %v3246_v8 = vld [vmem:[#allocation9 + $0x4] sm:$0x1] }
 0x4a6   : > { %v2987_v9 = vpop.f32.mrf.mxu0 }
 0x4a7   : > { %v2994_v10 = vmax.f32 %v2941_v5, %v2987_v9 }
 0x4a8   : > { %v2989_v11 = vpop.f32.mrf.mxu0 }
 0x4a9   : > { %v2995_v12 = vmax.f32 %v2943_v6, %v2989_v11  ;;  %v2996_v16 = vpack.c.bf16 %v2994_v10, %v2994_v10 }
 0x4aa   : > { %v2991_v13 = vpop.f32.mrf.mxu0 }
 0x4ab   : > { %v2997_v14 = vpack.c.bf16 %v2995_v12, %v2995_v12  ;;  %v16699_v13 = vld [vmem:[#allocation24 + $0xe0] ss:$8 sps:$4 sm:$0xff]  }
 0x4ac   : > { %v2992_v17 = vpop.f32.mrf.mxu0 }
 0x4ad   : > { %14873 = vmatprep.mubr.msk.bf16.mxu0 %vm20553_vm10, %v2997_v14  ;;  %14883 = vmatprep.mubr.msk.bf16.mxu1 %vm20553_vm10, %v2997_v14  ;;  %vm3311_vm10 = vcmask 654336   ;;  %v16707_v14 = vld [vmem:[#allocation24 + $0xd4] ss:$8 sps:$4 sm:$0xff]  }
 0x4ae   : > { %3106 = vmatmul.mubr.bf16.vlgmr.msra.gmra.mxu0 %v2996_v16  ;;  %3219 = vmatmul.mubr.bf16.vlgmr.msra.gmra.mxu1 %v2996_v16 }
 0x4af   : > { %3322 = vmatpush1.bf16.msra.mxu0 %v16675_v15  ;;  %3347 = vmatprep.mubr.bf16.mxu0 %v19238_v0 }
 0x4b0   : > { %3479 = vmatprep.mubr.bf16.mxu1 %v19238_v0  ;;  %3323 = vmatprep.subr.bf16.mxu0 %v16680_v22 }
 0x4b1   : > { %3454 = vmatpush1.bf16.msra.mxu1 %v16684_v33  ;;  %v16720_v33 = vld [vmem:[#allocation24 + $0xa4] ss:$8 sps:$4 sm:$0xff]  }
 0x4b2   : > { %3455 = vmatprep.subr.bf16.mxu1 %v16692_v37 }
 0x4b3   : > { %3324 = vmatpush1.bf16.msra.mxu0 %v16678_v24  ;;  %v16711_v24 = vld [vmem:[#allocation24 + $0xc0] ss:$8 sps:$4 sm:$0xff]  }
 0x4b4   : > { %3325 = vmatprep.subr.bf16.mxu0 %v16683_v25 }
 0x4b5   : > { %3456 = vmatpush1.bf16.msra.mxu1 %v16690_v38 }
 0x4b6   : > { %3457 = vmatprep.subr.bf16.mxu1 %v16698_v41  ;;  %v16727_v41 = vld [vmem:[#allocation27 + $0x64] ss:$8 sps:$4 sm:$0xff]  }
 0x4b7   : > { %3326 = vmatpush1.bf16.msra.mxu0 %v16681_v27  ;;  %v16717_v27 = vld [vmem:[#allocation24 + $0xb4] ss:$8 sps:$4 sm:$0xff]  }
 0x4b8   : > { %3327 = vmatprep.subr.bf16.mxu0 %v16689_v34 }
 0x4b9   : > { %3458 = vmatpush1.bf16.msra.mxu1 %v16696_v42  ;;  %v16725_v42 = vld [vmem:[#allocation27 + $0x60] ss:$8 sps:$4 sm:$0xff]  }
 0x4ba   : > { %3459 = vmatprep.subr.bf16.mxu1 %v16704_v49  ;;  %v16731_v49 = vld [vmem:[#allocation27 + $0x50] ss:$8 sps:$4 sm:$0xff]  }
 0x4bb   : > { %3328 = vmatpush1.bf16.msra.mxu0 %v16687_v36  ;;  %v16718_v36 = vld [vmem:[#allocation24 + $0xa0] ss:$8 sps:$4 sm:$0xff]  }
 0x4bc   : > { %3329 = vmatprep.subr.bf16.mxu0 %v16695_v39  ;;  %v16724_v39 = vld [vmem:[#allocation27 + $0x74] ss:$8 sps:$4 sm:$0xff]  }
 0x4bd   : > { %3460 = vmatpush1.bf16.msra.mxu1 %v16702_v50  ;;  %v16739_v50 = vld [vmem:[#allocation27 + $0x44] ss:$8 sps:$4 sm:$0xff]  }
 0x4be   : > { %3461 = vmatprep.subr.bf16.mxu1 %v16710_v52  ;;  %v16730_v52 = vld [vmem:[#allocation27 + $0x114] ss:$8 sps:$4 sm:$0xff]  }
 0x4bf   : > { %3330 = vmatpush1.bf16.msra.mxu0 %v16693_v40  ;;  %v16722_v40 = vld [vmem:[#allocation27 + $0x70] ss:$8 sps:$4 sm:$0xff]  }
 0x4c0   : > { %3565 = vmatprep.subr.bf16.mxu0 %v16701_v45  ;;  %v16733_v45 = vld [vmem:[#allocation27 + $0x54] ss:$8 sps:$4 sm:$0xff]  }
 0x4c1   : > { %3462 = vmatpush1.bf16.msra.mxu1 %v16708_v51  ;;  %v16737_v51 = vld [vmem:[#allocation27 + $0x40] ss:$8 sps:$4 sm:$0xff]  }
 0x4c2   : > { %3762 = vmatprep.subr.bf16.mxu1 %v16724_v39 }
 0x56e   : > { %v3107_v54 = vpop.f32.mrf.mxu0  ;;  %v3220_v55 = vpop.f32.mrf.mxu1 }
 0x56f   : > { %v3226_v57 = vmax.f32 %v3107_v54, %v3220_v55  ;;  %v16728_v54 = vld [vmem:[#allocation27 + $0x110] ss:$8 sps:$4 sm:$0xff]   ;;  %v16745_v55 = vld [vmem:[#allocation27 + $0x34] ss:$8 sps:$4 sm:$0xff]  }
 0x570   : > { %v3109_v58 = vpop.f32.mrf.mxu0  ;;  %v3222_v59 = vpop.f32.mrf.mxu1 }
 0x571   : > { %v16177_v60 = vpack.c.bf16 %v3226_v57, %v3226_v57  ;;  %v16743_v57 = vld [vmem:[#allocation27 + $0x30] ss:$8 sps:$4 sm:$0xff]   ;;  %v16734_v58 = vld [vmem:[#allocation27 + $0x100] ss:$8 sps:$4 sm:$0xff]   ;;  %v16736_v59 = vld [vmem:[#allocation27 + $0x104] ss:$8 sps:$4 sm:$0xff]  }
 0x572   : > { %v3110_v61 = vpop.f32.mrf.mxu0  ;;  %v3223_v62 = vpop.f32.mrf.mxu1 }
 0x573   : > { %v3232_v63 = vshrl.u32 %v16177_v60, 16  ;;  %v3235_v6 = vshll.u32 %v16177_v60, 16  ;;  %v16751_v60 = vld [vmem:[#allocation27 + $0x24] ss:$8 sps:$4 sm:$0xff]   ;;  %v16749_v61 = vld [vmem:[#allocation27 + $0x20] ss:$8 sps:$4 sm:$0xff]  }
 0x574   : > { %v3111_v1 = vpop.f32.mrf.mxu0  ;;  %v3224_v3 = vpop.f32.mrf.mxu1  ;;  %v16742_v62 = vld [vmem:[#allocation27 + $0xf4] ss:$8 sps:$4 sm:$0xff]  }
 0x575   : > { %v3234_v5 = vrot.slane %v3232_v63, 7  ;;  %v16740_v63 = vld [vmem:[#allocation27 + $0xf0] ss:$8 sps:$4 sm:$0xff]   ;;  %v16757_v1 = vld [vmem:[#allocation27 + $0x14] ss:$8 sps:$4 sm:$0xff]  }
 0x577   : > { %v3237_v9 = vor.u32 %v3235_v6, %v3234_v5  ;;  %v3238_v10 = vrot.slane %v3234_v5, 4  ;;  %v16755_v5 = vld [vmem:[#allocation27 + $0x10] ss:$8 sps:$4 sm:$0xff]  }
 0x578   : > { %v1855_v6 = vld [vmem:[#allocation3] sm:$0x11] }
 0x579   : > { %v3244_v11 = vsel %vm3242_vm1, %v3237_v9, %v3243_v7  ;;  %v3247_v12 = vsel %vm20000_vm15, %v3238_v10, %v3246_v8  ;;  %vm20692_vm15 = vsmask.f32 7954  ;;  %vm20695_vm1 = vsmask.f32 4352  ;;  %v1860_v7 = vld [vmem:[#allocation3 + $0x8] sm:$0x11] }
 0x57a   : > { %3245 = vst [vmem:[#allocation9] sm:$0xf] %v3244_v11  ;;  %3248 = vst [vmem:[#allocation9 + $0x4] sm:$0x1] %v3247_v12  ;;  %v16746_v9 = vld [vmem:[#allocation27 + $0xe0] ss:$8 sps:$4 sm:$0xff]  }
 0x57b   : > { %v16748_v10 = vld [vmem:[#allocation27 + $0xe4] ss:$8 sps:$4 sm:$0xff]   ;;  %v16761_v12 = vld [vmem:[#allocation27] ss:$8 sps:$4 sm:$0xff]  }
 0x581   : > { %v3250_v15 = vld [vmem:[#allocation9] sm:$0xf]  ;;  %v3370_v17 = vld [vmem:[#allocation9 + $0x4] sm:$0x1] }
 0x582   : > { %v3369_v16 = vld [vmem:[#allocation9] sm:$0xf]  ;;  %14895 = vmatmul.mubr.msk.bf16.vlgmr.msra.gmra.mxu0 %vm3311_vm10, %v3250_v15  ;;  %v16752_v15 = vld [vmem:[#allocation27 + $0xd0] ss:$8 sps:$4 sm:$0xff]  }
 0x583   : > { %v14896_v18 = vcombine.low %v3369_v16, %v3370_v17  ;;  %3566 = vmatpush1.bf16.msra.mxu0 %v16699_v13  ;;  %3591 = vmatprep.mubr.bf16.mxu0 %v19238_v0  ;;  %v3490_v34 = vld [vmem:[#allocation9] sm:$0xe]  ;;  %v16769_v16 = vld [vmem:[#allocation27 + $0x94] ss:$8 sps:$4 sm:$0xff]  }
 0x584   : > { %3567 = vmatprep.subr.bf16.mxu0 %v16707_v14  ;;  %v14908_v37 = vcombine.low %v3490_v34, %v3370_v17  ;;  %v16763_v13 = vld [vmem:[#allocation27 + $0x4] ss:$8 sps:$4 sm:$0xff]   ;;  %v16754_v14 = vld [vmem:[#allocation27 + $0xd4] ss:$8 sps:$4 sm:$0xff]   ;;  %v16767_v17 = vld [vmem:[#allocation27 + $0x90] ss:$8 sps:$4 sm:$0xff]  }
 0x585   : > { %v3390_v22 = vshll.u32 %v14896_v18, 16  ;;  %v3388_v20 = vshrl.u32 %v14896_v18, 16  ;;  %v16760_v18 = vld [vmem:[#allocation27 + $0xc4] ss:$8 sps:$4 sm:$0xff]   ;;  %v16783_v34 = vld [vmem:[#allocation27 + $0x120] ss:$8 sps:$4 sm:$0xff]  }
 0x586   : > { %v3505_v38 = vrot.slane %v14908_v37, 1 }
 0x587   : > { %v3392_v23 = vrot.slane %v3390_v22, 1  ;;  %3568 = vmatpush1.bf16.msra.mxu0 %v16705_v19  ;;  %v16758_v19 = vld [vmem:[#allocation27 + $0xc0] ss:$8 sps:$4 sm:$0xff]  }
 0x588   : > { %3569 = vmatprep.subr.bf16.mxu0 %v16713_v21  ;;  %v16775_v21 = vld [vmem:[#allocation27 + $0x84] ss:$8 sps:$4 sm:$0xff]   ;;  %v16773_v22 = vld [vmem:[#allocation27 + $0x80] ss:$8 sps:$4 sm:$0xff]  }
 0x589   : > { %v3393_v25 = vor.u32 %v3392_v23, %v3388_v20  ;;  %v16766_v20 = vld [vmem:[#allocation27 + $0xb4] ss:$8 sps:$4 sm:$0xff]   ;;  %v16764_v23 = vld [vmem:[#allocation27 + $0xb0] ss:$8 sps:$4 sm:$0xff]  }
 0x58b   : > { %14907 = vmatmul.mubr.msk.bf16.vlgmr.msra.gmra.mxu1 %vm3311_vm10, %v3393_v25  ;;  %3570 = vmatpush1.bf16.msra.mxu0 %v16711_v24  ;;  %v16772_v24 = vld [vmem:[#allocation27 + $0xa4] ss:$8 sps:$4 sm:$0xff]   ;;  %v16781_v25 = vld [vmem:[#allocation27 + $0x1b4] ss:$8 sps:$4 sm:$0xff]  }
 0x58c   : > { %3571 = vmatprep.subr.bf16.mxu0 %v16717_v27  ;;  %3763 = vmatpush1.bf16.msra.mxu1 %v16722_v40  ;;  %v16770_v27 = vld [vmem:[#allocation27 + $0xa0] ss:$8 sps:$4 sm:$0xff]  }
 0x58d   : > { %3764 = vmatprep.subr.bf16.mxu1 %v16727_v41 }
 0x58f   : > { %3572 = vmatpush1.bf16.msra.mxu0 %v16715_v31  ;;  %v16778_v31 = vld [vmem:[#allocation27 + $0x134] ss:$8 sps:$4 sm:$0xff]  }
 0x590   : > { %3573 = vmatprep.subr.bf16.mxu0 %v16720_v33  ;;  %3765 = vmatpush1.bf16.msra.mxu1 %v16725_v42  ;;  %v16776_v33 = vld [vmem:[#allocation27 + $0x130] ss:$8 sps:$4 sm:$0xff]   ;;  %v3249_v42 = vld [vmem:[#allocation26] sm:$0x3] }
 0x591   : > { %3766 = vmatprep.subr.bf16.mxu1 %v16733_v45 }
 0x593   : > { %3574 = vmatpush1.bf16.msra.mxu0 %v16718_v36  ;;  %v16785_v36 = vld [vmem:[#allocation27 + $0x124] ss:$8 sps:$4 sm:$0xff]  }
 0x594   : > { %3767 = vmatpush1.bf16.msra.mxu1 %v16731_v49  ;;  %3965 = vmatprep.subr.bf16.mxu0 %v16730_v52  ;;  %v3364_v52 = vrot.slane %v3249_v42, %v19882_v32 }
 0x595   : > { %3768 = vmatprep.subr.bf16.mxu1 %v16739_v50  ;;  %v3360_v50 = vrot.slane %v3249_v42, %v19879_v30 }
 0x596   : > { %14919 = vmatmul.mubr.msk.bf16.vlgmr.msra.gmra.mxu0 %vm3311_vm10, %v3505_v38  ;;  %vm1852_vm10 = vcmask 258052  }
 0x597   : > { %3966 = vmatpush1.bf16.msra.mxu0 %v16728_v54  ;;  %vm1858_vm3 = vmand %vm1852_vm10, %vm20692_vm15 }
 0x598   : > { %3769 = vmatpush1.bf16.msra.mxu1 %v16737_v51  ;;  %3967 = vmatprep.subr.bf16.mxu0 %v16736_v59  ;;  %vm20018_vm13 = vmor %vm1858_vm3, %vm19858_vm12  ;;  %vm20698_vm12 = vsmask.f32 7954 }
 0x599   : > { %3770 = vmatprep.subr.bf16.mxu1 %v16745_v55  ;;  %vm1853_vm2 = vmand %vm1852_vm10, %vm20695_vm1  ;;  %v1861_v48 = vsel %vm20018_vm13, 0, %v1860_v7  ;;  %vm20555_vm1 = vcmask 261120  }
 0x59a   : > { %vm20026_vm15 = vmor %vm1853_vm2, %vm19842_vm7  ;;  %1862 = vst [vmem:[#allocation3 + $0x8] sm:$0x11] %v1861_v48  ;;  %vm3621_vm2 = vcmask 261124  }
 0x59b   : > { %3968 = vmatpush1.bf16.msra.mxu0 %v16734_v58  ;;  %v1856_v11 = vsel %vm20026_vm15, 0, %v1855_v6  ;;  %vm3622_vm10 = vmand %vm3621_vm2, %vm20698_vm12  ;;  %vm4220_vm2 = vcmask 80896   ;;  %vm1870_vm12 = vsmask.f32 7946 }
 0x59c   : > { %3771 = vmatpush1.bf16.msra.mxu1 %v16743_v57  ;;  %3969 = vmatprep.subr.bf16.mxu0 %v16742_v62  ;;  %1857 = vst [vmem:[#allocation3] sm:$0x11] %v1856_v11  ;;  %vm20039_vm3 = vmor %vm3622_vm10, %vm19887_vm5  ;;  %vm4224_vm5 = vcmask 1044480   ;;  %vm1922_vm10 = vcmask 778240  }
 0x59d   : > { %3772 = vmatprep.subr.bf16.mxu1 %v16751_v60 }
 0x59f   : > { %3970 = vmatpush1.bf16.msra.mxu0 %v16740_v63 }
 0x5a0   : > { %3773 = vmatpush1.bf16.msra.mxu1 %v16749_v61  ;;  %3971 = vmatprep.subr.bf16.mxu0 %v16748_v10 }
 0x5a1   : > { %3774 = vmatprep.subr.bf16.mxu1 %v16757_v1 }
 0x5a3   : > { %3972 = vmatpush1.bf16.msra.mxu0 %v16746_v9 }
 0x5a4   : > { %3775 = vmatpush1.bf16.msra.mxu1 %v16755_v5  ;;  %3973 = vmatprep.subr.bf16.mxu0 %v16754_v14 }
 0x5a5   : > { %3776 = vmatprep.subr.bf16.mxu1 %v16763_v13  ;;  %v3627_v13 = vld [vmem:[#allocation3 + $0x8] sm:$0x11] }
 0x5a7   : > { %3974 = vmatpush1.bf16.msra.mxu0 %v16752_v15 }
 0x5a8   : > { %3777 = vmatpush1.bf16.msra.mxu1 %v16761_v12  ;;  %3975 = vmatprep.subr.bf16.mxu0 %v16760_v18  ;;  %v3624_v12 = vld [vmem:[#allocation3] sm:$0xff] }
 0x5a9   : > { %3790 = vmatprep.subr.bf16.mxu1 %v16769_v16 }
 0x5ab   : > { %3976 = vmatpush1.bf16.msra.mxu0 %v16758_v19  ;;  %v16779_v19 = vld [vmem:[#allocation27 + $0x1b0] ss:$8 sps:$4 sm:$0xff]  }
 0x5ac   : > { %3791 = vmatpush2.bf16.msra.mxu1 %v16767_v17  ;;  %3977 = vmatprep.subr.bf16.mxu0 %v16766_v20  ;;  %v16791_v20 = vld [vmem:[#allocation27 + $0x194] ss:$8 sps:$4 sm:$0xff]  }
 0x5ad   : > { %3792 = vmatprep.subr.bf16.mxu1 %v16775_v21  ;;  %v16788_v21 = vld [vmem:[#allocation27 + $0x1a4] ss:$8 sps:$4 sm:$0xff]  }
 0x5af   : > { %3978 = vmatpush1.bf16.msra.mxu0 %v16764_v23 }
 0x5b0   : > { %3793 = vmatpush2.bf16.msra.mxu1 %v16773_v22  ;;  %3979 = vmatprep.subr.bf16.mxu0 %v16772_v24  ;;  %v16786_v22 = vld [vmem:[#allocation27 + $0x1a0] ss:$8 sps:$4 sm:$0xff]  }
 0x5b1   : > { %4141 = vmatprep.subr.bf16.mxu1 %v16781_v25 }
 0x5b3   : > { %3980 = vmatpush1.bf16.msra.mxu0 %v16770_v27 }
 0x5b4   : > { %3993 = vmatprep.subr.bf16.mxu0 %v16778_v31 }
 0x5b7   : > { %3994 = vmatpush2.bf16.msra.mxu0 %v16776_v33  ;;  %v16789_v33 = vld [vmem:[#allocation27 + $0x190] ss:$8 sps:$4 sm:$0xff]  }
 0x5b8   : > { %3995 = vmatprep.subr.bf16.mxu0 %v16785_v36 }
 0x5bb   : > { %3996 = vmatpush2.bf16.msra.mxu0 %v16783_v34  ;;  %v16794_v34 = vld [vmem:[#allocation27 + $0x184] ss:$8 sps:$4 sm:$0xff]  }
 0x642   : > { %v3349_v37 = vpop.f32.mrf.mxu0 }
 0x643   : > { %v3367_v54 = vadd.f32 %v3360_v50, %v3349_v37 }
 0x644   : > { %v3351_v38 = vpop.f32.mrf.mxu0 }
 0x645   : > { %v3368_v55 = vadd.f32 %v3364_v52, %v3351_v38  ;;  %v16795_v52 = vld [vmem:[#allocation27 + $0x170] ss:$8 sps:$4 sm:$0xff]  }
 0x646   : > { %v3353_v39 = vpop.f32.mrf.mxu0 }
 0x648   : > { %v3354_v40 = vpop.f32.mrf.mxu0 }
 0x64b   : > { %v3481_v41 = vpop.f32.mrf.mxu1 }
 0x64c   : > { %v3488_v57 = vadd.f32 %v3481_v41, %v3367_v54  ;;  %v16792_v41 = vld [vmem:[#allocation27 + $0x180] ss:$8 sps:$4 sm:$0xff]   ;;  %v16800_v54 = vld [vmem:[#allocation27 + $0x164] ss:$8 sps:$4 sm:$0xff]  }
 0x64d   : > { %v3483_v45 = vpop.f32.mrf.mxu1 }
 0x64e   : > { %v3489_v59 = vadd.f32 %v3483_v45, %v3368_v55  ;;  %v16798_v55 = vld [vmem:[#allocation27 + $0x160] ss:$8 sps:$4 sm:$0xff]  }
 0x64f   : > { %v3485_v49 = vpop.f32.mrf.mxu1 }
 0x650   : > { %v16797_v49 = vld [vmem:[#allocation27 + $0x174] ss:$8 sps:$4 sm:$0xff]  }
 0x651   : > { %v3486_v51 = vpop.f32.mrf.mxu1 }
 0x656   : > { %v3593_v58 = vpop.f32.mrf.mxu0 }
 0x657   : > { %v3600_v60 = vadd.f32 %v3593_v58, %v3488_v57  ;;  %v16803_v57 = vld [vmem:[#allocation27 + $0x154] ss:$8 sps:$4 sm:$0xff]   ;;  %v16801_v58 = vld [vmem:[#allocation27 + $0x150] ss:$8 sps:$4 sm:$0xff]  }
 0x658   : > { %v3595_v61 = vpop.f32.mrf.mxu0 }
 0x659   : > { %v3601_v62 = vadd.f32 %v3595_v61, %v3489_v59  ;;  %v3602_v1 = vmax.f32 %v3600_v60, 0.0  ;;  %v16806_v59 = vld [vmem:[#allocation27 + $0x144] ss:$8 sps:$4 sm:$0xff]   ;;  %v16804_v60 = vld [vmem:[#allocation27 + $0x140] ss:$8 sps:$4 sm:$0xff]  }
 0x65a   : > { %v3597_v63 = vpop.f32.mrf.mxu0  ;;  %v16809_v61 = vld [vmem:[#allocation27 + $0x1d4] ss:$8 sps:$4 sm:$0xff]  }
 0x65b   : > { %v3603_v5 = vmax.f32 %v3601_v62, 0.0  ;;  %v16807_v62 = vld [vmem:[#allocation27 + $0x1d0] ss:$8 sps:$4 sm:$0xff]   ;;  %v16812_v63 = vld [vmem:[#allocation27 + $0x1c4] ss:$8 sps:$4 sm:$0xff]  }
 0x65c   : > { %v3598_v6 = vpop.f32.mrf.mxu0 }
 0x65d   : > { %v16178_v7 = vpack.c.bf16 %v3603_v5, %v3602_v1  ;;  %v16810_v1 = vld [vmem:[#allocation27 + $0x1c0] ss:$8 sps:$4 sm:$0xff]  }
 0x65f   : > { %v3612_v48 = vshrl.u32 %v16178_v7, 16  ;;  %v3615_v10 = vshll.u32 %v16178_v7, 16  ;;  %v1901_v7 = vld [vmem:[#allocation7 + $0x8] sm:$0x11] }
 0x661   : > { %v3614_v9 = vrot.slane %v3612_v48, 7  ;;  %v1904_v48 = vld [vmem:[#allocation7] sm:$0x11] }
 0x663   : > { %v3617_v14 = vor.u32 %v3615_v10, %v3614_v9  ;;  %v3618_v15 = vrot.slane %v3614_v9, 4  ;;  %v1902_v9 = vsel %vm20026_vm15, 0, %v1901_v7  ;;  %v1905_v10 = vsel %vm20018_vm13, 0, %v1904_v48  ;;  %v4211_v7 = vld [vmem:[%s20702_s21] sm:$0x3] }
 0x664   : > { %1903 = vst [vmem:[#allocation7 + $0x8] sm:$0x11] %v1902_v9  ;;  %1906 = vst [vmem:[#allocation7] sm:$0x11] %v1905_v10  ;;  %v14995_v48 = vld [vmem:[%s20702_s21 + $0x2] sm:$0x3] }
 0x665   : > { %v3625_v16 = vsel %vm20039_vm3, %v3617_v14, %v3624_v12  ;;  %v3628_v17 = vsel %vm20026_vm15, %v3618_v15, %v3627_v13  ;;  %v16815_v12 = vld [vmem:[#allocation29 + $0x88] sm:$0xff]   ;;  %v16817_v13 = vld [vmem:[#allocation29 + $0x80] sm:$0xff]   ;;  %v16819_v14 = vld [vmem:[#allocation29 + $0x78] sm:$0xff]  }
 0x666   : > { %3626 = vst [vmem:[#allocation3] sm:$0xff] %v3625_v16  ;;  %3629 = vst [vmem:[#allocation3 + $0x8] sm:$0x11] %v3628_v17  ;;  %v14922_v18 = vcombine.high %v3625_v16, %v3625_v16  ;;  %v14921_v35 = vcombine.low %v3625_v16, %v3625_v16  ;;  %v16821_v15 = vld [vmem:[#allocation29 + $0x70] sm:$0xff]   ;;  %v16825_v17 = vld [vmem:[#allocation29 + $0x60] sm:$0xff]  }
 0x667   : > { %v16814_v9 = vld [vmem:[#allocation29 + $0x38] sm:$0xff]   ;;  %v16816_v10 = vld [vmem:[#allocation29 + $0x30] sm:$0xff]  }
 0x668   : > { %14943 = vmatprep.mubr.msk.bf16.mxu1 %vm20555_vm1, %v14922_v18 }
 0x669   : > { %3795 = vmatmul.mubr.bf16.vlgmr.msra.gmra.mxu1 %v14921_v35 }
 0x66a   : > { %4142 = vmatpush1.bf16.msra.mxu1 %v16779_v19 }
 0x66b   : > { %4143 = vmatprep.subr.bf16.mxu1 %v16788_v21 }
 0x66d   : > { %v3817_v23 = vld [vmem:[#allocation3 + $0x8] sm:$0x11]  ;;  %v4008_v24 = vld [vmem:[#allocation3] sm:$0xee] }
 0x66e   : > { %v14968_v25 = vcombine.high %v4008_v24, %v3817_v23  ;;  %4144 = vmatpush1.bf16.msra.mxu1 %v16786_v22  ;;  %v14945_v27 = vcombine.high %v3625_v16, %v3817_v23  ;;  %v14944_v31 = vcombine.low %v3625_v16, %v3817_v23  ;;  %v14967_v5 = vcombine.low %v4008_v24, %v3817_v23  ;;  %v16823_v16 = vld [vmem:[#allocation29 + $0x68] sm:$0xff]  }
 0x66f   : > { %4145 = vmatprep.subr.bf16.mxu1 %v16791_v20 }
 0x670   : > { %v4036_v36 = vrot.slane %v14968_v25, 1  ;;  %v3857_v37 = vshll.u32 %v14945_v27, 16  ;;  %v3850_v38 = vshll.u32 %v14944_v31, 16  ;;  %v3855_v39 = vshrl.u32 %v14945_v27, 16  ;;  %v3630_v25 = vld [vmem:[%s20701_s1] sm:$0x3] }
 0x671   : > { %v3848_v42 = vshrl.u32 %v14944_v31, 16  ;;  %v4035_v6 = vrot.slane %v14967_v5, 1  ;;  %v3807_v27 = vrot.slane %v3630_v25, %v19879_v30  ;;  %v3811_v31 = vrot.slane %v3630_v25, %v19882_v32  ;;  %s20751_s1 = sld [smem:[#allocation101_spill]] }
 0x672   : > { %14989 = vmatprep.mubr.msk.bf16.mxu1 %vm20555_vm1, %v4036_v36  ;;  %v3859_v40 = vrot.slane %v3857_v37, 1  ;;  %4146 = vmatpush1.bf16.msra.mxu1 %v16789_v33  ;;  %v3852_v45 = vrot.slane %v3850_v38, 1 }
 0x673   : > { %4147 = vmatprep.subr.bf16.mxu1 %v16794_v34 }
 0x674   : > { %v3860_v50 = vor.u32 %v3859_v40, %v3855_v39  ;;  %v3853_v51 = vor.u32 %v3852_v45, %v3848_v42 }
 0x676   : > { %14966 = vmatprep.mubr.msk.bf16.mxu0 %vm20555_vm1, %v3860_v50  ;;  %4148 = vmatpush1.bf16.msra.mxu1 %v16792_v41 }
 0x677   : > { %3998 = vmatmul.mubr.bf16.vlgmr.msra.gmra.mxu0 %v3853_v51  ;;  %4149 = vmatprep.subr.bf16.mxu1 %v16797_v49 }
 0x678   : > { %4263 = vmatprep.mubr.bf16.mxu0 %v19238_v0 }
 0x67a   : > { %4150 = vmatpush1.bf16.msra.mxu1 %v16795_v52 }
 0x67b   : > { %4151 = vmatprep.subr.bf16.mxu1 %v16800_v54 }
 0x67e   : > { %4152 = vmatpush1.bf16.msra.mxu1 %v16798_v55 }
 0x67f   : > { %4153 = vmatprep.subr.bf16.mxu1 %v16803_v57  ;;  %v4203_v57 = vld [vmem:[#allocation7 + $0x8] sm:$0xff] }
 0x682   : > { %4154 = vmatpush1.bf16.msra.mxu1 %v16801_v58  ;;  %v4206_v58 = vld [vmem:[#allocation7] sm:$0x11] }
 0x683   : > { %4155 = vmatprep.subr.bf16.mxu1 %v16806_v59 }
 0x686   : > { %4156 = vmatpush1.bf16.msra.mxu1 %v16804_v60 }
 0x687   : > { %4169 = vmatprep.subr.bf16.mxu1 %v16809_v61 }
 0x68a   : > { %4170 = vmatpush2.bf16.msra.mxu1 %v16807_v62 }
 0x68b   : > { %4171 = vmatprep.subr.bf16.mxu1 %v16812_v63 }
 0x68e   : > { %4172 = vmatpush2.bf16.msra.mxu1 %v16810_v1 }
 0x68f   : > { %4526 = vmatprep.subr.bf16.mxu1 %v19238_v0 }
 0x691   : > { %4174 = vmatmul.mubr.bf16.vlgmr.msra.gmra.mxu1 %v4035_v6 }
 0x692   : > { %4527 = vmatpush1.bf16.msra.mxu1 %v16815_v12  ;;  %v16818_v12 = vld [vmem:[#allocation29 + $0x28] sm:$0xff]  }
 0x693   : > { %4528 = vmatprep.subr.bf16.mxu1 %v19238_v0 }
 0x696   : > { %4529 = vmatpush1.bf16.msra.mxu1 %v16817_v13  ;;  %v16820_v13 = vld [vmem:[#allocation29 + $0x20] sm:$0xff]  }
 0x697   : > { %4530 = vmatprep.subr.bf16.mxu1 %v19238_v0 }
 0x69a   : > { %4531 = vmatpush1.bf16.msra.mxu1 %v16819_v14  ;;  %v16822_v14 = vld [vmem:[#allocation29 + $0x18] sm:$0xff]  }
 0x69b   : > { %4532 = vmatprep.subr.bf16.mxu1 %v19238_v0 }
 0x69e   : > { %4533 = vmatpush1.bf16.msra.mxu1 %v16821_v15  ;;  %v16824_v15 = vld [vmem:[#allocation29 + $0x10] sm:$0xff]  }
 0x69f   : > { %4534 = vmatprep.subr.bf16.mxu1 %v19238_v0 }
 0x6a2   : > { %4535 = vmatpush1.bf16.msra.mxu1 %v16823_v16  ;;  %v16826_v16 = vld [vmem:[#allocation29 + $0x8] sm:$0xff]  }
 0x6a3   : > { %4536 = vmatprep.subr.bf16.mxu1 %v19238_v0 }
 0x6a6   : > { %4537 = vmatpush1.bf16.msra.mxu1 %v16825_v17  ;;  %v16827_v17 = vld [vmem:[#allocation29 + $0x58] sm:$0xff]  }
 0x6a7   : > { %4538 = vmatprep.subr.bf16.mxu1 %v19238_v0 }
 0x6aa   : > { %4539 = vmatpush1.bf16.msra.mxu1 %v16827_v17  ;;  %v16875_v17 = vld [vmem:[#allocation30 + $0x64] ss:$8 sps:$4 sm:$0xff]  }
 0x6ab   : > { %4540 = vmatprep.subr.bf16.mxu1 %v19238_v0 }
 0x729   : > { %v3796_v18 = vpop.f32.mrf.mxu1 }
 0x72a   : > { %v3814_v33 = vadd.f32 %v3807_v27, %v3796_v18  ;;  %v16828_v18 = vld [vmem:[#allocation29] sm:$0xff]  }
 0x72b   : > { %v3798_v19 = vpop.f32.mrf.mxu1 }
 0x72c   : > { %v3815_v34 = vadd.f32 %v3811_v31, %v3798_v19  ;;  %v16829_v19 = vld [vmem:[#allocation29 + $0x50] sm:$0xff]  }
 0x72d   : > { %v3800_v35 = vpop.f32.mrf.mxu1  ;;  %4541 = vmatpush1.bf16.msra.mxu1 %v16829_v19 }
 0x72e   : > { %4554 = vmatprep.subr.bf16.mxu1 %v19238_v0  ;;  %v16830_v35 = vld [vmem:[#allocation29 + $0x48] sm:$0xff]  }
 0x72f   : > { %v3801_v21 = vpop.f32.mrf.mxu1 }
 0x730   : > { %v16831_v21 = vld [vmem:[#allocation29 + $0x98] sm:$0xff]  }
 0x731   : > { %4555 = vmatpush2.bf16.msra.mxu1 %v16831_v21 }
 0x732   : > { %4556 = vmatprep.subr.bf16.mxu1 %v19238_v0 }
 0x737   : > { %v3999_v22 = vpop.f32.mrf.mxu0 }
 0x738   : > { %v4006_v36 = vadd.f32 %v3999_v22, %v3814_v33  ;;  %v16832_v22 = vld [vmem:[#allocation29 + $0x40] sm:$0xff]  }
 0x739   : > { %v4001_v20 = vpop.f32.mrf.mxu0 }
 0x73a   : > { %v4007_v38 = vadd.f32 %v4001_v20, %v3815_v34  ;;  %v16833_v20 = vld [vmem:[#allocation29 + $0x90] sm:$0xff]  }
 0x73b   : > { %v4003_v23 = vpop.f32.mrf.mxu0  ;;  %4557 = vmatpush2.bf16.msra.mxu1 %v16833_v20 }
 0x73c   : > { %v16836_v23 = vld [vmem:[#allocation30 + $0x54] ss:$8 sps:$4 sm:$0xff]  }
 0x73d   : > { %v4004_v24 = vpop.f32.mrf.mxu0 }
 0x751   : > { %v4175_v37 = vpop.f32.mrf.mxu1 }
 0x752   : > { %v4182_v39 = vadd.f32 %v4175_v37, %v4006_v36 }
 0x753   : > { %v4177_v40 = vpop.f32.mrf.mxu1 }
 0x754   : > { %v4183_v41 = vadd.f32 %v4177_v40, %v4007_v38  ;;  %v4184_v45 = vmax.f32 %v4182_v39, 0.0  ;;  %v16834_v40 = vld [vmem:[#allocation30 + $0x50] ss:$8 sps:$4 sm:$0xff]  }
 0x755   : > { %v4179_v42 = vpop.f32.mrf.mxu1 }
 0x756   : > { %v4185_v49 = vmax.f32 %v4183_v41, 0.0 }
 0x757   : > { %v4180_v50 = vpop.f32.mrf.mxu1 }
 0x758   : > { %v16179_v51 = vpack.c.bf16 %v4185_v49, %v4184_v45  ;;  %v16839_v45 = vld [vmem:[#allocation30 + $0x44] ss:$8 sps:$4 sm:$0xff]   ;;  %v16837_v49 = vld [vmem:[#allocation30 + $0x40] ss:$8 sps:$4 sm:$0xff]  }
 0x759   : > { %v1924_v50 = vld [vmem:[#allocation10] sm:$0x1] }
 0x75a   : > { %v4194_v52 = vshrl.u32 %v16179_v51, 16  ;;  %v4197_v55 = vshll.u32 %v16179_v51, 16  ;;  %v16840_v51 = vld [vmem:[#allocation30 + $0x30] ss:$8 sps:$4 sm:$0xff]  }
 0x75c   : > { %v4196_v54 = vrot.slane %v4194_v52, 7  ;;  %v16842_v52 = vld [vmem:[#allocation30 + $0x34] ss:$8 sps:$4 sm:$0xff]  }
 0x75e   : > { %v4199_v59 = vor.u32 %v4197_v55, %v4196_v54  ;;  %v4200_v60 = vrot.slane %v4196_v54, 4  ;;  %v1929_v54 = vld [vmem:[#allocation10] sm:$0x4]  ;;  %v16843_v55 = vld [vmem:[#allocation30 + $0xb0] ss:$8 sps:$4 sm:$0xff]  }
 0x760   : > { %v4204_v61 = vsel %vm20039_vm3, %v4199_v59, %v4203_v57  ;;  %v4207_v62 = vsel %vm20026_vm15, %v4200_v60, %v4206_v58  ;;  %v16845_v57 = vld [vmem:[#allocation30 + $0xb4] ss:$8 sps:$4 sm:$0xff]   ;;  %v16848_v59 = vld [vmem:[#allocation30 + $0x24] ss:$8 sps:$4 sm:$0xff]  }
 0x761   : > { %4205 = vst [vmem:[#allocation7 + $0x8] sm:$0xff] %v4204_v61  ;;  %4208 = vst [vmem:[#allocation7] sm:$0x11] %v4207_v62  ;;  %4808 = vmatprep.subr.bf16.mxu1 %v16845_v57  ;;  %v16851_v60 = vld [vmem:[#allocation30 + $0xa4] ss:$8 sps:$4 sm:$0xff]  }
 0x762   : > { %v16846_v62 = vld [vmem:[#allocation30 + $0x20] ss:$8 sps:$4 sm:$0xff]   ;;  %v16882_v57 = vld [vmem:[#allocation30 + $0xe4] ss:$8 sps:$4 sm:$0xff]  }
 0x768   : > { %v4210_v63 = vld [vmem:[#allocation7] sm:$0x11] }
 0x769   : > { %v14992_v1 = vcombine.high %v4204_v61, %v4210_v63  ;;  %v14991_v5 = vcombine.low %v4204_v61, %v4210_v63  ;;  %v16849_v63 = vld [vmem:[#allocation30 + $0xa0] ss:$8 sps:$4 sm:$0xff]  }
 0x76b   : > { %14993 = vmatprep.subr.msk.bf16.mxu0 %vm4224_vm5, %v14992_v1  ;;  %v4226_v6 = vsel %vm4224_vm5, %v14991_v5, 0  ;;  %v16852_v5 = vld [vmem:[#allocation30 + $0x10] ss:$8 sps:$4 sm:$0xff]  }
 0x76c   : > { %4246 = vmatpush1.bf16.msra.mxu0 %v4226_v6 }
 0x76d   : > { %14996 = vmatprep.subr.msk.bf16.mxu0 %vm4224_vm5, %v14992_v1  ;;  %vm1927_vm5 = vcmask 780290   ;;  %v16854_v1 = vld [vmem:[#allocation30 + $0x14] ss:$8 sps:$4 sm:$0xff]  }
 0x76f   : > { %14994 = vmatmul.mubr.msk.bf16.vlgmr.msra.gmra.mxu0 %vm4220_vm2, %v4211_v7  ;;  %v16857_v7 = vld [vmem:[#allocation30 + $0x94] ss:$8 sps:$4 sm:$0xff]  }
 0x770   : > { %4292 = vmatpush1.bf16.msra.mxu0 %v4226_v6  ;;  %4309 = vmatprep.mubr.bf16.mxu0 %v19238_v0  ;;  %v16855_v6 = vld [vmem:[#allocation30 + $0x90] ss:$8 sps:$4 sm:$0xff]  }
 0x771   : > { %4405 = vmatprep.subr.bf16.mxu0 %v19238_v0 }
 0x777   : > { %14997 = vmatmul.mubr.msk.bf16.vlgmr.msra.gmra.mxu0 %vm4220_vm2, %v14995_v48  ;;  %vm1923_vm2 = vmand %vm1922_vm10, %vm1835_vm4  ;;  %v16858_v48 = vld [vmem:[#allocation30] ss:$8 sps:$4 sm:$0xff]   ;;  %vm4579_vm4 = vcmask 780288  }
 0x778   : > { %4406 = vmatpush1.bf16.msra.mxu0 %v16814_v9  ;;  %v1925_v58 = vsel %vm1923_vm2, 0, %v1924_v50  ;;  %v16860_v9 = vld [vmem:[#allocation30 + $0x4] ss:$8 sps:$4 sm:$0xff]   ;;  %vm20558_vm2 = vcmask 1042434  }
 0x779   : > { %4407 = vmatprep.subr.bf16.mxu0 %v19238_v0  ;;  %1926 = vst [vmem:[#allocation10] sm:$0x1] %v1925_v58  ;;  %v16880_v58 = vld [vmem:[#allocation30 + $0xe0] ss:$8 sps:$4 sm:$0xff]  }
 0x77c   : > { %4408 = vmatpush1.bf16.msra.mxu0 %v16816_v10  ;;  %v16861_v10 = vld [vmem:[#allocation30 + $0x80] ss:$8 sps:$4 sm:$0xff]  }
 0x77d   : > { %4409 = vmatprep.subr.bf16.mxu0 %v19238_v0 }
 0x780   : > { %4410 = vmatpush1.bf16.msra.mxu0 %v16818_v12  ;;  %v16863_v12 = vld [vmem:[#allocation30 + $0x84] ss:$8 sps:$4 sm:$0xff]  }
 0x781   : > { %4411 = vmatprep.subr.bf16.mxu0 %v19238_v0 }
 0x784   : > { %4412 = vmatpush1.bf16.msra.mxu0 %v16820_v13  ;;  %v16866_v13 = vld [vmem:[#allocation30 + $0x114] ss:$8 sps:$4 sm:$0xff]  }
 0x785   : > { %4413 = vmatprep.subr.bf16.mxu0 %v19238_v0 }
 0x788   : > { %4414 = vmatpush1.bf16.msra.mxu0 %v16822_v14  ;;  %v16869_v14 = vld [vmem:[#allocation30 + $0x74] ss:$8 sps:$4 sm:$0xff]  }
 0x789   : > { %4415 = vmatprep.subr.bf16.mxu0 %v19238_v0 }
 0x78c   : > { %4416 = vmatpush1.bf16.msra.mxu0 %v16824_v15  ;;  %v16867_v15 = vld [vmem:[#allocation30 + $0x70] ss:$8 sps:$4 sm:$0xff]  }
 0x78d   : > { %4417 = vmatprep.subr.bf16.mxu0 %v19238_v0 }
 0x790   : > { %4418 = vmatpush1.bf16.msra.mxu0 %v16826_v16  ;;  %v16873_v16 = vld [vmem:[#allocation30 + $0x60] ss:$8 sps:$4 sm:$0xff]  }
 0x791   : > { %4419 = vmatprep.subr.bf16.mxu0 %v19238_v0 }
 0x794   : > { %4420 = vmatpush1.bf16.msra.mxu0 %v16828_v18 }
 0x795   : > { %4433 = vmatprep.subr.bf16.mxu0 %v19238_v0 }
 0x798   : > { %4434 = vmatpush2.bf16.msra.mxu0 %v16830_v35 }
 0x799   : > { %4435 = vmatprep.subr.bf16.mxu0 %v19238_v0 }
 0x79c   : > { %4436 = vmatpush2.bf16.msra.mxu0 %v16832_v22 }
 0x79d   : > { %4667 = vmatprep.subr.bf16.mxu0 %v16836_v23 }
 0x82f   : > { %v4265_v24 = vpop.f32.mrf.mxu0 }
 0x831   : > { %v4267_v25 = vpop.f32.mrf.mxu0 }
 0x833   : > { %v4269_v27 = vpop.f32.mrf.mxu0 }
 0x835   : > { %v4270_v31 = vpop.f32.mrf.mxu0 }
 0x837   : > { %v4311_v33 = vpop.f32.mrf.mxu0 }
 0x838   : > { %v4318_v34 = vmax.f32 %v4265_v24, %v4311_v33 }
 0x839   : > { %v4313_v36 = vpop.f32.mrf.mxu0 }
 0x83a   : > { %v4319_v37 = vmax.f32 %v4267_v25, %v4313_v36  ;;  %v4320_v41 = vpack.c.bf16 %v4318_v34, %v4318_v34 }
 0x83b   : > { %v4315_v38 = vpop.f32.mrf.mxu0 }
 0x83c   : > { %v4321_v39 = vpack.c.bf16 %v4319_v37, %v4319_v37 }
 0x83d   : > { %v4316_v42 = vpop.f32.mrf.mxu0 }
 0x83e   : > { %15008 = vmatprep.mubr.msk.bf16.mxu0 %vm20555_vm1, %v4321_v39  ;;  %15019 = vmatprep.mubr.msk.bf16.mxu1 %vm20555_vm1, %v4321_v39  ;;  %vm1928_vm1 = vmand %vm1927_vm5, %vm1870_vm12  ;;  %v16864_v39 = vld [vmem:[#allocation30 + $0x110] ss:$8 sps:$4 sm:$0xff]   ;;  %vm4659_vm5 = vcmask 785408  }
 0x83f   : > { %4438 = vmatmul.mubr.bf16.vlgmr.msra.gmra.mxu0 %v4320_v41  ;;  %4559 = vmatmul.mubr.bf16.vlgmr.msra.gmra.mxu1 %v4320_v41  ;;  %v1930_v61 = vsel %vm1928_vm1, 0, %v1929_v54  ;;  %vm20557_vm1 = vsmask.f32 2306  ;;  %v16876_v54 = vld [vmem:[#allocation30 + $0xf0] ss:$8 sps:$4 sm:$0xff]  }
 0x840   : > { %4668 = vmatpush1.bf16.msra.mxu0 %v16834_v40  ;;  %4695 = vmatprep.mubr.bf16.mxu0 %v19238_v0  ;;  %1931 = vst [vmem:[#allocation10] sm:$0x4] %v1930_v61  ;;  %vm4581_vm10 = vmand %vm4579_vm4, %vm20557_vm1  ;;  %v16872_v40 = vld [vmem:[#allocation30 + $0x104] ss:$8 sps:$4 sm:$0xff]   ;;  %vm1872_vm4 = vcmask 522246  }
 0x841   : > { %4669 = vmatprep.subr.bf16.mxu0 %v16839_v45  ;;  %4836 = vmatprep.mubr.bf16.mxu1 %v19238_v0  ;;  %v16870_v45 = vld [vmem:[#allocation30 + $0x100] ss:$8 sps:$4 sm:$0xff]   ;;  %v16888_v61 = vld [vmem:[#allocation30 + $0xc4] ss:$8 sps:$4 sm:$0xff]  }
 0x842   : > { %4809 = vmatpush1.bf16.msra.mxu1 %v16843_v55 }
 0x843   : > { %4810 = vmatprep.subr.bf16.mxu1 %v16851_v60  ;;  %v16883_v60 = vld [vmem:[#allocation30 + $0xd0] ss:$8 sps:$4 sm:$0xff]  }
 0x844   : > { %4670 = vmatpush1.bf16.msra.mxu0 %v16837_v49  ;;  %v16878_v49 = vld [vmem:[#allocation30 + $0xf4] ss:$8 sps:$4 sm:$0xff]  }
 0x845   : > { %4671 = vmatprep.subr.bf16.mxu0 %v16842_v52 }
 0x846   : > { %4811 = vmatpush1.bf16.msra.mxu1 %v16849_v63 }
 0x847   : > { %4812 = vmatprep.subr.bf16.mxu1 %v16857_v7  ;;  %v4582_v36 = vld [vmem:[#allocation10] sm:$0x7]  ;;  %v16893_v7 = vld [vmem:[#allocation32 + $0x60] ss:$8 sps:$4 sm:$0xff]  }
 0x848   : > { %4672 = vmatpush1.bf16.msra.mxu0 %v16840_v51 }
 0x849   : > { %4673 = vmatprep.subr.bf16.mxu0 %v16848_v59  ;;  %v16885_v59 = vld [vmem:[#allocation30 + $0xd4] ss:$8 sps:$4 sm:$0xff]  }
 0x84a   : > { %4813 = vmatpush1.bf16.msra.mxu1 %v16855_v6  ;;  %v16890_v6 = vld [vmem:[#allocation32 + $0x70] ss:$8 sps:$4 sm:$0xff]  }
 0x84b   : > { %4814 = vmatprep.subr.bf16.mxu1 %v16863_v12  ;;  %v16901_v12 = vld [vmem:[#allocation32 + $0x54] ss:$8 sps:$4 sm:$0xff]  }
 0x84c   : > { %4674 = vmatpush1.bf16.msra.mxu0 %v16846_v62  ;;  %v16886_v62 = vld [vmem:[#allocation30 + $0xc0] ss:$8 sps:$4 sm:$0xff]  }
 0x84d   : > { %4675 = vmatprep.subr.bf16.mxu0 %v16854_v1 }
 0x84e   : > { %4815 = vmatpush1.bf16.msra.mxu1 %v16861_v10  ;;  %v16896_v10 = vld [vmem:[#allocation32 + $0x130] ss:$8 sps:$4 sm:$0xff]  }
 0x84f   : > { %4816 = vmatprep.subr.bf16.mxu1 %v16869_v14  ;;  %v16904_v14 = vld [vmem:[#allocation32 + $0x124] ss:$8 sps:$4 sm:$0xff]  }
 0x850   : > { %4676 = vmatpush1.bf16.msra.mxu0 %v16852_v5  ;;  %v16892_v5 = vld [vmem:[#allocation32 + $0x74] ss:$8 sps:$4 sm:$0xff]  }
 0x851   : > { %4677 = vmatprep.subr.bf16.mxu0 %v16860_v9  ;;  %v16898_v9 = vld [vmem:[#allocation32 + $0x134] ss:$8 sps:$4 sm:$0xff]  }
 0x852   : > { %4817 = vmatpush1.bf16.msra.mxu1 %v16867_v15  ;;  %v16902_v15 = vld [vmem:[#allocation32 + $0x120] ss:$8 sps:$4 sm:$0xff]  }
 0x853   : > { %4818 = vmatprep.subr.bf16.mxu1 %v16875_v17  ;;  %v16907_v17 = vld [vmem:[#allocation32 + $0x44] ss:$8 sps:$4 sm:$0xff]  }
 0x854   : > { %4678 = vmatpush1.bf16.msra.mxu0 %v16858_v48  ;;  %v16895_v48 = vld [vmem:[#allocation32 + $0x64] ss:$8 sps:$4 sm:$0xff]  }
 0x855   : > { %4932 = vmatprep.subr.bf16.mxu0 %v16866_v13  ;;  %v16899_v13 = vld [vmem:[#allocation32 + $0x50] ss:$8 sps:$4 sm:$0xff]  }
 0x856   : > { %4819 = vmatpush1.bf16.msra.mxu1 %v16873_v16  ;;  %v16905_v16 = vld [vmem:[#allocation32 + $0x40] ss:$8 sps:$4 sm:$0xff]  }
 0x857   : > { %5153 = vmatprep.subr.bf16.mxu1 %v16892_v5  ;;  %v16958_v5 = vld [vmem:[#allocation32 + $0x154] ss:$8 sps:$4 sm:$0xff]  }
 0x8ff   : > { %v4439_v18 = vpop.f32.mrf.mxu0  ;;  %v4560_v19 = vpop.f32.mrf.mxu1 }
 0x900   : > { %v4566_v35 = vmax.f32 %v4439_v18, %v4560_v19  ;;  %v16908_v18 = vld [vmem:[#allocation32 + $0x110] ss:$8 sps:$4 sm:$0xff]   ;;  %v16910_v19 = vld [vmem:[#allocation32 + $0x114] ss:$8 sps:$4 sm:$0xff]  }
 0x901   : > { %v4441_v21 = vpop.f32.mrf.mxu0  ;;  %v4562_v22 = vpop.f32.mrf.mxu1 }
 0x902   : > { %v16180_v20 = vpack.c.bf16 %v4566_v35, %v4566_v35  ;;  %v16911_v35 = vld [vmem:[#allocation32 + $0x30] ss:$8 sps:$4 sm:$0xff]   ;;  %v16913_v21 = vld [vmem:[#allocation32 + $0x34] ss:$8 sps:$4 sm:$0xff]   ;;  %v16916_v22 = vld [vmem:[#allocation32 + $0x104] ss:$8 sps:$4 sm:$0xff]  }
 0x903   : > { %v4442_v23 = vpop.f32.mrf.mxu0  ;;  %v4563_v24 = vpop.f32.mrf.mxu1 }
 0x904   : > { %v4572_v25 = vshrl.u32 %v16180_v20, 16  ;;  %v4575_v34 = vshll.u32 %v16180_v20, 16  ;;  %v16919_v20 = vld [vmem:[#allocation32 + $0x24] ss:$8 sps:$4 sm:$0xff]   ;;  %v16914_v23 = vld [vmem:[#allocation32 + $0x100] ss:$8 sps:$4 sm:$0xff]  }
 0x905   : > { %v4443_v27 = vpop.f32.mrf.mxu0  ;;  %v4564_v31 = vpop.f32.mrf.mxu1  ;;  %v16917_v24 = vld [vmem:[#allocation32 + $0x20] ss:$8 sps:$4 sm:$0xff]  }
 0x906   : > { %v4574_v33 = vrot.slane %v4572_v25, 7  ;;  %v16922_v25 = vld [vmem:[#allocation32 + $0xf4] ss:$8 sps:$4 sm:$0xff]   ;;  %v16920_v27 = vld [vmem:[#allocation32 + $0xf0] ss:$8 sps:$4 sm:$0xff]  }
 0x907   : > { %v16925_v31 = vld [vmem:[#allocation32 + $0x14] ss:$8 sps:$4 sm:$0xff]  }
 0x908   : > { %v4577_v37 = vor.u32 %v4575_v34, %v4574_v33  ;;  %v16923_v34 = vld [vmem:[#allocation32 + $0x10] ss:$8 sps:$4 sm:$0xff]   ;;  %v17509_v33 = vld [vmem:[#allocation41 + $0xa4] ss:$8 sps:$4 sm:$0xff]  }
 0x90a   : > { %v4583_v38 = vsel %vm4581_vm10, %v4577_v37, %v4582_v36  ;;  %vm1873_vm10 = vsmask.f32 7962  ;;  %v1876_v36 = vld [vmem:[#allocation4] sm:$0x44] }
 0x90b   : > { %4584 = vst [vmem:[#allocation10] sm:$0x7] %v4583_v38  ;;  %vm1874_vm0 = vmand %vm1872_vm4, %vm1873_vm10  ;;  %v16928_v37 = vld [vmem:[#allocation32 + $0xe4] ss:$8 sps:$4 sm:$0xff]   ;;  %vm4991_vm4 = vsmask.f32 6418 }
 0x90c   : > { %vm20706_vm10 = vsmask.f32 2306 }
 0x912   : > { %v4586_v41 = vld [vmem:[#allocation10] sm:$0x3] }
 0x913   : > { %15033 = vmatmul.mubr.msk.bf16.vlgmr.msra.gmra.mxu0 %vm4659_vm5, %v4586_v41  ;;  %v16879_v42 = vld [vmem:[#allocation10] ss:$0 sps:$4 sm:$0x77]   ;;  %v16929_v41 = vld [vmem:[#allocation32] ss:$8 sps:$4 sm:$0xff]  }
 0x914   : > { %4933 = vmatpush1.bf16.msra.mxu0 %v16864_v39  ;;  %4960 = vmatprep.mubr.bf16.mxu0 %v19238_v0  ;;  %v4737_v50 = vshll.u32 %v16879_v42, 16  ;;  %v4735_v51 = vshrl.u32 %v16879_v42, 16  ;;  %v16889_v63 = vld [vmem:[#allocation10] ss:$0 sps:$4 sm:$0x66]  }
 0x915   : > { %4934 = vmatprep.subr.bf16.mxu0 %v16872_v40  ;;  %v4864_v1 = vrot.slane %v16889_v63, 1  ;;  %v16926_v39 = vld [vmem:[#allocation32 + $0xe0] ss:$8 sps:$4 sm:$0xff]   ;;  %v16931_v40 = vld [vmem:[#allocation32 + $0x4] ss:$8 sps:$4 sm:$0xff]  }
 0x916   : > { %v4739_v52 = vrot.slane %v4737_v50, 1  ;;  %v16934_v42 = vld [vmem:[#allocation32 + $0xd4] ss:$8 sps:$4 sm:$0xff]   ;;  %v16935_v50 = vld [vmem:[#allocation32 + $0xb0] ss:$8 sps:$4 sm:$0xff]  }
 0x917   : > { %v16955_v63 = vld [vmem:[#allocation32 + $0x84] ss:$8 sps:$4 sm:$0xff]  }
 0x918   : > { %4935 = vmatpush1.bf16.msra.mxu0 %v16870_v45  ;;  %v4740_v55 = vor.u32 %v4739_v52, %v4735_v51  ;;  %v16932_v45 = vld [vmem:[#allocation32 + $0xd0] ss:$8 sps:$4 sm:$0xff]   ;;  %v16940_v51 = vld [vmem:[#allocation32 + $0xc4] ss:$8 sps:$4 sm:$0xff]   ;;  %v16938_v52 = vld [vmem:[#allocation32 + $0xc0] ss:$8 sps:$4 sm:$0xff]  }
 0x919   : > { %4936 = vmatprep.subr.bf16.mxu0 %v16878_v49  ;;  %v16937_v49 = vld [vmem:[#allocation32 + $0xb4] ss:$8 sps:$4 sm:$0xff]  }
 0x91a   : > { %15047 = vmatmul.mubr.msk.bf16.vlgmr.msra.gmra.mxu1 %vm4659_vm5, %v4740_v55  ;;  %v16941_v55 = vld [vmem:[#allocation32 + $0xa0] ss:$8 sps:$4 sm:$0xff]  }
 0x91b   : > { %5154 = vmatpush1.bf16.msra.mxu1 %v16890_v6  ;;  %v16956_v6 = vld [vmem:[#allocation32 + $0x150] ss:$8 sps:$4 sm:$0xff]  }
 0x91c   : > { %4937 = vmatpush1.bf16.msra.mxu0 %v16876_v54  ;;  %5155 = vmatprep.subr.bf16.mxu1 %v16895_v48  ;;  %v16943_v54 = vld [vmem:[#allocation32 + $0xa4] ss:$8 sps:$4 sm:$0xff]   ;;  %v16965_v48 = vld [vmem:[#allocation32 + $0x140] ss:$8 sps:$4 sm:$0xff]  }
 0x91d   : > { %4938 = vmatprep.subr.bf16.mxu0 %v16882_v57  ;;  %v16946_v57 = vld [vmem:[#allocation32 + $0x174] ss:$8 sps:$4 sm:$0xff]  }
 0x91f   : > { %5156 = vmatpush1.bf16.msra.mxu1 %v16893_v7  ;;  %v16962_v7 = vld [vmem:[#allocation32 + $0x1f4] ss:$8 sps:$4 sm:$0xff]  }
 0x920   : > { %4939 = vmatpush1.bf16.msra.mxu0 %v16880_v58  ;;  %5157 = vmatprep.subr.bf16.mxu1 %v16901_v12  ;;  %v16944_v58 = vld [vmem:[#allocation32 + $0x170] ss:$8 sps:$4 sm:$0xff]  }
 0x921   : > { %4940 = vmatprep.subr.bf16.mxu0 %v16885_v59  ;;  %v16947_v59 = vld [vmem:[#allocation32 + $0x90] ss:$8 sps:$4 sm:$0xff]  }
 0x923   : > { %5158 = vmatpush1.bf16.msra.mxu1 %v16899_v13 }
 0x924   : > { %4941 = vmatpush1.bf16.msra.mxu0 %v16883_v60  ;;  %5159 = vmatprep.subr.bf16.mxu1 %v16907_v17  ;;  %v16949_v60 = vld [vmem:[#allocation32 + $0x94] ss:$8 sps:$4 sm:$0xff]  }
 0x925   : > { %4942 = vmatprep.subr.bf16.mxu0 %v16888_v61  ;;  %v16952_v61 = vld [vmem:[#allocation32 + $0x164] ss:$8 sps:$4 sm:$0xff]  }
 0x927   : > { %5160 = vmatpush1.bf16.msra.mxu1 %v16905_v16 }
 0x928   : > { %4943 = vmatpush1.bf16.msra.mxu0 %v16886_v62  ;;  %5161 = vmatprep.subr.bf16.mxu1 %v16913_v21  ;;  %v16950_v62 = vld [vmem:[#allocation32 + $0x160] ss:$8 sps:$4 sm:$0xff]  }
 0x929   : > { %5376 = vmatprep.subr.bf16.mxu0 %v16898_v9  ;;  %v16967_v9 = vld [vmem:[#allocation32 + $0x144] ss:$8 sps:$4 sm:$0xff]  }
 0x92b   : > { %15061 = vmatmul.mubr.msk.bf16.vlgmr.msra.gmra.mxu0 %vm4659_vm5, %v4864_v1  ;;  %5162 = vmatpush1.bf16.msra.mxu1 %v16911_v35  ;;  %vm1871_vm5 = vmand %vm20558_vm2, %vm1870_vm12  ;;  %v16953_v1 = vld [vmem:[#allocation32 + $0x80] ss:$8 sps:$4 sm:$0xff]   ;;  %vm4990_vm12 = vcmask 522244  }
 0x92c   : > { %5377 = vmatpush1.bf16.msra.mxu0 %v16896_v10  ;;  %5163 = vmatprep.subr.bf16.mxu1 %v16919_v20  ;;  %vm20098_vm1 = vmor %vm1874_vm0, %vm1871_vm5  ;;  %vm4988_vm0 = vcmask 1042432  }
 0x92d   : > { %5378 = vmatprep.subr.bf16.mxu0 %v16904_v14  ;;  %v1877_v38 = vsel %vm20098_vm1, 0, %v1876_v36  ;;  %vm4989_vm5 = vmand %vm4988_vm0, %vm20706_vm10  ;;  %vm20563_vm10 = vcmask 1041408  }
 0x92e   : > { %1878 = vst [vmem:[#allocation4] sm:$0x44] %v1877_v38  ;;  %vm4992_vm2 = vmand %vm4990_vm12, %vm4991_vm4  ;;  %vm1886_vm12 = vsmask.f32 7942 }
 0x92f   : > { %5164 = vmatpush1.bf16.msra.mxu1 %v16917_v24  ;;  %vm20109_vm9 = vmor %vm4992_vm2, %vm4989_vm5  ;;  %vm5646_vm2 = vcmask 48128   ;;  %vm6043_vm5 = vsmask.f32 1282 }
 0x930   : > { %5379 = vmatpush1.bf16.msra.mxu0 %v16902_v15  ;;  %5165 = vmatprep.subr.bf16.mxu1 %v16925_v31 }
 0x931   : > { %5380 = vmatprep.subr.bf16.mxu0 %v16910_v19 }
 0x933   : > { %5166 = vmatpush1.bf16.msra.mxu1 %v16923_v34 }
 0x934   : > { %5381 = vmatpush1.bf16.msra.mxu0 %v16908_v18  ;;  %5167 = vmatprep.subr.bf16.mxu1 %v16931_v40  ;;  %v4585_v18 = vld [vmem:[%s20705_s26] sm:$0x3]  ;;  %s20757_s26 = sld [smem:[#allocation102_spill]] }
 0x935   : > { %5382 = vmatprep.subr.bf16.mxu0 %v16916_v22  ;;  %v4708_v35 = vrot.slane %v4585_v18, %v19879_v30  ;;  %v4712_v21 = vrot.slane %v4585_v18, %v19882_v32  ;;  %v16978_v18 = vld [vmem:[#allocation32 + $0x1c4] ss:$8 sps:$4 sm:$0xff]  }
 0x937   : > { %5168 = vmatpush1.bf16.msra.mxu1 %v16929_v41 }
 0x938   : > { %5383 = vmatpush1.bf16.msra.mxu0 %v16914_v23  ;;  %5177 = vmatprep.subr.bf16.mxu1 %v16937_v49 }
 0x939   : > { %5384 = vmatprep.subr.bf16.mxu0 %v16922_v25 }
 0x93b   : > { %5178 = vmatpush2.bf16.msra.mxu1 %v16935_v50  ;;  %v4994_v50 = vld [vmem:[#allocation4] sm:$0x77] }
 0x93c   : > { %5385 = vmatpush1.bf16.msra.mxu0 %v16920_v27  ;;  %5179 = vmatprep.subr.bf16.mxu1 %v16943_v54 }
 0x93d   : > { %5386 = vmatprep.subr.bf16.mxu0 %v16928_v37 }
 0x93f   : > { %5180 = vmatpush2.bf16.msra.mxu1 %v16941_v55 }
 0x940   : > { %5387 = vmatpush1.bf16.msra.mxu0 %v16926_v39  ;;  %5181 = vmatprep.subr.bf16.mxu1 %v16949_v60 }
 0x941   : > { %5388 = vmatprep.subr.bf16.mxu0 %v16934_v42 }
 0x943   : > { %5182 = vmatpush2.bf16.msra.mxu1 %v16947_v59  ;;  %v16960_v59 = vld [vmem:[#allocation32 + $0x1f0] ss:$8 sps:$4 sm:$0xff]  }
 0x944   : > { %5389 = vmatpush1.bf16.msra.mxu0 %v16932_v45  ;;  %5183 = vmatprep.subr.bf16.mxu1 %v16955_v63  ;;  %v16970_v63 = vld [vmem:[#allocation32 + $0x1e4] ss:$8 sps:$4 sm:$0xff]  }
 0x945   : > { %5390 = vmatprep.subr.bf16.mxu0 %v16940_v51 }
 0x947   : > { %5184 = vmatpush2.bf16.msra.mxu1 %v16953_v1 }
 0x948   : > { %5391 = vmatpush1.bf16.msra.mxu0 %v16938_v52  ;;  %5576 = vmatprep.subr.bf16.mxu1 %v16962_v7 }
 0x949   : > { %5400 = vmatprep.subr.bf16.mxu0 %v16946_v57 }
 0x94c   : > { %5401 = vmatpush2.bf16.msra.mxu0 %v16944_v58 }
 0x94d   : > { %5402 = vmatprep.subr.bf16.mxu0 %v16952_v61 }
 0x950   : > { %5403 = vmatpush2.bf16.msra.mxu0 %v16950_v62 }
 0x951   : > { %5404 = vmatprep.subr.bf16.mxu0 %v16958_v5 }
 0x954   : > { %5405 = vmatpush2.bf16.msra.mxu0 %v16956_v6 }
 0x955   : > { %5406 = vmatprep.subr.bf16.mxu0 %v16967_v9 }
 0x958   : > { %5407 = vmatpush2.bf16.msra.mxu0 %v16965_v48  ;;  %v16968_v48 = vld [vmem:[#allocation32 + $0x1e0] ss:$8 sps:$4 sm:$0xff]  }
 0x9d3   : > { %v4697_v10 = vpop.f32.mrf.mxu0 }
 0x9d4   : > { %v4715_v22 = vadd.f32 %v4708_v35, %v4697_v10  ;;  %v16981_v35 = vld [vmem:[#allocation32 + $0x1b4] ss:$8 sps:$4 sm:$0xff]  }
 0x9d5   : > { %v4699_v12 = vpop.f32.mrf.mxu0 }
 0x9d6   : > { %v4716_v20 = vadd.f32 %v4712_v21, %v4699_v12  ;;  %v16979_v21 = vld [vmem:[#allocation32 + $0x1b0] ss:$8 sps:$4 sm:$0xff]  }
 0x9d7   : > { %v4701_v13 = vpop.f32.mrf.mxu0 }
 0x9d9   : > { %v4702_v14 = vpop.f32.mrf.mxu0 }
 0x9da   : > { %v4838_v15 = vpop.f32.mrf.mxu1  ;;  %v16975_v14 = vld [vmem:[#allocation32 + $0x1d4] ss:$8 sps:$4 sm:$0xff]  }
 0x9db   : > { %v4845_v23 = vadd.f32 %v4838_v15, %v4715_v22  ;;  %v16984_v22 = vld [vmem:[#allocation32 + $0x1a4] ss:$8 sps:$4 sm:$0xff]  }
 0x9dc   : > { %v4840_v16 = vpop.f32.mrf.mxu1 }
 0x9dd   : > { %v4846_v25 = vadd.f32 %v4840_v16, %v4716_v20  ;;  %v16982_v20 = vld [vmem:[#allocation32 + $0x1a0] ss:$8 sps:$4 sm:$0xff]  }
 0x9de   : > { %v4842_v17 = vpop.f32.mrf.mxu1 }
 0x9df   : > { %v16973_v17 = vld [vmem:[#allocation32 + $0x1d0] ss:$8 sps:$4 sm:$0xff]  }
 0x9e0   : > { %v4843_v19 = vpop.f32.mrf.mxu1 }
 0x9e1   : > { %v16976_v19 = vld [vmem:[#allocation32 + $0x1c0] ss:$8 sps:$4 sm:$0xff]  }
 0x9eb   : > { %v4962_v24 = vpop.f32.mrf.mxu0 }
 0x9ec   : > { %v4969_v27 = vadd.f32 %v4962_v24, %v4845_v23  ;;  %v16987_v23 = vld [vmem:[#allocation32 + $0x194] ss:$8 sps:$4 sm:$0xff]   ;;  %v16985_v24 = vld [vmem:[#allocation32 + $0x190] ss:$8 sps:$4 sm:$0xff]  }
 0x9ed   : > { %v4964_v31 = vpop.f32.mrf.mxu0 }
 0x9ee   : > { %v4970_v34 = vadd.f32 %v4964_v31, %v4846_v25  ;;  %v4971_v37 = vmax.f32 %v4969_v27, 0.0  ;;  %v16990_v25 = vld [vmem:[#allocation32 + $0x184] ss:$8 sps:$4 sm:$0xff]   ;;  %v16988_v27 = vld [vmem:[#allocation32 + $0x180] ss:$8 sps:$4 sm:$0xff]  }
 0x9ef   : > { %v4966_v36 = vpop.f32.mrf.mxu0  ;;  %v16993_v31 = vld [vmem:[#allocation32 + $0x234] ss:$8 sps:$4 sm:$0xff]  }
 0x9f0   : > { %v4972_v38 = vmax.f32 %v4970_v34, 0.0  ;;  %v16991_v34 = vld [vmem:[#allocation32 + $0x230] ss:$8 sps:$4 sm:$0xff]   ;;  %v16996_v36 = vld [vmem:[#allocation32 + $0x224] ss:$8 sps:$4 sm:$0xff]  }
 0x9f1   : > { %v4967_v39 = vpop.f32.mrf.mxu0 }
 0x9f2   : > { %v16181_v40 = vpack.c.bf16 %v4972_v38, %v4971_v37  ;;  %v16994_v37 = vld [vmem:[#allocation32 + $0x220] ss:$8 sps:$4 sm:$0xff]   ;;  %v16999_v38 = vld [vmem:[#allocation32 + $0x214] ss:$8 sps:$4 sm:$0xff]   ;;  %v16997_v39 = vld [vmem:[#allocation32 + $0x210] ss:$8 sps:$4 sm:$0xff]  }
 0x9f4   : > { %v4981_v41 = vshrl.u32 %v16181_v40, 16  ;;  %v4984_v45 = vshll.u32 %v16181_v40, 16  ;;  %v17002_v40 = vld [vmem:[#allocation32 + $0x204] ss:$8 sps:$4 sm:$0xff]  }
 0x9f6   : > { %v4983_v42 = vrot.slane %v4981_v41, 7  ;;  %v17000_v41 = vld [vmem:[#allocation32 + $0x200] ss:$8 sps:$4 sm:$0xff]  }
 0x9f8   : > { %v4986_v51 = vor.u32 %v4984_v45, %v4983_v42 }
 0x9fa   : > { %v4995_v52 = vsel %vm20109_vm9, %v4986_v51, %v4994_v50  ;;  %v1910_v50 = vld [vmem:[#allocation8] sm:$0x44] }
 0x9fb   : > { %4996 = vst [vmem:[#allocation4] sm:$0x77] %v4995_v52  ;;  %v1911_v51 = vsel %vm20098_vm1, 0, %v1910_v50  ;;  %v17007_v52 = vld [vmem:[#allocation33 + $0x98] sm:$0xff]  }
 0x9fc   : > { %1912 = vst [vmem:[#allocation8] sm:$0x44] %v1911_v51  ;;  %v15149_v50 = vld [vmem:[%s20710_s23 + $0x1] sm:$0x1] }
 0x9fd   : > { %v17006_v51 = vld [vmem:[#allocation33 + $0x38] sm:$0xff]  }
 0xa02   : > { %v4998_v54 = vld [vmem:[#allocation4] sm:$0x33] }
 0xa03   : > { %v20115_v55 = vld [vmem:[#allocation4] sm:$0x66]  ;;  %v15064_v58 = vcombine.high %v4998_v54, %v4998_v54  ;;  %v15063_v60 = vcombine.low %v4998_v54, %v4998_v54  ;;  %v17009_v54 = vld [vmem:[#allocation33 + $0x90] sm:$0xff]  }
 0xa04   : > { %v5207_v57 = vld [vmem:[#allocation4] sm:$0x77]  ;;  %v15118_v61 = vcombine.high %v20115_v55, %v20115_v55  ;;  %v15117_v42 = vcombine.low %v20115_v55, %v20115_v55  ;;  %v17013_v55 = vld [vmem:[#allocation33 + $0x80] sm:$0xff]  }
 0xa05   : > { %v15091_v62 = vcombine.high %v5207_v57, %v5207_v57  ;;  %v15090_v1 = vcombine.low %v5207_v57, %v5207_v57  ;;  %15089 = vmatprep.mubr.msk.bf16.mxu1 %vm20564_vm8, %v15064_v58  ;;  %v17011_v57 = vld [vmem:[#allocation33 + $0x88] sm:$0xff]   ;;  %v17015_v58 = vld [vmem:[#allocation33 + $0x78] sm:$0xff]  }
 0xa06   : > { %v5451_v5 = vrot.slane %v15118_v61, 1  ;;  %5186 = vmatmul.mubr.bf16.vlgmr.msra.gmra.mxu1 %v15063_v60  ;;  %v5450_v45 = vrot.slane %v15117_v42, 1  ;;  %v17019_v60 = vld [vmem:[#allocation33 + $0x68] sm:$0xff]   ;;  %v17021_v61 = vld [vmem:[#allocation33 + $0x60] sm:$0xff]  }
 0xa07   : > { %v5248_v6 = vshll.u32 %v15091_v62, 16  ;;  %v5241_v7 = vshll.u32 %v15090_v1, 16  ;;  %5577 = vmatpush1.bf16.msra.mxu1 %v16960_v59  ;;  %v5246_v9 = vshrl.u32 %v15091_v62, 16  ;;  %v5239_v12 = vshrl.u32 %v15090_v1, 16  ;;  %v17017_v59 = vld [vmem:[#allocation33 + $0x70] sm:$0xff]  }
 0xa08   : > { %15143 = vmatprep.mubr.msk.bf16.mxu1 %vm20564_vm8, %v5451_v5  ;;  %5578 = vmatprep.subr.bf16.mxu1 %v16970_v63 }
 0xa09   : > { %v5250_v10 = vrot.slane %v5248_v6, 1  ;;  %v5243_v13 = vrot.slane %v5241_v7, 1 }
 0xa0b   : > { %v5251_v15 = vor.u32 %v5250_v10, %v5246_v9  ;;  %v5244_v16 = vor.u32 %v5243_v13, %v5239_v12  ;;  %5579 = vmatpush1.bf16.msra.mxu1 %v16968_v48  ;;  %v4997_v10 = vld [vmem:[%s20709_s18] sm:$0x3]  ;;  %s20762_s18 = sld [smem:[#allocation105_spill]] }
 0xa0c   : > { %5580 = vmatprep.subr.bf16.mxu1 %v16975_v14  ;;  %v5198_v12 = vrot.slane %v4997_v10, %v19879_v30  ;;  %v5202_v13 = vrot.slane %v4997_v10, %v19882_v32  ;;  %v17038_v10 = vld [vmem:[#allocation35 + $0xf4] ss:$8 sps:$4 sm:$0xff]  }
 0xa0d   : > { %15116 = vmatprep.mubr.msk.bf16.mxu0 %vm20564_vm8, %v5251_v15 }
 0xa0e   : > { %5409 = vmatmul.mubr.bf16.vlgmr.msra.gmra.mxu0 %v5244_v16 }
 0xa0f   : > { %5689 = vmatprep.mubr.bf16.mxu0 %v19238_v0  ;;  %5581 = vmatpush1.bf16.msra.mxu1 %v16973_v17 }
 0xa10   : > { %5582 = vmatprep.subr.bf16.mxu1 %v16978_v18 }
 0xa13   : > { %5583 = vmatpush1.bf16.msra.mxu1 %v16976_v19 }
 0xa14   : > { %5584 = vmatprep.subr.bf16.mxu1 %v16981_v35 }
 0xa17   : > { %5585 = vmatpush1.bf16.msra.mxu1 %v16979_v21 }
 0xa18   : > { %5586 = vmatprep.subr.bf16.mxu1 %v16984_v22 }
 0xa1b   : > { %5587 = vmatpush1.bf16.msra.mxu1 %v16982_v20 }
 0xa1c   : > { %5588 = vmatprep.subr.bf16.mxu1 %v16987_v23 }
 0xa1f   : > { %5589 = vmatpush1.bf16.msra.mxu1 %v16985_v24 }
 0xa20   : > { %5590 = vmatprep.subr.bf16.mxu1 %v16990_v25 }
 0xa23   : > { %5591 = vmatpush1.bf16.msra.mxu1 %v16988_v27 }
 0xa24   : > { %5600 = vmatprep.subr.bf16.mxu1 %v16993_v31 }
 0xa27   : > { %5601 = vmatpush2.bf16.msra.mxu1 %v16991_v34 }
 0xa28   : > { %5602 = vmatprep.subr.bf16.mxu1 %v16996_v36  ;;  %v5636_v36 = vld [vmem:[#allocation8] sm:$0x77] }
 0xa2b   : > { %5603 = vmatpush2.bf16.msra.mxu1 %v16994_v37 }
 0xa2c   : > { %5604 = vmatprep.subr.bf16.mxu1 %v16999_v38 }
 0xa2f   : > { %5605 = vmatpush2.bf16.msra.mxu1 %v16997_v39 }
 0xa30   : > { %5606 = vmatprep.subr.bf16.mxu1 %v17002_v40 }
 0xa33   : > { %5607 = vmatpush2.bf16.msra.mxu1 %v17000_v41 }
 0xa34   : > { %5984 = vmatprep.subr.bf16.mxu1 %v19238_v0 }
 0xa36   : > { %5609 = vmatmul.mubr.bf16.vlgmr.msra.gmra.mxu1 %v5450_v45  ;;  %v5640_v45 = vld [vmem:[%s20710_s23] sm:$0x1] }
 0xa37   : > { %5985 = vmatpush1.bf16.msra.mxu1 %v17007_v52  ;;  %v17008_v52 = vld [vmem:[#allocation33 + $0x30] sm:$0xff]  }
 0xa38   : > { %5986 = vmatprep.subr.bf16.mxu1 %v19238_v0 }
 0xa3b   : > { %5987 = vmatpush1.bf16.msra.mxu1 %v17009_v54  ;;  %v17010_v54 = vld [vmem:[#allocation33 + $0x28] sm:$0xff]  }
 0xa3c   : > { %5988 = vmatprep.subr.bf16.mxu1 %v19238_v0 }
 0xa3f   : > { %5989 = vmatpush1.bf16.msra.mxu1 %v17011_v57  ;;  %v17012_v57 = vld [vmem:[#allocation33 + $0x20] sm:$0xff]  }
 0xa40   : > { %5990 = vmatprep.subr.bf16.mxu1 %v19238_v0 }
 0xa43   : > { %5991 = vmatpush1.bf16.msra.mxu1 %v17013_v55  ;;  %v17014_v55 = vld [vmem:[#allocation33 + $0x18] sm:$0xff]  }
 0xa44   : > { %5992 = vmatprep.subr.bf16.mxu1 %v19238_v0 }
 0xa47   : > { %5993 = vmatpush1.bf16.msra.mxu1 %v17015_v58  ;;  %v17016_v58 = vld [vmem:[#allocation33 + $0x10] sm:$0xff]  }
 0xa48   : > { %5994 = vmatprep.subr.bf16.mxu1 %v19238_v0 }
 0xa4b   : > { %5995 = vmatpush1.bf16.msra.mxu1 %v17017_v59  ;;  %v17018_v59 = vld [vmem:[#allocation33 + $0x8] sm:$0xff]  }
 0xa4c   : > { %5996 = vmatprep.subr.bf16.mxu1 %v19238_v0 }
 0xa4f   : > { %5997 = vmatpush1.bf16.msra.mxu1 %v17019_v60  ;;  %v17020_v60 = vld [vmem:[#allocation33] sm:$0xff]  }
 0xa50   : > { %5998 = vmatprep.subr.bf16.mxu1 %v19238_v0 }
 0xa53   : > { %5999 = vmatpush1.bf16.msra.mxu1 %v17021_v61  ;;  %v17022_v61 = vld [vmem:[#allocation33 + $0x58] sm:$0xff]  }
 0xa54   : > { %6008 = vmatprep.subr.bf16.mxu1 %v19238_v0 }
 0xac6   : > { %v5187_v62 = vpop.f32.mrf.mxu1 }
 0xac7   : > { %v5205_v14 = vadd.f32 %v5198_v12, %v5187_v62  ;;  %v17023_v62 = vld [vmem:[#allocation33 + $0xb8] sm:$0xff]  }
 0xac8   : > { %v5189_v63 = vpop.f32.mrf.mxu1  ;;  %6009 = vmatpush2.bf16.msra.mxu1 %v17023_v62  ;;  %v17060_v62 = vld [vmem:[#allocation35 + $0xb0] ss:$8 sps:$4 sm:$0xff]  }
 0xac9   : > { %v5206_v15 = vadd.f32 %v5202_v13, %v5189_v63  ;;  %6010 = vmatprep.subr.bf16.mxu1 %v19238_v0  ;;  %v17024_v63 = vld [vmem:[#allocation33 + $0x50] sm:$0xff]  }
 0xaca   : > { %v5191_v1 = vpop.f32.mrf.mxu1 }
 0xacb   : > { %v17025_v1 = vld [vmem:[#allocation33 + $0xb0] sm:$0xff]  }
 0xacc   : > { %v5192_v5 = vpop.f32.mrf.mxu1  ;;  %6011 = vmatpush2.bf16.msra.mxu1 %v17025_v1  ;;  %v17065_v1 = vld [vmem:[#allocation35 + $0x14] ss:$8 sps:$4 sm:$0xff]  }
 0xacd   : > { %6012 = vmatprep.subr.bf16.mxu1 %v19238_v0  ;;  %v17026_v5 = vld [vmem:[#allocation33 + $0x48] sm:$0xff]  }
 0xace   : > { %v5410_v6 = vpop.f32.mrf.mxu0 }
 0xacf   : > { %v5417_v16 = vadd.f32 %v5410_v6, %v5205_v14  ;;  %v17027_v6 = vld [vmem:[#allocation33 + $0xa8] sm:$0xff]  }
 0xad0   : > { %v5412_v7 = vpop.f32.mrf.mxu0  ;;  %6013 = vmatpush2.bf16.msra.mxu1 %v17027_v6  ;;  %v17068_v6 = vld [vmem:[#allocation35 + $0xa4] ss:$8 sps:$4 sm:$0xff]  }
 0xad1   : > { %v5418_v18 = vadd.f32 %v5412_v7, %v5206_v15  ;;  %6014 = vmatprep.subr.bf16.mxu1 %v19238_v0  ;;  %v17028_v7 = vld [vmem:[#allocation33 + $0x40] sm:$0xff]  }
 0xad2   : > { %v5414_v48 = vpop.f32.mrf.mxu0 }
 0xad3   : > { %v17029_v48 = vld [vmem:[#allocation33 + $0xa0] sm:$0xff]  }
 0xad4   : > { %v5415_v9 = vpop.f32.mrf.mxu0  ;;  %6015 = vmatpush2.bf16.msra.mxu1 %v17029_v48  ;;  %v17071_v48 = vld [vmem:[#allocation35 + $0x4] ss:$8 sps:$4 sm:$0xff]  }
 0xad5   : > { %v17032_v9 = vld [vmem:[#allocation35 + $0x74] ss:$8 sps:$4 sm:$0xff]   ;;  %6314 = vmatprep.subr.bf16.mxu1 %v17038_v10 }
 0xad6   : > { %v17077_v10 = vld [vmem:[#allocation35 + $0x174] ss:$8 sps:$4 sm:$0xff]  }
 0xaf6   : > { %v5610_v17 = vpop.f32.mrf.mxu1 }
 0xaf7   : > { %v5617_v19 = vadd.f32 %v5610_v17, %v5417_v16 }
 0xaf8   : > { %v5612_v35 = vpop.f32.mrf.mxu1 }
 0xaf9   : > { %v5618_v21 = vadd.f32 %v5612_v35, %v5418_v18  ;;  %v5619_v20 = vmax.f32 %v5617_v19, 0.0 }
 0xafa   : > { %v5614_v22 = vpop.f32.mrf.mxu1 }
 0xafb   : > { %v5620_v23 = vmax.f32 %v5618_v21, 0.0  ;;  %v17030_v22 = vld [vmem:[#allocation35 + $0x70] ss:$8 sps:$4 sm:$0xff]  }
 0xafc   : > { %v5615_v24 = vpop.f32.mrf.mxu1 }
 0xafd   : > { %v16182_v25 = vpack.c.bf16 %v5620_v23, %v5619_v20  ;;  %v17036_v20 = vld [vmem:[#allocation35 + $0xf0] ss:$8 sps:$4 sm:$0xff]  }
 0xaff   : > { %v5629_v27 = vshrl.u32 %v16182_v25, 16  ;;  %v5632_v34 = vshll.u32 %v16182_v25, 16  ;;  %v17035_v25 = vld [vmem:[#allocation35 + $0x64] ss:$8 sps:$4 sm:$0xff]  }
 0xb01   : > { %v5631_v31 = vrot.slane %v5629_v27, 7  ;;  %v17033_v27 = vld [vmem:[#allocation35 + $0x60] ss:$8 sps:$4 sm:$0xff]  }
 0xb03   : > { %v5634_v37 = vor.u32 %v5632_v34, %v5631_v31  ;;  %v17041_v31 = vld [vmem:[#allocation35 + $0x54] ss:$8 sps:$4 sm:$0xff]   ;;  %v17039_v34 = vld [vmem:[#allocation35 + $0x50] ss:$8 sps:$4 sm:$0xff]  }
 0xb05   : > { %v5637_v38 = vsel %vm20109_vm9, %v5634_v37, %v5636_v36  ;;  %v17044_v36 = vld [vmem:[#allocation35 + $0xe4] ss:$8 sps:$4 sm:$0xff]   ;;  %v17042_v37 = vld [vmem:[#allocation35 + $0xe0] ss:$8 sps:$4 sm:$0xff]  }
 0xb06   : > { %5638 = vst [vmem:[#allocation8] sm:$0x77] %v5637_v38  ;;  %v17047_v38 = vld [vmem:[#allocation35 + $0x44] ss:$8 sps:$4 sm:$0xff]  }
 0xb0d   : > { %v5639_v39 = vld [vmem:[#allocation8] sm:$0x77] }
 0xb0e   : > { %v15146_v40 = vcombine.high %v5639_v39, %v5639_v39  ;;  %v15145_v41 = vcombine.low %v5639_v39, %v5639_v39  ;;  %v17162_v39 = vld [vmem:[#allocation36 + $0x1e0] ss:$8 sps:$4 sm:$0xff]  }
 0xb10   : > { %15147 = vmatprep.subr.msk.bf16.mxu0 %vm4988_vm0, %v15146_v40  ;;  %v5652_v42 = vsel %vm4988_vm0, %v15145_v41, 0  ;;  %v1935_v41 = vld [vmem:[#allocation11] sm:$0x2] }
 0xb11   : > { %5672 = vmatpush1.bf16.msra.mxu0 %v5652_v42 }
 0xb12   : > { %15150 = vmatprep.subr.msk.bf16.mxu0 %vm4988_vm0, %v15146_v40  ;;  %vm1885_vm0 = vcmask 1041409   ;;  %v1932_v40 = vld [vmem:[#allocation11] sm:$0x1] }
 0xb13   : > { %vm20166_vm4 = vmand %vm1885_vm0, %vm1886_vm12  ;;  %vm1879_vm0 = vsmask.f32 2304  ;;  %vm1888_vm12 = vcmask 1043459  }
 0xb14   : > { %15148 = vmatmul.mubr.msk.bf16.vlgmr.msra.gmra.mxu0 %vm5646_vm2, %v5640_v45  ;;  %v1936_v45 = vsel %vm20166_vm4, 0, %v1935_v41 }
 0xb15   : > { %5718 = vmatpush1.bf16.msra.mxu0 %v5652_v42  ;;  %5735 = vmatprep.mubr.bf16.mxu0 %v19238_v0  ;;  %v1933_v42 = vsel %vm19842_vm7, 0, %v1932_v40  ;;  %1937 = vst [vmem:[#allocation11] sm:$0x2] %v1936_v45 }
 0xb16   : > { %5847 = vmatprep.subr.bf16.mxu0 %v19238_v0  ;;  %1934 = vst [vmem:[#allocation11] sm:$0x1] %v1933_v42 }
 0xb1c   : > { %15151 = vmatmul.mubr.msk.bf16.vlgmr.msra.gmra.mxu0 %vm5646_vm2, %v15149_v50  ;;  %v17045_v50 = vld [vmem:[#allocation35 + $0x40] ss:$8 sps:$4 sm:$0xff]   ;;  %vm20179_vm2 = vmand %vm20563_vm10, %vm6043_vm5  ;;  %vm1889_vm5 = vsmask.f32 7950  ;;  %vm20715_vm10 = vcmask 1042434  }
 0xb1d   : > { %5848 = vmatpush1.bf16.msra.mxu0 %v17006_v51  ;;  %v17050_v51 = vld [vmem:[#allocation35 + $0xd4] ss:$8 sps:$4 sm:$0xff]   ;;  %vm20191_vm6 = vmand %vm1888_vm12, %vm1889_vm5  ;;  %vm7786_vm12 = vcmask 15360  }
 0xb1e   : > { %5849 = vmatprep.subr.bf16.mxu0 %v19238_v0 }
 0xb21   : > { %5850 = vmatpush1.bf16.msra.mxu0 %v17008_v52  ;;  %v17048_v52 = vld [vmem:[#allocation35 + $0xd0] ss:$8 sps:$4 sm:$0xff]  }
 0xb22   : > { %5851 = vmatprep.subr.bf16.mxu0 %v19238_v0 }
 0xb25   : > { %5852 = vmatpush1.bf16.msra.mxu0 %v17010_v54  ;;  %v17053_v54 = vld [vmem:[#allocation35 + $0x34] ss:$8 sps:$4 sm:$0xff]  }
 0xb26   : > { %5853 = vmatprep.subr.bf16.mxu0 %v19238_v0 }
 0xb29   : > { %5854 = vmatpush1.bf16.msra.mxu0 %v17012_v57  ;;  %v17051_v57 = vld [vmem:[#allocation35 + $0x30] ss:$8 sps:$4 sm:$0xff]  }
 0xb2a   : > { %5855 = vmatprep.subr.bf16.mxu0 %v19238_v0 }
 0xb2d   : > { %5856 = vmatpush1.bf16.msra.mxu0 %v17014_v55  ;;  %v17056_v55 = vld [vmem:[#allocation35 + $0xc4] ss:$8 sps:$4 sm:$0xff]  }
 0xb2e   : > { %5857 = vmatprep.subr.bf16.mxu0 %v19238_v0 }
 0xb31   : > { %5858 = vmatpush1.bf16.msra.mxu0 %v17016_v58  ;;  %v17054_v58 = vld [vmem:[#allocation35 + $0xc0] ss:$8 sps:$4 sm:$0xff]  }
 0xb32   : > { %5859 = vmatprep.subr.bf16.mxu0 %v19238_v0 }
 0xb35   : > { %5860 = vmatpush1.bf16.msra.mxu0 %v17018_v59  ;;  %v17059_v59 = vld [vmem:[#allocation35 + $0x24] ss:$8 sps:$4 sm:$0xff]  }
 0xb36   : > { %5861 = vmatprep.subr.bf16.mxu0 %v19238_v0 }
 0xb39   : > { %5862 = vmatpush1.bf16.msra.mxu0 %v17020_v60  ;;  %v17057_v60 = vld [vmem:[#allocation35 + $0x20] ss:$8 sps:$4 sm:$0xff]  }
 0xb3a   : > { %5871 = vmatprep.subr.bf16.mxu0 %v19238_v0 }
 0xb3d   : > { %5872 = vmatpush2.bf16.msra.mxu0 %v17022_v61  ;;  %v17062_v61 = vld [vmem:[#allocation35 + $0xb4] ss:$8 sps:$4 sm:$0xff]  }
 0xb3e   : > { %5873 = vmatprep.subr.bf16.mxu0 %v19238_v0 }
 0xb41   : > { %5874 = vmatpush2.bf16.msra.mxu0 %v17024_v63  ;;  %v17063_v63 = vld [vmem:[#allocation35 + $0x10] ss:$8 sps:$4 sm:$0xff]  }
 0xb42   : > { %5875 = vmatprep.subr.bf16.mxu0 %v19238_v0 }
 0xb45   : > { %5876 = vmatpush2.bf16.msra.mxu0 %v17026_v5  ;;  %v17066_v5 = vld [vmem:[#allocation35 + $0xa0] ss:$8 sps:$4 sm:$0xff]  }
 0xb46   : > { %5877 = vmatprep.subr.bf16.mxu0 %v19238_v0 }
 0xb49   : > { %5878 = vmatpush2.bf16.msra.mxu0 %v17028_v7  ;;  %v17069_v7 = vld [vmem:[#allocation35] ss:$8 sps:$4 sm:$0xff]  }
 0xb4a   : > { %6146 = vmatprep.subr.bf16.mxu0 %v17032_v9  ;;  %v17074_v9 = vld [vmem:[#allocation35 + $0x94] ss:$8 sps:$4 sm:$0xff]  }
 0xbd4   : > { %v5691_v12 = vpop.f32.mrf.mxu0 }
 0xbd6   : > { %v5693_v13 = vpop.f32.mrf.mxu0 }
 0xbd8   : > { %v5695_v14 = vpop.f32.mrf.mxu0 }
 0xbd9   : > { %v17080_v14 = vld [vmem:[#allocation35 + $0x84] ss:$8 sps:$4 sm:$0xff]  }
 0xbda   : > { %v5696_v15 = vpop.f32.mrf.mxu0 }
 0xbdb   : > { %v17104_v15 = vld [vmem:[#allocation36 + $0x74] ss:$8 sps:$4 sm:$0xff]  }
 0xbdc   : > { %v5737_v16 = vpop.f32.mrf.mxu0 }
 0xbdd   : > { %v5744_v17 = vmax.f32 %v5691_v12, %v5737_v16  ;;  %v17072_v12 = vld [vmem:[#allocation35 + $0x90] ss:$8 sps:$4 sm:$0xff]   ;;  %v19239_v16 = vmov 1983009808  }
 0xbde   : > { %v5739_v18 = vpop.f32.mrf.mxu0 }
 0xbdf   : > { %v5745_v19 = vmax.f32 %v5693_v13, %v5739_v18  ;;  %v5746_v23 = vpack.c.bf16 %v5744_v17, %v5744_v17  ;;  %v17078_v13 = vld [vmem:[#allocation35 + $0x80] ss:$8 sps:$4 sm:$0xff]   ;;  %v6028_v17 = vunpack.c.l.s4 %v19239_v16 }
 0xbe0   : > { %v5741_v35 = vpop.f32.mrf.mxu0  ;;  %v17099_v16 = vld [vmem:[#allocation35 + $0x100] ss:$8 sps:$4 sm:$0xff]  }
 0xbe1   : > { %v5747_v21 = vpack.c.bf16 %v5745_v19, %v5745_v19  ;;  %v6029_v18 = vunpack.c.0.s8 %v6028_v17 }
 0xbe2   : > { %v5742_v24 = vpop.f32.mrf.mxu0 }
 0xbe3   : > { %15164 = vmatprep.mubr.msk.bf16.mxu0 %vm20564_vm8, %v5747_v21  ;;  %15177 = vmatprep.mubr.msk.bf16.mxu1 %vm20564_vm8, %v5747_v21  ;;  %vm20187_vm8 = vmand %vm20715_vm10, %vm1879_vm0 }
 0xbe4   : > { %5880 = vmatmul.mubr.bf16.vlgmr.msra.gmra.mxu0 %v5746_v23  ;;  %6017 = vmatmul.mubr.bf16.vlgmr.msra.gmra.mxu1 %v5746_v23  ;;  %vm1881_vm14 = vmor %vm20187_vm8, %vm19842_vm7  ;;  %vm6531_vm7 = vsmask.f32 3338 }
 0xbe5   : > { %6147 = vmatpush1.bf16.msra.mxu0 %v17030_v22  ;;  %6315 = vmatpush1.bf16.msra.mxu1 %v17036_v20  ;;  %v20175_v22 = vsub.s32 %v6029_v18, %v19876_v26  ;;  %v6045_v26 = vld [vmem:[#allocation11] sm:$0x3]  ;;  %vm1891_vm10 = vmor %vm20191_vm6, %vm20166_vm4  ;;  %vm6530_vm6 = vcmask 1043458   ;;  %vm20722_vm4 = vcmask 523264  }
 0xbe6   : > { %6148 = vmatprep.subr.bf16.mxu0 %v17035_v25  ;;  %6178 = vmatprep.mubr.bf16.mxu0 %v19238_v0  ;;  %vm6532_vm8 = vmand %vm6530_vm6, %vm6531_vm7 }
 0xbe7   : > { %6346 = vmatprep.mubr.bf16.mxu1 %v19238_v0  ;;  %6316 = vmatprep.subr.bf16.mxu1 %v17044_v36  ;;  %vm20728_vm6 = vmmov %vm20722_vm4 }
 0xbe8   : > { %vm20729_vm7 = vmmov %vm20722_vm4 }
 0xbe9   : > { %6149 = vmatpush1.bf16.msra.mxu0 %v17033_v27  ;;  %6317 = vmatpush1.bf16.msra.mxu1 %v17042_v37 }
 0xbea   : > { %6150 = vmatprep.subr.bf16.mxu0 %v17041_v31  ;;  %6318 = vmatprep.subr.bf16.mxu1 %v17050_v51  ;;  %v17083_v51 = vld [vmem:[#allocation35 + $0x164] ss:$8 sps:$4 sm:$0xff]  }
 0xbed   : > { %6151 = vmatpush1.bf16.msra.mxu0 %v17039_v34  ;;  %6319 = vmatpush1.bf16.msra.mxu1 %v17048_v52 }
 0xbee   : > { %6152 = vmatprep.subr.bf16.mxu0 %v17047_v38  ;;  %6320 = vmatprep.subr.bf16.mxu1 %v17056_v55  ;;  %v17081_v55 = vld [vmem:[#allocation35 + $0x160] ss:$8 sps:$4 sm:$0xff]  }
 0xbf1   : > { %6153 = vmatpush1.bf16.msra.mxu0 %v17045_v50  ;;  %6321 = vmatpush1.bf16.msra.mxu1 %v17054_v58  ;;  %v17075_v50 = vld [vmem:[#allocation35 + $0x170] ss:$8 sps:$4 sm:$0xff]  }
 0xbf2   : > { %6154 = vmatprep.subr.bf16.mxu0 %v17053_v54  ;;  %6322 = vmatprep.subr.bf16.mxu1 %v17062_v61  ;;  %v17102_v61 = vld [vmem:[#allocation36 + $0x70] ss:$8 sps:$4 sm:$0xff]  }
 0xbf5   : > { %6155 = vmatpush1.bf16.msra.mxu0 %v17051_v57  ;;  %6323 = vmatpush1.bf16.msra.mxu1 %v17060_v62 }
 0xbf6   : > { %6156 = vmatprep.subr.bf16.mxu0 %v17059_v59  ;;  %6324 = vmatprep.subr.bf16.mxu1 %v17068_v6  ;;  %v17105_v6 = vld [vmem:[#allocation36 + $0x60] ss:$8 sps:$4 sm:$0xff]  }
 0xbf9   : > { %6157 = vmatpush1.bf16.msra.mxu0 %v17057_v60  ;;  %6325 = vmatpush1.bf16.msra.mxu1 %v17066_v5  ;;  %v17086_v60 = vld [vmem:[#allocation35 + $0x154] ss:$8 sps:$4 sm:$0xff]   ;;  %v17089_v5 = vld [vmem:[#allocation35 + $0x144] ss:$8 sps:$4 sm:$0xff]  }
 0xbfa   : > { %6158 = vmatprep.subr.bf16.mxu0 %v17065_v1  ;;  %6326 = vmatprep.subr.bf16.mxu1 %v17074_v9  ;;  %v17084_v1 = vld [vmem:[#allocation35 + $0x150] ss:$8 sps:$4 sm:$0xff]  }
 0xbfb   : > { %v17090_v9 = vld [vmem:[#allocation35 + $0x130] ss:$8 sps:$4 sm:$0xff]  }
 0xbfd   : > { %6159 = vmatpush1.bf16.msra.mxu0 %v17063_v63  ;;  %6327 = vmatpush1.bf16.msra.mxu1 %v17072_v12  ;;  %v17107_v63 = vld [vmem:[#allocation36 + $0x64] ss:$8 sps:$4 sm:$0xff]   ;;  %v17093_v12 = vld [vmem:[#allocation35 + $0x120] ss:$8 sps:$4 sm:$0xff]  }
 0xbfe   : > { %6160 = vmatprep.subr.bf16.mxu0 %v17071_v48  ;;  %6328 = vmatprep.subr.bf16.mxu1 %v17080_v14  ;;  %v17092_v48 = vld [vmem:[#allocation35 + $0x134] ss:$8 sps:$4 sm:$0xff]   ;;  %v17096_v14 = vld [vmem:[#allocation35 + $0x110] ss:$8 sps:$4 sm:$0xff]  }
 0xc01   : > { %6161 = vmatpush1.bf16.msra.mxu0 %v17069_v7  ;;  %6329 = vmatpush1.bf16.msra.mxu1 %v17078_v13  ;;  %v17087_v7 = vld [vmem:[#allocation35 + $0x140] ss:$8 sps:$4 sm:$0xff]   ;;  %v17098_v13 = vld [vmem:[#allocation35 + $0x114] ss:$8 sps:$4 sm:$0xff]  }
 0xc02   : > { %6465 = vmatprep.subr.bf16.mxu0 %v17077_v10  ;;  %6742 = vmatprep.subr.bf16.mxu1 %v17104_v15  ;;  %v17095_v10 = vld [vmem:[#allocation35 + $0x124] ss:$8 sps:$4 sm:$0xff]  }
 0xc03   : > { %v17101_v15 = vld [vmem:[#allocation35 + $0x104] ss:$8 sps:$4 sm:$0xff]  }
 0xca4   : > { %v5881_v19 = vpop.f32.mrf.mxu0  ;;  %v6018_v35 = vpop.f32.mrf.mxu1 }
 0xca5   : > { %v6024_v21 = vmax.f32 %v5881_v19, %v6018_v35  ;;  %v17110_v19 = vld [vmem:[#allocation36 + $0x174] ss:$8 sps:$4 sm:$0xff]   ;;  %v17108_v35 = vld [vmem:[#allocation36 + $0x170] ss:$8 sps:$4 sm:$0xff]  }
 0xca6   : > { %v5883_v20 = vpop.f32.mrf.mxu0  ;;  %v6020_v23 = vpop.f32.mrf.mxu1 }
 0xca7   : > { %v6025_v24 = vpack.c.bf16 %v6024_v21, %v6024_v21  ;;  %v17113_v21 = vld [vmem:[#allocation36 + $0x54] ss:$8 sps:$4 sm:$0xff]   ;;  %v17111_v20 = vld [vmem:[#allocation36 + $0x50] ss:$8 sps:$4 sm:$0xff]   ;;  %v17116_v23 = vld [vmem:[#allocation36 + $0x164] ss:$8 sps:$4 sm:$0xff]  }
 0xca8   : > { %v5884_v25 = vpop.f32.mrf.mxu0  ;;  %v6021_v27 = vpop.f32.mrf.mxu1 }
 0xca9   : > { %v6033_v31 = vrot.slane %v6025_v24, %v20175_v22  ;;  %v17114_v24 = vld [vmem:[#allocation36 + $0x160] ss:$8 sps:$4 sm:$0xff]   ;;  %v17119_v25 = vld [vmem:[#allocation36 + $0x44] ss:$8 sps:$4 sm:$0xff]  }
 0xcaa   : > { %v5885_v34 = vpop.f32.mrf.mxu0  ;;  %v6022_v36 = vpop.f32.mrf.mxu1  ;;  %v17117_v27 = vld [vmem:[#allocation36 + $0x40] ss:$8 sps:$4 sm:$0xff]  }
 0xcab   : > { %v6035_v37 = vshrl.u32 %v6033_v31, 16  ;;  %v6038_v40 = vshll.u32 %v6033_v31, 16  ;;  %v17122_v31 = vld [vmem:[#allocation36 + $0x154] ss:$8 sps:$4 sm:$0xff]   ;;  %v17120_v34 = vld [vmem:[#allocation36 + $0x150] ss:$8 sps:$4 sm:$0xff]  }
 0xcac   : > { %v17123_v36 = vld [vmem:[#allocation36 + $0x30] ss:$8 sps:$4 sm:$0xff]  }
 0xcad   : > { %v6037_v38 = vrot.slane %v6035_v37, 7  ;;  %v17125_v37 = vld [vmem:[#allocation36 + $0x34] ss:$8 sps:$4 sm:$0xff]  }
 0xcaf   : > { %v6040_v42 = vor.u32 %v6038_v40, %v6037_v38  ;;  %v17126_v38 = vld [vmem:[#allocation36 + $0x140] ss:$8 sps:$4 sm:$0xff]   ;;  %v17128_v40 = vld [vmem:[#allocation36 + $0x144] ss:$8 sps:$4 sm:$0xff]  }
 0xcb1   : > { %v6046_v45 = vsel %vm20179_vm2, %v6040_v42, %v6045_v26  ;;  %v17129_v26 = vld [vmem:[#allocation36 + $0x20] ss:$8 sps:$4 sm:$0xff]   ;;  %v17131_v42 = vld [vmem:[#allocation36 + $0x24] ss:$8 sps:$4 sm:$0xff]  }
 0xcb2   : > { %6047 = vst [vmem:[#allocation11] sm:$0x3] %v6046_v45  ;;  %v17134_v45 = vld [vmem:[#allocation36 + $0x134] ss:$8 sps:$4 sm:$0xff]  }
 0xcb9   : > { %v6049_v52 = vld [vmem:[#allocation11] sm:$0x1]  ;;  %v15211_v17 = vld.sshfl [vmem:[#allocation11] sm:$0x2 pattern:$0x76325410] }
 0xcba   : > { %v15194_v54 = vld.sshfl [vmem:[#allocation11] sm:$0x3 pattern:$0x76325410]  ;;  %6179 = vmatmul.mubr.bf16.vlgmr.msra.gmra.mxu0 %v6049_v52  ;;  %v6383_v18 = vrot.slane %v15211_v17, 1 }
 0xcbb   : > { %v6229_v57 = vshll.u32 %v15194_v54, 16  ;;  %6466 = vmatpush1.bf16.msra.mxu0 %v17075_v50  ;;  %6497 = vmatprep.mubr.bf16.mxu0 %v19238_v0  ;;  %v6227_v58 = vshrl.u32 %v15194_v54, 16  ;;  %v17137_v50 = vld [vmem:[#allocation36 + $0x14] ss:$8 sps:$4 sm:$0xff]   ;;  %v17135_v52 = vld [vmem:[#allocation36 + $0x10] ss:$8 sps:$4 sm:$0xff]  }
 0xcbc   : > { %6467 = vmatprep.subr.bf16.mxu0 %v17083_v51  ;;  %v17132_v51 = vld [vmem:[#allocation36 + $0x130] ss:$8 sps:$4 sm:$0xff]   ;;  %v17140_v54 = vld [vmem:[#allocation36 + $0x124] ss:$8 sps:$4 sm:$0xff]  }
 0xcbd   : > { %v6231_v59 = vrot.slane %v6229_v57, 1  ;;  %v17143_v57 = vld [vmem:[#allocation36 + $0x4] ss:$8 sps:$4 sm:$0xff]  }
 0xcbe   : > { %v17164_v17 = vld [vmem:[#allocation36 + $0x1e4] ss:$8 sps:$4 sm:$0xff]  }
 0xcbf   : > { %v6232_v62 = vor.u32 %v6231_v59, %v6227_v58  ;;  %6468 = vmatpush1.bf16.msra.mxu0 %v17081_v55  ;;  %v17138_v55 = vld [vmem:[#allocation36 + $0x120] ss:$8 sps:$4 sm:$0xff]   ;;  %v17146_v59 = vld [vmem:[#allocation36 + $0x114] ss:$8 sps:$4 sm:$0xff]  }
 0xcc0   : > { %6469 = vmatprep.subr.bf16.mxu0 %v17086_v60  ;;  %v17141_v58 = vld [vmem:[#allocation36] ss:$8 sps:$4 sm:$0xff]   ;;  %v17149_v60 = vld [vmem:[#allocation36 + $0xf4] ss:$8 sps:$4 sm:$0xff]  }
 0xcc1   : > { %6347 = vmatmul.mubr.bf16.vlgmr.msra.gmra.mxu1 %v6232_v62  ;;  %v17147_v62 = vld [vmem:[#allocation36 + $0xf0] ss:$8 sps:$4 sm:$0xff]  }
 0xcc2   : > { %6743 = vmatpush1.bf16.msra.mxu1 %v17102_v61  ;;  %v17144_v61 = vld [vmem:[#allocation36 + $0x110] ss:$8 sps:$4 sm:$0xff]  }
 0xcc3   : > { %6744 = vmatprep.subr.bf16.mxu1 %v17107_v63  ;;  %6470 = vmatpush1.bf16.msra.mxu0 %v17084_v1  ;;  %v17152_v63 = vld [vmem:[#allocation36 + $0x104] ss:$8 sps:$4 sm:$0xff]   ;;  %v17150_v1 = vld [vmem:[#allocation36 + $0x100] ss:$8 sps:$4 sm:$0xff]  }
 0xcc4   : > { %6471 = vmatprep.subr.bf16.mxu0 %v17089_v5  ;;  %v6048_v5 = vld [vmem:[%s20720_s22] sm:$0x3]  ;;  %s20771_s22 = sld [smem:[#allocation104_spill]] }
 0xcc6   : > { %6745 = vmatpush1.bf16.msra.mxu1 %v17105_v6  ;;  %v6191_v6 = vrot.slane %v6048_v5, %v19879_v30 }
 0xcc7   : > { %6472 = vmatpush1.bf16.msra.mxu0 %v17087_v7  ;;  %6746 = vmatprep.subr.bf16.mxu1 %v17113_v21  ;;  %v17155_v7 = vld [vmem:[#allocation36 + $0xe4] ss:$8 sps:$4 sm:$0xff]   ;;  %v17168_v21 = vld [vmem:[#allocation36 + $0x1d0] ss:$8 sps:$4 sm:$0xff]  }
 0xcc8   : > { %6473 = vmatprep.subr.bf16.mxu0 %v17092_v48  ;;  %v17153_v48 = vld [vmem:[#allocation36 + $0xe0] ss:$8 sps:$4 sm:$0xff]  }
 0xcca   : > { %6747 = vmatpush1.bf16.msra.mxu1 %v17111_v20  ;;  %v17173_v20 = vld [vmem:[#allocation36 + $0xb4] ss:$8 sps:$4 sm:$0xff]  }
 0xccb   : > { %6474 = vmatpush1.bf16.msra.mxu0 %v17090_v9  ;;  %6748 = vmatprep.subr.bf16.mxu1 %v17119_v25  ;;  %v17158_v9 = vld [vmem:[#allocation36 + $0x1f4] ss:$8 sps:$4 sm:$0xff]   ;;  %v17174_v25 = vld [vmem:[#allocation36 + $0x1c0] ss:$8 sps:$4 sm:$0xff]  }
 0xccc   : > { %6475 = vmatprep.subr.bf16.mxu0 %v17095_v10  ;;  %v17156_v10 = vld [vmem:[#allocation36 + $0x1f0] ss:$8 sps:$4 sm:$0xff]  }
 0xcce   : > { %6749 = vmatpush1.bf16.msra.mxu1 %v17117_v27  ;;  %v17179_v27 = vld [vmem:[#allocation36 + $0xa4] ss:$8 sps:$4 sm:$0xff]  }
 0xccf   : > { %6476 = vmatpush1.bf16.msra.mxu0 %v17093_v12  ;;  %6750 = vmatprep.subr.bf16.mxu1 %v17125_v37  ;;  %v17161_v12 = vld [vmem:[#allocation36 + $0xd4] ss:$8 sps:$4 sm:$0xff]   ;;  %v17183_v37 = vld [vmem:[#allocation36 + $0x90] ss:$8 sps:$4 sm:$0xff]  }
 0xcd0   : > { %6477 = vmatprep.subr.bf16.mxu0 %v17098_v13  ;;  %v1882_v13 = vld [vmem:[#allocation5] sm:$0x5] }
 0xcd2   : > { %6751 = vmatpush1.bf16.msra.mxu1 %v17123_v36  ;;  %v17180_v36 = vld [vmem:[#allocation36 + $0x1b0] ss:$8 sps:$4 sm:$0xff]  }
 0xcd3   : > { %6478 = vmatpush1.bf16.msra.mxu0 %v17096_v14  ;;  %6752 = vmatprep.subr.bf16.mxu1 %v17131_v42  ;;  %v1892_v14 = vld [vmem:[#allocation5] sm:$0xa]  ;;  %v17191_v42 = vld [vmem:[#allocation36 + $0x84] ss:$8 sps:$4 sm:$0xff]  }
 0xcd4   : > { %6479 = vmatprep.subr.bf16.mxu0 %v17101_v15  ;;  %v17159_v15 = vld [vmem:[#allocation36 + $0xd0] ss:$8 sps:$4 sm:$0xff]   ;;  %v1893_v44 = vsel %vm1891_vm10, 0, %v1892_v14 }
 0xcd5   : > { %1894 = vst [vmem:[#allocation5] sm:$0xa] %v1893_v44 }
 0xcd6   : > { %6753 = vmatpush1.bf16.msra.mxu1 %v17129_v26  ;;  %v17186_v26 = vld [vmem:[#allocation36 + $0x1a0] ss:$8 sps:$4 sm:$0xff]  }
 0xcd7   : > { %6480 = vmatpush1.bf16.msra.mxu0 %v17099_v16  ;;  %6754 = vmatprep.subr.bf16.mxu1 %v17137_v50  ;;  %v1883_v16 = vsel %vm1881_vm14, 0, %v1882_v13  ;;  %v17194_v50 = vld [vmem:[#allocation36 + $0x194] ss:$8 sps:$4 sm:$0xff]   ;;  %vm6533_vm14 = vmor %vm6532_vm8, %vm20179_vm2  ;;  %vm20724_vm2 = vcmask 1040384  }
 0xcd8   : > { %7015 = vmatprep.subr.bf16.mxu0 %v17110_v19  ;;  %1884 = vst [vmem:[#allocation5] sm:$0x5] %v1883_v16  ;;  %v17165_v19 = vld [vmem:[#allocation36 + $0xc0] ss:$8 sps:$4 sm:$0xff]   ;;  %vm20725_vm0 = vmmov %vm20724_vm2 }
 0xcd9   : > { %vm20726_vm5 = vmmov %vm20725_vm0 }
 0xcda   : > { %6498 = vmatmul.mubr.bf16.vlgmr.msra.gmra.mxu0 %v6383_v18  ;;  %6755 = vmatpush1.bf16.msra.mxu1 %v17135_v52  ;;  %v17167_v18 = vld [vmem:[#allocation36 + $0xc4] ss:$8 sps:$4 sm:$0xff]   ;;  %v17197_v52 = vld [vmem:[#allocation36 + $0x274] ss:$8 sps:$4 sm:$0xff]   ;;  %vm20727_vm10 = vmmov %vm20725_vm0 }
 0xcdb   : > { %7016 = vmatpush1.bf16.msra.mxu0 %v17108_v35  ;;  %6756 = vmatprep.subr.bf16.mxu1 %v17143_v57  ;;  %v17170_v35 = vld [vmem:[#allocation36 + $0x1d4] ss:$8 sps:$4 sm:$0xff]   ;;  %v17198_v57 = vld [vmem:[#allocation36 + $0x180] ss:$8 sps:$4 sm:$0xff]  }
 0xcdc   : > { %7017 = vmatprep.subr.bf16.mxu0 %v17116_v23  ;;  %v17171_v23 = vld [vmem:[#allocation36 + $0xb0] ss:$8 sps:$4 sm:$0xff]  }
 0xcde   : > { %6757 = vmatpush1.bf16.msra.mxu1 %v17141_v58 }
 0xcdf   : > { %7018 = vmatpush1.bf16.msra.mxu0 %v17114_v24  ;;  %6758 = vmatprep.subr.bf16.mxu1 %v17149_v60  ;;  %v17176_v24 = vld [vmem:[#allocation36 + $0x1c4] ss:$8 sps:$4 sm:$0xff]  }
 0xce0   : > { %7019 = vmatprep.subr.bf16.mxu0 %v17122_v31  ;;  %v17177_v31 = vld [vmem:[#allocation36 + $0xa0] ss:$8 sps:$4 sm:$0xff]  }
 0xce2   : > { %6759 = vmatpush2.bf16.msra.mxu1 %v17147_v62 }
 0xce3   : > { %7020 = vmatpush1.bf16.msra.mxu0 %v17120_v34  ;;  %6760 = vmatprep.subr.bf16.mxu1 %v17155_v7  ;;  %v17182_v34 = vld [vmem:[#allocation36 + $0x1b4] ss:$8 sps:$4 sm:$0xff]   ;;  %v6195_v7 = vrot.slane %v6048_v5, %v19882_v32  ;;  %v17215_v5 = vld [vmem:[#allocation36 + $0x224] ss:$8 sps:$4 sm:$0xff]  }
 0xce4   : > { %7021 = vmatprep.subr.bf16.mxu0 %v17128_v40  ;;  %v17188_v40 = vld [vmem:[#allocation36 + $0x1a4] ss:$8 sps:$4 sm:$0xff]  }
 0xce6   : > { %6761 = vmatpush2.bf16.msra.mxu1 %v17153_v48 }
 0xce7   : > { %7022 = vmatpush1.bf16.msra.mxu0 %v17126_v38  ;;  %6762 = vmatprep.subr.bf16.mxu1 %v17161_v12  ;;  %v17185_v38 = vld [vmem:[#allocation36 + $0x94] ss:$8 sps:$4 sm:$0xff]  }
 0xce8   : > { %7023 = vmatprep.subr.bf16.mxu0 %v17134_v45  ;;  %v17189_v45 = vld [vmem:[#allocation36 + $0x80] ss:$8 sps:$4 sm:$0xff]  }
 0xcea   : > { %6763 = vmatpush2.bf16.msra.mxu1 %v17159_v15 }
 0xceb   : > { %7024 = vmatpush1.bf16.msra.mxu0 %v17132_v51  ;;  %6764 = vmatprep.subr.bf16.mxu1 %v17167_v18  ;;  %v17192_v51 = vld [vmem:[#allocation36 + $0x190] ss:$8 sps:$4 sm:$0xff]  }
 0xcec   : > { %7025 = vmatprep.subr.bf16.mxu0 %v17140_v54  ;;  %v17200_v54 = vld [vmem:[#allocation36 + $0x184] ss:$8 sps:$4 sm:$0xff]  }
 0xcee   : > { %6765 = vmatpush2.bf16.msra.mxu1 %v17165_v19 }
 0xcef   : > { %7026 = vmatpush1.bf16.msra.mxu0 %v17138_v55  ;;  %6766 = vmatprep.subr.bf16.mxu1 %v17173_v20 }
 0xcf0   : > { %7027 = vmatprep.subr.bf16.mxu0 %v17146_v59 }
 0xcf2   : > { %6767 = vmatpush2.bf16.msra.mxu1 %v17171_v23 }
 0xcf3   : > { %7028 = vmatpush1.bf16.msra.mxu0 %v17144_v61  ;;  %6768 = vmatprep.subr.bf16.mxu1 %v17179_v27 }
 0xcf4   : > { %7029 = vmatprep.subr.bf16.mxu0 %v17152_v63 }
 0xcf6   : > { %6769 = vmatpush2.bf16.msra.mxu1 %v17177_v31 }
 0xcf7   : > { %7030 = vmatpush1.bf16.msra.mxu0 %v17150_v1  ;;  %6770 = vmatprep.subr.bf16.mxu1 %v17185_v38 }
 0xcf8   : > { %7031 = vmatprep.subr.bf16.mxu0 %v17158_v9 }
 0xcfa   : > { %6771 = vmatpush2.bf16.msra.mxu1 %v17183_v37 }
 0xcfb   : > { %7032 = vmatpush2.bf16.msra.mxu0 %v17156_v10  ;;  %6772 = vmatprep.subr.bf16.mxu1 %v17191_v42 }
 0xcfc   : > { %7033 = vmatprep.subr.bf16.mxu0 %v17164_v17 }
 0xcfe   : > { %6773 = vmatpush2.bf16.msra.mxu1 %v17189_v45  ;;  %v17201_v45 = vld [vmem:[#allocation36 + $0x260] ss:$8 sps:$4 sm:$0xff]  }
 0xcff   : > { %7034 = vmatpush2.bf16.msra.mxu0 %v17162_v39  ;;  %7265 = vmatprep.subr.bf16.mxu1 %v17197_v52  ;;  %v17206_v52 = vld [vmem:[#allocation36 + $0x254] ss:$8 sps:$4 sm:$0xff]  }
 0xd00   : > { %7035 = vmatprep.subr.bf16.mxu0 %v17170_v35 }
 0xd03   : > { %7036 = vmatpush2.bf16.msra.mxu0 %v17168_v21 }
 0xd04   : > { %7037 = vmatprep.subr.bf16.mxu0 %v17176_v24  ;;  %v6534_v24 = vld [vmem:[#allocation5] sm:$0xf] }
 0xd07   : > { %7038 = vmatpush2.bf16.msra.mxu0 %v17174_v25 }
 0xd08   : > { %7039 = vmatprep.subr.bf16.mxu0 %v17182_v34 }
 0xd0b   : > { %7040 = vmatpush2.bf16.msra.mxu0 %v17180_v36  ;;  %v17195_v36 = vld [vmem:[#allocation36 + $0x270] ss:$8 sps:$4 sm:$0xff]  }
 0xd0c   : > { %7041 = vmatprep.subr.bf16.mxu0 %v17188_v40 }
 0xd0f   : > { %7042 = vmatpush2.bf16.msra.mxu0 %v17186_v26 }
 0xd10   : > { %7043 = vmatprep.subr.bf16.mxu0 %v17194_v50 }
 0xd13   : > { %7044 = vmatpush2.bf16.msra.mxu0 %v17192_v51 }
 0xd14   : > { %7045 = vmatprep.subr.bf16.mxu0 %v17200_v54 }
 0xd17   : > { %7046 = vmatpush2.bf16.msra.mxu0 %v17198_v57 }
 0xd7a   : > { %v6180_v55 = vpop.f32.mrf.mxu0 }
 0xd7b   : > { %v6198_v48 = vadd.f32 %v6191_v6, %v6180_v55  ;;  %v17213_v6 = vld [vmem:[#allocation36 + $0x220] ss:$8 sps:$4 sm:$0xff]  }
 0xd7c   : > { %v6182_v58 = vpop.f32.mrf.mxu0 }
 0xd7d   : > { %v6199_v9 = vadd.f32 %v6195_v7, %v6182_v58  ;;  %v17218_v7 = vld [vmem:[#allocation36 + $0x214] ss:$8 sps:$4 sm:$0xff]  }
 0xd7e   : > { %v6184_v59 = vpop.f32.mrf.mxu0 }
 0xd7f   : > { %v17204_v59 = vld [vmem:[#allocation36 + $0x250] ss:$8 sps:$4 sm:$0xff]  }
 0xd80   : > { %v6185_v60 = vpop.f32.mrf.mxu0 }
 0xd81   : > { %v6348_v61 = vpop.f32.mrf.mxu1 }
 0xd82   : > { %v6355_v10 = vadd.f32 %v6348_v61, %v6198_v48  ;;  %v17209_v61 = vld [vmem:[#allocation36 + $0x244] ss:$8 sps:$4 sm:$0xff]   ;;  %v17216_v48 = vld [vmem:[#allocation36 + $0x210] ss:$8 sps:$4 sm:$0xff]  }
 0xd83   : > { %v6350_v62 = vpop.f32.mrf.mxu1 }
 0xd84   : > { %v6356_v13 = vadd.f32 %v6350_v62, %v6199_v9  ;;  %v17207_v62 = vld [vmem:[#allocation36 + $0x240] ss:$8 sps:$4 sm:$0xff]   ;;  %v17221_v9 = vld [vmem:[#allocation36 + $0x204] ss:$8 sps:$4 sm:$0xff]  }
 0xd85   : > { %v6352_v63 = vpop.f32.mrf.mxu1 }
 0xd86   : > { %v17212_v63 = vld [vmem:[#allocation36 + $0x234] ss:$8 sps:$4 sm:$0xff]  }
 0xd87   : > { %v6353_v1 = vpop.f32.mrf.mxu1 }
 0xd88   : > { %v17210_v1 = vld [vmem:[#allocation36 + $0x230] ss:$8 sps:$4 sm:$0xff]  }
 0xd9a   : > { %v6499_v12 = vpop.f32.mrf.mxu0 }
 0xd9b   : > { %v6506_v14 = vadd.f32 %v6499_v12, %v6355_v10  ;;  %v17219_v10 = vld [vmem:[#allocation36 + $0x200] ss:$8 sps:$4 sm:$0xff]   ;;  %v17224_v12 = vld [vmem:[#allocation36 + $0x2f4] ss:$8 sps:$4 sm:$0xff]  }
 0xd9c   : > { %v6501_v15 = vpop.f32.mrf.mxu0 }
 0xd9d   : > { %v6507_v16 = vadd.f32 %v6501_v15, %v6356_v13  ;;  %v6508_v17 = vmax.f32 %v6506_v14, 0.0  ;;  %v17222_v13 = vld [vmem:[#allocation36 + $0x2f0] ss:$8 sps:$4 sm:$0xff]   ;;  %v17227_v14 = vld [vmem:[#allocation36 + $0x2e4] ss:$8 sps:$4 sm:$0xff]  }
 0xd9e   : > { %v6503_v44 = vpop.f32.mrf.mxu0  ;;  %v17225_v15 = vld [vmem:[#allocation36 + $0x2e0] ss:$8 sps:$4 sm:$0xff]  }
 0xd9f   : > { %v6509_v39 = vmax.f32 %v6507_v16, 0.0  ;;  %v17230_v16 = vld [vmem:[#allocation36 + $0x2d4] ss:$8 sps:$4 sm:$0xff]   ;;  %v17228_v44 = vld [vmem:[#allocation36 + $0x2d0] ss:$8 sps:$4 sm:$0xff]  }
 0xda0   : > { %v6504_v18 = vpop.f32.mrf.mxu0 }
 0xda1   : > { %v15228_v19 = vpack.c.bf16 %v6509_v39, %v6508_v17  ;;  %v17233_v17 = vld [vmem:[#allocation36 + $0x2c4] ss:$8 sps:$4 sm:$0xff]   ;;  %v17231_v39 = vld [vmem:[#allocation36 + $0x2c0] ss:$8 sps:$4 sm:$0xff]   ;;  %v17236_v18 = vld [vmem:[#allocation36 + $0x2b4] ss:$8 sps:$4 sm:$0xff]  }
 0xda3   : > { %v6521_v35 = vrot.slane %v15228_v19, %v20175_v22  ;;  %v17203_v22 = vld [vmem:[#allocation36 + $0x264] ss:$8 sps:$4 sm:$0xff]   ;;  %v17234_v19 = vld [vmem:[#allocation36 + $0x2b0] ss:$8 sps:$4 sm:$0xff]  }
 0xda5   : > { %v6523_v21 = vshrl.u32 %v6521_v35, 16  ;;  %v6526_v23 = vshll.u32 %v6521_v35, 16  ;;  %v17239_v35 = vld [vmem:[#allocation36 + $0x2a4] ss:$8 sps:$4 sm:$0xff]  }
 0xda7   : > { %v6525_v20 = vrot.slane %v6523_v21, 7  ;;  %v17237_v21 = vld [vmem:[#allocation36 + $0x2a0] ss:$8 sps:$4 sm:$0xff]  }
 0xda9   : > { %v6528_v25 = vor.u32 %v6526_v23, %v6525_v20  ;;  %v17242_v20 = vld [vmem:[#allocation36 + $0x294] ss:$8 sps:$4 sm:$0xff]   ;;  %v17240_v23 = vld [vmem:[#allocation36 + $0x290] ss:$8 sps:$4 sm:$0xff]  }
 0xdab   : > { %v6535_v27 = vsel %vm6533_vm14, %v6528_v25, %v6534_v24  ;;  %v17245_v24 = vld [vmem:[#allocation36 + $0x284] ss:$8 sps:$4 sm:$0xff]   ;;  %v17243_v25 = vld [vmem:[#allocation36 + $0x280] ss:$8 sps:$4 sm:$0xff]  }
 0xdac   : > { %6536 = vst [vmem:[#allocation5] sm:$0xf] %v6535_v27 }
 0xdb3   : > { %v15229_v31 = vld.sshfl [vmem:[#allocation5] sm:$0x11 pattern:$0x76325410] }
 0xdb4   : > { %v6579_v34 = vcombine.high %v15229_v31, %v15229_v31  ;;  %v20209_v37 = vld.sshfl [vmem:[#allocation5] sm:$0x22 pattern:$0x76325410] }
 0xdb5   : > { %v7100_v38 = vcombine.high %v20209_v37, %v20209_v37  ;;  %v15262_v40 = vld.sshfl [vmem:[#allocation5] sm:$0x33 pattern:$0x76325410]  ;;  %v7101_v27 = vrot.slane %v20209_v37, 1 }
 0xdb6   : > { %6774 = vmatprep.mubr.bf16.mxu1 %v6579_v34  ;;  %v6838_v26 = vcombine.high %v15262_v40, %v15262_v40  ;;  %v6842_v42 = vshll.u32 %v15262_v40, 16  ;;  %v6840_v55 = vshrl.u32 %v15262_v40, 16  ;;  %v17246_v34 = vld [vmem:[#allocation38 + $0x170] ss:$8 sps:$4 sm:$0xff]   ;;  %v17252_v40 = vld [vmem:[#allocation38 + $0x160] ss:$8 sps:$4 sm:$0xff]  }
 0xdb7   : > { %6775 = vmatmul.mubr.bf16.vlgmr.msra.gmra.mxu1 %v15229_v31  ;;  %v7102_v41 = vrot.slane %v7100_v38, 1  ;;  %v17248_v31 = vld [vmem:[#allocation38 + $0x174] ss:$8 sps:$4 sm:$0xff]   ;;  %v17249_v38 = vld [vmem:[#allocation38 + $0x70] ss:$8 sps:$4 sm:$0xff]  }
 0xdb8   : > { %7266 = vmatpush1.bf16.msra.mxu1 %v17195_v36  ;;  %v6849_v50 = vshll.u32 %v6838_v26, 16  ;;  %v6844_v51 = vrot.slane %v6842_v42, 1  ;;  %v6847_v54 = vshrl.u32 %v6838_v26, 16  ;;  %v17251_v36 = vld [vmem:[#allocation38 + $0x74] ss:$8 sps:$4 sm:$0xff]  }
 0xdb9   : > { %7297 = vmatprep.mubr.bf16.mxu1 %v7102_v41  ;;  %7267 = vmatprep.subr.bf16.mxu1 %v17203_v22  ;;  %v17254_v22 = vld [vmem:[#allocation38 + $0x164] ss:$8 sps:$4 sm:$0xff]   ;;  %v17255_v42 = vld [vmem:[#allocation38 + $0x60] ss:$8 sps:$4 sm:$0xff]   ;;  %v17260_v41 = vld [vmem:[#allocation38 + $0x154] ss:$8 sps:$4 sm:$0xff]  }
 0xdba   : > { %v6851_v57 = vrot.slane %v6849_v50, 1  ;;  %v6845_v60 = vor.u32 %v6844_v51, %v6840_v55  ;;  %7504 = vmatprep.subr.bf16.mxu0 %v17251_v36  ;;  %v17257_v26 = vld [vmem:[#allocation38 + $0x64] ss:$8 sps:$4 sm:$0xff]   ;;  %v17263_v50 = vld [vmem:[#allocation38 + $0x54] ss:$8 sps:$4 sm:$0xff]  }
 0xdbb   : > { %v17261_v37 = vld [vmem:[#allocation38 + $0x50] ss:$8 sps:$4 sm:$0xff]   ;;  %v17266_v51 = vld [vmem:[#allocation38 + $0x144] ss:$8 sps:$4 sm:$0xff]   ;;  %v17272_v55 = vld [vmem:[#allocation38 + $0x134] ss:$8 sps:$4 sm:$0xff]  }
 0xdbc   : > { %7268 = vmatpush1.bf16.msra.mxu1 %v17201_v45  ;;  %v6852_v58 = vor.u32 %v6851_v57, %v6847_v54  ;;  %v17258_v45 = vld [vmem:[#allocation38 + $0x150] ss:$8 sps:$4 sm:$0xff]   ;;  %v17264_v54 = vld [vmem:[#allocation38 + $0x140] ss:$8 sps:$4 sm:$0xff]   ;;  %v17323_v36 = vld [vmem:[#allocation38 + $0xb4] ss:$8 sps:$4 sm:$0xff]  }
 0xdbd   : > { %7269 = vmatprep.subr.bf16.mxu1 %v17206_v52  ;;  %v17269_v52 = vld [vmem:[#allocation38 + $0x44] ss:$8 sps:$4 sm:$0xff]   ;;  %v17267_v57 = vld [vmem:[#allocation38 + $0x40] ss:$8 sps:$4 sm:$0xff]  }
 0xdbe   : > { %7047 = vmatprep.mubr.bf16.mxu0 %v6852_v58  ;;  %v17275_v58 = vld [vmem:[#allocation38 + $0x34] ss:$8 sps:$4 sm:$0xff]  }
 0xdbf   : > { %7048 = vmatmul.mubr.bf16.vlgmr.msra.gmra.mxu0 %v6845_v60  ;;  %v17273_v60 = vld [vmem:[#allocation38 + $0x30] ss:$8 sps:$4 sm:$0xff]  }
 0xdc0   : > { %7270 = vmatpush1.bf16.msra.mxu1 %v17204_v59  ;;  %7505 = vmatpush1.bf16.msra.mxu0 %v17249_v38  ;;  %v17270_v59 = vld [vmem:[#allocation38 + $0x130] ss:$8 sps:$4 sm:$0xff]  }
 0xdc1   : > { %7271 = vmatprep.subr.bf16.mxu1 %v17209_v61  ;;  %7506 = vmatprep.subr.bf16.mxu0 %v17257_v26  ;;  %v17278_v61 = vld [vmem:[#allocation38 + $0x124] ss:$8 sps:$4 sm:$0xff]   ;;  %v17318_v38 = vld [vmem:[#allocation38 + $0x1b0] ss:$8 sps:$4 sm:$0xff]  }
 0xdc2   : > { %v17329_v26 = vld [vmem:[#allocation38 + $0xa4] ss:$8 sps:$4 sm:$0xff]  }
 0xdc4   : > { %7272 = vmatpush1.bf16.msra.mxu1 %v17207_v62  ;;  %7507 = vmatpush1.bf16.msra.mxu0 %v17255_v42  ;;  %v17281_v62 = vld [vmem:[#allocation38 + $0x24] ss:$8 sps:$4 sm:$0xff]   ;;  %v17324_v42 = vld [vmem:[#allocation38 + $0x1a0] ss:$8 sps:$4 sm:$0xff]  }
 0xdc5   : > { %7273 = vmatprep.subr.bf16.mxu1 %v17212_v63  ;;  %7508 = vmatprep.subr.bf16.mxu0 %v17263_v50  ;;  %v17276_v63 = vld [vmem:[#allocation38 + $0x120] ss:$8 sps:$4 sm:$0xff]   ;;  %v17330_v50 = vld [vmem:[#allocation38 + $0x190] ss:$8 sps:$4 sm:$0xff]  }
 0xdc8   : > { %7274 = vmatpush1.bf16.msra.mxu1 %v17210_v1  ;;  %7509 = vmatpush1.bf16.msra.mxu0 %v17261_v37  ;;  %v17279_v1 = vld [vmem:[#allocation38 + $0x20] ss:$8 sps:$4 sm:$0xff]   ;;  %v17335_v37 = vld [vmem:[#allocation38 + $0x94] ss:$8 sps:$4 sm:$0xff]  }
 0xdc9   : > { %7275 = vmatprep.subr.bf16.mxu1 %v17215_v5  ;;  %7510 = vmatprep.subr.bf16.mxu0 %v17269_v52  ;;  %v17284_v5 = vld [vmem:[#allocation38 + $0x114] ss:$8 sps:$4 sm:$0xff]   ;;  %v17338_v52 = vld [vmem:[#allocation38 + $0x184] ss:$8 sps:$4 sm:$0xff]  }
 0xdcc   : > { %7276 = vmatpush1.bf16.msra.mxu1 %v17213_v6  ;;  %7511 = vmatpush1.bf16.msra.mxu0 %v17267_v57  ;;  %v17287_v6 = vld [vmem:[#allocation38 + $0x14] ss:$8 sps:$4 sm:$0xff]   ;;  %v17341_v57 = vld [vmem:[#allocation38 + $0x84] ss:$8 sps:$4 sm:$0xff]  }
 0xdcd   : > { %7277 = vmatprep.subr.bf16.mxu1 %v17218_v7  ;;  %7512 = vmatprep.subr.bf16.mxu0 %v17275_v58  ;;  %v17282_v7 = vld [vmem:[#allocation38 + $0x110] ss:$8 sps:$4 sm:$0xff]   ;;  %v17344_v58 = vld [vmem:[#allocation39 + $0x134] ss:$8 sps:$4 sm:$0xff]  }
 0xdd0   : > { %7278 = vmatpush1.bf16.msra.mxu1 %v17216_v48  ;;  %7513 = vmatpush1.bf16.msra.mxu0 %v17273_v60  ;;  %v17285_v48 = vld [vmem:[#allocation38 + $0x10] ss:$8 sps:$4 sm:$0xff]  }
 0xdd1   : > { %7279 = vmatprep.subr.bf16.mxu1 %v17221_v9  ;;  %7514 = vmatprep.subr.bf16.mxu0 %v17281_v62  ;;  %v17290_v9 = vld [vmem:[#allocation38 + $0x104] ss:$8 sps:$4 sm:$0xff]  }
 0xdd4   : > { %7280 = vmatpush1.bf16.msra.mxu1 %v17219_v10  ;;  %7515 = vmatpush1.bf16.msra.mxu0 %v17279_v1  ;;  %v17293_v10 = vld [vmem:[#allocation38 + $0x4] ss:$8 sps:$4 sm:$0xff]  }
 0xdd5   : > { %7281 = vmatprep.subr.bf16.mxu1 %v17224_v12  ;;  %7516 = vmatprep.subr.bf16.mxu0 %v17287_v6  ;;  %v17288_v12 = vld [vmem:[#allocation38 + $0x100] ss:$8 sps:$4 sm:$0xff]  }
 0xdd8   : > { %7282 = vmatpush2.bf16.msra.mxu1 %v17222_v13  ;;  %7517 = vmatpush1.bf16.msra.mxu0 %v17285_v48  ;;  %v17291_v13 = vld [vmem:[#allocation38] ss:$8 sps:$4 sm:$0xff]  }
 0xdd9   : > { %7283 = vmatprep.subr.bf16.mxu1 %v17227_v14  ;;  %v17296_v14 = vld [vmem:[#allocation38 + $0x1f4] ss:$8 sps:$4 sm:$0xff]   ;;  %7518 = vmatprep.subr.bf16.mxu0 %v17293_v10 }
 0xddc   : > { %7284 = vmatpush2.bf16.msra.mxu1 %v17225_v15  ;;  %v17299_v15 = vld [vmem:[#allocation38 + $0xf4] ss:$8 sps:$4 sm:$0xff]   ;;  %7519 = vmatpush1.bf16.msra.mxu0 %v17291_v13 }
 0xddd   : > { %7285 = vmatprep.subr.bf16.mxu1 %v17230_v16  ;;  %v17294_v16 = vld [vmem:[#allocation38 + $0x1f0] ss:$8 sps:$4 sm:$0xff]   ;;  %7520 = vmatprep.subr.bf16.mxu0 %v17299_v15 }
 0xde0   : > { %7286 = vmatpush2.bf16.msra.mxu1 %v17228_v44  ;;  %v17297_v44 = vld [vmem:[#allocation38 + $0xf0] ss:$8 sps:$4 sm:$0xff]  }
 0xde1   : > { %7287 = vmatprep.subr.bf16.mxu1 %v17233_v17  ;;  %v17302_v17 = vld [vmem:[#allocation38 + $0x1e4] ss:$8 sps:$4 sm:$0xff]   ;;  %7521 = vmatpush2.bf16.msra.mxu0 %v17297_v44 }
 0xde4   : > { %7288 = vmatpush2.bf16.msra.mxu1 %v17231_v39  ;;  %v17305_v39 = vld [vmem:[#allocation38 + $0xe4] ss:$8 sps:$4 sm:$0xff]  }
 0xde5   : > { %7289 = vmatprep.subr.bf16.mxu1 %v17236_v18  ;;  %v17300_v18 = vld [vmem:[#allocation38 + $0x1e0] ss:$8 sps:$4 sm:$0xff]   ;;  %7522 = vmatprep.subr.bf16.mxu0 %v17305_v39 }
 0xde8   : > { %7290 = vmatpush2.bf16.msra.mxu1 %v17234_v19  ;;  %v17303_v19 = vld [vmem:[#allocation38 + $0xe0] ss:$8 sps:$4 sm:$0xff]  }
 0xde9   : > { %7291 = vmatprep.subr.bf16.mxu1 %v17239_v35  ;;  %v17308_v35 = vld [vmem:[#allocation38 + $0x1d4] ss:$8 sps:$4 sm:$0xff]   ;;  %7523 = vmatpush2.bf16.msra.mxu0 %v17303_v19 }
 0xdec   : > { %7292 = vmatpush2.bf16.msra.mxu1 %v17237_v21  ;;  %v17311_v21 = vld [vmem:[#allocation38 + $0xd4] ss:$8 sps:$4 sm:$0xff]  }
 0xded   : > { %7293 = vmatprep.subr.bf16.mxu1 %v17242_v20  ;;  %v17306_v20 = vld [vmem:[#allocation38 + $0x1d0] ss:$8 sps:$4 sm:$0xff]   ;;  %7524 = vmatprep.subr.bf16.mxu0 %v17311_v21 }
 0xdf0   : > { %7294 = vmatpush2.bf16.msra.mxu1 %v17240_v23  ;;  %v17309_v23 = vld [vmem:[#allocation38 + $0xd0] ss:$8 sps:$4 sm:$0xff]  }
 0xdf1   : > { %7295 = vmatprep.subr.bf16.mxu1 %v17245_v24  ;;  %v17314_v24 = vld [vmem:[#allocation38 + $0x1c4] ss:$8 sps:$4 sm:$0xff]   ;;  %7525 = vmatpush2.bf16.msra.mxu0 %v17309_v23 }
 0xdf4   : > { %7296 = vmatpush2.bf16.msra.mxu1 %v17243_v25  ;;  %v17317_v25 = vld [vmem:[#allocation38 + $0xc4] ss:$8 sps:$4 sm:$0xff]  }
 0xdf5   : > { %7740 = vmatprep.subr.bf16.mxu1 %v17248_v31  ;;  %v17315_v31 = vld [vmem:[#allocation38 + $0xc0] ss:$8 sps:$4 sm:$0xff]   ;;  %7526 = vmatprep.subr.bf16.mxu0 %v17317_v25 }
 0xdf6   : > { %7527 = vmatpush2.bf16.msra.mxu0 %v17315_v31 }
 0xdf7   : > { %7298 = vmatmul.mubr.bf16.vlgmr.msra.gmra.mxu1 %v7101_v27  ;;  %v17312_v27 = vld [vmem:[#allocation38 + $0x1c0] ss:$8 sps:$4 sm:$0xff]   ;;  %7528 = vmatprep.subr.bf16.mxu0 %v17323_v36  ;;  %v17348_v36 = vld [vmem:[#allocation39 + $0x124] ss:$8 sps:$4 sm:$0xff]  }
 0xdf8   : > { %7741 = vmatpush1.bf16.msra.mxu1 %v17246_v34  ;;  %v17320_v34 = vld [vmem:[#allocation38 + $0x1b4] ss:$8 sps:$4 sm:$0xff]  }
 0xdf9   : > { %7742 = vmatprep.subr.bf16.mxu1 %v17254_v22  ;;  %v17321_v22 = vld [vmem:[#allocation38 + $0xb0] ss:$8 sps:$4 sm:$0xff]  }
 0xdfa   : > { %7529 = vmatpush2.bf16.msra.mxu0 %v17321_v22  ;;  %v17346_v22 = vld [vmem:[#allocation39 + $0x120] ss:$8 sps:$4 sm:$0xff]  }
 0xdfb   : > { %7530 = vmatprep.subr.bf16.mxu0 %v17329_v26  ;;  %v17349_v26 = vld [vmem:[#allocation39 + $0x110] ss:$8 sps:$4 sm:$0xff]  }
 0xdfc   : > { %7743 = vmatpush1.bf16.msra.mxu1 %v17252_v40  ;;  %v17326_v40 = vld [vmem:[#allocation38 + $0x1a4] ss:$8 sps:$4 sm:$0xff]  }
 0xdfd   : > { %7744 = vmatprep.subr.bf16.mxu1 %v17260_v41  ;;  %v17327_v41 = vld [vmem:[#allocation38 + $0xa0] ss:$8 sps:$4 sm:$0xff]  }
 0xdfe   : > { %7531 = vmatpush2.bf16.msra.mxu0 %v17327_v41  ;;  %v17352_v41 = vld [vmem:[#allocation39 + $0x100] ss:$8 sps:$4 sm:$0xff]  }
 0xdff   : > { %7532 = vmatprep.subr.bf16.mxu0 %v17335_v37  ;;  %v17360_v37 = vld [vmem:[#allocation39 + $0xe4] ss:$8 sps:$4 sm:$0xff]  }
 0xe00   : > { %7745 = vmatpush1.bf16.msra.mxu1 %v17258_v45  ;;  %v17332_v45 = vld [vmem:[#allocation38 + $0x194] ss:$8 sps:$4 sm:$0xff]  }
 0xe01   : > { %7746 = vmatprep.subr.bf16.mxu1 %v17266_v51  ;;  %v17333_v51 = vld [vmem:[#allocation38 + $0x90] ss:$8 sps:$4 sm:$0xff]  }
 0xe02   : > { %7533 = vmatpush2.bf16.msra.mxu0 %v17333_v51  ;;  %v17358_v51 = vld [vmem:[#allocation39 + $0xe0] ss:$8 sps:$4 sm:$0xff]  }
 0xe03   : > { %7534 = vmatprep.subr.bf16.mxu0 %v17341_v57  ;;  %v17366_v57 = vld [vmem:[#allocation39 + $0xc4] ss:$8 sps:$4 sm:$0xff]  }
 0xe04   : > { %7747 = vmatpush1.bf16.msra.mxu1 %v17264_v54  ;;  %v17336_v54 = vld [vmem:[#allocation38 + $0x180] ss:$8 sps:$4 sm:$0xff]  }
 0xe05   : > { %7748 = vmatprep.subr.bf16.mxu1 %v17272_v55  ;;  %v17339_v55 = vld [vmem:[#allocation38 + $0x80] ss:$8 sps:$4 sm:$0xff]  }
 0xe06   : > { %7535 = vmatpush2.bf16.msra.mxu0 %v17339_v55  ;;  %v17364_v55 = vld [vmem:[#allocation39 + $0xc0] ss:$8 sps:$4 sm:$0xff]  }
 0xe08   : > { %7749 = vmatpush1.bf16.msra.mxu1 %v17270_v59 }
 0xe09   : > { %7750 = vmatprep.subr.bf16.mxu1 %v17278_v61 }
 0xe0c   : > { %7751 = vmatpush1.bf16.msra.mxu1 %v17276_v63 }
 0xe0d   : > { %7752 = vmatprep.subr.bf16.mxu1 %v17284_v5 }
 0xe10   : > { %7753 = vmatpush1.bf16.msra.mxu1 %v17282_v7  ;;  %v6537_v7 = vld [vmem:[%s20721_s13] sm:$0x3]  ;;  %s20781_s13 = sld [smem:[#allocation107_spill]] }
 0xe11   : > { %7754 = vmatprep.subr.bf16.mxu1 %v17290_v9  ;;  %v6787_v48 = vrot.slane %v6537_v7, %v19879_v30  ;;  %v20216_v9 = vld [vmem:[#allocation8] sm:$0x77]  ;;  %v6791_v10 = vrot.slane %v6537_v7, %v19882_v32 }
 0xe12   : > { %v15426_v13 = vcombine.high %v20216_v9, %v20216_v9  ;;  %v17376_v7 = vld [vmem:[#allocation39 + $0x140] ss:$8 sps:$4 sm:$0xff]  }
 0xe14   : > { %7755 = vmatpush1.bf16.msra.mxu1 %v17288_v12  ;;  %v8171_v39 = vshll.u32 %v15426_v13, 16  ;;  %v8169_v31 = vshrl.u32 %v15426_v13, 16  ;;  %v17456_v13 = vld [vmem:[#allocation41 + $0x70] ss:$8 sps:$4 sm:$0xff]  }
 0xe15   : > { %7756 = vmatprep.subr.bf16.mxu1 %v17296_v14 }
 0xe16   : > { %v8173_v23 = vrot.slane %v8171_v39, 1 }
 0xe18   : > { %7757 = vmatpush2.bf16.msra.mxu1 %v17294_v16 }
 0xe19   : > { %7758 = vmatprep.subr.bf16.mxu1 %v17302_v17 }
 0xe1c   : > { %7759 = vmatpush2.bf16.msra.mxu1 %v17300_v18 }
 0xe1d   : > { %7760 = vmatprep.subr.bf16.mxu1 %v17308_v35 }
 0xe20   : > { %7761 = vmatpush2.bf16.msra.mxu1 %v17306_v20 }
 0xe21   : > { %7762 = vmatprep.subr.bf16.mxu1 %v17314_v24 }
 0xe24   : > { %7763 = vmatpush2.bf16.msra.mxu1 %v17312_v27  ;;  %v17342_v27 = vld [vmem:[#allocation39 + $0x130] ss:$8 sps:$4 sm:$0xff]  }
 0xe25   : > { %7764 = vmatprep.subr.bf16.mxu1 %v17320_v34 }
 0xe28   : > { %7765 = vmatpush2.bf16.msra.mxu1 %v17318_v38  ;;  %v8174_v38 = vor.u32 %v8173_v23, %v8169_v31 }
 0xe29   : > { %7766 = vmatprep.subr.bf16.mxu1 %v17326_v40  ;;  %v17351_v40 = vld [vmem:[#allocation39 + $0x114] ss:$8 sps:$4 sm:$0xff]  }
 0xe2c   : > { %7767 = vmatpush2.bf16.msra.mxu1 %v17324_v42  ;;  %v17354_v42 = vld [vmem:[#allocation39 + $0x104] ss:$8 sps:$4 sm:$0xff]  }
 0xe2d   : > { %7768 = vmatprep.subr.bf16.mxu1 %v17332_v45  ;;  %v17357_v45 = vld [vmem:[#allocation39 + $0xf4] ss:$8 sps:$4 sm:$0xff]  }
 0xe30   : > { %7769 = vmatpush2.bf16.msra.mxu1 %v17330_v50  ;;  %v17355_v50 = vld [vmem:[#allocation39 + $0xf0] ss:$8 sps:$4 sm:$0xff]  }
 0xe31   : > { %7770 = vmatprep.subr.bf16.mxu1 %v17338_v52  ;;  %v17363_v52 = vld [vmem:[#allocation39 + $0xd4] ss:$8 sps:$4 sm:$0xff]  }
 0xe34   : > { %7771 = vmatpush2.bf16.msra.mxu1 %v17336_v54  ;;  %v17361_v54 = vld [vmem:[#allocation39 + $0xd0] ss:$8 sps:$4 sm:$0xff]  }
 0xe35   : > { %8299 = vmatprep.subr.bf16.mxu1 %v17344_v58  ;;  %v17369_v58 = vld [vmem:[#allocation39 + $0x174] ss:$8 sps:$4 sm:$0xff]  }
 0xe77   : > { %v6776_v59 = vpop.f32.mrf.mxu1 }
 0xe78   : > { %v6794_v12 = vadd.f32 %v6787_v48, %v6776_v59  ;;  %v17367_v59 = vld [vmem:[#allocation39 + $0x170] ss:$8 sps:$4 sm:$0xff]  }
 0xe79   : > { %v6778_v60 = vpop.f32.mrf.mxu1 }
 0xe7a   : > { %v6795_v14 = vadd.f32 %v6791_v10, %v6778_v60  ;;  %v17372_v60 = vld [vmem:[#allocation39 + $0x164] ss:$8 sps:$4 sm:$0xff]  }
 0xe7b   : > { %v6780_v61 = vpop.f32.mrf.mxu1 }
 0xe7c   : > { %v17370_v61 = vld [vmem:[#allocation39 + $0x160] ss:$8 sps:$4 sm:$0xff]  }
 0xe7d   : > { %v6781_v62 = vpop.f32.mrf.mxu1 }
 0xe7e   : > { %v17375_v62 = vld [vmem:[#allocation39 + $0x154] ss:$8 sps:$4 sm:$0xff]  }
 0xe7f   : > { %v7049_v63 = vpop.f32.mrf.mxu0 }
 0xe80   : > { %v7056_v15 = vadd.f32 %v7049_v63, %v6794_v12  ;;  %v15425_v63 = vcombine.low %v20216_v9, %v20216_v9  ;;  %v17467_v9 = vld [vmem:[#allocation41 + $0x54] ss:$8 sps:$4 sm:$0xff]  }
 0xe81   : > { %v7051_v1 = vpop.f32.mrf.mxu0 }
 0xe82   : > { %v7057_v44 = vadd.f32 %v7051_v1, %v6795_v14  ;;  %v17373_v1 = vld [vmem:[#allocation39 + $0x150] ss:$8 sps:$4 sm:$0xff]   ;;  %v8162_v10 = vshrl.u32 %v15425_v63, 16  ;;  %v17458_v14 = vld [vmem:[#allocation41 + $0x74] ss:$8 sps:$4 sm:$0xff]  }
 0xe83   : > { %v7053_v5 = vpop.f32.mrf.mxu0 }
 0xe84   : > { %v17378_v5 = vld [vmem:[#allocation39 + $0x144] ss:$8 sps:$4 sm:$0xff]  }
 0xe85   : > { %v7054_v6 = vpop.f32.mrf.mxu0 }
 0xe86   : > { %v8164_v6 = vshll.u32 %v15425_v63, 16  ;;  %v17402_v63 = vld [vmem:[#allocation39] ss:$8 sps:$4 sm:$0xff]  }
 0xe88   : > { %v8166_v48 = vrot.slane %v8164_v6, 1  ;;  %v17410_v6 = vld [vmem:[#allocation39 + $0xa4] ss:$8 sps:$4 sm:$0xff]  }
 0xe8a   : > { %v8167_v12 = vor.u32 %v8166_v48, %v8162_v10  ;;  %v17408_v10 = vld [vmem:[#allocation39 + $0xa0] ss:$8 sps:$4 sm:$0xff]  }
 0xeb7   : > { %v7299_v16 = vpop.f32.mrf.mxu1 }
 0xeb8   : > { %v7306_v17 = vadd.f32 %v7299_v16, %v7056_v15  ;;  %v17461_v15 = vld [vmem:[#allocation41 + $0x64] ss:$8 sps:$4 sm:$0xff]   ;;  %v17459_v16 = vld [vmem:[#allocation41 + $0x60] ss:$8 sps:$4 sm:$0xff]  }
 0xeb9   : > { %v7301_v18 = vpop.f32.mrf.mxu1 }
 0xeba   : > { %v7307_v19 = vadd.f32 %v7301_v18, %v7057_v44  ;;  %v7308_v35 = vmax.f32 %v7306_v17, 0.0  ;;  %v17465_v44 = vld [vmem:[#allocation41 + $0x50] ss:$8 sps:$4 sm:$0xff]  }
 0xebb   : > { %v7303_v21 = vpop.f32.mrf.mxu1 }
 0xebc   : > { %v7309_v20 = vmax.f32 %v7307_v19, 0.0  ;;  %v7310_v34 = vpack.c.bf16 %v7308_v35, %v7308_v35 }
 0xebd   : > { %v7304_v24 = vpop.f32.mrf.mxu1 }
 0xebe   : > { %v7311_v25 = vpack.c.bf16 %v7309_v20, %v7309_v20 }
 0xec0   : > { %7536 = vmatprep.mubr.bf16.mxu0 %v7311_v25  ;;  %7772 = vmatprep.mubr.bf16.mxu1 %v7311_v25 }
 0xec1   : > { %7537 = vmatmul.mubr.bf16.vlgmr.msra.gmra.mxu0 %v7310_v34  ;;  %7773 = vmatmul.mubr.bf16.vlgmr.msra.gmra.mxu1 %v7310_v34 }
 0xec2   : > { %8300 = vmatpush1.bf16.msra.mxu1 %v17342_v27  ;;  %15451 = vmatprep.mubr.msk.bf16.mxu1 %vm20722_vm4, %v8174_v38  ;;  %v17382_v38 = vld [vmem:[#allocation39 + $0x74] ss:$8 sps:$4 sm:$0xff]  }
 0xec3   : > { %8301 = vmatprep.subr.bf16.mxu1 %v17348_v36  ;;  %7828 = vmatprep.mubr.bf16.mxu0 %v19238_v0  ;;  %v15392_v36 = vld [vmem:[%s20723_s3 + $0x2] sm:$0x3] }
 0xec6   : > { %8302 = vmatpush1.bf16.msra.mxu1 %v17346_v22 }
 0xec7   : > { %8303 = vmatprep.subr.bf16.mxu1 %v17351_v40  ;;  %v20231_v40 = vld [vmem:[#allocation8] sm:$0x33] }
 0xeca   : > { %8304 = vmatpush1.bf16.msra.mxu1 %v17349_v26  ;;  %v17380_v26 = vld [vmem:[#allocation39 + $0x70] ss:$8 sps:$4 sm:$0xff]  }
 0xecb   : > { %8305 = vmatprep.subr.bf16.mxu1 %v17354_v42  ;;  %v7783_v42 = vld [vmem:[%s20723_s3] sm:$0x3] }
 0xece   : > { %8306 = vmatpush1.bf16.msra.mxu1 %v17352_v41  ;;  %v17386_v41 = vld [vmem:[#allocation39 + $0x64] ss:$8 sps:$4 sm:$0xff]  }
 0xecf   : > { %8307 = vmatprep.subr.bf16.mxu1 %v17357_v45  ;;  %v15399_v45 = vcombine.high %v20231_v40, %v20231_v40 }
 0xed2   : > { %8308 = vmatpush1.bf16.msra.mxu1 %v17355_v50  ;;  %v17384_v50 = vld [vmem:[#allocation39 + $0x60] ss:$8 sps:$4 sm:$0xff]  }
 0xed3   : > { %8309 = vmatprep.subr.bf16.mxu1 %v17360_v37  ;;  %v17389_v37 = vld [vmem:[#allocation39 + $0x54] ss:$8 sps:$4 sm:$0xff]  }
 0xed6   : > { %8310 = vmatpush1.bf16.msra.mxu1 %v17358_v51  ;;  %v17387_v51 = vld [vmem:[#allocation39 + $0x50] ss:$8 sps:$4 sm:$0xff]  }
 0xed7   : > { %8311 = vmatprep.subr.bf16.mxu1 %v17363_v52  ;;  %v17392_v52 = vld [vmem:[#allocation39 + $0x44] ss:$8 sps:$4 sm:$0xff]  }
 0xeda   : > { %8312 = vmatpush1.bf16.msra.mxu1 %v17361_v54  ;;  %v17390_v54 = vld [vmem:[#allocation39 + $0x40] ss:$8 sps:$4 sm:$0xff]  }
 0xedb   : > { %8313 = vmatprep.subr.bf16.mxu1 %v17366_v57  ;;  %v17395_v57 = vld [vmem:[#allocation39 + $0x34] ss:$8 sps:$4 sm:$0xff]  }
 0xede   : > { %8314 = vmatpush1.bf16.msra.mxu1 %v17364_v55  ;;  %v17393_v55 = vld [vmem:[#allocation39 + $0x30] ss:$8 sps:$4 sm:$0xff]  }
 0xedf   : > { %8323 = vmatprep.subr.bf16.mxu1 %v17369_v58  ;;  %v17398_v58 = vld [vmem:[#allocation39 + $0x24] ss:$8 sps:$4 sm:$0xff]  }
 0xee2   : > { %8324 = vmatpush2.bf16.msra.mxu1 %v17367_v59  ;;  %v17396_v59 = vld [vmem:[#allocation39 + $0x20] ss:$8 sps:$4 sm:$0xff]  }
 0xee3   : > { %8325 = vmatprep.subr.bf16.mxu1 %v17372_v60  ;;  %v17401_v60 = vld [vmem:[#allocation39 + $0x14] ss:$8 sps:$4 sm:$0xff]  }
 0xee6   : > { %8326 = vmatpush2.bf16.msra.mxu1 %v17370_v61  ;;  %v17399_v61 = vld [vmem:[#allocation39 + $0x10] ss:$8 sps:$4 sm:$0xff]  }
 0xee7   : > { %8327 = vmatprep.subr.bf16.mxu1 %v17375_v62  ;;  %v17404_v62 = vld [vmem:[#allocation39 + $0x4] ss:$8 sps:$4 sm:$0xff]  }
 0xeea   : > { %8328 = vmatpush2.bf16.msra.mxu1 %v17373_v1  ;;  %v17407_v1 = vld [vmem:[#allocation39 + $0xb4] ss:$8 sps:$4 sm:$0xff]  }
 0xeeb   : > { %8329 = vmatprep.subr.bf16.mxu1 %v17378_v5  ;;  %v17405_v5 = vld [vmem:[#allocation39 + $0xb0] ss:$8 sps:$4 sm:$0xff]  }
 0xeee   : > { %8330 = vmatpush2.bf16.msra.mxu1 %v17376_v7 }
 0xeef   : > { %8696 = vmatprep.subr.bf16.mxu1 %v17458_v14 }
 0xef1   : > { %8332 = vmatmul.mubr.bf16.vlgmr.msra.gmra.mxu1 %v8167_v12  ;;  %v17413_v12 = vld [vmem:[#allocation39 + $0x94] ss:$8 sps:$4 sm:$0xff]  }
 0xef2   : > { %8697 = vmatpush1.bf16.msra.mxu1 %v17456_v13 }
 0xef3   : > { %8698 = vmatprep.subr.bf16.mxu1 %v17461_v15  ;;  %v17411_v15 = vld [vmem:[#allocation39 + $0x90] ss:$8 sps:$4 sm:$0xff]  }
 0xef6   : > { %8699 = vmatpush1.bf16.msra.mxu1 %v17459_v16  ;;  %v17416_v16 = vld [vmem:[#allocation39 + $0x84] ss:$8 sps:$4 sm:$0xff]  }
 0xef7   : > { %8700 = vmatprep.subr.bf16.mxu1 %v17467_v9  ;;  %v20241_v9 = vld [vmem:[#allocation8] sm:$0x66] }
 0xefa   : > { %8701 = vmatpush1.bf16.msra.mxu1 %v17465_v44  ;;  %v17414_v44 = vld [vmem:[#allocation39 + $0x80] ss:$8 sps:$4 sm:$0xff]  }
 0xf81   : > { %v7538_v17 = vpop.f32.mrf.mxu0  ;;  %v7774_v39 = vpop.f32.mrf.mxu1 }
 0xf82   : > { %v7781_v18 = vpack.c.bf16 %v7774_v39, %v7774_v39  ;;  %v7545_v24 = vpack.c.bf16 %v7538_v17, %v7538_v17  ;;  %v17420_v17 = vld [vmem:[#allocation39 + $0x1f4] ss:$8 sps:$4 sm:$0xff]   ;;  %v15453_v39 = vcombine.high %v20241_v9, %v20241_v9 }
 0xf83   : > { %v7540_v19 = vpop.f32.mrf.mxu0  ;;  %v7776_v35 = vpop.f32.mrf.mxu1 }
 0xf84   : > { %v7782_v21 = vpack.c.bf16 %v7776_v35, %v7776_v35  ;;  %v7791_v25 = vsel %vm20724_vm2, %v7781_v18, 0  ;;  %v7546_v27 = vpack.c.bf16 %v7540_v19, %v7540_v19  ;;  %v7841_v22 = vsel %vm20727_vm10, %v7545_v24, 0  ;;  %v17418_v18 = vld [vmem:[#allocation39 + $0x1f0] ss:$8 sps:$4 sm:$0xff]   ;;  %v17424_v35 = vld [vmem:[#allocation39 + $0x1e4] ss:$8 sps:$4 sm:$0xff]  }
 0xf85   : > { %v7542_v20 = vpop.f32.mrf.mxu0  ;;  %v7778_v23 = vpop.f32.mrf.mxu1  ;;  %v15398_v19 = vcombine.low %v20231_v40, %v20231_v40  ;;  %v17425_v24 = vld [vmem:[#allocation39 + $0x1d0] ss:$8 sps:$4 sm:$0xff]  }
 0xf86   : > { %15393 = vmatprep.subr.msk.bf16.mxu0 %vm20725_vm0, %v7782_v21  ;;  %v8374_v21 = vrot.slane %v15453_v39, 1  ;;  %v17422_v20 = vld [vmem:[#allocation39 + $0x1e0] ss:$8 sps:$4 sm:$0xff]   ;;  %v17427_v23 = vld [vmem:[#allocation39 + $0x1d4] ss:$8 sps:$4 sm:$0xff]  }
 0xf87   : > { %v7543_v31 = vpop.f32.mrf.mxu0  ;;  %v7779_v34 = vpop.f32.mrf.mxu1  ;;  %7811 = vmatpush1.bf16.msra.mxu0 %v7791_v25  ;;  %v17430_v25 = vld [vmem:[#allocation39 + $0x1c4] ss:$8 sps:$4 sm:$0xff]   ;;  %v17431_v40 = vld [vmem:[#allocation39 + $0x1b0] ss:$8 sps:$4 sm:$0xff]   ;;  %v17452_v39 = vld [vmem:[#allocation39 + $0x200] ss:$8 sps:$4 sm:$0xff]  }
 0xf88   : > { %15395 = vmatprep.subr.msk.bf16.mxu0 %vm20726_vm5, %v7546_v27  ;;  %v17473_v27 = vld [vmem:[#allocation41 + $0x44] ss:$8 sps:$4 sm:$0xff]   ;;  %v17471_v31 = vld [vmem:[#allocation41 + $0x40] ss:$8 sps:$4 sm:$0xff]   ;;  %vm20742_vm5 = vcmask 1041408  }
 0xf89   : > { %v17428_v34 = vld [vmem:[#allocation39 + $0x1c0] ss:$8 sps:$4 sm:$0xff]   ;;  %8702 = vmatprep.subr.bf16.mxu1 %v17473_v27  ;;  %v17474_v27 = vld [vmem:[#allocation41 + $0x110] ss:$8 sps:$4 sm:$0xff]   ;;  %vm20743_vm10 = vmmov %vm20742_vm5 }
 0xf8a   : > { %15394 = vmatmul.mubr.msk.bf16.vlgmr.msra.gmra.mxu0 %vm7786_vm12, %v15392_v36  ;;  %v17433_v36 = vld [vmem:[#allocation39 + $0x1b4] ss:$8 sps:$4 sm:$0xff]   ;;  %8703 = vmatpush1.bf16.msra.mxu1 %v17471_v31  ;;  %v17482_v31 = vld [vmem:[#allocation41 + $0x104] ss:$8 sps:$4 sm:$0xff]  }
 0xf8b   : > { %7861 = vmatpush1.bf16.msra.mxu0 %v7841_v22  ;;  %7878 = vmatprep.mubr.bf16.mxu0 %v19238_v0  ;;  %v17477_v22 = vld [vmem:[#allocation41 + $0x30] ss:$8 sps:$4 sm:$0xff]  }
 0xf8c   : > { %8076 = vmatprep.subr.bf16.mxu0 %v17382_v38  ;;  %v17479_v38 = vld [vmem:[#allocation41 + $0x34] ss:$8 sps:$4 sm:$0xff]  }
 0xf8d   : > { %8704 = vmatprep.subr.bf16.mxu1 %v17479_v38  ;;  %v17494_v38 = vld [vmem:[#allocation41 + $0xe4] ss:$8 sps:$4 sm:$0xff]  }
 0xf8e   : > { %8705 = vmatpush1.bf16.msra.mxu1 %v17477_v22  ;;  %v17492_v22 = vld [vmem:[#allocation41 + $0xe0] ss:$8 sps:$4 sm:$0xff]  }
 0xf92   : > { %15396 = vmatmul.mubr.msk.bf16.vlgmr.msra.gmra.mxu0 %vm7786_vm12, %v7783_v42  ;;  %v17485_v42 = vld [vmem:[#allocation41 + $0x24] ss:$8 sps:$4 sm:$0xff]  }
 0xf93   : > { %8077 = vmatpush1.bf16.msra.mxu0 %v17380_v26  ;;  %15424 = vmatprep.mubr.msk.bf16.mxu0 %vm20728_vm6, %v15399_v45  ;;  %v17436_v26 = vld [vmem:[#allocation39 + $0x1a4] ss:$8 sps:$4 sm:$0xff]   ;;  %v17434_v45 = vld [vmem:[#allocation39 + $0x1a0] ss:$8 sps:$4 sm:$0xff]   ;;  %vm20744_vm6 = vmmov %vm20742_vm5 }
 0xf94   : > { %8078 = vmatprep.subr.bf16.mxu0 %v17386_v41  ;;  %v17483_v41 = vld [vmem:[#allocation41 + $0x20] ss:$8 sps:$4 sm:$0xff]   ;;  %8706 = vmatprep.subr.bf16.mxu1 %v17485_v42  ;;  %v17506_v42 = vld [vmem:[#allocation41 + $0xc4] ss:$8 sps:$4 sm:$0xff]  }
 0xf95   : > { %8707 = vmatpush1.bf16.msra.mxu1 %v17483_v41  ;;  %v17504_v41 = vld [vmem:[#allocation41 + $0xc0] ss:$8 sps:$4 sm:$0xff]  }
 0xf97   : > { %8079 = vmatpush1.bf16.msra.mxu0 %v17384_v50  ;;  %v17439_v50 = vld [vmem:[#allocation39 + $0x194] ss:$8 sps:$4 sm:$0xff]  }
 0xf98   : > { %8080 = vmatprep.subr.bf16.mxu0 %v17389_v37  ;;  %v17491_v37 = vld [vmem:[#allocation41 + $0x14] ss:$8 sps:$4 sm:$0xff]  }
 0xf99   : > { %8708 = vmatprep.subr.bf16.mxu1 %v17491_v37  ;;  %v17518_v37 = vld [vmem:[#allocation41 + $0x164] ss:$8 sps:$4 sm:$0xff]  }
 0xf9b   : > { %8081 = vmatpush1.bf16.msra.mxu0 %v17387_v51  ;;  %v17489_v51 = vld [vmem:[#allocation41 + $0x10] ss:$8 sps:$4 sm:$0xff]  }
 0xf9c   : > { %8082 = vmatprep.subr.bf16.mxu0 %v17392_v52  ;;  %v17437_v52 = vld [vmem:[#allocation39 + $0x190] ss:$8 sps:$4 sm:$0xff]   ;;  %8709 = vmatpush1.bf16.msra.mxu1 %v17489_v51  ;;  %v17516_v51 = vld [vmem:[#allocation41 + $0x160] ss:$8 sps:$4 sm:$0xff]  }
 0xf9f   : > { %8083 = vmatpush1.bf16.msra.mxu0 %v17390_v54  ;;  %v1941_v54 = vld [vmem:[#allocation12] sm:$0x44] }
 0xfa0   : > { %8084 = vmatprep.subr.bf16.mxu0 %v17395_v57  ;;  %v17442_v57 = vld [vmem:[#allocation39 + $0x184] ss:$8 sps:$4 sm:$0xff]  }
 0xfa3   : > { %8085 = vmatpush1.bf16.msra.mxu0 %v17393_v55  ;;  %v1942_v55 = vsel %vm20098_vm1, 0, %v1941_v54  ;;  %v17522_v54 = vld [vmem:[#allocation41 + $0x150] ss:$8 sps:$4 sm:$0xff]   ;;  %vm20731_vm1 = vmmov %vm20722_vm4 }
 0xfa4   : > { %8086 = vmatprep.subr.bf16.mxu0 %v17398_v58  ;;  %1943 = vst [vmem:[#allocation12] sm:$0x44] %v1942_v55  ;;  %v17497_v58 = vld [vmem:[#allocation41 + $0x4] ss:$8 sps:$4 sm:$0xff]   ;;  %v17531_v55 = vld [vmem:[#allocation41 + $0x140] ss:$8 sps:$4 sm:$0xff]   ;;  %vm20732_vm8 = vmmov %vm20731_vm1 }
 0xfa5   : > { %8710 = vmatprep.subr.bf16.mxu1 %v17497_v58  ;;  %vm20733_vm14 = vmmov %vm20731_vm1 }
 0xfa6   : > { %vm20735_vm4 = vmmov %vm20731_vm1 }
 0xfa7   : > { %8087 = vmatpush1.bf16.msra.mxu0 %v17396_v59  ;;  %v17495_v59 = vld [vmem:[#allocation41] ss:$8 sps:$4 sm:$0xff]   ;;  %vm20737_vm2 = vmmov %vm20731_vm1 }
 0xfa8   : > { %8088 = vmatprep.subr.bf16.mxu0 %v17401_v60  ;;  %v17440_v60 = vld [vmem:[#allocation39 + $0x180] ss:$8 sps:$4 sm:$0xff]   ;;  %8711 = vmatpush1.bf16.msra.mxu1 %v17495_v59  ;;  %vm20739_vm0 = vmmov %vm20731_vm1 }
 0xfa9   : > { %vm20740_vm12 = vmmov %vm20739_vm0 }
 0xfab   : > { %8089 = vmatpush1.bf16.msra.mxu0 %v17399_v61  ;;  %v17445_v61 = vld [vmem:[#allocation39 + $0x234] ss:$8 sps:$4 sm:$0xff]  }
 0xfac   : > { %8090 = vmatprep.subr.bf16.mxu0 %v17404_v62  ;;  %v17503_v62 = vld [vmem:[#allocation41 + $0xb4] ss:$8 sps:$4 sm:$0xff]  }
 0xfad   : > { %8720 = vmatprep.subr.bf16.mxu1 %v17503_v62 }
 0xfaf   : > { %8091 = vmatpush1.bf16.msra.mxu0 %v17402_v63  ;;  %v17501_v63 = vld [vmem:[#allocation41 + $0xb0] ss:$8 sps:$4 sm:$0xff]  }
 0xfb0   : > { %8100 = vmatprep.subr.bf16.mxu0 %v17407_v1  ;;  %v17443_v1 = vld [vmem:[#allocation39 + $0x230] ss:$8 sps:$4 sm:$0xff]   ;;  %8721 = vmatpush2.bf16.msra.mxu1 %v17501_v63 }
 0xfb1   : > { %v20237_v7 = vpop.f32.mrf.mxu1  ;;  %8722 = vmatprep.subr.bf16.mxu1 %v17509_v33 }
 0xfb3   : > { %8101 = vmatpush2.bf16.msra.mxu0 %v17405_v5  ;;  %v20239_v48 = vpop.f32.mrf.mxu1  ;;  %v17448_v5 = vld [vmem:[#allocation39 + $0x224] ss:$8 sps:$4 sm:$0xff]  }
 0xfb4   : > { %8102 = vmatprep.subr.bf16.mxu0 %v17410_v6  ;;  %v17507_v6 = vld [vmem:[#allocation41 + $0xa0] ss:$8 sps:$4 sm:$0xff]  }
 0xfb5   : > { %v8337_v13 = vpop.f32.mrf.mxu1  ;;  %8723 = vmatpush2.bf16.msra.mxu1 %v17507_v6 }
 0xfb6   : > { %v17513_v13 = vld [vmem:[#allocation41 + $0x90] ss:$8 sps:$4 sm:$0xff]  }
 0xfb7   : > { %8103 = vmatpush2.bf16.msra.mxu0 %v17408_v10  ;;  %v8338_v14 = vpop.f32.mrf.mxu1  ;;  %v17446_v10 = vld [vmem:[#allocation39 + $0x220] ss:$8 sps:$4 sm:$0xff]  }
 0xfb8   : > { %8104 = vmatprep.subr.bf16.mxu0 %v17413_v12  ;;  %v17451_v12 = vld [vmem:[#allocation39 + $0x214] ss:$8 sps:$4 sm:$0xff]  }
 0xfb9   : > { %v17515_v14 = vld [vmem:[#allocation41 + $0x94] ss:$8 sps:$4 sm:$0xff]  }
 0xfba   : > { %8724 = vmatprep.subr.bf16.mxu1 %v17515_v14 }
 0xfbb   : > { %8105 = vmatpush2.bf16.msra.mxu0 %v17411_v15  ;;  %v17521_v15 = vld [vmem:[#allocation41 + $0x84] ss:$8 sps:$4 sm:$0xff]   ;;  %8725 = vmatpush2.bf16.msra.mxu1 %v17513_v13 }
 0xfbc   : > { %8106 = vmatprep.subr.bf16.mxu0 %v17416_v16  ;;  %v17449_v16 = vld [vmem:[#allocation39 + $0x210] ss:$8 sps:$4 sm:$0xff]   ;;  %8726 = vmatprep.subr.bf16.mxu1 %v17521_v15 }
 0xfbf   : > { %8107 = vmatpush2.bf16.msra.mxu0 %v17414_v44  ;;  %v17454_v44 = vld [vmem:[#allocation39 + $0x204] ss:$8 sps:$4 sm:$0xff]  }
 0xfc0   : > { %8499 = vmatprep.subr.bf16.mxu0 %v17420_v17  ;;  %v17519_v17 = vld [vmem:[#allocation41 + $0x80] ss:$8 sps:$4 sm:$0xff]  }
 0xfc1   : > { %8727 = vmatpush2.bf16.msra.mxu1 %v17519_v17 }
 0xfc2   : > { %8109 = vmatmul.mubr.bf16.vlgmr.msra.gmra.mxu0 %v15398_v19  ;;  %v17464_v19 = vld [vmem:[#allocation41 + $0x134] ss:$8 sps:$4 sm:$0xff]  }
 0xfc3   : > { %8500 = vmatpush1.bf16.msra.mxu0 %v17418_v18  ;;  %15478 = vmatprep.mubr.msk.bf16.mxu0 %vm20729_vm7, %v8374_v21  ;;  %v15452_v18 = vcombine.low %v20241_v9, %v20241_v9  ;;  %v17462_v21 = vld [vmem:[#allocation41 + $0x130] ss:$8 sps:$4 sm:$0xff]   ;;  %v17480_v9 = vld [vmem:[#allocation41 + $0x100] ss:$8 sps:$4 sm:$0xff]   ;;  %vm20745_vm7 = vmmov %vm20742_vm5 }
 0xfc4   : > { %8501 = vmatprep.subr.bf16.mxu0 %v17424_v35  ;;  %v17528_v35 = vld [vmem:[#allocation41 + $0x1f4] ss:$8 sps:$4 sm:$0xff]  }
 0xfc5   : > { %9108 = vmatprep.subr.bf16.mxu1 %v17528_v35  ;;  %v7918_v35 = vld [vmem:[#allocation12] sm:$0x77] }
 0xfc7   : > { %8502 = vmatpush1.bf16.msra.mxu0 %v17422_v20  ;;  %v8373_v20 = vrot.slane %v15452_v18, 1 }
 0xfc8   : > { %8503 = vmatprep.subr.bf16.mxu0 %v17427_v23  ;;  %v17470_v23 = vld [vmem:[#allocation41 + $0x124] ss:$8 sps:$4 sm:$0xff]  }
 0xfcb   : > { %8504 = vmatpush1.bf16.msra.mxu0 %v17425_v24  ;;  %v17468_v24 = vld [vmem:[#allocation41 + $0x120] ss:$8 sps:$4 sm:$0xff]  }
 0xfcc   : > { %8505 = vmatprep.subr.bf16.mxu0 %v17430_v25  ;;  %v17476_v25 = vld [vmem:[#allocation41 + $0x114] ss:$8 sps:$4 sm:$0xff]  }
 0xfcf   : > { %8506 = vmatpush1.bf16.msra.mxu0 %v17428_v34  ;;  %v17488_v34 = vld [vmem:[#allocation41 + $0xf4] ss:$8 sps:$4 sm:$0xff]  }
 0xfd0   : > { %8507 = vmatprep.subr.bf16.mxu0 %v17433_v36  ;;  %v17486_v36 = vld [vmem:[#allocation41 + $0xf0] ss:$8 sps:$4 sm:$0xff]  }
 0xfd3   : > { %8508 = vmatpush1.bf16.msra.mxu0 %v17431_v40  ;;  %v17500_v40 = vld [vmem:[#allocation41 + $0xd4] ss:$8 sps:$4 sm:$0xff]  }
 0xfd4   : > { %8509 = vmatprep.subr.bf16.mxu0 %v17436_v26  ;;  %v17498_v26 = vld [vmem:[#allocation41 + $0xd0] ss:$8 sps:$4 sm:$0xff]  }
 0xfd7   : > { %8510 = vmatpush1.bf16.msra.mxu0 %v17434_v45  ;;  %v17512_v45 = vld [vmem:[#allocation41 + $0x174] ss:$8 sps:$4 sm:$0xff]  }
 0xfd8   : > { %8511 = vmatprep.subr.bf16.mxu0 %v17439_v50  ;;  %v17510_v50 = vld [vmem:[#allocation41 + $0x170] ss:$8 sps:$4 sm:$0xff]  }
 0xfdb   : > { %8512 = vmatpush1.bf16.msra.mxu0 %v17437_v52  ;;  %v17524_v52 = vld [vmem:[#allocation41 + $0x154] ss:$8 sps:$4 sm:$0xff]  }
 0xfdc   : > { %8513 = vmatprep.subr.bf16.mxu0 %v17442_v57  ;;  %v17533_v57 = vld [vmem:[#allocation41 + $0x144] ss:$8 sps:$4 sm:$0xff]  }
 0xfdf   : > { %8514 = vmatpush1.bf16.msra.mxu0 %v17440_v60 }
 0xfe0   : > { %8523 = vmatprep.subr.bf16.mxu0 %v17445_v61  ;;  %v7887_v61 = vld [vmem:[%s20730_s4] sm:$0x3]  ;;  %s1825_s4 = sand.u32 1, %s19149_s0  }
 0xfe1   : > { %v7892_v63 = vrot.slane %v7887_v61, %v19879_v30  ;;  %v7896_v33 = vrot.slane %v7887_v61, %v19882_v32  ;;  %v17545_v61 = vld [vmem:[#allocation41 + $0x1b0] ss:$8 sps:$4 sm:$0xff]  }
 0xfe3   : > { %8524 = vmatpush2.bf16.msra.mxu0 %v17443_v1 }
 0xfe4   : > { %8525 = vmatprep.subr.bf16.mxu0 %v17448_v5 }
 0xfe7   : > { %8526 = vmatpush2.bf16.msra.mxu0 %v17446_v10 }
 0xfe8   : > { %8527 = vmatprep.subr.bf16.mxu0 %v17451_v12 }
 0xfeb   : > { %8528 = vmatpush2.bf16.msra.mxu0 %v17449_v16 }
 0xfec   : > { %8529 = vmatprep.subr.bf16.mxu0 %v17454_v44 }
 0xfef   : > { %8530 = vmatpush2.bf16.msra.mxu0 %v17452_v39 }
 0xff0   : > { %8908 = vmatprep.subr.bf16.mxu0 %v17464_v19 }
 0xff2   : > { %8532 = vmatmul.mubr.bf16.vlgmr.msra.gmra.mxu0 %v8373_v20 }
 0xff3   : > { %8909 = vmatpush1.bf16.msra.mxu0 %v17462_v21 }
 0xff4   : > { %8910 = vmatprep.subr.bf16.mxu0 %v17470_v23 }
 0xff7   : > { %8911 = vmatpush1.bf16.msra.mxu0 %v17468_v24 }
 0xff8   : > { %8912 = vmatprep.subr.bf16.mxu0 %v17476_v25 }
 0xffb   : > { %8913 = vmatpush1.bf16.msra.mxu0 %v17474_v27 }
 0xffc   : > { %8914 = vmatprep.subr.bf16.mxu0 %v17482_v31  ;;  %v17526_v31 = vld [vmem:[#allocation41 + $0x1f0] ss:$8 sps:$4 sm:$0xff]  }
 0xfff   : > { %8915 = vmatpush1.bf16.msra.mxu0 %v17480_v9 }
0x1000   : > { %8916 = vmatprep.subr.bf16.mxu0 %v17488_v34 }
0x1003   : > { %8917 = vmatpush1.bf16.msra.mxu0 %v17486_v36 }
0x1004   : > { %8918 = vmatprep.subr.bf16.mxu0 %v17494_v38  ;;  %v17536_v38 = vld [vmem:[#allocation41 + $0x1e4] ss:$8 sps:$4 sm:$0xff]  }
0x1007   : > { %8919 = vmatpush1.bf16.msra.mxu0 %v17492_v22 }
0x1008   : > { %8920 = vmatprep.subr.bf16.mxu0 %v17500_v40 }
0x100b   : > { %8921 = vmatpush1.bf16.msra.mxu0 %v17498_v26 }
0x100c   : > { %8922 = vmatprep.subr.bf16.mxu0 %v17506_v42 }
0x100f   : > { %8923 = vmatpush1.bf16.msra.mxu0 %v17504_v41  ;;  %v17534_v41 = vld [vmem:[#allocation41 + $0x1e0] ss:$8 sps:$4 sm:$0xff]  }
0x1010   : > { %8932 = vmatprep.subr.bf16.mxu0 %v17512_v45 }
0x1013   : > { %8933 = vmatpush2.bf16.msra.mxu0 %v17510_v50 }
0x1014   : > { %8934 = vmatprep.subr.bf16.mxu0 %v17518_v37 }
0x1017   : > { %8935 = vmatpush2.bf16.msra.mxu0 %v17516_v51 }
0x1018   : > { %8936 = vmatprep.subr.bf16.mxu0 %v17524_v52  ;;  %v17541_v52 = vld [vmem:[#allocation41 + $0x1d4] ss:$8 sps:$4 sm:$0xff]  }
0x101b   : > { %8937 = vmatpush2.bf16.msra.mxu0 %v17522_v54 }
0x101c   : > { %8938 = vmatprep.subr.bf16.mxu0 %v17533_v57 }
0x101f   : > { %8939 = vmatpush2.bf16.msra.mxu0 %v17531_v55  ;;  %v17539_v55 = vld [vmem:[#allocation41 + $0x1d0] ss:$8 sps:$4 sm:$0xff]  }
0x104a   : > { %v7830_v58 = vpop.f32.mrf.mxu0 }
0x104c   : > { %v7832_v59 = vpop.f32.mrf.mxu0 }
0x104e   : > { %v7834_v60 = vpop.f32.mrf.mxu0 }
0x104f   : > { %v17547_v60 = vld [vmem:[#allocation41 + $0x1b4] ss:$8 sps:$4 sm:$0xff]  }
0x1050   : > { %v7835_v62 = vpop.f32.mrf.mxu0 }
0x1051   : > { %v17550_v62 = vld [vmem:[#allocation41 + $0x1a4] ss:$8 sps:$4 sm:$0xff]  }
0x1052   : > { %v7880_v1 = vpop.f32.mrf.mxu0 }
0x1053   : > { %v7881_v5 = vadd.f32 %v7880_v1, %v7830_v58  ;;  %v17544_v58 = vld [vmem:[#allocation41 + $0x1c4] ss:$8 sps:$4 sm:$0xff]   ;;  %v17553_v1 = vld [vmem:[#allocation41 + $0x194] ss:$8 sps:$4 sm:$0xff]  }
0x1054   : > { %v7882_v6 = vpop.f32.mrf.mxu0 }
0x1055   : > { %v7899_v10 = vadd.f32 %v7892_v63, %v7881_v5  ;;  %v7883_v12 = vadd.f32 %v7882_v6, %v7832_v59  ;;  %v17542_v59 = vld [vmem:[#allocation41 + $0x1c0] ss:$8 sps:$4 sm:$0xff]   ;;  %v17551_v6 = vld [vmem:[#allocation41 + $0x190] ss:$8 sps:$4 sm:$0xff]  }
0x1056   : > { %v7884_v13 = vpop.f32.mrf.mxu0  ;;  %v17548_v63 = vld [vmem:[#allocation41 + $0x1a0] ss:$8 sps:$4 sm:$0xff]  }
0x1057   : > { %v7900_v14 = vadd.f32 %v7896_v33, %v7883_v12  ;;  %v7901_v16 = vmax.f32 %v7899_v10, 0.0  ;;  %v17556_v10 = vld [vmem:[#allocation41 + $0x184] ss:$8 sps:$4 sm:$0xff]  }
0x1058   : > { %v7885_v15 = vpop.f32.mrf.mxu0 }
0x1059   : > { %v7902_v44 = vmax.f32 %v7900_v14, 0.0  ;;  %v17554_v14 = vld [vmem:[#allocation41 + $0x180] ss:$8 sps:$4 sm:$0xff]   ;;  %v17559_v15 = vld [vmem:[#allocation41 + $0x234] ss:$8 sps:$4 sm:$0xff]  }
0x105b   : > { %v16183_v17 = vpack.c.bf16 %v7902_v44, %v7901_v16  ;;  %v17557_v16 = vld [vmem:[#allocation41 + $0x230] ss:$8 sps:$4 sm:$0xff]   ;;  %v17562_v44 = vld [vmem:[#allocation41 + $0x224] ss:$8 sps:$4 sm:$0xff]  }
0x105d   : > { %v7911_v39 = vshrl.u32 %v16183_v17, 16  ;;  %v7914_v19 = vshll.u32 %v16183_v17, 16  ;;  %v17560_v17 = vld [vmem:[#allocation41 + $0x220] ss:$8 sps:$4 sm:$0xff]  }
0x105f   : > { %v7913_v18 = vrot.slane %v7911_v39, 7  ;;  %v17565_v39 = vld [vmem:[#allocation41 + $0x214] ss:$8 sps:$4 sm:$0xff]  }
0x1061   : > { %v7916_v21 = vor.u32 %v7914_v19, %v7913_v18  ;;  %v17563_v18 = vld [vmem:[#allocation41 + $0x210] ss:$8 sps:$4 sm:$0xff]   ;;  %v17568_v19 = vld [vmem:[#allocation41 + $0x204] ss:$8 sps:$4 sm:$0xff]  }
0x1063   : > { %v7919_v20 = vsel %vm20109_vm9, %v7916_v21, %v7918_v35  ;;  %v17566_v35 = vld [vmem:[#allocation41 + $0x200] ss:$8 sps:$4 sm:$0xff]  }
0x1064   : > { %7920 = vst [vmem:[#allocation12] sm:$0x77] %v7919_v20 }
0x106b   : > { %v8542_v23 = vld [vmem:[#allocation12] sm:$0x33] }
0x106c   : > { %v20257_v24 = vld [vmem:[#allocation12] sm:$0x66]  ;;  %v15480_v27 = vcombine.high %v8542_v23, %v8542_v23  ;;  %v15479_v9 = vcombine.low %v8542_v23, %v8542_v23 }
0x106d   : > { %v8739_v25 = vld [vmem:[#allocation12] sm:$0x77]  ;;  %v15534_v34 = vcombine.high %v20257_v24, %v20257_v24  ;;  %v15533_v21 = vcombine.low %v20257_v24, %v20257_v24 }
0x106e   : > { %v15507_v36 = vcombine.high %v8739_v25, %v8739_v25  ;;  %v15506_v22 = vcombine.low %v8739_v25, %v8739_v25  ;;  %15505 = vmatprep.mubr.msk.bf16.mxu1 %vm20731_vm1, %v15480_v27  ;;  %v7921_v23 = vld [vmem:[%s20734_s7] sm:$0x3]  ;;  %s14762_s7 = sshll.u32 %s1825_s4, 5 }
0x106f   : > { %v8983_v40 = vrot.slane %v15534_v34, 1  ;;  %8729 = vmatmul.mubr.bf16.vlgmr.msra.gmra.mxu1 %v15479_v9  ;;  %v8982_v20 = vrot.slane %v15533_v21, 1  ;;  %v8121_v25 = vrot.slane %v7921_v23, %v19879_v30  ;;  %v8125_v27 = vrot.slane %v7921_v23, %v19882_v32  ;;  %v17618_v21 = vld [vmem:[#allocation42 + $0xc0] ss:$8 sps:$4 sm:$0xff]  }
0x1070   : > { %v8780_v26 = vshll.u32 %v15507_v36, 16  ;;  %v8773_v42 = vshll.u32 %v15506_v22, 16  ;;  %9109 = vmatpush1.bf16.msra.mxu1 %v17526_v31  ;;  %v8778_v45 = vshrl.u32 %v15507_v36, 16  ;;  %v8771_v37 = vshrl.u32 %v15506_v22, 16  ;;  %v17621_v23 = vld [vmem:[#allocation42 + $0xa0] ss:$8 sps:$4 sm:$0xff]  }
0x1071   : > { %15559 = vmatprep.mubr.msk.bf16.mxu1 %vm20732_vm8, %v8983_v40  ;;  %9110 = vmatprep.subr.bf16.mxu1 %v17536_v38  ;;  %vm20746_vm8 = vcmask 261120  }
0x1072   : > { %v8782_v50 = vrot.slane %v8780_v26, 1  ;;  %v8775_v51 = vrot.slane %v8773_v42, 1 }
0x1074   : > { %v8783_v54 = vor.u32 %v8782_v50, %v8778_v45  ;;  %v8776_v57 = vor.u32 %v8775_v51, %v8771_v37  ;;  %9111 = vmatpush1.bf16.msra.mxu1 %v17534_v41  ;;  %v17570_v41 = vld [vmem:[#allocation42 + $0x70] ss:$8 sps:$4 sm:$0xff]   ;;  %v17572_v45 = vld [vmem:[#allocation42 + $0x74] ss:$8 sps:$4 sm:$0xff]   ;;  %v17575_v50 = vld [vmem:[#allocation42 + $0x64] ss:$8 sps:$4 sm:$0xff]  }
0x1075   : > { %9112 = vmatprep.subr.bf16.mxu1 %v17541_v52  ;;  %v17576_v37 = vld [vmem:[#allocation42 + $0x130] ss:$8 sps:$4 sm:$0xff]   ;;  %v17578_v51 = vld [vmem:[#allocation42 + $0x134] ss:$8 sps:$4 sm:$0xff]   ;;  %9326 = vmatprep.subr.bf16.mxu0 %v17572_v45  ;;  %v17573_v52 = vld [vmem:[#allocation42 + $0x60] ss:$8 sps:$4 sm:$0xff]  }
0x1076   : > { %15532 = vmatprep.mubr.msk.bf16.mxu0 %vm20733_vm14, %v8783_v54  ;;  %v17581_v54 = vld [vmem:[#allocation42 + $0x54] ss:$8 sps:$4 sm:$0xff]   ;;  %v17646_v45 = vld [vmem:[#allocation42 + $0x140] ss:$8 sps:$4 sm:$0xff]   ;;  %vm20747_vm14 = vmmov %vm20746_vm8 }
0x1077   : > { %8941 = vmatmul.mubr.bf16.vlgmr.msra.gmra.mxu0 %v8776_v57  ;;  %v17582_v57 = vld [vmem:[#allocation42 + $0x120] ss:$8 sps:$4 sm:$0xff]  }
0x1078   : > { %9113 = vmatpush1.bf16.msra.mxu1 %v17539_v55  ;;  %9327 = vmatpush1.bf16.msra.mxu0 %v17570_v41  ;;  %v17579_v55 = vld [vmem:[#allocation42 + $0x50] ss:$8 sps:$4 sm:$0xff]   ;;  %v17643_v41 = vld [vmem:[#allocation42 + $0x1f4] ss:$8 sps:$4 sm:$0xff]  }
0x1079   : > { %9114 = vmatprep.subr.bf16.mxu1 %v17544_v58  ;;  %9328 = vmatprep.subr.bf16.mxu0 %v17575_v50  ;;  %v17587_v58 = vld [vmem:[#allocation42 + $0x44] ss:$8 sps:$4 sm:$0xff]  }
0x107a   : > { %v17648_v50 = vld [vmem:[#allocation42 + $0x144] ss:$8 sps:$4 sm:$0xff]  }
0x107c   : > { %9115 = vmatpush1.bf16.msra.mxu1 %v17542_v59  ;;  %9329 = vmatpush1.bf16.msra.mxu0 %v17573_v52  ;;  %v17588_v59 = vld [vmem:[#allocation42 + $0x110] ss:$8 sps:$4 sm:$0xff]  }
0x107d   : > { %9116 = vmatprep.subr.bf16.mxu1 %v17547_v60  ;;  %9330 = vmatprep.subr.bf16.mxu0 %v17581_v54  ;;  %v17596_v60 = vld [vmem:[#allocation42 + $0x104] ss:$8 sps:$4 sm:$0xff]  }
0x1080   : > { %9117 = vmatpush1.bf16.msra.mxu1 %v17545_v61  ;;  %9331 = vmatpush1.bf16.msra.mxu0 %v17579_v55  ;;  %v17585_v61 = vld [vmem:[#allocation42 + $0x40] ss:$8 sps:$4 sm:$0xff]  }
0x1081   : > { %9118 = vmatprep.subr.bf16.mxu1 %v17550_v62  ;;  %9332 = vmatprep.subr.bf16.mxu0 %v17587_v58  ;;  %v17593_v62 = vld [vmem:[#allocation42 + $0x34] ss:$8 sps:$4 sm:$0xff]  }
0x1082   : > { %v8110_v5 = vpop.f32.mrf.mxu0 }
0x1083   : > { %v8128_v31 = vadd.f32 %v8121_v25, %v8110_v5  ;;  %v17599_v5 = vld [vmem:[#allocation42 + $0x24] ss:$8 sps:$4 sm:$0xff]   ;;  %v17626_v25 = vld [vmem:[#allocation42 + $0x174] ss:$8 sps:$4 sm:$0xff]  }
0x1084   : > { %v8112_v33 = vpop.f32.mrf.mxu0  ;;  %9119 = vmatpush1.bf16.msra.mxu1 %v17548_v63  ;;  %v17594_v63 = vld [vmem:[#allocation42 + $0x100] ss:$8 sps:$4 sm:$0xff]   ;;  %9333 = vmatpush1.bf16.msra.mxu0 %v17585_v61 }
0x1085   : > { %9120 = vmatprep.subr.bf16.mxu1 %v17553_v1  ;;  %v8129_v9 = vadd.f32 %v8125_v27, %v8112_v33  ;;  %v8340_v34 = vadd.f32 %v20237_v7, %v8128_v31  ;;  %v17584_v7 = vld [vmem:[#allocation42 + $0x124] ss:$8 sps:$4 sm:$0xff]   ;;  %v17591_v1 = vld [vmem:[#allocation42 + $0x30] ss:$8 sps:$4 sm:$0xff]   ;;  %9334 = vmatprep.subr.bf16.mxu0 %v17593_v62  ;;  %v17597_v33 = vld [vmem:[#allocation42 + $0x20] ss:$8 sps:$4 sm:$0xff]  }
0x1086   : > { %v8114_v12 = vpop.f32.mrf.mxu0  ;;  %v17624_v27 = vld [vmem:[#allocation42 + $0x170] ss:$8 sps:$4 sm:$0xff]  }
0x1087   : > { %v8341_v22 = vadd.f32 %v20239_v48, %v8129_v9  ;;  %v17590_v48 = vld [vmem:[#allocation42 + $0x114] ss:$8 sps:$4 sm:$0xff]   ;;  %v17627_v31 = vld [vmem:[#allocation42 + $0x90] ss:$8 sps:$4 sm:$0xff]  }
0x1088   : > { %v8115_v13 = vpop.f32.mrf.mxu0  ;;  %9121 = vmatpush1.bf16.msra.mxu1 %v17551_v6  ;;  %9335 = vmatpush1.bf16.msra.mxu0 %v17591_v1  ;;  %v17602_v6 = vld [vmem:[#allocation42 + $0xf4] ss:$8 sps:$4 sm:$0xff]  }
0x1089   : > { %9122 = vmatprep.subr.bf16.mxu1 %v17556_v10  ;;  %9336 = vmatprep.subr.bf16.mxu0 %v17599_v5  ;;  %v17600_v10 = vld [vmem:[#allocation42 + $0xf0] ss:$8 sps:$4 sm:$0xff]   ;;  %v17605_v12 = vld [vmem:[#allocation42 + $0x14] ss:$8 sps:$4 sm:$0xff]  }
0x108a   : > { %v17603_v13 = vld [vmem:[#allocation42 + $0x10] ss:$8 sps:$4 sm:$0xff]   ;;  %v17629_v9 = vld [vmem:[#allocation42 + $0x94] ss:$8 sps:$4 sm:$0xff]  }
0x108c   : > { %9123 = vmatpush1.bf16.msra.mxu1 %v17554_v14  ;;  %9337 = vmatpush1.bf16.msra.mxu0 %v17597_v33  ;;  %v17608_v14 = vld [vmem:[#allocation42 + $0xe4] ss:$8 sps:$4 sm:$0xff]  }
0x108d   : > { %9132 = vmatprep.subr.bf16.mxu1 %v17559_v15  ;;  %9338 = vmatprep.subr.bf16.mxu0 %v17605_v12  ;;  %v17606_v15 = vld [vmem:[#allocation42 + $0xe0] ss:$8 sps:$4 sm:$0xff]  }
0x1090   : > { %9133 = vmatpush2.bf16.msra.mxu1 %v17557_v16  ;;  %9339 = vmatpush1.bf16.msra.mxu0 %v17603_v13  ;;  %v17611_v16 = vld [vmem:[#allocation42 + $0x4] ss:$8 sps:$4 sm:$0xff]  }
0x1091   : > { %9134 = vmatprep.subr.bf16.mxu1 %v17562_v44  ;;  %v17609_v44 = vld [vmem:[#allocation42] ss:$8 sps:$4 sm:$0xff]   ;;  %9340 = vmatprep.subr.bf16.mxu0 %v17611_v16 }
0x1094   : > { %9135 = vmatpush2.bf16.msra.mxu1 %v17560_v17  ;;  %9341 = vmatpush1.bf16.msra.mxu0 %v17609_v44  ;;  %v17614_v17 = vld [vmem:[#allocation42 + $0xd4] ss:$8 sps:$4 sm:$0xff]  }
0x1095   : > { %9136 = vmatprep.subr.bf16.mxu1 %v17565_v39  ;;  %v17612_v39 = vld [vmem:[#allocation42 + $0xd0] ss:$8 sps:$4 sm:$0xff]  }
0x1098   : > { %9137 = vmatpush2.bf16.msra.mxu1 %v17563_v18  ;;  %v17617_v18 = vld [vmem:[#allocation42 + $0xb4] ss:$8 sps:$4 sm:$0xff]  }
0x1099   : > { %9138 = vmatprep.subr.bf16.mxu1 %v17568_v19  ;;  %v17615_v19 = vld [vmem:[#allocation42 + $0xb0] ss:$8 sps:$4 sm:$0xff]   ;;  %9350 = vmatprep.subr.bf16.mxu0 %v17617_v18 }
0x109a   : > { %9351 = vmatpush2.bf16.msra.mxu0 %v17615_v19 }
0x109c   : > { %9139 = vmatpush2.bf16.msra.mxu1 %v17566_v35  ;;  %v17620_v35 = vld [vmem:[#allocation42 + $0xc4] ss:$8 sps:$4 sm:$0xff]  }
0x109d   : > { %9549 = vmatprep.subr.bf16.mxu1 %v17578_v51 }
0x109f   : > { %9141 = vmatmul.mubr.bf16.vlgmr.msra.gmra.mxu1 %v8982_v20  ;;  %v17623_v20 = vld [vmem:[#allocation42 + $0xa4] ss:$8 sps:$4 sm:$0xff]  }
0x10a0   : > { %9550 = vmatpush1.bf16.msra.mxu1 %v17576_v37  ;;  %9352 = vmatprep.subr.bf16.mxu0 %v17623_v20 }
0x10a1   : > { %9551 = vmatprep.subr.bf16.mxu1 %v17584_v7  ;;  %9353 = vmatpush2.bf16.msra.mxu0 %v17621_v23  ;;  %v17651_v23 = vld [vmem:[#allocation42 + $0x1e4] ss:$8 sps:$4 sm:$0xff]  }
0x10a2   : > { %9354 = vmatprep.subr.bf16.mxu0 %v17629_v9 }
0x10a4   : > { %9552 = vmatpush1.bf16.msra.mxu1 %v17582_v57 }
0x10a5   : > { %9553 = vmatprep.subr.bf16.mxu1 %v17590_v48  ;;  %9355 = vmatpush2.bf16.msra.mxu0 %v17627_v31 }
0x10a8   : > { %9554 = vmatpush1.bf16.msra.mxu1 %v17588_v59 }
0x10a9   : > { %9555 = vmatprep.subr.bf16.mxu1 %v17596_v60 }
0x10ac   : > { %9556 = vmatpush1.bf16.msra.mxu1 %v17594_v63 }
0x10ad   : > { %9557 = vmatprep.subr.bf16.mxu1 %v17602_v6 }
0x10b0   : > { %9558 = vmatpush1.bf16.msra.mxu1 %v17600_v10 }
0x10b1   : > { %9559 = vmatprep.subr.bf16.mxu1 %v17608_v14 }
0x10b2   : > { %v8533_v36 = vpop.f32.mrf.mxu0 }
0x10b3   : > { %v20270_v38 = vadd.f32 %v8533_v36, %v8340_v34  ;;  %v17632_v34 = vld [vmem:[#allocation42 + $0x164] ss:$8 sps:$4 sm:$0xff]   ;;  %v17630_v36 = vld [vmem:[#allocation42 + $0x160] ss:$8 sps:$4 sm:$0xff]  }
0x10b4   : > { %v8535_v40 = vpop.f32.mrf.mxu0  ;;  %9560 = vmatpush1.bf16.msra.mxu1 %v17606_v15 }
0x10b5   : > { %v20273_v26 = vadd.f32 %v8535_v40, %v8341_v22  ;;  %9561 = vmatprep.subr.bf16.mxu1 %v17614_v17  ;;  %v17635_v22 = vld [vmem:[#allocation42 + $0x84] ss:$8 sps:$4 sm:$0xff]   ;;  %v17633_v40 = vld [vmem:[#allocation42 + $0x80] ss:$8 sps:$4 sm:$0xff]  }
0x10b6   : > { %v8537_v24 = vpop.f32.mrf.mxu0  ;;  %9356 = vmatprep.subr.bf16.mxu0 %v17635_v22  ;;  %v9168_v17 = vld [vmem:[#allocation4] sm:$0x77] }
0x10b7   : > { %v17638_v24 = vld [vmem:[#allocation42 + $0x154] ss:$8 sps:$4 sm:$0xff]   ;;  %9357 = vmatpush2.bf16.msra.mxu0 %v17633_v40 }
0x10b8   : > { %v8538_v42 = vpop.f32.mrf.mxu0  ;;  %9562 = vmatpush1.bf16.msra.mxu1 %v17612_v39  ;;  %9749 = vmatprep.subr.bf16.mxu0 %v17643_v41 }
0x10b9   : > { %9563 = vmatprep.subr.bf16.mxu1 %v17620_v35  ;;  %v17636_v42 = vld [vmem:[#allocation42 + $0x150] ss:$8 sps:$4 sm:$0xff]  }
0x10bc   : > { %9564 = vmatpush1.bf16.msra.mxu1 %v17618_v21  ;;  %v17641_v21 = vld [vmem:[#allocation42 + $0x1f0] ss:$8 sps:$4 sm:$0xff]  }
0x10bd   : > { %9573 = vmatprep.subr.bf16.mxu1 %v17626_v25 }
0x10c0   : > { %9574 = vmatpush2.bf16.msra.mxu1 %v17624_v27 }
0x10c1   : > { %9575 = vmatprep.subr.bf16.mxu1 %v17632_v34  ;;  %v17649_v34 = vld [vmem:[#allocation42 + $0x1e0] ss:$8 sps:$4 sm:$0xff]  }
0x10c4   : > { %9576 = vmatpush2.bf16.msra.mxu1 %v17630_v36 }
0x10c5   : > { %9577 = vmatprep.subr.bf16.mxu1 %v17638_v24 }
0x10c8   : > { %9578 = vmatpush2.bf16.msra.mxu1 %v17636_v42  ;;  %v17656_v42 = vld [vmem:[#allocation42 + $0x1d4] ss:$8 sps:$4 sm:$0xff]  }
0x10c9   : > { %9579 = vmatprep.subr.bf16.mxu1 %v17648_v50  ;;  %v17654_v50 = vld [vmem:[#allocation42 + $0x1d0] ss:$8 sps:$4 sm:$0xff]  }
0x10cc   : > { %9580 = vmatpush2.bf16.msra.mxu1 %v17646_v45 }
0x112f   : > { %v8730_v37 = vpop.f32.mrf.mxu1 }
0x1130   : > { %v8737_v58 = vadd.f32 %v8730_v37, %v20270_v38  ;;  %v17659_v37 = vld [vmem:[#allocation42 + $0x1c4] ss:$8 sps:$4 sm:$0xff]  }
0x1131   : > { %v8732_v51 = vpop.f32.mrf.mxu1 }
0x1132   : > { %v8738_v59 = vadd.f32 %v8732_v51, %v20273_v26  ;;  %v17657_v51 = vld [vmem:[#allocation42 + $0x1c0] ss:$8 sps:$4 sm:$0xff]  }
0x1133   : > { %v8734_v52 = vpop.f32.mrf.mxu1 }
0x1134   : > { %v17662_v52 = vld [vmem:[#allocation42 + $0x1b4] ss:$8 sps:$4 sm:$0xff]  }
0x1135   : > { %v8735_v7 = vpop.f32.mrf.mxu1 }
0x1136   : > { %v17660_v7 = vld [vmem:[#allocation42 + $0x1b0] ss:$8 sps:$4 sm:$0xff]  }
0x1137   : > { %v8942_v54 = vpop.f32.mrf.mxu0 }
0x1138   : > { %v8949_v60 = vadd.f32 %v8942_v54, %v8737_v58  ;;  %v17665_v54 = vld [vmem:[#allocation42 + $0x1a4] ss:$8 sps:$4 sm:$0xff]  }
0x1139   : > { %v8944_v57 = vpop.f32.mrf.mxu0  ;;  %v17671_v58 = vld [vmem:[#allocation42 + $0x184] ss:$8 sps:$4 sm:$0xff]  }
0x113a   : > { %v8950_v62 = vadd.f32 %v8944_v57, %v8738_v59  ;;  %v17663_v57 = vld [vmem:[#allocation42 + $0x1a0] ss:$8 sps:$4 sm:$0xff]  }
0x113b   : > { %v8946_v48 = vpop.f32.mrf.mxu0  ;;  %v17669_v59 = vld [vmem:[#allocation42 + $0x180] ss:$8 sps:$4 sm:$0xff]  }
0x113c   : > { %v17668_v48 = vld [vmem:[#allocation42 + $0x194] ss:$8 sps:$4 sm:$0xff]  }
0x113d   : > { %v8947_v55 = vpop.f32.mrf.mxu0 }
0x113e   : > { %v17666_v55 = vld [vmem:[#allocation42 + $0x190] ss:$8 sps:$4 sm:$0xff]  }
0x115f   : > { %v9142_v61 = vpop.f32.mrf.mxu1 }
0x1160   : > { %v9149_v63 = vadd.f32 %v9142_v61, %v8949_v60  ;;  %v17674_v60 = vld [vmem:[#allocation42 + $0x234] ss:$8 sps:$4 sm:$0xff]   ;;  %v17672_v61 = vld [vmem:[#allocation42 + $0x230] ss:$8 sps:$4 sm:$0xff]  }
0x1161   : > { %v9144_v1 = vpop.f32.mrf.mxu1 }
0x1162   : > { %v9150_v5 = vadd.f32 %v9144_v1, %v8950_v62  ;;  %v9151_v6 = vmax.f32 %v9149_v63, 0.0  ;;  %v17677_v62 = vld [vmem:[#allocation42 + $0x224] ss:$8 sps:$4 sm:$0xff]   ;;  %v17675_v63 = vld [vmem:[#allocation42 + $0x220] ss:$8 sps:$4 sm:$0xff]  }
0x1163   : > { %v9146_v33 = vpop.f32.mrf.mxu1  ;;  %v17680_v1 = vld [vmem:[#allocation42 + $0x214] ss:$8 sps:$4 sm:$0xff]  }
0x1164   : > { %v9152_v10 = vmax.f32 %v9150_v5, 0.0  ;;  %v17678_v5 = vld [vmem:[#allocation42 + $0x210] ss:$8 sps:$4 sm:$0xff]   ;;  %v17683_v33 = vld [vmem:[#allocation42 + $0x204] ss:$8 sps:$4 sm:$0xff]  }
0x1165   : > { %v9147_v12 = vpop.f32.mrf.mxu1 }
0x1166   : > { %v16184_v13 = vpack.c.bf16 %v9152_v10, %v9151_v6  ;;  %v17681_v6 = vld [vmem:[#allocation42 + $0x200] ss:$8 sps:$4 sm:$0xff]  }
0x1168   : > { %v9161_v14 = vshrl.u32 %v16184_v13, 16  ;;  %v9164_v16 = vshll.u32 %v16184_v13, 16  ;;  %v17686_v13 = vld [vmem:[#allocation44 + $0x74] ss:$8 sps:$4 sm:$0xff]  }
0x1169   : > { %9943 = vmatprep.subr.bf16.mxu1 %v17686_v13 }
0x116a   : > { %v9163_v15 = vrot.slane %v9161_v14, 7  ;;  %v17689_v14 = vld [vmem:[#allocation44 + $0x134] ss:$8 sps:$4 sm:$0xff]  }
0x116c   : > { %v9166_v44 = vor.u32 %v9164_v16, %v9163_v15  ;;  %v17684_v15 = vld [vmem:[#allocation44 + $0x70] ss:$8 sps:$4 sm:$0xff]  }
0x116d   : > { %v17687_v16 = vld [vmem:[#allocation44 + $0x130] ss:$8 sps:$4 sm:$0xff]  }
0x116e   : > { %v9169_v38 = vsel %vm20109_vm9, %v9166_v44, %v9168_v17  ;;  %vm20736_vm9 = vmmov %vm20731_vm1  ;;  %v17692_v44 = vld [vmem:[#allocation44 + $0x64] ss:$8 sps:$4 sm:$0xff]   ;;  %vm10177_vm1 = vcmask 31744  }
0x116f   : > { %9170 = vst [vmem:[#allocation4] sm:$0x77] %v9169_v38  ;;  %v17695_v17 = vld [vmem:[#allocation44 + $0x124] ss:$8 sps:$4 sm:$0xff]   ;;  %v17690_v38 = vld [vmem:[#allocation44 + $0x60] ss:$8 sps:$4 sm:$0xff]  }
0x1176   : > { %v9172_v26 = vld [vmem:[#allocation4] sm:$0x33] }
0x1177   : > { %v20279_v39 = vld [vmem:[#allocation4] sm:$0x66]  ;;  %v15561_v19 = vcombine.low %v9172_v26, %v9172_v26  ;;  %v15562_v35 = vcombine.high %v9172_v26, %v9172_v26 }
0x1178   : > { %v9380_v18 = vld [vmem:[#allocation4] sm:$0x77]  ;;  %v15616_v20 = vcombine.high %v20279_v39, %v20279_v39  ;;  %v15615_v10 = vcombine.low %v20279_v39, %v20279_v39  ;;  %v17701_v39 = vld [vmem:[#allocation44 + $0x114] ss:$8 sps:$4 sm:$0xff]  }
0x1179   : > { %v15589_v25 = vcombine.high %v9380_v18, %v9380_v18  ;;  %v15588_v27 = vcombine.low %v9380_v18, %v9380_v18  ;;  %15587 = vmatprep.mubr.msk.bf16.mxu0 %vm20735_vm4, %v15562_v35  ;;  %v17693_v26 = vld [vmem:[#allocation44 + $0x120] ss:$8 sps:$4 sm:$0xff]   ;;  %v17698_v18 = vld [vmem:[#allocation44 + $0x54] ss:$8 sps:$4 sm:$0xff]   ;;  %v17699_v35 = vld [vmem:[#allocation44 + $0x110] ss:$8 sps:$4 sm:$0xff]  }
0x117a   : > { %v9624_v31 = vrot.slane %v15616_v20, 1  ;;  %9359 = vmatmul.mubr.bf16.vlgmr.msra.gmra.mxu0 %v15561_v19  ;;  %v9623_v12 = vrot.slane %v15615_v10, 1  ;;  %v17696_v19 = vld [vmem:[#allocation44 + $0x50] ss:$8 sps:$4 sm:$0xff]   ;;  %v17707_v20 = vld [vmem:[#allocation44 + $0x104] ss:$8 sps:$4 sm:$0xff]   ;;  %vm20748_vm4 = vmmov %vm20746_vm8 }
0x117b   : > { %v9421_v49 = vshll.u32 %v15589_v25, 16  ;;  %v9414_v9 = vshll.u32 %v15588_v27, 16  ;;  %9750 = vmatpush1.bf16.msra.mxu0 %v17641_v21  ;;  %v9419_v36 = vshrl.u32 %v15589_v25, 16  ;;  %v9412_v40 = vshrl.u32 %v15588_v27, 16  ;;  %v17704_v21 = vld [vmem:[#allocation44 + $0x44] ss:$8 sps:$4 sm:$0xff]  }
0x117c   : > { %15641 = vmatprep.mubr.msk.bf16.mxu0 %vm20736_vm9, %v9624_v31  ;;  %9751 = vmatprep.subr.bf16.mxu0 %v17651_v23  ;;  %v17702_v23 = vld [vmem:[#allocation44 + $0x40] ss:$8 sps:$4 sm:$0xff]   ;;  %v17710_v27 = vld [vmem:[#allocation44 + $0x34] ss:$8 sps:$4 sm:$0xff]   ;;  %vm20752_vm9 = vmmov %vm20748_vm4 }
0x117d   : > { %v9423_v22 = vrot.slane %v9421_v49, 1  ;;  %v9416_v24 = vrot.slane %v9414_v9, 1  ;;  %v17705_v25 = vld [vmem:[#allocation44 + $0x100] ss:$8 sps:$4 sm:$0xff]   ;;  %v17713_v31 = vld [vmem:[#allocation44 + $0xf4] ss:$8 sps:$4 sm:$0xff]  }
0x117e   : > { %v17708_v49 = vld [vmem:[#allocation44 + $0x30] ss:$8 sps:$4 sm:$0xff]   ;;  %v17753_v10 = vld [vmem:[#allocation44 + $0x140] ss:$8 sps:$4 sm:$0xff]  }
0x117f   : > { %v9424_v41 = vor.u32 %v9423_v22, %v9419_v36  ;;  %v9417_v45 = vor.u32 %v9416_v24, %v9412_v40  ;;  %9752 = vmatpush1.bf16.msra.mxu0 %v17649_v34  ;;  %v17711_v9 = vld [vmem:[#allocation44 + $0xf0] ss:$8 sps:$4 sm:$0xff]   ;;  %v17716_v34 = vld [vmem:[#allocation44 + $0x24] ss:$8 sps:$4 sm:$0xff]   ;;  %v17714_v22 = vld [vmem:[#allocation44 + $0x20] ss:$8 sps:$4 sm:$0xff]  }
0x1180   : > { %9753 = vmatprep.subr.bf16.mxu0 %v17656_v42  ;;  %v17719_v36 = vld [vmem:[#allocation44 + $0xe4] ss:$8 sps:$4 sm:$0xff]   ;;  %v17717_v40 = vld [vmem:[#allocation44 + $0xe0] ss:$8 sps:$4 sm:$0xff]   ;;  %v17722_v24 = vld [vmem:[#allocation44 + $0x14] ss:$8 sps:$4 sm:$0xff]  }
0x1181   : > { %15614 = vmatprep.mubr.msk.bf16.mxu1 %vm20737_vm2, %v9424_v41  ;;  %v17725_v42 = vld [vmem:[#allocation44 + $0xd4] ss:$8 sps:$4 sm:$0xff]   ;;  %v17720_v41 = vld [vmem:[#allocation44 + $0x10] ss:$8 sps:$4 sm:$0xff]   ;;  %vm20753_vm2 = vmmov %vm20748_vm4 }
0x1182   : > { %9582 = vmatmul.mubr.bf16.vlgmr.msra.gmra.mxu1 %v9417_v45  ;;  %v17723_v45 = vld [vmem:[#allocation44 + $0xd0] ss:$8 sps:$4 sm:$0xff]  }
0x1183   : > { %9754 = vmatpush1.bf16.msra.mxu0 %v17654_v50  ;;  %9944 = vmatpush1.bf16.msra.mxu1 %v17684_v15  ;;  %v17728_v50 = vld [vmem:[#allocation44 + $0x4] ss:$8 sps:$4 sm:$0xff]  }
0x1184   : > { %9755 = vmatprep.subr.bf16.mxu0 %v17659_v37  ;;  %9945 = vmatprep.subr.bf16.mxu1 %v17692_v44  ;;  %v17731_v37 = vld [vmem:[#allocation44 + $0xc4] ss:$8 sps:$4 sm:$0xff]  }
0x1187   : > { %9756 = vmatpush1.bf16.msra.mxu0 %v17657_v51  ;;  %9946 = vmatpush1.bf16.msra.mxu1 %v17690_v38  ;;  %v17726_v51 = vld [vmem:[#allocation44] ss:$8 sps:$4 sm:$0xff]  }
0x1188   : > { %9757 = vmatprep.subr.bf16.mxu0 %v17662_v52  ;;  %9947 = vmatprep.subr.bf16.mxu1 %v17698_v18  ;;  %v17729_v52 = vld [vmem:[#allocation44 + $0xc0] ss:$8 sps:$4 sm:$0xff]  }
0x118b   : > { %9758 = vmatpush1.bf16.msra.mxu0 %v17660_v7  ;;  %9948 = vmatpush1.bf16.msra.mxu1 %v17696_v19  ;;  %v17734_v7 = vld [vmem:[#allocation44 + $0xb4] ss:$8 sps:$4 sm:$0xff]  }
0x118c   : > { %9759 = vmatprep.subr.bf16.mxu0 %v17665_v54  ;;  %9949 = vmatprep.subr.bf16.mxu1 %v17704_v21  ;;  %v17737_v54 = vld [vmem:[#allocation44 + $0x174] ss:$8 sps:$4 sm:$0xff]  }
0x118f   : > { %9760 = vmatpush1.bf16.msra.mxu0 %v17663_v57  ;;  %9950 = vmatpush1.bf16.msra.mxu1 %v17702_v23  ;;  %v17732_v57 = vld [vmem:[#allocation44 + $0xb0] ss:$8 sps:$4 sm:$0xff]  }
0x1190   : > { %9761 = vmatprep.subr.bf16.mxu0 %v17668_v48  ;;  %9951 = vmatprep.subr.bf16.mxu1 %v17710_v27  ;;  %v17735_v48 = vld [vmem:[#allocation44 + $0x170] ss:$8 sps:$4 sm:$0xff]  }
0x1193   : > { %9762 = vmatpush1.bf16.msra.mxu0 %v17666_v55  ;;  %9952 = vmatpush1.bf16.msra.mxu1 %v17708_v49  ;;  %v17740_v55 = vld [vmem:[#allocation44 + $0xa4] ss:$8 sps:$4 sm:$0xff]  }
0x1194   : > { %9763 = vmatprep.subr.bf16.mxu0 %v17671_v58  ;;  %9953 = vmatprep.subr.bf16.mxu1 %v17716_v34  ;;  %v17743_v58 = vld [vmem:[#allocation44 + $0x164] ss:$8 sps:$4 sm:$0xff]  }
0x1197   : > { %9764 = vmatpush1.bf16.msra.mxu0 %v17669_v59  ;;  %9954 = vmatpush1.bf16.msra.mxu1 %v17714_v22  ;;  %v17738_v59 = vld [vmem:[#allocation44 + $0xa0] ss:$8 sps:$4 sm:$0xff]  }
0x1198   : > { %9773 = vmatprep.subr.bf16.mxu0 %v17674_v60  ;;  %9955 = vmatprep.subr.bf16.mxu1 %v17722_v24  ;;  %v17741_v60 = vld [vmem:[#allocation44 + $0x160] ss:$8 sps:$4 sm:$0xff]   ;;  %v20295_v24 = vld [vmem:[#allocation7 + $0x8] sm:$0xff] }
0x119b   : > { %9774 = vmatpush2.bf16.msra.mxu0 %v17672_v61  ;;  %9956 = vmatpush1.bf16.msra.mxu1 %v17720_v41  ;;  %v17746_v61 = vld [vmem:[#allocation44 + $0x94] ss:$8 sps:$4 sm:$0xff]  }
0x119c   : > { %9775 = vmatprep.subr.bf16.mxu0 %v17677_v62  ;;  %9957 = vmatprep.subr.bf16.mxu1 %v17728_v50  ;;  %v17749_v62 = vld [vmem:[#allocation44 + $0x154] ss:$8 sps:$4 sm:$0xff]  }
0x119f   : > { %9776 = vmatpush2.bf16.msra.mxu0 %v17675_v63  ;;  %9958 = vmatpush1.bf16.msra.mxu1 %v17726_v51  ;;  %v17744_v63 = vld [vmem:[#allocation44 + $0x90] ss:$8 sps:$4 sm:$0xff]  }
0x11a0   : > { %9777 = vmatprep.subr.bf16.mxu0 %v17680_v1  ;;  %9967 = vmatprep.subr.bf16.mxu1 %v17734_v7  ;;  %v17747_v1 = vld [vmem:[#allocation44 + $0x150] ss:$8 sps:$4 sm:$0xff]  }
0x11a3   : > { %9778 = vmatpush2.bf16.msra.mxu0 %v17678_v5  ;;  %9968 = vmatpush2.bf16.msra.mxu1 %v17732_v57  ;;  %v17752_v5 = vld [vmem:[#allocation44 + $0x84] ss:$8 sps:$4 sm:$0xff]  }
0x11a4   : > { %9779 = vmatprep.subr.bf16.mxu0 %v17683_v33  ;;  %9969 = vmatprep.subr.bf16.mxu1 %v17740_v55  ;;  %v17755_v33 = vld [vmem:[#allocation44 + $0x144] ss:$8 sps:$4 sm:$0xff]   ;;  %v17758_v55 = vld [vmem:[#allocation45 + $0x74] ss:$8 sps:$4 sm:$0xff]  }
0x11a7   : > { %9780 = vmatpush2.bf16.msra.mxu0 %v17681_v6  ;;  %9970 = vmatpush2.bf16.msra.mxu1 %v17738_v59  ;;  %v17750_v6 = vld [vmem:[#allocation44 + $0x80] ss:$8 sps:$4 sm:$0xff]  }
0x11a8   : > { %10131 = vmatprep.subr.bf16.mxu0 %v17689_v14  ;;  %9971 = vmatprep.subr.bf16.mxu1 %v17746_v61 }
0x11aa   : > { %9782 = vmatmul.mubr.bf16.vlgmr.msra.gmra.mxu0 %v9623_v12 }
0x11ab   : > { %10132 = vmatpush1.bf16.msra.mxu0 %v17687_v16  ;;  %9972 = vmatpush2.bf16.msra.mxu1 %v17744_v63  ;;  %v15692_v63 = vld [vmem:[%s20741_s2 + $0x4] sm:$0xf] }
0x11ac   : > { %10133 = vmatprep.subr.bf16.mxu0 %v17695_v17  ;;  %9973 = vmatprep.subr.bf16.mxu1 %v17752_v5 }
0x11af   : > { %10134 = vmatpush1.bf16.msra.mxu0 %v17693_v26  ;;  %9974 = vmatpush2.bf16.msra.mxu1 %v17750_v6  ;;  %v9171_v26 = vld [vmem:[%s20738_s10] sm:$0x3]  ;;  %s1827_s10 = scalar_lea.vmem [#allocation56], %s14762_s7 }
0x11b0   : > { %10135 = vmatprep.subr.bf16.mxu0 %v17701_v39  ;;  %v9371_v18 = vrot.slane %v9171_v26, %v19879_v30  ;;  %v9375_v39 = vrot.slane %v9171_v26, %v19882_v32  ;;  %v10174_v6 = vld [vmem:[%s20741_s2] sm:$0xf]  ;;  %v17773_v26 = vld [vmem:[#allocation45 + $0x54] ss:$8 sps:$4 sm:$0xff]  }
0x11b3   : > { %10136 = vmatpush1.bf16.msra.mxu0 %v17699_v35 }
0x11b4   : > { %10137 = vmatprep.subr.bf16.mxu0 %v17707_v20 }
0x11b7   : > { %10138 = vmatpush1.bf16.msra.mxu0 %v17705_v25 }
0x11b8   : > { %10139 = vmatprep.subr.bf16.mxu0 %v17713_v31 }
0x11bb   : > { %10140 = vmatpush1.bf16.msra.mxu0 %v17711_v9 }
0x11bc   : > { %10141 = vmatprep.subr.bf16.mxu0 %v17719_v36 }
0x11bf   : > { %10142 = vmatpush1.bf16.msra.mxu0 %v17717_v40 }
0x11c0   : > { %10143 = vmatprep.subr.bf16.mxu0 %v17725_v42  ;;  %v20297_v42 = vld [vmem:[#allocation7] sm:$0x11] }
0x11c1   : > { %v15722_v41 = vcombine.high %v20295_v24, %v20297_v42 }
0x11c3   : > { %10144 = vmatpush1.bf16.msra.mxu0 %v17723_v45 }
0x11c4   : > { %10145 = vmatprep.subr.bf16.mxu0 %v17731_v37 }
0x11c7   : > { %10146 = vmatpush1.bf16.msra.mxu0 %v17729_v52  ;;  %v10544_v52 = vshll.u32 %v15722_v41, 16 }
0x11c8   : > { %10155 = vmatprep.subr.bf16.mxu0 %v17737_v54 }
0x11cb   : > { %10156 = vmatpush2.bf16.msra.mxu0 %v17735_v48 }
0x11cc   : > { %10157 = vmatprep.subr.bf16.mxu0 %v17743_v58  ;;  %v17761_v58 = vld [vmem:[#allocation45 + $0x114] ss:$8 sps:$4 sm:$0xff]  }
0x11cf   : > { %10158 = vmatpush2.bf16.msra.mxu0 %v17741_v60 }
0x11d0   : > { %10159 = vmatprep.subr.bf16.mxu0 %v17749_v62 }
0x11d3   : > { %10160 = vmatpush2.bf16.msra.mxu0 %v17747_v1  ;;  %v10546_v1 = vrot.slane %v10544_v52, 1  ;;  %v17801_v52 = vld [vmem:[#allocation45] ss:$8 sps:$4 sm:$0xff]  }
0x11d4   : > { %10161 = vmatprep.subr.bf16.mxu0 %v17755_v33 }
0x11d7   : > { %10162 = vmatpush2.bf16.msra.mxu0 %v17753_v10  ;;  %v17756_v10 = vld [vmem:[#allocation45 + $0x70] ss:$8 sps:$4 sm:$0xff]  }
0x123a   : > { %v9360_v12 = vpop.f32.mrf.mxu0 }
0x123b   : > { %v9378_v19 = vadd.f32 %v9371_v18, %v9360_v12  ;;  %v17759_v12 = vld [vmem:[#allocation45 + $0x110] ss:$8 sps:$4 sm:$0xff]   ;;  %v17776_v18 = vld [vmem:[#allocation45 + $0xf4] ss:$8 sps:$4 sm:$0xff]  }
0x123c   : > { %v9362_v13 = vpop.f32.mrf.mxu0 }
0x123d   : > { %v9379_v35 = vadd.f32 %v9375_v39, %v9362_v13  ;;  %v10542_v13 = vshrl.u32 %v15722_v41, 16  ;;  %v17771_v39 = vld [vmem:[#allocation45 + $0x50] ss:$8 sps:$4 sm:$0xff]   ;;  %v17800_v41 = vld [vmem:[#allocation45 + $0xb4] ss:$8 sps:$4 sm:$0xff]  }
0x123e   : > { %v9364_v14 = vpop.f32.mrf.mxu0 }
0x123f   : > { %v15699_v14 = vcombine.high %v20295_v24, %v20295_v24 }
0x1240   : > { %v9365_v15 = vpop.f32.mrf.mxu0 }
0x1241   : > { %v17767_v15 = vld [vmem:[#allocation45 + $0x64] ss:$8 sps:$4 sm:$0xff]  }
0x1242   : > { %v9583_v16 = vpop.f32.mrf.mxu1 }
0x1243   : > { %v9590_v21 = vadd.f32 %v9583_v16, %v9378_v19  ;;  %v17770_v16 = vld [vmem:[#allocation45 + $0x104] ss:$8 sps:$4 sm:$0xff]   ;;  %v17774_v19 = vld [vmem:[#allocation45 + $0xf0] ss:$8 sps:$4 sm:$0xff]  }
0x1244   : > { %v9585_v44 = vpop.f32.mrf.mxu1 }
0x1245   : > { %v9591_v23 = vadd.f32 %v9585_v44, %v9379_v35  ;;  %v10547_v44 = vor.u32 %v10546_v1, %v10542_v13  ;;  %v17779_v35 = vld [vmem:[#allocation45 + $0x44] ss:$8 sps:$4 sm:$0xff]   ;;  %v17816_v1 = vld [vmem:[#allocation45 + $0x120] ss:$8 sps:$4 sm:$0xff]   ;;  %v17820_v13 = vld [vmem:[#allocation45 + $0x1b0] ss:$8 sps:$4 sm:$0xff]  }
0x1246   : > { %v9587_v17 = vpop.f32.mrf.mxu1 }
0x1247   : > { %v17765_v17 = vld [vmem:[#allocation45 + $0x60] ss:$8 sps:$4 sm:$0xff]  }
0x1248   : > { %v9588_v38 = vpop.f32.mrf.mxu1 }
0x1249   : > { %v17768_v38 = vld [vmem:[#allocation45 + $0x100] ss:$8 sps:$4 sm:$0xff]  }
0x126a   : > { %v9783_v20 = vpop.f32.mrf.mxu0 }
0x126b   : > { %v9790_v25 = vadd.f32 %v9783_v20, %v9590_v21  ;;  %v17782_v21 = vld [vmem:[#allocation45 + $0xe4] ss:$8 sps:$4 sm:$0xff]   ;;  %v17777_v20 = vld [vmem:[#allocation45 + $0x40] ss:$8 sps:$4 sm:$0xff]  }
0x126c   : > { %v9785_v27 = vpop.f32.mrf.mxu0 }
0x126d   : > { %v9791_v31 = vadd.f32 %v9785_v27, %v9591_v23  ;;  %v9792_v49 = vmax.f32 %v9790_v25, 0.0  ;;  %v17780_v23 = vld [vmem:[#allocation45 + $0xe0] ss:$8 sps:$4 sm:$0xff]   ;;  %v17785_v25 = vld [vmem:[#allocation45 + $0x34] ss:$8 sps:$4 sm:$0xff]  }
0x126e   : > { %v9787_v9 = vpop.f32.mrf.mxu0  ;;  %v17788_v27 = vld [vmem:[#allocation45 + $0xd4] ss:$8 sps:$4 sm:$0xff]  }
0x126f   : > { %v9793_v34 = vmax.f32 %v9791_v31, 0.0  ;;  %v9794_v40 = vpack.c.bf16 %v9792_v49, %v9792_v49  ;;  %v17783_v31 = vld [vmem:[#allocation45 + $0x30] ss:$8 sps:$4 sm:$0xff]   ;;  %v17791_v9 = vld [vmem:[#allocation45 + $0x24] ss:$8 sps:$4 sm:$0xff]  }
0x1270   : > { %v9788_v36 = vpop.f32.mrf.mxu0  ;;  %v17786_v49 = vld [vmem:[#allocation45 + $0xd0] ss:$8 sps:$4 sm:$0xff]  }
0x1271   : > { %v9795_v22 = vpack.c.bf16 %v9793_v34, %v9793_v34  ;;  %v17794_v34 = vld [vmem:[#allocation45 + $0xc4] ss:$8 sps:$4 sm:$0xff]   ;;  %v17789_v36 = vld [vmem:[#allocation45 + $0x20] ss:$8 sps:$4 sm:$0xff]  }
0x1273   : > { %15666 = vmatprep.mubr.msk.bf16.mxu1 %vm20739_vm0, %v9795_v22  ;;  %15691 = vmatprep.mubr.msk.bf16.mxu0 %vm20740_vm12, %v9795_v22  ;;  %v17792_v22 = vld [vmem:[#allocation45 + $0xc0] ss:$8 sps:$4 sm:$0xff]   ;;  %vm20754_vm0 = vmmov %vm20753_vm2 }
0x1274   : > { %9976 = vmatmul.mubr.bf16.vlgmr.msra.gmra.mxu1 %v9794_v40  ;;  %10164 = vmatmul.mubr.bf16.vlgmr.msra.gmra.mxu0 %v9794_v40  ;;  %v17797_v40 = vld [vmem:[#allocation45 + $0x14] ss:$8 sps:$4 sm:$0xff]   ;;  %vm20758_vm12 = vmmov %vm20754_vm0 }
0x1275   : > { %10220 = vmatprep.mubr.bf16.mxu1 %v19238_v0  ;;  %10270 = vmatprep.mubr.bf16.mxu0 %v19238_v0 }
0x1334   : > { %v9977_v45 = vpop.f32.mrf.mxu1  ;;  %v10165_v50 = vpop.f32.mrf.mxu0 }
0x1335   : > { %v9984_v37 = vpack.c.bf16 %v9977_v45, %v9977_v45  ;;  %v10172_v51 = vpack.c.bf16 %v10165_v50, %v10165_v50  ;;  %v17795_v45 = vld [vmem:[#allocation45 + $0x10] ss:$8 sps:$4 sm:$0xff]  }
0x1336   : > { %v9979_v7 = vpop.f32.mrf.mxu1  ;;  %v10167_v54 = vpop.f32.mrf.mxu0  ;;  %v17798_v50 = vld [vmem:[#allocation45 + $0xb0] ss:$8 sps:$4 sm:$0xff]  }
0x1337   : > { %v9985_v57 = vpack.c.bf16 %v9979_v7, %v9979_v7  ;;  %v10173_v48 = vpack.c.bf16 %v10167_v54, %v10167_v54  ;;  %v10233_v61 = vsel %vm20742_vm5, %v9984_v37, 0  ;;  %v10183_v62 = vsel %vm20743_vm10, %v10172_v51, 0  ;;  %v17803_v37 = vld [vmem:[#allocation45 + $0x4] ss:$8 sps:$4 sm:$0xff]   ;;  %v17804_v7 = vld [vmem:[#allocation45 + $0xa0] ss:$8 sps:$4 sm:$0xff]   ;;  %vm20759_vm5 = vmmov %vm20754_vm0 }
0x1338   : > { %v9981_v59 = vpop.f32.mrf.mxu1  ;;  %v10169_v60 = vpop.f32.mrf.mxu0  ;;  %v17806_v51 = vld [vmem:[#allocation45 + $0xa4] ss:$8 sps:$4 sm:$0xff]   ;;  %v17809_v54 = vld [vmem:[#allocation45 + $0x94] ss:$8 sps:$4 sm:$0xff]   ;;  %vm20760_vm10 = vsmask.f32 7424 }
0x1339   : > { %15693 = vmatprep.subr.msk.bf16.mxu1 %vm20744_vm6, %v10173_v48  ;;  %15695 = vmatprep.subr.msk.bf16.mxu0 %vm20745_vm7, %v9985_v57  ;;  %v15721_v57 = vcombine.low %v20295_v24, %v20297_v42  ;;  %v17812_v48 = vld [vmem:[#allocation45 + $0x134] ss:$8 sps:$4 sm:$0xff]   ;;  %v17815_v59 = vld [vmem:[#allocation45 + $0x84] ss:$8 sps:$4 sm:$0xff]   ;;  %vm20761_vm6 = vcmask 130048   ;;  %vm20763_vm7 = vmmov %vm20760_vm10 }
0x133a   : > { %v9982_v5 = vpop.f32.mrf.mxu1  ;;  %v10170_v33 = vpop.f32.mrf.mxu0  ;;  %10203 = vmatpush1.bf16.msra.mxu1 %v10183_v62  ;;  %10253 = vmatpush1.bf16.msra.mxu0 %v10233_v61  ;;  %v17818_v60 = vld [vmem:[#allocation45 + $0x124] ss:$8 sps:$4 sm:$0xff]   ;;  %v17813_v62 = vld [vmem:[#allocation45 + $0x80] ss:$8 sps:$4 sm:$0xff]  }
0x133b   : > { %10449 = vmatprep.subr.bf16.mxu1 %v17758_v55  ;;  %10652 = vmatprep.subr.bf16.mxu0 %v17761_v58  ;;  %v17807_v55 = vld [vmem:[#allocation45 + $0x90] ss:$8 sps:$4 sm:$0xff]   ;;  %v10537_v61 = vshll.u32 %v15721_v57, 16  ;;  %v17822_v5 = vld [vmem:[#allocation45 + $0x1b4] ss:$8 sps:$4 sm:$0xff]  }
0x133c   : > { %v17810_v58 = vld [vmem:[#allocation45 + $0x130] ss:$8 sps:$4 sm:$0xff]  }
0x133d   : > { %15694 = vmatmul.mubr.msk.bf16.vlgmr.msra.gmra.mxu1 %vm10177_vm1, %v15692_v63  ;;  %15696 = vmatmul.mubr.msk.bf16.vlgmr.msra.gmra.mxu0 %vm10177_vm1, %v10174_v6  ;;  %v20313_v63 = vld [vmem:[#allocation7 + $0x8] sm:$0xee]  ;;  %v10539_v33 = vrot.slane %v10537_v61, 1  ;;  %v17891_v61 = vld [vmem:[#allocation47] ss:$8 sps:$4 sm:$0xff]   ;;  %vm20764_vm1 = vcmask 1043456  }
0x133e   : > { %10450 = vmatpush1.bf16.msra.mxu1 %v17756_v10  ;;  %15720 = vmatprep.mubr.msk.bf16.mxu1 %vm20746_vm8, %v15699_v14  ;;  %v17854_v6 = vld [vmem:[#allocation47 + $0x74] ss:$8 sps:$4 sm:$0xff]   ;;  %v15745_v10 = vcombine.high %v20313_v63, %v20297_v42  ;;  %v15698_v14 = vcombine.low %v20295_v24, %v20295_v24  ;;  %v17827_v24 = vld [vmem:[#allocation45 + $0x190] ss:$8 sps:$4 sm:$0xff]   ;;  %vm20765_vm8 = vmmov %vm20764_vm1 }
0x133f   : > { %10653 = vmatpush1.bf16.msra.mxu0 %v17759_v12  ;;  %15743 = vmatprep.mubr.msk.bf16.mxu0 %vm20747_vm14, %v10547_v44  ;;  %v10535_v12 = vshrl.u32 %v15721_v57, 16  ;;  %v17852_v44 = vld [vmem:[#allocation47 + $0x70] ss:$8 sps:$4 sm:$0xff]   ;;  %v1944_v57 = vld [vmem:[#allocation13 + $0x8] sm:$0x11]  ;;  %vm12334_vm14 = vcmask 64512  }
0x1340   : > { %10451 = vmatprep.subr.bf16.mxu1 %v17767_v15  ;;  %10654 = vmatprep.subr.bf16.mxu0 %v17770_v16  ;;  %v17826_v15 = vld [vmem:[#allocation45 + $0x1a4] ss:$8 sps:$4 sm:$0xff]  }
0x1341   : > { %v10540_v16 = vor.u32 %v10539_v33, %v10535_v12  ;;  %v17899_v33 = vld [vmem:[#allocation47 + $0x94] ss:$8 sps:$4 sm:$0xff]   ;;  %v17866_v12 = vld [vmem:[#allocation47 + $0x104] ss:$8 sps:$4 sm:$0xff]  }
0x1342   : > { %10452 = vmatpush1.bf16.msra.mxu1 %v17765_v17  ;;  %v10723_v17 = vrot.slane %v15745_v10, 1  ;;  %v17858_v10 = vld [vmem:[#allocation47 + $0x110] ss:$8 sps:$4 sm:$0xff]  }
0x1343   : > { %10655 = vmatpush1.bf16.msra.mxu0 %v17768_v38  ;;  %10453 = vmatprep.subr.bf16.mxu1 %v17773_v26  ;;  %v17857_v38 = vld [vmem:[#allocation47 + $0x64] ss:$8 sps:$4 sm:$0xff]   ;;  %v17824_v26 = vld [vmem:[#allocation45 + $0x1a0] ss:$8 sps:$4 sm:$0xff]  }
0x1344   : > { %10656 = vmatprep.subr.bf16.mxu0 %v17776_v18  ;;  %v17829_v18 = vld [vmem:[#allocation45 + $0x194] ss:$8 sps:$4 sm:$0xff]  }
0x1346   : > { %10454 = vmatpush1.bf16.msra.mxu1 %v17771_v39  ;;  %v17855_v39 = vld [vmem:[#allocation47 + $0x60] ss:$8 sps:$4 sm:$0xff]  }
0x1347   : > { %10657 = vmatpush1.bf16.msra.mxu0 %v17774_v19  ;;  %10455 = vmatprep.subr.bf16.mxu1 %v17779_v35  ;;  %v17863_v19 = vld [vmem:[#allocation47 + $0x54] ss:$8 sps:$4 sm:$0xff]   ;;  %v17832_v35 = vld [vmem:[#allocation45 + $0x184] ss:$8 sps:$4 sm:$0xff]  }
0x1348   : > { %10658 = vmatprep.subr.bf16.mxu0 %v17782_v21  ;;  %v17861_v21 = vld [vmem:[#allocation47 + $0x50] ss:$8 sps:$4 sm:$0xff]  }
0x134a   : > { %10456 = vmatpush1.bf16.msra.mxu1 %v17777_v20  ;;  %v17830_v20 = vld [vmem:[#allocation45 + $0x180] ss:$8 sps:$4 sm:$0xff]  }
0x134b   : > { %10659 = vmatpush1.bf16.msra.mxu0 %v17780_v23  ;;  %10457 = vmatprep.subr.bf16.mxu1 %v17785_v25  ;;  %v17835_v23 = vld [vmem:[#allocation45 + $0x174] ss:$8 sps:$4 sm:$0xff]   ;;  %v17833_v25 = vld [vmem:[#allocation45 + $0x170] ss:$8 sps:$4 sm:$0xff]  }
0x134c   : > { %10660 = vmatprep.subr.bf16.mxu0 %v17788_v27  ;;  %v17838_v27 = vld [vmem:[#allocation45 + $0x164] ss:$8 sps:$4 sm:$0xff]  }
0x134e   : > { %10458 = vmatpush1.bf16.msra.mxu1 %v17783_v31  ;;  %v17869_v31 = vld [vmem:[#allocation47 + $0x44] ss:$8 sps:$4 sm:$0xff]  }
0x134f   : > { %10661 = vmatpush1.bf16.msra.mxu0 %v17786_v49  ;;  %10459 = vmatprep.subr.bf16.mxu1 %v17791_v9  ;;  %v17867_v49 = vld [vmem:[#allocation47 + $0x40] ss:$8 sps:$4 sm:$0xff]  }
0x1350   : > { %10662 = vmatprep.subr.bf16.mxu0 %v17794_v34  ;;  %v17836_v9 = vld [vmem:[#allocation45 + $0x160] ss:$8 sps:$4 sm:$0xff]   ;;  %v17841_v34 = vld [vmem:[#allocation45 + $0x154] ss:$8 sps:$4 sm:$0xff]  }
0x1352   : > { %10460 = vmatpush1.bf16.msra.mxu1 %v17789_v36  ;;  %v17875_v36 = vld [vmem:[#allocation47 + $0x34] ss:$8 sps:$4 sm:$0xff]  }
0x1353   : > { %10663 = vmatpush1.bf16.msra.mxu0 %v17792_v22  ;;  %10461 = vmatprep.subr.bf16.mxu1 %v17797_v40  ;;  %v17873_v22 = vld [vmem:[#allocation47 + $0x30] ss:$8 sps:$4 sm:$0xff]  }
0x1354   : > { %10664 = vmatprep.subr.bf16.mxu0 %v17800_v41  ;;  %v17839_v40 = vld [vmem:[#allocation45 + $0x150] ss:$8 sps:$4 sm:$0xff]   ;;  %v17844_v41 = vld [vmem:[#allocation45 + $0x144] ss:$8 sps:$4 sm:$0xff]  }
0x1356   : > { %10462 = vmatpush1.bf16.msra.mxu1 %v17795_v45  ;;  %v17881_v45 = vld [vmem:[#allocation47 + $0x24] ss:$8 sps:$4 sm:$0xff]  }
0x1357   : > { %10665 = vmatpush1.bf16.msra.mxu0 %v17798_v50  ;;  %10463 = vmatprep.subr.bf16.mxu1 %v17803_v37  ;;  %v17879_v50 = vld [vmem:[#allocation47 + $0x20] ss:$8 sps:$4 sm:$0xff]  }
0x1358   : > { %10666 = vmatprep.subr.bf16.mxu0 %v17806_v51  ;;  %v17842_v37 = vld [vmem:[#allocation45 + $0x140] ss:$8 sps:$4 sm:$0xff]   ;;  %v17847_v51 = vld [vmem:[#allocation45 + $0x1d4] ss:$8 sps:$4 sm:$0xff]  }
0x135a   : > { %10464 = vmatpush1.bf16.msra.mxu1 %v17801_v52  ;;  %v17887_v52 = vld [vmem:[#allocation47 + $0x14] ss:$8 sps:$4 sm:$0xff]  }
0x135b   : > { %10667 = vmatpush1.bf16.msra.mxu0 %v17804_v7  ;;  %10477 = vmatprep.subr.bf16.mxu1 %v17809_v54  ;;  %v17885_v7 = vld [vmem:[#allocation47 + $0x10] ss:$8 sps:$4 sm:$0xff]  }
0x135c   : > { %10680 = vmatprep.subr.bf16.mxu0 %v17812_v48  ;;  %v17845_v54 = vld [vmem:[#allocation45 + $0x1d0] ss:$8 sps:$4 sm:$0xff]  }
0x135d   : > { %v1947_v48 = vld [vmem:[#allocation13] sm:$0x11] }
0x135e   : > { %10478 = vmatpush2.bf16.msra.mxu1 %v17807_v55  ;;  %v17850_v55 = vld [vmem:[#allocation45 + $0x1c4] ss:$8 sps:$4 sm:$0xff]  }
0x135f   : > { %10681 = vmatpush2.bf16.msra.mxu0 %v17810_v58  ;;  %10479 = vmatprep.subr.bf16.mxu1 %v17815_v59  ;;  %v1945_v58 = vsel %vm20026_vm15, 0, %v1944_v57  ;;  %v1948_v59 = vsel %vm20018_vm13, 0, %v1947_v48  ;;  %vm20750_vm13 = vmmov %vm20748_vm4 }
0x1360   : > { %10682 = vmatprep.subr.bf16.mxu0 %v17818_v60  ;;  %1946 = vst [vmem:[#allocation13 + $0x8] sm:$0x11] %v1945_v58  ;;  %1949 = vst [vmem:[#allocation13] sm:$0x11] %v1948_v59  ;;  %v17893_v60 = vld [vmem:[#allocation47 + $0x4] ss:$8 sps:$4 sm:$0xff]  }
0x1362   : > { %10480 = vmatpush2.bf16.msra.mxu1 %v17813_v62  ;;  %v17848_v62 = vld [vmem:[#allocation45 + $0x1c0] ss:$8 sps:$4 sm:$0xff]  }
0x1363   : > { %10683 = vmatpush2.bf16.msra.mxu0 %v17816_v1  ;;  %10828 = vmatprep.subr.bf16.mxu1 %v17822_v5  ;;  %v15744_v1 = vcombine.low %v20313_v63, %v20297_v42  ;;  %v17860_v5 = vld [vmem:[#allocation47 + $0x114] ss:$8 sps:$4 sm:$0xff]   ;;  %v17870_v63 = vld [vmem:[#allocation47 + $0xf0] ss:$8 sps:$4 sm:$0xff]  }
0x1364   : > { %11001 = vmatprep.subr.bf16.mxu0 %v17854_v6  ;;  %v17897_v6 = vld [vmem:[#allocation47 + $0x90] ss:$8 sps:$4 sm:$0xff]   ;;  %v17911_v42 = vld [vmem:[#allocation47 + $0x1b4] ss:$8 sps:$4 sm:$0xff]  }
0x1365   : > { %10482 = vmatmul.mubr.bf16.vlgmr.msra.gmra.mxu1 %v15698_v14  ;;  %v10722_v3 = vrot.slane %v15744_v1, 1  ;;  %v17903_v14 = vld [vmem:[#allocation47 + $0x80] ss:$8 sps:$4 sm:$0xff]  }
0x1366   : > { %10685 = vmatmul.mubr.bf16.vlgmr.msra.gmra.mxu0 %v10540_v16  ;;  %10829 = vmatpush1.bf16.msra.mxu1 %v17820_v13  ;;  %v17905_v13 = vld [vmem:[#allocation47 + $0x84] ss:$8 sps:$4 sm:$0xff]   ;;  %v17872_v16 = vld [vmem:[#allocation47 + $0xf4] ss:$8 sps:$4 sm:$0xff]  }
0x1367   : > { %15766 = vmatprep.mubr.msk.bf16.mxu1 %vm20748_vm4, %v10723_v17  ;;  %10830 = vmatprep.subr.bf16.mxu1 %v17826_v15  ;;  %v17864_v15 = vld [vmem:[#allocation47 + $0x100] ss:$8 sps:$4 sm:$0xff]   ;;  %vm20766_vm4 = vmmov %vm20764_vm1 }
0x1368   : > { %11002 = vmatpush1.bf16.msra.mxu0 %v17852_v44  ;;  %v17878_v44 = vld [vmem:[#allocation47 + $0xe4] ss:$8 sps:$4 sm:$0xff]   ;;  %v17876_v17 = vld [vmem:[#allocation47 + $0xe0] ss:$8 sps:$4 sm:$0xff]  }
0x1369   : > { %11003 = vmatprep.subr.bf16.mxu0 %v17857_v38  ;;  %v17884_v38 = vld [vmem:[#allocation47 + $0xd4] ss:$8 sps:$4 sm:$0xff]  }
0x136a   : > { %10831 = vmatpush1.bf16.msra.mxu1 %v17824_v26  ;;  %v17882_v26 = vld [vmem:[#allocation47 + $0xd0] ss:$8 sps:$4 sm:$0xff]  }
0x136b   : > { %10832 = vmatprep.subr.bf16.mxu1 %v17829_v18  ;;  %v17890_v18 = vld [vmem:[#allocation47 + $0xc4] ss:$8 sps:$4 sm:$0xff]  }
0x136c   : > { %11004 = vmatpush1.bf16.msra.mxu0 %v17855_v39  ;;  %v17888_v39 = vld [vmem:[#allocation47 + $0xc0] ss:$8 sps:$4 sm:$0xff]  }
0x136d   : > { %11005 = vmatprep.subr.bf16.mxu0 %v17863_v19  ;;  %v17896_v19 = vld [vmem:[#allocation47 + $0xb4] ss:$8 sps:$4 sm:$0xff]  }
0x136e   : > { %10833 = vmatpush1.bf16.msra.mxu1 %v17827_v24  ;;  %v17894_v24 = vld [vmem:[#allocation47 + $0xb0] ss:$8 sps:$4 sm:$0xff]  }
0x136f   : > { %10834 = vmatprep.subr.bf16.mxu1 %v17832_v35  ;;  %v17902_v35 = vld [vmem:[#allocation47 + $0xa4] ss:$8 sps:$4 sm:$0xff]  }
0x1370   : > { %11006 = vmatpush1.bf16.msra.mxu0 %v17861_v21  ;;  %v17900_v21 = vld [vmem:[#allocation47 + $0xa0] ss:$8 sps:$4 sm:$0xff]  }
0x1371   : > { %11007 = vmatprep.subr.bf16.mxu0 %v17869_v31  ;;  %v10279_v31 = vld [vmem:[%s20749_s11] sm:$0x3]  ;;  %s19240_s11 = smov 112  }
0x1372   : > { %10835 = vmatpush1.bf16.msra.mxu1 %v17830_v20  ;;  %v17908_v20 = vld [vmem:[#allocation47 + $0x134] ss:$8 sps:$4 sm:$0xff]  }
0x1373   : > { %10836 = vmatprep.subr.bf16.mxu1 %v17835_v23  ;;  %v17906_v23 = vld [vmem:[#allocation47 + $0x130] ss:$8 sps:$4 sm:$0xff]  }
0x1374   : > { %11008 = vmatpush1.bf16.msra.mxu0 %v17867_v49  ;;  %v10284_v49 = vrot.slane %v10279_v31, %v19879_v30 }
0x1375   : > { %11009 = vmatprep.subr.bf16.mxu0 %v17875_v36 }
0x1376   : > { %10837 = vmatpush1.bf16.msra.mxu1 %v17833_v25  ;;  %v17916_v25 = vld [vmem:[#allocation47 + $0x124] ss:$8 sps:$4 sm:$0xff]  }
0x1377   : > { %10838 = vmatprep.subr.bf16.mxu1 %v17838_v27  ;;  %v17914_v27 = vld [vmem:[#allocation47 + $0x120] ss:$8 sps:$4 sm:$0xff]  }
0x1378   : > { %11010 = vmatpush1.bf16.msra.mxu0 %v17873_v22  ;;  %v10288_v22 = vrot.slane %v10279_v31, %v19882_v32 }
0x1379   : > { %11011 = vmatprep.subr.bf16.mxu0 %v17881_v45 }
0x137a   : > { %10839 = vmatpush1.bf16.msra.mxu1 %v17836_v9 }
0x137b   : > { %10840 = vmatprep.subr.bf16.mxu1 %v17841_v34 }
0x137c   : > { %11012 = vmatpush1.bf16.msra.mxu0 %v17879_v50 }
0x137d   : > { %11013 = vmatprep.subr.bf16.mxu0 %v17887_v52 }
0x137e   : > { %10841 = vmatpush1.bf16.msra.mxu1 %v17839_v40 }
0x137f   : > { %10842 = vmatprep.subr.bf16.mxu1 %v17844_v41 }
0x1380   : > { %11014 = vmatpush1.bf16.msra.mxu0 %v17885_v7 }
0x1381   : > { %11015 = vmatprep.subr.bf16.mxu0 %v17893_v60 }
0x1382   : > { %10843 = vmatpush1.bf16.msra.mxu1 %v17842_v37 }
0x1383   : > { %10856 = vmatprep.subr.bf16.mxu1 %v17847_v51 }
0x1384   : > { %11016 = vmatpush1.bf16.msra.mxu0 %v17891_v61  ;;  %v10312_v61 = vld [vmem:[#allocation13 + $0x8] sm:$0xff] }
0x1385   : > { %11029 = vmatprep.subr.bf16.mxu0 %v17899_v33 }
0x1386   : > { %10857 = vmatpush2.bf16.msra.mxu1 %v17845_v54 }
0x1387   : > { %10858 = vmatprep.subr.bf16.mxu1 %v17850_v55 }
0x1388   : > { %11030 = vmatpush2.bf16.msra.mxu0 %v17897_v6 }
0x1389   : > { %11031 = vmatprep.subr.bf16.mxu0 %v17905_v13  ;;  %v17919_v13 = vld [vmem:[#allocation47 + $0x1a4] ss:$8 sps:$4 sm:$0xff]  }
0x138a   : > { %10859 = vmatpush2.bf16.msra.mxu1 %v17848_v62  ;;  %v10315_v62 = vld [vmem:[#allocation13] sm:$0x11] }
0x138b   : > { %11193 = vmatprep.subr.bf16.mxu1 %v17860_v5 }
0x138c   : > { %11032 = vmatpush2.bf16.msra.mxu0 %v17903_v14  ;;  %v17917_v14 = vld [vmem:[#allocation47 + $0x1a0] ss:$8 sps:$4 sm:$0xff]  }
0x138d   : > { %10861 = vmatmul.mubr.bf16.vlgmr.msra.gmra.mxu1 %v10722_v3  ;;  %11369 = vmatprep.subr.bf16.mxu0 %v17911_v42 }
0x138e   : > { %11194 = vmatpush1.bf16.msra.mxu1 %v17858_v10 }
0x138f   : > { %11195 = vmatprep.subr.bf16.mxu1 %v17866_v12  ;;  %v17909_v12 = vld [vmem:[#allocation47 + $0x1b0] ss:$8 sps:$4 sm:$0xff]  }
0x1392   : > { %11196 = vmatpush1.bf16.msra.mxu1 %v17864_v15  ;;  %v17922_v15 = vld [vmem:[#allocation47 + $0x194] ss:$8 sps:$4 sm:$0xff]  }
0x1393   : > { %11197 = vmatprep.subr.bf16.mxu1 %v17872_v16 }
0x1396   : > { %11198 = vmatpush1.bf16.msra.mxu1 %v17870_v63 }
0x1397   : > { %11199 = vmatprep.subr.bf16.mxu1 %v17878_v44 }
0x139a   : > { %11200 = vmatpush1.bf16.msra.mxu1 %v17876_v17 }
0x139b   : > { %11201 = vmatprep.subr.bf16.mxu1 %v17884_v38  ;;  %v17920_v38 = vld [vmem:[#allocation47 + $0x190] ss:$8 sps:$4 sm:$0xff]  }
0x139e   : > { %11202 = vmatpush1.bf16.msra.mxu1 %v17882_v26  ;;  %v17925_v26 = vld [vmem:[#allocation47 + $0x184] ss:$8 sps:$4 sm:$0xff]  }
0x139f   : > { %11203 = vmatprep.subr.bf16.mxu1 %v17890_v18 }
0x13a2   : > { %11204 = vmatpush1.bf16.msra.mxu1 %v17888_v39 }
0x13a3   : > { %11205 = vmatprep.subr.bf16.mxu1 %v17896_v19 }
0x13a6   : > { %11206 = vmatpush1.bf16.msra.mxu1 %v17894_v24 }
0x13a7   : > { %11207 = vmatprep.subr.bf16.mxu1 %v17902_v35 }
0x13aa   : > { %11208 = vmatpush1.bf16.msra.mxu1 %v17900_v21  ;;  %v17923_v21 = vld [vmem:[#allocation47 + $0x180] ss:$8 sps:$4 sm:$0xff]  }
0x13ab   : > { %11221 = vmatprep.subr.bf16.mxu1 %v17908_v20 }
0x13ae   : > { %11222 = vmatpush2.bf16.msra.mxu1 %v17906_v23 }
0x13af   : > { %11223 = vmatprep.subr.bf16.mxu1 %v17916_v25  ;;  %v17928_v25 = vld [vmem:[#allocation47 + $0x174] ss:$8 sps:$4 sm:$0xff]  }
0x13b2   : > { %11224 = vmatpush2.bf16.msra.mxu1 %v17914_v27 }
0x13fd   : > { %v10222_v9 = vpop.f32.mrf.mxu1  ;;  %v10272_v34 = vpop.f32.mrf.mxu0 }
0x13fe   : > { %v10273_v36 = vadd.f32 %v10272_v34, %v10222_v9  ;;  %v17926_v9 = vld [vmem:[#allocation47 + $0x170] ss:$8 sps:$4 sm:$0xff]   ;;  %v17931_v34 = vld [vmem:[#allocation47 + $0x164] ss:$8 sps:$4 sm:$0xff]  }
0x13ff   : > { %v10224_v40 = vpop.f32.mrf.mxu1  ;;  %v10274_v41 = vpop.f32.mrf.mxu0 }
0x1400   : > { %v10291_v45 = vadd.f32 %v10284_v49, %v10273_v36  ;;  %v10275_v50 = vadd.f32 %v10274_v41, %v10224_v40  ;;  %v10318_v49 = vld [vmem:[%s20751_s1] sm:$0x3]  ;;  %v17934_v41 = vld [vmem:[#allocation47 + $0x154] ss:$8 sps:$4 sm:$0xff]   ;;  %s14345_s1 = sshll.u32 %s1827_s10, 4  ;;  %s20482_s1 = int_to_ptr.vmem [resolvable:$true] %s14345_s1 }
0x1401   : > { %v10226_v37 = vpop.f32.mrf.mxu1  ;;  %v10276_v51 = vpop.f32.mrf.mxu0  ;;  %v10494_v36 = vrot.slane %v10318_v49, %v19879_v30  ;;  %v10498_v40 = vrot.slane %v10318_v49, %v19882_v32  ;;  %v17964_v49 = vld [vmem:[#allocation48 + $0xf4] ss:$8 sps:$4 sm:$0xff]   ;;  %s19041_s7 = scalar_lea.vmem %s20482_s1, 512 }
0x1402   : > { %v10292_v52 = vadd.f32 %v10288_v22, %v10275_v50  ;;  %v10293_v57 = vmax.f32 %v10291_v45, 0.0  ;;  %v17929_v22 = vld [vmem:[#allocation47 + $0x160] ss:$8 sps:$4 sm:$0xff]   ;;  %p19042_p13 = scmp.ne.s32.totalorder %s20482_s1, %s19041_s7 }
0x1403   : > { %v10227_v7 = vpop.f32.mrf.mxu1  ;;  %v10277_v54 = vpop.f32.mrf.mxu0 }
0x1404   : > { %v10294_v48 = vmax.f32 %v10292_v52, 0.0  ;;  %v17932_v52 = vld [vmem:[#allocation47 + $0x150] ss:$8 sps:$4 sm:$0xff]   ;;  %p19043_p7 = pnand %p19042_p13, %p20794_p4 }
0x1406   : > { %v16185_v55 = vpack.c.bf16 %v10294_v48, %v10293_v57  ;;  %v17937_v48 = vld [vmem:[#allocation47 + $0x144] ss:$8 sps:$4 sm:$0xff]   ;;  %p19044_p8 = pneg %p19043_p7 }
0x1408   : > { %v10303_v58 = vshrl.u32 %v16185_v55, 16  ;;  %v10306_v60 = vshll.u32 %v16185_v55, 16 }
0x140a   : > { %v10305_v59 = vrot.slane %v10303_v58, 7 }
0x140c   : > { %v10308_v1 = vor.u32 %v10306_v60, %v10305_v59  ;;  %v10309_v5 = vrot.slane %v10305_v59, 4 }
0x140e   : > { %v10313_v33 = vsel %vm20039_vm3, %v10308_v1, %v10312_v61  ;;  %v10316_v6 = vsel %vm20026_vm15, %v10309_v5, %v10315_v62  ;;  %v17935_v61 = vld [vmem:[#allocation47 + $0x140] ss:$8 sps:$4 sm:$0xff]   ;;  %v17940_v1 = vld [vmem:[#allocation47 + $0x1d4] ss:$8 sps:$4 sm:$0xff]   ;;  %v17938_v5 = vld [vmem:[#allocation47 + $0x1d0] ss:$8 sps:$4 sm:$0xff]  }
0x140f   : > { %10314 = vst [vmem:[#allocation13 + $0x8] sm:$0xff] %v10313_v33  ;;  %10317 = vst [vmem:[#allocation13] sm:$0x11] %v10316_v6  ;;  %v15767_v10 = vcombine.low %v10313_v33, %v10313_v33  ;;  %v15768_v3 = vcombine.high %v10313_v33, %v10313_v33  ;;  %v17941_v6 = vld [vmem:[#allocation47 + $0x1c0] ss:$8 sps:$4 sm:$0xff]  }
0x1411   : > { %15789 = vmatprep.mubr.msk.bf16.mxu0 %vm20750_vm13, %v15768_v3  ;;  %vm20767_vm13 = vmmov %vm20764_vm1 }
0x1412   : > { %11034 = vmatmul.mubr.bf16.vlgmr.msra.gmra.mxu0 %v15767_v10 }
0x1413   : > { %11370 = vmatpush1.bf16.msra.mxu0 %v17909_v12 }
0x1414   : > { %11371 = vmatprep.subr.bf16.mxu0 %v17919_v13 }
0x1416   : > { %v20334_v16 = vld [vmem:[#allocation13] sm:$0x11]  ;;  %v20336_v42 = vld [vmem:[#allocation13 + $0x8] sm:$0xee] }
0x1417   : > { %v15814_v63 = vcombine.high %v20336_v42, %v20334_v16  ;;  %11372 = vmatpush1.bf16.msra.mxu0 %v17917_v14  ;;  %v15791_v44 = vcombine.high %v10313_v33, %v20334_v16  ;;  %v15790_v17 = vcombine.low %v10313_v33, %v20334_v16  ;;  %v17943_v33 = vld [vmem:[#allocation47 + $0x1c4] ss:$8 sps:$4 sm:$0xff]   ;;  %v15813_v10 = vcombine.low %v20336_v42, %v20334_v16  ;;  %v17952_v16 = vld [vmem:[#allocation48 + $0x114] ss:$8 sps:$4 sm:$0xff]  }
0x1418   : > { %11373 = vmatprep.subr.bf16.mxu0 %v17922_v15  ;;  %v17955_v42 = vld [vmem:[#allocation48 + $0x54] ss:$8 sps:$4 sm:$0xff]  }
0x1419   : > { %v11264_v18 = vrot.slane %v15814_v63, 1  ;;  %v11085_v39 = vshll.u32 %v15791_v44, 16  ;;  %v11078_v19 = vshll.u32 %v15790_v17, 16  ;;  %v11083_v24 = vshrl.u32 %v15791_v44, 16 }
0x141a   : > { %v11076_v20 = vshrl.u32 %v15790_v17, 16  ;;  %v11263_v3 = vrot.slane %v15813_v10, 1  ;;  %v17946_v17 = vld [vmem:[#allocation48 + $0x74] ss:$8 sps:$4 sm:$0xff]  }
0x141b   : > { %15835 = vmatprep.mubr.msk.bf16.mxu0 %vm20752_vm9, %v11264_v18  ;;  %v11087_v35 = vrot.slane %v11085_v39, 1  ;;  %11374 = vmatpush1.bf16.msra.mxu0 %v17920_v38  ;;  %v11080_v23 = vrot.slane %v11078_v19, 1  ;;  %v17944_v38 = vld [vmem:[#allocation48 + $0x70] ss:$8 sps:$4 sm:$0xff]   ;;  %v17949_v18 = vld [vmem:[#allocation48 + $0x64] ss:$8 sps:$4 sm:$0xff]   ;;  %vm20768_vm9 = vmmov %vm20761_vm6 }
0x141c   : > { %11375 = vmatprep.subr.bf16.mxu0 %v17925_v26  ;;  %11568 = vmatprep.subr.bf16.mxu1 %v17946_v17  ;;  %v17947_v26 = vld [vmem:[#allocation48 + $0x60] ss:$8 sps:$4 sm:$0xff]   ;;  %v17950_v39 = vld [vmem:[#allocation48 + $0x110] ss:$8 sps:$4 sm:$0xff]   ;;  %v17958_v19 = vld [vmem:[#allocation48 + $0x104] ss:$8 sps:$4 sm:$0xff]  }
0x141d   : > { %v11088_v27 = vor.u32 %v11087_v35, %v11083_v24  ;;  %v11081_v31 = vor.u32 %v11080_v23, %v11076_v20  ;;  %v17953_v24 = vld [vmem:[#allocation48 + $0x50] ss:$8 sps:$4 sm:$0xff]   ;;  %v17956_v35 = vld [vmem:[#allocation48 + $0x100] ss:$8 sps:$4 sm:$0xff]   ;;  %v17967_v23 = vld [vmem:[#allocation48 + $0x34] ss:$8 sps:$4 sm:$0xff]  }
0x141e   : > { %v17959_v20 = vld [vmem:[#allocation48 + $0x40] ss:$8 sps:$4 sm:$0xff]  }
0x141f   : > { %15812 = vmatprep.mubr.msk.bf16.mxu1 %vm20753_vm2, %v11088_v27  ;;  %11376 = vmatpush1.bf16.msra.mxu0 %v17923_v21  ;;  %v17961_v21 = vld [vmem:[#allocation48 + $0x44] ss:$8 sps:$4 sm:$0xff]   ;;  %vm20769_vm2 = vmmov %vm20761_vm6 }
0x1420   : > { %11226 = vmatmul.mubr.bf16.vlgmr.msra.gmra.mxu1 %v11081_v31  ;;  %11377 = vmatprep.subr.bf16.mxu0 %v17928_v25  ;;  %v17965_v25 = vld [vmem:[#allocation48 + $0x30] ss:$8 sps:$4 sm:$0xff]   ;;  %v17973_v27 = vld [vmem:[#allocation48 + $0x24] ss:$8 sps:$4 sm:$0xff]   ;;  %v17971_v31 = vld [vmem:[#allocation48 + $0x20] ss:$8 sps:$4 sm:$0xff]  }
0x1421   : > { %11569 = vmatpush1.bf16.msra.mxu1 %v17944_v38 }
0x1422   : > { %11570 = vmatprep.subr.bf16.mxu1 %v17949_v18 }
0x1423   : > { %11378 = vmatpush1.bf16.msra.mxu0 %v17926_v9  ;;  %v17962_v9 = vld [vmem:[#allocation48 + $0xf0] ss:$8 sps:$4 sm:$0xff]  }
0x1424   : > { %11379 = vmatprep.subr.bf16.mxu0 %v17931_v34  ;;  %v17979_v34 = vld [vmem:[#allocation48 + $0x14] ss:$8 sps:$4 sm:$0xff]  }
0x1425   : > { %v10483_v45 = vpop.f32.mrf.mxu1  ;;  %11571 = vmatpush1.bf16.msra.mxu1 %v17947_v26 }
0x1426   : > { %v10501_v50 = vadd.f32 %v10494_v36, %v10483_v45  ;;  %v10686_v37 = vpop.f32.mrf.mxu0  ;;  %11572 = vmatprep.subr.bf16.mxu1 %v17955_v42  ;;  %v17977_v36 = vld [vmem:[#allocation48 + $0x10] ss:$8 sps:$4 sm:$0xff]   ;;  %v17983_v45 = vld [vmem:[#allocation48] ss:$8 sps:$4 sm:$0xff]  }
0x1427   : > { %v10485_v51 = vpop.f32.mrf.mxu1  ;;  %11380 = vmatpush1.bf16.msra.mxu0 %v17929_v22  ;;  %v17970_v22 = vld [vmem:[#allocation48 + $0xe4] ss:$8 sps:$4 sm:$0xff]  }
0x1428   : > { %v10693_v7 = vadd.f32 %v10686_v37, %v10501_v50  ;;  %v10502_v54 = vadd.f32 %v10498_v40, %v10485_v51  ;;  %v10688_v57 = vpop.f32.mrf.mxu0  ;;  %11381 = vmatprep.subr.bf16.mxu0 %v17934_v41  ;;  %v17968_v40 = vld [vmem:[#allocation48 + $0xe0] ss:$8 sps:$4 sm:$0xff]   ;;  %v17985_v41 = vld [vmem:[#allocation48 + $0x4] ss:$8 sps:$4 sm:$0xff]   ;;  %v17976_v50 = vld [vmem:[#allocation48 + $0xd4] ss:$8 sps:$4 sm:$0xff]  }
0x1429   : > { %v10487_v55 = vpop.f32.mrf.mxu1  ;;  %11573 = vmatpush1.bf16.msra.mxu1 %v17953_v24  ;;  %v17974_v37 = vld [vmem:[#allocation48 + $0xd0] ss:$8 sps:$4 sm:$0xff]   ;;  %v17991_v51 = vld [vmem:[#allocation48 + $0x94] ss:$8 sps:$4 sm:$0xff]  }
0x142a   : > { %v10694_v58 = vadd.f32 %v10688_v57, %v10502_v54  ;;  %v10690_v59 = vpop.f32.mrf.mxu0  ;;  %11574 = vmatprep.subr.bf16.mxu1 %v17961_v21  ;;  %v17980_v54 = vld [vmem:[#allocation48 + $0xc0] ss:$8 sps:$4 sm:$0xff]   ;;  %v17997_v57 = vld [vmem:[#allocation48 + $0x84] ss:$8 sps:$4 sm:$0xff]   ;;  %v17988_v55 = vld [vmem:[#allocation48 + $0xb4] ss:$8 sps:$4 sm:$0xff]  }
0x142b   : > { %v10488_v60 = vpop.f32.mrf.mxu1  ;;  %11382 = vmatpush1.bf16.msra.mxu0 %v17932_v52  ;;  %v17989_v52 = vld [vmem:[#allocation48 + $0x90] ss:$8 sps:$4 sm:$0xff]   ;;  %v17994_v59 = vld [vmem:[#allocation48 + $0xa4] ss:$8 sps:$4 sm:$0xff]  }
0x142c   : > { %v10691_v62 = vpop.f32.mrf.mxu0  ;;  %11383 = vmatprep.subr.bf16.mxu0 %v17937_v48  ;;  %v17995_v48 = vld [vmem:[#allocation48 + $0x80] ss:$8 sps:$4 sm:$0xff]  }
0x142d   : > { %11575 = vmatpush1.bf16.msra.mxu1 %v17959_v20  ;;  %v17992_v60 = vld [vmem:[#allocation48 + $0xa0] ss:$8 sps:$4 sm:$0xff]   ;;  %v18000_v62 = vld [vmem:[#allocation48 + $0x134] ss:$8 sps:$4 sm:$0xff]  }
0x142e   : > { %11576 = vmatprep.subr.bf16.mxu1 %v17967_v23 }
0x142f   : > { %11384 = vmatpush1.bf16.msra.mxu0 %v17935_v61  ;;  %v18003_v61 = vld [vmem:[#allocation48 + $0x1b4] ss:$8 sps:$4 sm:$0xff]  }
0x1430   : > { %11397 = vmatprep.subr.bf16.mxu0 %v17940_v1  ;;  %v17998_v1 = vld [vmem:[#allocation48 + $0x130] ss:$8 sps:$4 sm:$0xff]  }
0x1431   : > { %11577 = vmatpush1.bf16.msra.mxu1 %v17965_v25 }
0x1432   : > { %11578 = vmatprep.subr.bf16.mxu1 %v17973_v27 }
0x1433   : > { %11398 = vmatpush2.bf16.msra.mxu0 %v17938_v5  ;;  %v18005_v5 = vld [vmem:[#allocation48 + $0x120] ss:$8 sps:$4 sm:$0xff]  }
0x1434   : > { %11399 = vmatprep.subr.bf16.mxu0 %v17943_v33  ;;  %v18007_v33 = vld [vmem:[#allocation48 + $0x124] ss:$8 sps:$4 sm:$0xff]  }
0x1435   : > { %11579 = vmatpush1.bf16.msra.mxu1 %v17971_v31 }
0x1436   : > { %11580 = vmatprep.subr.bf16.mxu1 %v17979_v34 }
0x1437   : > { %11400 = vmatpush2.bf16.msra.mxu0 %v17941_v6 }
0x1438   : > { %11771 = vmatprep.subr.bf16.mxu0 %v17952_v16 }
0x1439   : > { %11581 = vmatpush1.bf16.msra.mxu1 %v17977_v36  ;;  %v11431_v36 = vld [vmem:[#allocation3] sm:$0xff] }
0x143a   : > { %11402 = vmatmul.mubr.bf16.vlgmr.msra.gmra.mxu0 %v11263_v3  ;;  %11582 = vmatprep.subr.bf16.mxu1 %v17985_v41  ;;  %v18001_v41 = vld [vmem:[#allocation48 + $0x1b0] ss:$8 sps:$4 sm:$0xff]  }
0x143b   : > { %11772 = vmatpush1.bf16.msra.mxu0 %v17950_v39 }
0x143c   : > { %11773 = vmatprep.subr.bf16.mxu0 %v17958_v19 }
0x143d   : > { %11583 = vmatpush1.bf16.msra.mxu1 %v17983_v45 }
0x143e   : > { %11596 = vmatprep.subr.bf16.mxu1 %v17991_v51  ;;  %v18013_v51 = vld [vmem:[#allocation48 + $0x194] ss:$8 sps:$4 sm:$0xff]  }
0x143f   : > { %11774 = vmatpush1.bf16.msra.mxu0 %v17956_v35 }
0x1440   : > { %11775 = vmatprep.subr.bf16.mxu0 %v17964_v49 }
0x1441   : > { %11597 = vmatpush2.bf16.msra.mxu1 %v17989_v52 }
0x1442   : > { %11598 = vmatprep.subr.bf16.mxu1 %v17997_v57  ;;  %v18011_v57 = vld [vmem:[#allocation48 + $0x190] ss:$8 sps:$4 sm:$0xff]  }
0x1443   : > { %11776 = vmatpush1.bf16.msra.mxu0 %v17962_v9 }
0x1444   : > { %11777 = vmatprep.subr.bf16.mxu0 %v17970_v22 }
0x1445   : > { %11599 = vmatpush2.bf16.msra.mxu1 %v17995_v48  ;;  %v18016_v48 = vld [vmem:[#allocation48 + $0x184] ss:$8 sps:$4 sm:$0xff]  }
0x1446   : > { %11947 = vmatprep.subr.bf16.mxu1 %v18003_v61 }
0x1447   : > { %11778 = vmatpush1.bf16.msra.mxu0 %v17968_v40 }
0x1448   : > { %11779 = vmatprep.subr.bf16.mxu0 %v17976_v50  ;;  %v18010_v50 = vld [vmem:[#allocation48 + $0x1a4] ss:$8 sps:$4 sm:$0xff]  }
0x144b   : > { %11780 = vmatpush1.bf16.msra.mxu0 %v17974_v37  ;;  %v18008_v37 = vld [vmem:[#allocation48 + $0x1a0] ss:$8 sps:$4 sm:$0xff]  }
0x144d   : > { %v10862_v12 = vpop.f32.mrf.mxu1 }
0x144e   : > { %v20349_v13 = vadd.f32 %v10862_v12, %v10693_v7  ;;  %v17982_v7 = vld [vmem:[#allocation48 + $0xc4] ss:$8 sps:$4 sm:$0xff]  }
0x144f   : > { %v10864_v14 = vpop.f32.mrf.mxu1  ;;  %11781 = vmatprep.subr.bf16.mxu0 %v17982_v7 }
0x1450   : > { %v20351_v15 = vadd.f32 %v10864_v14, %v10694_v58  ;;  %11782 = vmatpush1.bf16.msra.mxu0 %v17980_v54  ;;  %v17986_v58 = vld [vmem:[#allocation48 + $0xb0] ss:$8 sps:$4 sm:$0xff]  }
0x1451   : > { %v10866_v63 = vpop.f32.mrf.mxu1  ;;  %11783 = vmatprep.subr.bf16.mxu0 %v17988_v55 }
0x1453   : > { %v10867_v44 = vpop.f32.mrf.mxu1 }
0x1454   : > { %11784 = vmatpush1.bf16.msra.mxu0 %v17986_v58 }
0x1455   : > { %11785 = vmatprep.subr.bf16.mxu0 %v17994_v59 }
0x1458   : > { %11786 = vmatpush1.bf16.msra.mxu0 %v17992_v60 }
0x1459   : > { %11799 = vmatprep.subr.bf16.mxu0 %v18000_v62  ;;  %v18014_v62 = vld [vmem:[#allocation48 + $0x180] ss:$8 sps:$4 sm:$0xff]  }
0x145c   : > { %11800 = vmatpush2.bf16.msra.mxu0 %v17998_v1 }
0x145d   : > { %11801 = vmatprep.subr.bf16.mxu0 %v18007_v33  ;;  %v18019_v33 = vld [vmem:[#allocation48 + $0x174] ss:$8 sps:$4 sm:$0xff]  }
0x1460   : > { %11802 = vmatpush2.bf16.msra.mxu0 %v18005_v5 }
0x14d2   : > { %v11035_v6 = vpop.f32.mrf.mxu0 }
0x14d3   : > { %v11042_v38 = vadd.f32 %v11035_v6, %v20349_v13  ;;  %v11434_v13 = vld [vmem:[#allocation3 + $0x8] sm:$0x11] }
0x14d4   : > { %v11037_v10 = vpop.f32.mrf.mxu0 }
0x14d5   : > { %v11043_v26 = vadd.f32 %v11037_v10, %v20351_v15 }
0x14d6   : > { %v11039_v3 = vpop.f32.mrf.mxu0 }
0x14d7   : > { %v18017_v3 = vld [vmem:[#allocation48 + $0x170] ss:$8 sps:$4 sm:$0xff]  }
0x14d8   : > { %v11040_v12 = vpop.f32.mrf.mxu0 }
0x14d9   : > { %v18022_v12 = vld [vmem:[#allocation48 + $0x164] ss:$8 sps:$4 sm:$0xff]  }
0x14e0   : > { %v11227_v14 = vpop.f32.mrf.mxu1 }
0x14e1   : > { %v11234_v18 = vadd.f32 %v11227_v14, %v11042_v38  ;;  %v18020_v14 = vld [vmem:[#allocation48 + $0x160] ss:$8 sps:$4 sm:$0xff]  }
0x14e2   : > { %v11229_v63 = vpop.f32.mrf.mxu1  ;;  %v18026_v38 = vld [vmem:[#allocation48 + $0x140] ss:$8 sps:$4 sm:$0xff]  }
0x14e3   : > { %v11235_v16 = vadd.f32 %v11229_v63, %v11043_v26  ;;  %v18025_v63 = vld [vmem:[#allocation48 + $0x154] ss:$8 sps:$4 sm:$0xff]  }
0x14e4   : > { %v11231_v44 = vpop.f32.mrf.mxu1  ;;  %v18031_v26 = vld [vmem:[#allocation48 + $0x1d4] ss:$8 sps:$4 sm:$0xff]  }
0x14e5   : > { %v18023_v44 = vld [vmem:[#allocation48 + $0x150] ss:$8 sps:$4 sm:$0xff]  }
0x14e6   : > { %v11232_v17 = vpop.f32.mrf.mxu1 }
0x14e7   : > { %v18028_v17 = vld [vmem:[#allocation48 + $0x144] ss:$8 sps:$4 sm:$0xff]  }
0x14fa   : > { %v11403_v39 = vpop.f32.mrf.mxu0 }
0x14fb   : > { %v11410_v42 = vadd.f32 %v11403_v39, %v11234_v18  ;;  %v18029_v18 = vld [vmem:[#allocation48 + $0x1d0] ss:$8 sps:$4 sm:$0xff]   ;;  %v18034_v39 = vld [vmem:[#allocation48 + $0x1c4] ss:$8 sps:$4 sm:$0xff]  }
0x14fc   : > { %v11405_v19 = vpop.f32.mrf.mxu0 }
0x14fd   : > { %v11411_v24 = vadd.f32 %v11405_v19, %v11235_v16  ;;  %v11412_v21 = vmax.f32 %v11410_v42, 0.0  ;;  %v18032_v16 = vld [vmem:[#allocation48 + $0x1c0] ss:$8 sps:$4 sm:$0xff]  }
0x14fe   : > { %v11407_v35 = vpop.f32.mrf.mxu0 }
0x14ff   : > { %v11413_v20 = vmax.f32 %v11411_v24, 0.0  ;;  %v18038_v24 = vld [vmem:[#allocation50 + $0x114] ss:$8 sps:$4 sm:$0xff]   ;;  %v18036_v35 = vld [vmem:[#allocation50 + $0x110] ss:$8 sps:$4 sm:$0xff]  }
0x1500   : > { %v11408_v23 = vpop.f32.mrf.mxu0 }
0x1501   : > { %v16186_v25 = vpack.c.bf16 %v11413_v20, %v11412_v21  ;;  %v18041_v21 = vld [vmem:[#allocation50 + $0x74] ss:$8 sps:$4 sm:$0xff]   ;;  %v18039_v20 = vld [vmem:[#allocation50 + $0x70] ss:$8 sps:$4 sm:$0xff]   ;;  %v18044_v23 = vld [vmem:[#allocation50 + $0x104] ss:$8 sps:$4 sm:$0xff]  }
0x1502   : > { %12117 = vmatprep.subr.bf16.mxu0 %v18041_v21 }
0x1503   : > { %v11422_v27 = vshrl.u32 %v16186_v25, 16  ;;  %v11425_v49 = vshll.u32 %v16186_v25, 16  ;;  %v18042_v25 = vld [vmem:[#allocation50 + $0x100] ss:$8 sps:$4 sm:$0xff]  }
0x1505   : > { %v11424_v31 = vrot.slane %v11422_v27, 7  ;;  %v18047_v27 = vld [vmem:[#allocation50 + $0x64] ss:$8 sps:$4 sm:$0xff]  }
0x1507   : > { %v11427_v9 = vor.u32 %v11425_v49, %v11424_v31  ;;  %v11428_v34 = vrot.slane %v11424_v31, 4  ;;  %v18045_v31 = vld [vmem:[#allocation50 + $0x60] ss:$8 sps:$4 sm:$0xff]   ;;  %v18050_v49 = vld [vmem:[#allocation50 + $0xf4] ss:$8 sps:$4 sm:$0xff]  }
0x1509   : > { %v11432_v15 = vsel %vm20039_vm3, %v11427_v9, %v11431_v36  ;;  %v11435_v22 = vsel %vm20026_vm15, %v11428_v34, %v11434_v13  ;;  %vm20755_vm15 = vmmov %vm20754_vm0  ;;  %v18048_v9 = vld [vmem:[#allocation50 + $0xf0] ss:$8 sps:$4 sm:$0xff]   ;;  %v18053_v34 = vld [vmem:[#allocation50 + $0x54] ss:$8 sps:$4 sm:$0xff]  }
0x150a   : > { %11433 = vst [vmem:[#allocation3] sm:$0xff] %v11432_v15  ;;  %11436 = vst [vmem:[#allocation3 + $0x8] sm:$0x11] %v11435_v22  ;;  %v15838_v40 = vcombine.high %v11432_v15, %v11432_v15  ;;  %v15837_v45 = vcombine.low %v11432_v15, %v11432_v15  ;;  %v18051_v36 = vld [vmem:[#allocation50 + $0x50] ss:$8 sps:$4 sm:$0xff]  }
0x150b   : > { %vm20756_vm3 = vmmov %vm20754_vm0  ;;  %v18056_v13 = vld [vmem:[#allocation50 + $0xe4] ss:$8 sps:$4 sm:$0xff]   ;;  %v18057_v22 = vld [vmem:[#allocation50 + $0x40] ss:$8 sps:$4 sm:$0xff]  }
0x150c   : > { %15859 = vmatprep.mubr.msk.bf16.mxu1 %vm20754_vm0, %v15838_v40  ;;  %v18059_v40 = vld [vmem:[#allocation50 + $0x44] ss:$8 sps:$4 sm:$0xff]   ;;  %vm20770_vm0 = vnez %v20675_v53  ;;  %v18218_v53 = vld [vmem:[#allocation53 + $0xc0] ss:$8 sps:$4 sm:$0xff]  }
0x150d   : > { %11601 = vmatmul.mubr.bf16.vlgmr.msra.gmra.mxu1 %v15837_v45  ;;  %v18060_v45 = vld [vmem:[#allocation50 + $0xd0] ss:$8 sps:$4 sm:$0xff]  }
0x150e   : > { %11948 = vmatpush1.bf16.msra.mxu1 %v18001_v41  ;;  %v18062_v41 = vld [vmem:[#allocation50 + $0xd4] ss:$8 sps:$4 sm:$0xff]  }
0x150f   : > { %11949 = vmatprep.subr.bf16.mxu1 %v18010_v50  ;;  %v18065_v50 = vld [vmem:[#allocation50 + $0x34] ss:$8 sps:$4 sm:$0xff]  }
0x1511   : > { %v11623_v52 = vld [vmem:[#allocation3 + $0x8] sm:$0x11]  ;;  %v11814_v7 = vld [vmem:[#allocation3] sm:$0xee] }
0x1512   : > { %v15884_v11 = vcombine.high %v11814_v7, %v11623_v52  ;;  %11950 = vmatpush1.bf16.msra.mxu1 %v18008_v37  ;;  %v15860_v54 = vcombine.low %v11432_v15, %v11623_v52  ;;  %v15861_v8 = vcombine.high %v11432_v15, %v11623_v52  ;;  %v15883_v42 = vcombine.low %v11814_v7, %v11623_v52  ;;  %v18054_v15 = vld [vmem:[#allocation50 + $0xe0] ss:$8 sps:$4 sm:$0xff]   ;;  %v18063_v37 = vld [vmem:[#allocation50 + $0x30] ss:$8 sps:$4 sm:$0xff]   ;;  %v18071_v52 = vld [vmem:[#allocation50 + $0x24] ss:$8 sps:$4 sm:$0xff]  }
0x1513   : > { %11951 = vmatprep.subr.bf16.mxu1 %v18013_v51  ;;  %v18068_v51 = vld [vmem:[#allocation50 + $0xc4] ss:$8 sps:$4 sm:$0xff]   ;;  %v18066_v7 = vld [vmem:[#allocation50 + $0xc0] ss:$8 sps:$4 sm:$0xff]  }
0x1514   : > { %v11842_v55 = vrot.slane %v15884_v11, 1  ;;  %v11663_v58 = vshll.u32 %v15861_v8, 16  ;;  %v11656_v59 = vshll.u32 %v15860_v54, 16  ;;  %v11661_v60 = vshrl.u32 %v15861_v8, 16  ;;  %v18069_v11 = vld [vmem:[#allocation50 + $0x20] ss:$8 sps:$4 sm:$0xff]  }
0x1515   : > { %v11654_v1 = vshrl.u32 %v15860_v54, 16  ;;  %v11841_v19 = vrot.slane %v15883_v42, 1  ;;  %v18074_v54 = vld [vmem:[#allocation50 + $0xb4] ss:$8 sps:$4 sm:$0xff]  }
0x1516   : > { %15905 = vmatprep.mubr.msk.bf16.mxu1 %vm20755_vm15, %v11842_v55  ;;  %v11665_v61 = vrot.slane %v11663_v58, 1  ;;  %11952 = vmatpush1.bf16.msra.mxu1 %v18011_v57  ;;  %v11658_v5 = vrot.slane %v11656_v59, 1  ;;  %v18077_v8 = vld [vmem:[#allocation50 + $0x14] ss:$8 sps:$4 sm:$0xff]   ;;  %v18072_v57 = vld [vmem:[#allocation50 + $0xb0] ss:$8 sps:$4 sm:$0xff]   ;;  %vm20772_vm15 = vnez %v20681_v56 }
0x1517   : > { %11953 = vmatprep.subr.bf16.mxu1 %v18016_v48  ;;  %v18075_v48 = vld [vmem:[#allocation50 + $0x10] ss:$8 sps:$4 sm:$0xff]   ;;  %v18080_v55 = vld [vmem:[#allocation50 + $0xa4] ss:$8 sps:$4 sm:$0xff]   ;;  %v18078_v59 = vld [vmem:[#allocation50 + $0xa0] ss:$8 sps:$4 sm:$0xff]  }
0x1518   : > { %v11666_v6 = vor.u32 %v11665_v61, %v11661_v60  ;;  %v11659_v10 = vor.u32 %v11658_v5, %v11654_v1  ;;  %v18083_v58 = vld [vmem:[#allocation50 + $0x4] ss:$8 sps:$4 sm:$0xff]   ;;  %v18081_v60 = vld [vmem:[#allocation50] ss:$8 sps:$4 sm:$0xff]   ;;  %v18086_v61 = vld [vmem:[#allocation50 + $0x134] ss:$8 sps:$4 sm:$0xff]  }
0x1519   : > { %v18089_v1 = vld [vmem:[#allocation50 + $0x94] ss:$8 sps:$4 sm:$0xff]   ;;  %v18087_v5 = vld [vmem:[#allocation50 + $0x90] ss:$8 sps:$4 sm:$0xff]  }
0x151a   : > { %15882 = vmatprep.mubr.msk.bf16.mxu0 %vm20756_vm3, %v11666_v6  ;;  %11954 = vmatpush1.bf16.msra.mxu1 %v18014_v62  ;;  %v18084_v62 = vld [vmem:[#allocation50 + $0x130] ss:$8 sps:$4 sm:$0xff]   ;;  %v18090_v6 = vld [vmem:[#allocation50 + $0x120] ss:$8 sps:$4 sm:$0xff]   ;;  %vm20773_vm3 = vnez %v20683_v2 }
0x151b   : > { %11804 = vmatmul.mubr.bf16.vlgmr.msra.gmra.mxu0 %v11659_v10  ;;  %11955 = vmatprep.subr.bf16.mxu1 %v18019_v33  ;;  %v18092_v33 = vld [vmem:[#allocation50 + $0x124] ss:$8 sps:$4 sm:$0xff]  }
0x151c   : > { %12118 = vmatpush1.bf16.msra.mxu0 %v18039_v20  ;;  %v18095_v10 = vld [vmem:[#allocation50 + $0x84] ss:$8 sps:$4 sm:$0xff]  }
0x151d   : > { %12119 = vmatprep.subr.bf16.mxu0 %v18047_v27 }
0x151e   : > { %11956 = vmatpush1.bf16.msra.mxu1 %v18017_v3  ;;  %v18093_v3 = vld [vmem:[#allocation50 + $0x80] ss:$8 sps:$4 sm:$0xff]  }
0x151f   : > { %11957 = vmatprep.subr.bf16.mxu1 %v18022_v12  ;;  %v18098_v12 = vld [vmem:[#allocation51 + $0x104] ss:$8 sps:$4 sm:$0xff]  }
0x1520   : > { %12120 = vmatpush1.bf16.msra.mxu0 %v18045_v31 }
0x1521   : > { %12121 = vmatprep.subr.bf16.mxu0 %v18053_v34 }
0x1522   : > { %11958 = vmatpush1.bf16.msra.mxu1 %v18020_v14 }
0x1523   : > { %11959 = vmatprep.subr.bf16.mxu1 %v18025_v63 }
0x1524   : > { %12122 = vmatpush1.bf16.msra.mxu0 %v18051_v36 }
0x1525   : > { %12123 = vmatprep.subr.bf16.mxu0 %v18059_v40 }
0x1526   : > { %11960 = vmatpush1.bf16.msra.mxu1 %v18023_v44 }
0x1527   : > { %11961 = vmatprep.subr.bf16.mxu1 %v18028_v17 }
0x1528   : > { %12124 = vmatpush1.bf16.msra.mxu0 %v18057_v22 }
0x1529   : > { %12125 = vmatprep.subr.bf16.mxu0 %v18065_v50 }
0x152a   : > { %11962 = vmatpush1.bf16.msra.mxu1 %v18026_v38 }
0x152b   : > { %11975 = vmatprep.subr.bf16.mxu1 %v18031_v26 }
0x152c   : > { %12126 = vmatpush1.bf16.msra.mxu0 %v18063_v37 }
0x152d   : > { %12127 = vmatprep.subr.bf16.mxu0 %v18071_v52  ;;  %v18096_v52 = vld [vmem:[#allocation51 + $0x100] ss:$8 sps:$4 sm:$0xff]  }
0x152e   : > { %11976 = vmatpush2.bf16.msra.mxu1 %v18029_v18 }
0x152f   : > { %11977 = vmatprep.subr.bf16.mxu1 %v18034_v39 }
0x1530   : > { %12128 = vmatpush1.bf16.msra.mxu0 %v18069_v11 }
0x1531   : > { %12129 = vmatprep.subr.bf16.mxu0 %v18077_v8 }
0x1532   : > { %11978 = vmatpush2.bf16.msra.mxu1 %v18032_v16  ;;  %v11437_v16 = vld [vmem:[%s20757_s26] sm:$0x3]  ;;  %s16191_s26 = sshll.u32 %s19520_s15, 9  ;;  %s19241_s15 = smov [#allocation56]  }
0x1533   : > { %12281 = vmatprep.subr.bf16.mxu1 %v18038_v24  ;;  %v11613_v42 = vrot.slane %v11437_v16, %v19879_v30  ;;  %v18364_v24 = vld [vmem:[#allocation6 + $0x8] sm:$0xff]  ;;  %v11617_v21 = vrot.slane %v11437_v16, %v19882_v32 }
0x1534   : > { %12130 = vmatpush1.bf16.msra.mxu0 %v18075_v48  ;;  %v18104_v48 = vld [vmem:[#allocation51 + $0xe0] ss:$8 sps:$4 sm:$0xff]  }
0x1535   : > { %11980 = vmatmul.mubr.bf16.vlgmr.msra.gmra.mxu1 %v11841_v19  ;;  %12131 = vmatprep.subr.bf16.mxu0 %v18083_v58  ;;  %v12682_v19 = vld [vmem:[#allocation6] sm:$0xff] }
0x1536   : > { %12282 = vmatpush1.bf16.msra.mxu1 %v18036_v35  ;;  %v20364_v35 = vcombine.high %v12682_v19, %v18364_v24  ;;  %v18107_v58 = vld [vmem:[#allocation51 + $0xd0] ss:$8 sps:$4 sm:$0xff]  }
0x1537   : > { %12283 = vmatprep.subr.bf16.mxu1 %v18044_v23 }
0x1538   : > { %12132 = vmatpush1.bf16.msra.mxu0 %v18081_v60  ;;  %v12732_v23 = vshll.u32 %v20364_v35, 16  ;;  %v12730_v40 = vshrl.u32 %v20364_v35, 16  ;;  %v18110_v60 = vld [vmem:[#allocation51 + $0xc0] ss:$8 sps:$4 sm:$0xff]  }
0x1539   : > { %12145 = vmatprep.subr.bf16.mxu0 %v18089_v1  ;;  %v18118_v1 = vld [vmem:[#allocation51 + $0xa4] ss:$8 sps:$4 sm:$0xff]  }
0x153a   : > { %12284 = vmatpush1.bf16.msra.mxu1 %v18042_v25  ;;  %v12734_v36 = vrot.slane %v12732_v23, 1 }
0x153b   : > { %12285 = vmatprep.subr.bf16.mxu1 %v18050_v49 }
0x153c   : > { %12146 = vmatpush2.bf16.msra.mxu0 %v18087_v5  ;;  %v12735_v37 = vor.u32 %v12734_v36, %v12730_v40  ;;  %v20375_v5 = vcombine.low %v12682_v19, %v18364_v24  ;;  %v18132_v40 = vld [vmem:[#allocation51 + $0x60] ss:$8 sps:$4 sm:$0xff]  }
0x153d   : > { %12147 = vmatprep.subr.bf16.mxu0 %v18095_v10 }
0x153e   : > { %12286 = vmatpush1.bf16.msra.mxu1 %v18048_v9  ;;  %v12720_v10 = vshll.u32 %v20375_v5, 16 }
0x153f   : > { %12287 = vmatprep.subr.bf16.mxu1 %v18056_v13 }
0x1540   : > { %12148 = vmatpush2.bf16.msra.mxu0 %v18093_v3  ;;  %v18119_v3 = vld [vmem:[#allocation51 + $0x90] ss:$8 sps:$4 sm:$0xff]  }
0x1542   : > { %12288 = vmatpush1.bf16.msra.mxu1 %v18054_v15 }
0x1543   : > { %12289 = vmatprep.subr.bf16.mxu1 %v18062_v41  ;;  %v12737_v41 = vshll.u32 %v19963_v28, 16  ;;  %v18101_v28 = vld [vmem:[#allocation51 + $0xf0] ss:$8 sps:$4 sm:$0xff]  }
0x1545   : > { %v12739_v11 = vrot.slane %v12737_v41, 1  ;;  %v18137_v41 = vld [vmem:[#allocation51 + $0x54] ss:$8 sps:$4 sm:$0xff]  }
0x1546   : > { %12290 = vmatpush1.bf16.msra.mxu1 %v18060_v45 }
0x1547   : > { %12291 = vmatprep.subr.bf16.mxu1 %v18068_v51  ;;  %v12740_v8 = vsel %vm20760_vm10, %v12735_v37, %v12739_v11  ;;  %v18138_v37 = vld [vmem:[#allocation51 + $0x40] ss:$8 sps:$4 sm:$0xff]   ;;  %vm20776_vm10 = vcmask 1046528  }
0x1548   : > { %v18144_v11 = vld [vmem:[#allocation51 + $0x20] ss:$8 sps:$4 sm:$0xff]  }
0x154a   : > { %12292 = vmatpush1.bf16.msra.mxu1 %v18066_v7 }
0x154b   : > { %12293 = vmatprep.subr.bf16.mxu1 %v18074_v54  ;;  %v18103_v54 = vld [vmem:[#allocation51 + $0xf4] ss:$8 sps:$4 sm:$0xff]  }
0x154e   : > { %12294 = vmatpush1.bf16.msra.mxu1 %v18072_v57  ;;  %v18106_v57 = vld [vmem:[#allocation51 + $0xe4] ss:$8 sps:$4 sm:$0xff]  }
0x154f   : > { %12295 = vmatprep.subr.bf16.mxu1 %v18080_v55  ;;  %v18109_v55 = vld [vmem:[#allocation51 + $0xd4] ss:$8 sps:$4 sm:$0xff]  }
0x1552   : > { %12296 = vmatpush1.bf16.msra.mxu1 %v18078_v59  ;;  %v18112_v59 = vld [vmem:[#allocation51 + $0xc4] ss:$8 sps:$4 sm:$0xff]  }
0x1553   : > { %12309 = vmatprep.subr.bf16.mxu1 %v18086_v61  ;;  %v18115_v61 = vld [vmem:[#allocation51 + $0xb4] ss:$8 sps:$4 sm:$0xff]  }
0x1556   : > { %12310 = vmatpush2.bf16.msra.mxu1 %v18084_v62  ;;  %v18113_v62 = vld [vmem:[#allocation51 + $0xb0] ss:$8 sps:$4 sm:$0xff]  }
0x1557   : > { %12311 = vmatprep.subr.bf16.mxu1 %v18092_v33  ;;  %v18116_v33 = vld [vmem:[#allocation51 + $0xa0] ss:$8 sps:$4 sm:$0xff]  }
0x155a   : > { %12312 = vmatpush2.bf16.msra.mxu1 %v18090_v6  ;;  %v18121_v6 = vld [vmem:[#allocation51 + $0x94] ss:$8 sps:$4 sm:$0xff]  }
0x155b   : > { %12835 = vmatprep.subr.bf16.mxu1 %v18098_v12  ;;  %v18124_v12 = vld [vmem:[#allocation51 + $0x114] ss:$8 sps:$4 sm:$0xff]  }
0x15cd   : > { %v11602_v14 = vpop.f32.mrf.mxu1 }
0x15ce   : > { %v11620_v20 = vadd.f32 %v11613_v42, %v11602_v14  ;;  %v12722_v14 = vrot.slane %v12720_v10, 1  ;;  %v18170_v10 = vld [vmem:[#allocation51 + $0x150] ss:$8 sps:$4 sm:$0xff]  }
0x15cf   : > { %v11604_v63 = vpop.f32.mrf.mxu1 }
0x15d0   : > { %v11621_v25 = vadd.f32 %v11617_v21, %v11604_v63  ;;  %v18122_v63 = vld [vmem:[#allocation51 + $0x110] ss:$8 sps:$4 sm:$0xff]  }
0x15d1   : > { %v11606_v44 = vpop.f32.mrf.mxu1 }
0x15d2   : > { %v12718_v44 = vshrl.u32 %v20375_v5, 16 }
0x15d3   : > { %v11607_v17 = vpop.f32.mrf.mxu1 }
0x15d4   : > { %v12725_v17 = vshll.u32 %v19965_v29, 16 }
0x15db   : > { %v11805_v38 = vpop.f32.mrf.mxu0 }
0x15dc   : > { %v11812_v27 = vadd.f32 %v11805_v38, %v11620_v20  ;;  %v12723_v38 = vor.u32 %v12722_v14, %v12718_v44  ;;  %v18181_v14 = vld [vmem:[#allocation51 + $0x124] ss:$8 sps:$4 sm:$0xff]   ;;  %v18185_v44 = vld [vmem:[#allocation53 + $0x70] ss:$8 sps:$4 sm:$0xff]  }
0x15dd   : > { %v11807_v26 = vpop.f32.mrf.mxu0 }
0x15de   : > { %v11813_v49 = vadd.f32 %v11807_v26, %v11621_v25  ;;  %v12727_v26 = vrot.slane %v12725_v17, 1  ;;  %v18179_v17 = vld [vmem:[#allocation51 + $0x120] ss:$8 sps:$4 sm:$0xff]  }
0x15df   : > { %v11809_v18 = vpop.f32.mrf.mxu0 }
0x15e0   : > { %v12728_v18 = vsel %vm20763_vm7, %v12723_v38, %v12727_v26  ;;  %v18184_v38 = vld [vmem:[#allocation51 + $0x1a4] ss:$8 sps:$4 sm:$0xff]   ;;  %v18190_v26 = vld [vmem:[#allocation53 + $0x64] ss:$8 sps:$4 sm:$0xff]  }
0x15e1   : > { %v11810_v39 = vpop.f32.mrf.mxu0 }
0x15f5   : > { %v11981_v31 = vpop.f32.mrf.mxu1 }
0x15f6   : > { %v11988_v9 = vadd.f32 %v11981_v31, %v11812_v27  ;;  %v18127_v31 = vld [vmem:[%s20762_s18 + $0x8] sm:$0xff]  }
0x15f7   : > { %v11983_v34 = vpop.f32.mrf.mxu1 }
0x15f8   : > { %v11989_v13 = vadd.f32 %v11983_v34, %v11813_v49  ;;  %v11990_v15 = vmax.f32 %v11988_v9, 0.0  ;;  %v18130_v34 = vld [vmem:[#allocation51 + $0x74] ss:$8 sps:$4 sm:$0xff]  }
0x15f9   : > { %v11985_v22 = vpop.f32.mrf.mxu1 }
0x15fa   : > { %v11991_v45 = vmax.f32 %v11989_v13, 0.0  ;;  %v11992_v7 = vpack.c.bf16 %v11990_v15, %v11990_v15  ;;  %v18131_v13 = vld [vmem:[%s20762_s18] sm:$0xff]   ;;  %v18134_v22 = vld [vmem:[#allocation51 + $0x64] ss:$8 sps:$4 sm:$0xff]  }
0x15fb   : > { %v11986_v50 = vpop.f32.mrf.mxu1  ;;  %v18128_v15 = vld [vmem:[#allocation51 + $0x70] ss:$8 sps:$4 sm:$0xff]  }
0x15fc   : > { %v11993_v51 = vpack.c.bf16 %v11991_v45, %v11991_v45  ;;  %v18135_v45 = vld [vmem:[#allocation51 + $0x50] ss:$8 sps:$4 sm:$0xff]   ;;  %v18140_v50 = vld [vmem:[#allocation51 + $0x44] ss:$8 sps:$4 sm:$0xff]  }
0x15fe   : > { %15926 = vmatprep.mubr.msk.bf16.mxu0 %vm20758_vm12, %v11993_v51  ;;  %15947 = vmatprep.mubr.msk.bf16.mxu1 %vm20759_vm5, %v11993_v51  ;;  %v18143_v51 = vld [vmem:[#allocation51 + $0x34] ss:$8 sps:$4 sm:$0xff]   ;;  %vm20774_vm12 = vnez %v20685_v4  ;;  %vm20775_vm5 = vmmov %vm20769_vm2 }
0x15ff   : > { %12150 = vmatmul.mubr.bf16.vlgmr.msra.gmra.mxu0 %v11992_v7  ;;  %12314 = vmatmul.mubr.bf16.vlgmr.msra.gmra.mxu1 %v11992_v7  ;;  %v18146_v7 = vld [vmem:[#allocation51 + $0x24] ss:$8 sps:$4 sm:$0xff]  }
0x1600   : > { %12836 = vmatpush1.bf16.msra.mxu1 %v18096_v52  ;;  %16001 = vmatprep.mubr.msk.bf16.mxu1 %vm20761_vm6, %v12740_v8  ;;  %v18141_v52 = vld [vmem:[#allocation51 + $0x30] ss:$8 sps:$4 sm:$0xff]   ;;  %v18152_v8 = vld [vmem:[#allocation51 + $0x4] ss:$8 sps:$4 sm:$0xff]   ;;  %vm20777_vm6 = vmmov %vm20769_vm2 }
0x1601   : > { %12837 = vmatprep.subr.bf16.mxu1 %v18103_v54  ;;  %12376 = vmatprep.mubr.bf16.mxu0 %v19238_v0  ;;  %v18149_v54 = vld [vmem:[#allocation51 + $0x14] ss:$8 sps:$4 sm:$0xff]  }
0x1604   : > { %12838 = vmatpush1.bf16.msra.mxu1 %v18101_v28  ;;  %v18150_v28 = vld [vmem:[#allocation51] ss:$8 sps:$4 sm:$0xff]  }
0x1605   : > { %12839 = vmatprep.subr.bf16.mxu1 %v18106_v57  ;;  %v18155_v57 = vld [vmem:[#allocation51 + $0x84] ss:$8 sps:$4 sm:$0xff]  }
0x1608   : > { %12840 = vmatpush1.bf16.msra.mxu1 %v18104_v48  ;;  %v18153_v48 = vld [vmem:[#allocation51 + $0x80] ss:$8 sps:$4 sm:$0xff]  }
0x1609   : > { %12841 = vmatprep.subr.bf16.mxu1 %v18109_v55  ;;  %v18158_v55 = vld [vmem:[#allocation51 + $0x194] ss:$8 sps:$4 sm:$0xff]  }
0x160c   : > { %12842 = vmatpush1.bf16.msra.mxu1 %v18107_v58  ;;  %v18156_v58 = vld [vmem:[#allocation51 + $0x190] ss:$8 sps:$4 sm:$0xff]  }
0x160d   : > { %12843 = vmatprep.subr.bf16.mxu1 %v18112_v59  ;;  %v18163_v59 = vld [vmem:[#allocation51 + $0x184] ss:$8 sps:$4 sm:$0xff]  }
0x1610   : > { %12844 = vmatpush1.bf16.msra.mxu1 %v18110_v60  ;;  %v18161_v60 = vld [vmem:[#allocation51 + $0x180] ss:$8 sps:$4 sm:$0xff]  }
0x1611   : > { %12845 = vmatprep.subr.bf16.mxu1 %v18115_v61  ;;  %v18166_v61 = vld [vmem:[#allocation51 + $0x174] ss:$8 sps:$4 sm:$0xff]  }
0x1614   : > { %12846 = vmatpush1.bf16.msra.mxu1 %v18113_v62  ;;  %v18164_v62 = vld [vmem:[#allocation51 + $0x170] ss:$8 sps:$4 sm:$0xff]  }
0x1615   : > { %12847 = vmatprep.subr.bf16.mxu1 %v18118_v1  ;;  %v18169_v1 = vld [vmem:[#allocation51 + $0x164] ss:$8 sps:$4 sm:$0xff]  }
0x1618   : > { %12848 = vmatpush1.bf16.msra.mxu1 %v18116_v33  ;;  %v18167_v33 = vld [vmem:[#allocation51 + $0x160] ss:$8 sps:$4 sm:$0xff]  }
0x1619   : > { %12849 = vmatprep.subr.bf16.mxu1 %v18121_v6  ;;  %v18172_v6 = vld [vmem:[#allocation51 + $0x154] ss:$8 sps:$4 sm:$0xff]  }
0x161c   : > { %12850 = vmatpush1.bf16.msra.mxu1 %v18119_v3  ;;  %v18175_v3 = vld [vmem:[#allocation51 + $0x144] ss:$8 sps:$4 sm:$0xff]  }
0x161d   : > { %12865 = vmatprep.subr.bf16.mxu1 %v18124_v12  ;;  %v18178_v12 = vld [vmem:[#allocation51 + $0x134] ss:$8 sps:$4 sm:$0xff]  }
0x1620   : > { %12866 = vmatpush2.bf16.msra.mxu1 %v18122_v63  ;;  %v18187_v63 = vld [vmem:[#allocation53 + $0x74] ss:$8 sps:$4 sm:$0xff]  }
0x1621   : > { %13176 = vmatprep.subr.bf16.mxu1 %v18187_v63 }
0x1623   : > { %12868 = vmatmul.mubr.bf16.vlgmr.msra.gmra.mxu1 %v12728_v18  ;;  %v18188_v18 = vld [vmem:[#allocation53 + $0x60] ss:$8 sps:$4 sm:$0xff]  }
0x1624   : > { %13177 = vmatpush1.bf16.msra.mxu1 %v18185_v44 }
0x1625   : > { %13178 = vmatprep.subr.bf16.mxu1 %v18190_v26 }
0x1628   : > { %13179 = vmatpush1.bf16.msra.mxu1 %v18188_v18 }
0x16bf   : > { %v12151_v39 = vpop.f32.mrf.mxu0  ;;  %v12315_v16 = vpop.f32.mrf.mxu1 }
0x16c0   : > { %v12322_v42 = vpack.c.bf16 %v12315_v16, %v12315_v16  ;;  %v12158_v25 = vpack.c.bf16 %v12151_v39, %v12151_v39  ;;  %v18182_v39 = vld [vmem:[#allocation51 + $0x1a0] ss:$8 sps:$4 sm:$0xff]   ;;  %v18193_v16 = vld [vmem:[#allocation53 + $0x54] ss:$8 sps:$4 sm:$0xff]  }
0x16c1   : > { %v12153_v19 = vpop.f32.mrf.mxu0  ;;  %v12317_v24 = vpop.f32.mrf.mxu1  ;;  %13180 = vmatprep.subr.bf16.mxu1 %v18193_v16 }
0x16c2   : > { %v12323_v21 = vpack.c.bf16 %v12317_v24, %v12317_v24  ;;  %v12339_v29 = vsel %vm20764_vm1, %v12322_v42, 0  ;;  %v12159_v27 = vpack.c.bf16 %v12153_v19, %v12153_v19  ;;  %v12396_v36 = vsel %vm20767_vm13, %v12158_v25, 0  ;;  %v18196_v42 = vld [vmem:[#allocation53 + $0x104] ss:$8 sps:$4 sm:$0xff]   ;;  %v18191_v19 = vld [vmem:[#allocation53 + $0x50] ss:$8 sps:$4 sm:$0xff]   ;;  %vm20778_vm1 = vmmov %vm20769_vm2 }
0x16c3   : > { %v12155_v20 = vpop.f32.mrf.mxu0  ;;  %v12319_v23 = vpop.f32.mrf.mxu1  ;;  %v1950_v24 = vld [vmem:[#allocation14] sm:$0x11]  ;;  %13181 = vmatpush1.bf16.msra.mxu1 %v18191_v19  ;;  %vm20784_vm13 = vmmov %vm20778_vm1 }
0x16c4   : > { %15951 = vmatprep.subr.msk.bf16.mxu0 %vm20765_vm8, %v12323_v21  ;;  %v18194_v21 = vld [vmem:[#allocation53 + $0x100] ss:$8 sps:$4 sm:$0xff]   ;;  %v1951_v20 = vsel %vm19850_vm11, 0, %v1950_v24  ;;  %v18199_v23 = vld [vmem:[#allocation53 + $0x44] ss:$8 sps:$4 sm:$0xff]   ;;  %vm20779_vm8 = vmmov %vm20763_vm7 }
0x16c5   : > { %v12156_v49 = vpop.f32.mrf.mxu0  ;;  %v12320_v9 = vpop.f32.mrf.mxu1  ;;  %12359 = vmatpush1.bf16.msra.mxu0 %v12339_v29  ;;  %1952 = vst [vmem:[#allocation14] sm:$0x11] %v1951_v20  ;;  %v18202_v25 = vld [vmem:[#allocation53 + $0xf4] ss:$8 sps:$4 sm:$0xff]   ;;  %v18197_v29 = vld [vmem:[#allocation53 + $0x40] ss:$8 sps:$4 sm:$0xff]   ;;  %13182 = vmatprep.subr.bf16.mxu1 %v18199_v23 }
0x16c6   : > { %15954 = vmatprep.subr.msk.bf16.mxu0 %vm20766_vm4, %v12159_v27  ;;  %v18200_v27 = vld [vmem:[#allocation53 + $0xf0] ss:$8 sps:$4 sm:$0xff]   ;;  %v18208_v49 = vld [vmem:[#allocation53 + $0xe4] ss:$8 sps:$4 sm:$0xff]   ;;  %vm20783_vm4 = vmmov %vm20776_vm10 }
0x16c7   : > { %13183 = vmatpush1.bf16.msra.mxu1 %v18197_v29  ;;  %v1953_v9 = vld [vmem:[#allocation14 + $0x10] sm:$0x11] }
0x16c8   : > { %15952 = vmatmul.mubr.msk.bf16.vlgmr.msra.gmra.mxu0 %vm12334_vm14, %v18127_v31  ;;  %v18205_v31 = vld [vmem:[#allocation53 + $0x34] ss:$8 sps:$4 sm:$0xff]  }
0x16c9   : > { %12416 = vmatpush1.bf16.msra.mxu0 %v12396_v36  ;;  %12433 = vmatprep.mubr.bf16.mxu0 %v19238_v0  ;;  %v1954_v36 = vsel %vm20770_vm0, 0, %v1953_v9  ;;  %vm20787_vm0 = vmmov %vm20763_vm7 }
0x16ca   : > { %12624 = vmatprep.subr.bf16.mxu0 %v18130_v34  ;;  %v18203_v34 = vld [vmem:[#allocation53 + $0x30] ss:$8 sps:$4 sm:$0xff]   ;;  %13184 = vmatprep.subr.bf16.mxu1 %v18205_v31  ;;  %1955 = vst [vmem:[#allocation14 + $0x10] sm:$0x11] %v1954_v36 }
0x16cb   : > { %13185 = vmatpush1.bf16.msra.mxu1 %v18203_v34 }
0x16cc   : > { %v12494_v29 = vld [vmem:[#allocation14] sm:$0xff] }
0x16d0   : > { %15955 = vmatmul.mubr.msk.bf16.vlgmr.msra.gmra.mxu0 %vm12334_vm14, %v18131_v13  ;;  %v18206_v13 = vld [vmem:[#allocation53 + $0xe0] ss:$8 sps:$4 sm:$0xff]   ;;  %vm20780_vm14 = vmmov %vm20776_vm10 }
0x16d1   : > { %12625 = vmatpush1.bf16.msra.mxu0 %v18128_v15  ;;  %15978 = vmatprep.mubr.msk.bf16.mxu0 %vm20768_vm9, %v20364_v35  ;;  %v18147_v35 = vld [vmem:[#allocation51 + $0x10] ss:$8 sps:$4 sm:$0xff]   ;;  %v18214_v15 = vld [vmem:[#allocation53 + $0xd4] ss:$8 sps:$4 sm:$0xff]   ;;  %vm20785_vm9 = vmmov %vm20763_vm7 }
0x16d2   : > { %12626 = vmatprep.subr.bf16.mxu0 %v18134_v22  ;;  %v18209_v22 = vld [vmem:[#allocation53 + $0x20] ss:$8 sps:$4 sm:$0xff]  }
0x16d3   : > { %v12498_v36 = vld [vmem:[#allocation14 + $0x10] sm:$0x11] }
0x16d5   : > { %12627 = vmatpush1.bf16.msra.mxu0 %v18132_v40  ;;  %v18212_v40 = vld [vmem:[#allocation53 + $0xd0] ss:$8 sps:$4 sm:$0xff]  }
0x16d6   : > { %12628 = vmatprep.subr.bf16.mxu0 %v18137_v41  ;;  %v18217_v41 = vld [vmem:[#allocation53 + $0x14] ss:$8 sps:$4 sm:$0xff]  }
0x16d9   : > { %12629 = vmatpush1.bf16.msra.mxu0 %v18135_v45  ;;  %v18220_v45 = vld [vmem:[#allocation53 + $0xc4] ss:$8 sps:$4 sm:$0xff]  }
0x16da   : > { %12630 = vmatprep.subr.bf16.mxu0 %v18140_v50  ;;  %v18215_v50 = vld [vmem:[#allocation53 + $0x10] ss:$8 sps:$4 sm:$0xff]  }
0x16dd   : > { %12631 = vmatpush1.bf16.msra.mxu0 %v18138_v37  ;;  %v18221_v37 = vld [vmem:[#allocation53] ss:$8 sps:$4 sm:$0xff]  }
0x16de   : > { %12632 = vmatprep.subr.bf16.mxu0 %v18143_v51  ;;  %v18223_v51 = vld [vmem:[#allocation53 + $0x4] ss:$8 sps:$4 sm:$0xff]  }
0x16e1   : > { %12633 = vmatpush1.bf16.msra.mxu0 %v18141_v52  ;;  %v18226_v52 = vld [vmem:[#allocation53 + $0xb4] ss:$8 sps:$4 sm:$0xff]  }
0x16e2   : > { %12634 = vmatprep.subr.bf16.mxu0 %v18146_v7  ;;  %v18229_v7 = vld [vmem:[#allocation53 + $0x84] ss:$8 sps:$4 sm:$0xff]  }
0x16e5   : > { %12635 = vmatpush1.bf16.msra.mxu0 %v18144_v11  ;;  %v18224_v11 = vld [vmem:[#allocation53 + $0xb0] ss:$8 sps:$4 sm:$0xff]  }
0x16e6   : > { %12636 = vmatprep.subr.bf16.mxu0 %v18149_v54  ;;  %v18227_v54 = vld [vmem:[#allocation53 + $0x80] ss:$8 sps:$4 sm:$0xff]  }
0x16e9   : > { %12637 = vmatpush1.bf16.msra.mxu0 %v18147_v35  ;;  %v18232_v35 = vld [vmem:[#allocation53 + $0xa4] ss:$8 sps:$4 sm:$0xff]  }
0x16ea   : > { %12638 = vmatprep.subr.bf16.mxu0 %v18152_v8  ;;  %v18230_v8 = vld [vmem:[#allocation53 + $0xa0] ss:$8 sps:$4 sm:$0xff]  }
0x16ed   : > { %12639 = vmatpush1.bf16.msra.mxu0 %v18150_v28  ;;  %v18235_v28 = vld [vmem:[#allocation53 + $0x94] ss:$8 sps:$4 sm:$0xff]  }
0x16ee   : > { %12654 = vmatprep.subr.bf16.mxu0 %v18155_v57  ;;  %v18238_v57 = vld [vmem:[#allocation53 + $0x194] ss:$8 sps:$4 sm:$0xff]  }
0x16f1   : > { %12655 = vmatpush2.bf16.msra.mxu0 %v18153_v48  ;;  %v18233_v48 = vld [vmem:[#allocation53 + $0x90] ss:$8 sps:$4 sm:$0xff]  }
0x16f2   : > { %13007 = vmatprep.subr.bf16.mxu0 %v18158_v55  ;;  %v18245_v55 = vld [vmem:[#allocation53 + $0x114] ss:$8 sps:$4 sm:$0xff]  }
0x16f4   : > { %12657 = vmatmul.mubr.bf16.vlgmr.msra.gmra.mxu0 %v20375_v5  ;;  %v18173_v5 = vld [vmem:[#allocation51 + $0x140] ss:$8 sps:$4 sm:$0xff]  }
0x16f5   : > { %13008 = vmatpush1.bf16.msra.mxu0 %v18156_v58  ;;  %16022 = vmatprep.mubr.msk.bf16.mxu0 %vm20769_vm2, %v19972_v43  ;;  %v18176_v43 = vld [vmem:[#allocation51 + $0x130] ss:$8 sps:$4 sm:$0xff]   ;;  %v18243_v58 = vld [vmem:[#allocation53 + $0x110] ss:$8 sps:$4 sm:$0xff]   ;;  %vm20786_vm2 = vmmov %vm20778_vm1 }
0x16f6   : > { %13009 = vmatprep.subr.bf16.mxu0 %v18163_v59 }
0x16f9   : > { %13010 = vmatpush1.bf16.msra.mxu0 %v18161_v60 }
0x16fa   : > { %13011 = vmatprep.subr.bf16.mxu0 %v18166_v61 }
0x16fd   : > { %13012 = vmatpush1.bf16.msra.mxu0 %v18164_v62  ;;  %v12444_v62 = vld [vmem:[%s20771_s22] sm:$0x3]  ;;  %s20485_s22 = scalar_lea.hbm %s19497_s8, %s16191_s26 }
0x16fe   : > { %13013 = vmatprep.subr.bf16.mxu0 %v18169_v1 }
0x1701   : > { %13014 = vmatpush1.bf16.msra.mxu0 %v18167_v33  ;;  %v12449_v33 = vrot.slane %v12444_v62, %v19879_v30 }
0x1702   : > { %13015 = vmatprep.subr.bf16.mxu0 %v18172_v6 }
0x1705   : > { %13016 = vmatpush1.bf16.msra.mxu0 %v18170_v10 }
0x1706   : > { %13017 = vmatprep.subr.bf16.mxu0 %v18175_v3  ;;  %v12453_v3 = vrot.slane %v12444_v62, %v19882_v32 }
0x1709   : > { %13018 = vmatpush1.bf16.msra.mxu0 %v18173_v5 }
0x170a   : > { %13019 = vmatprep.subr.bf16.mxu0 %v18178_v12 }
0x170d   : > { %13020 = vmatpush1.bf16.msra.mxu0 %v18176_v43 }
0x170e   : > { %13021 = vmatprep.subr.bf16.mxu0 %v18181_v14 }
0x1711   : > { %13022 = vmatpush1.bf16.msra.mxu0 %v18179_v17 }
0x1712   : > { %13037 = vmatprep.subr.bf16.mxu0 %v18184_v38 }
0x1715   : > { %13038 = vmatpush2.bf16.msra.mxu0 %v18182_v39 }
0x1716   : > { %13376 = vmatprep.subr.bf16.mxu0 %v18196_v42 }
0x1718   : > { %13040 = vmatmul.mubr.bf16.vlgmr.msra.gmra.mxu0 %v19976_v47  ;;  %v18211_v47 = vld [vmem:[#allocation53 + $0x24] ss:$8 sps:$4 sm:$0xff]  }
0x1719   : > { %13377 = vmatpush1.bf16.msra.mxu0 %v18194_v21  ;;  %13186 = vmatprep.subr.bf16.mxu1 %v18211_v47 }
0x171a   : > { %13378 = vmatprep.subr.bf16.mxu0 %v18202_v25  ;;  %13187 = vmatpush1.bf16.msra.mxu1 %v18209_v22 }
0x171b   : > { %13188 = vmatprep.subr.bf16.mxu1 %v18217_v41 }
0x171d   : > { %13379 = vmatpush1.bf16.msra.mxu0 %v18200_v27 }
0x171e   : > { %13380 = vmatprep.subr.bf16.mxu0 %v18208_v49  ;;  %13189 = vmatpush1.bf16.msra.mxu1 %v18215_v50 }
0x171f   : > { %13190 = vmatprep.subr.bf16.mxu1 %v18223_v51 }
0x1721   : > { %13381 = vmatpush1.bf16.msra.mxu0 %v18206_v13 }
0x1722   : > { %13382 = vmatprep.subr.bf16.mxu0 %v18214_v15  ;;  %13191 = vmatpush1.bf16.msra.mxu1 %v18221_v37  ;;  %v18236_v37 = vld [vmem:[#allocation53 + $0x190] ss:$8 sps:$4 sm:$0xff]  }
0x1723   : > { %13206 = vmatprep.subr.bf16.mxu1 %v18229_v7 }
0x1725   : > { %13383 = vmatpush1.bf16.msra.mxu0 %v18212_v40 }
0x1726   : > { %13384 = vmatprep.subr.bf16.mxu0 %v18220_v45  ;;  %13207 = vmatpush2.bf16.msra.mxu1 %v18227_v54  ;;  %v18248_v54 = vld [vmem:[#allocation53 + $0x184] ss:$8 sps:$4 sm:$0xff]  }
0x1727   : > { %13548 = vmatprep.subr.bf16.mxu1 %v18238_v57 }
0x1729   : > { %13385 = vmatpush1.bf16.msra.mxu0 %v18218_v53 }
0x172a   : > { %13386 = vmatprep.subr.bf16.mxu0 %v18226_v52 }
0x172d   : > { %13387 = vmatpush1.bf16.msra.mxu0 %v18224_v11 }
0x172e   : > { %13388 = vmatprep.subr.bf16.mxu0 %v18232_v35 }
0x1731   : > { %13389 = vmatpush1.bf16.msra.mxu0 %v18230_v8 }
0x1732   : > { %13390 = vmatprep.subr.bf16.mxu0 %v18235_v28 }
0x1735   : > { %13391 = vmatpush1.bf16.msra.mxu0 %v18233_v48 }
0x1736   : > { %13406 = vmatprep.subr.bf16.mxu0 %v18245_v55 }
0x1739   : > { %13407 = vmatpush2.bf16.msra.mxu0 %v18243_v58  ;;  %v18246_v58 = vld [vmem:[#allocation53 + $0x180] ss:$8 sps:$4 sm:$0xff]  }
0x1788   : > { %v12378_v59 = vpop.f32.mrf.mxu0 }
0x178a   : > { %v12380_v60 = vpop.f32.mrf.mxu0 }
0x178c   : > { %v12382_v61 = vpop.f32.mrf.mxu0 }
0x178e   : > { %v12384_v1 = vpop.f32.mrf.mxu0 }
0x1790   : > { %v12435_v6 = vpop.f32.mrf.mxu0 }
0x1791   : > { %v12436_v10 = vadd.f32 %v12435_v6, %v12378_v59 }
0x1792   : > { %v12437_v5 = vpop.f32.mrf.mxu0 }
0x1793   : > { %v12456_v12 = vadd.f32 %v12449_v33, %v12436_v10  ;;  %v12438_v43 = vadd.f32 %v12437_v5, %v12380_v60 }
0x1794   : > { %v12439_v14 = vpop.f32.mrf.mxu0 }
0x1795   : > { %v12457_v63 = vadd.f32 %v12453_v3, %v12438_v43  ;;  %v12440_v44 = vadd.f32 %v12439_v14, %v12382_v61  ;;  %v12460_v38 = vmax.f32 %v12456_v12, 0.0  ;;  %v18249_v43 = vld [vmem:[#allocation53 + $0x170] ss:$8 sps:$4 sm:$0xff]  }
0x1796   : > { %v12441_v17 = vpop.f32.mrf.mxu0 }
0x1797   : > { %v12461_v26 = vmax.f32 %v12457_v63, 0.0  ;;  %v12458_v18 = vadd.f32 %v12449_v33, %v12440_v44  ;;  %v12442_v39 = vadd.f32 %v12441_v17, %v12384_v1  ;;  %v18251_v33 = vld [vmem:[#allocation53 + $0x174] ss:$8 sps:$4 sm:$0xff]   ;;  %v18254_v63 = vld [vmem:[#allocation53 + $0x164] ss:$8 sps:$4 sm:$0xff]  }
0x1798   : > { %v18252_v44 = vld [vmem:[#allocation53 + $0x160] ss:$8 sps:$4 sm:$0xff]   ;;  %v18257_v17 = vld [vmem:[#allocation53 + $0x154] ss:$8 sps:$4 sm:$0xff]  }
0x1799   : > { %v16187_v16 = vpack.c.bf16 %v12461_v26, %v12460_v38  ;;  %v12459_v42 = vadd.f32 %v12453_v3, %v12442_v39  ;;  %v12462_v24 = vmax.f32 %v12458_v18, 0.0  ;;  %v18255_v38 = vld [vmem:[#allocation53 + $0x150] ss:$8 sps:$4 sm:$0xff]   ;;  %v18260_v26 = vld [vmem:[#allocation53 + $0x144] ss:$8 sps:$4 sm:$0xff]  }
0x179a   : > { %v18258_v18 = vld [vmem:[#allocation53 + $0x140] ss:$8 sps:$4 sm:$0xff]   ;;  %v18263_v39 = vld [vmem:[#allocation53 + $0x134] ss:$8 sps:$4 sm:$0xff]  }
0x179b   : > { %v12475_v19 = vshrl.u32 %v16187_v16, 16  ;;  %v12463_v21 = vmax.f32 %v12459_v42, 0.0  ;;  %v12478_v23 = vshll.u32 %v16187_v16, 16  ;;  %v18261_v16 = vld [vmem:[#allocation53 + $0x130] ss:$8 sps:$4 sm:$0xff]  }
0x179c   : > { %v18266_v42 = vld [vmem:[#allocation53 + $0x124] ss:$8 sps:$4 sm:$0xff]  }
0x179d   : > { %v12477_v20 = vrot.slane %v12475_v19, 7  ;;  %v16188_v25 = vpack.c.bf16 %v12463_v21, %v12462_v24  ;;  %v18264_v19 = vld [vmem:[#allocation53 + $0x120] ss:$8 sps:$4 sm:$0xff]   ;;  %v18269_v24 = vld [vmem:[#allocation53 + $0x1a4] ss:$8 sps:$4 sm:$0xff]  }
0x179f   : > { %v12480_v27 = vor.u32 %v12478_v23, %v12477_v20  ;;  %v12483_v31 = vshrl.u32 %v16188_v25, 16  ;;  %v12486_v34 = vshll.u32 %v16188_v25, 16  ;;  %v12481_v13 = vrot.slane %v12477_v20, 4  ;;  %v18267_v20 = vld [vmem:[#allocation53 + $0x1a0] ss:$8 sps:$4 sm:$0xff]  }
0x17a1   : > { %v12495_v49 = vsel %vm20772_vm15, %v12480_v27, %v12494_v29  ;;  %v12485_v9 = vrot.slane %v12483_v31, 7  ;;  %v18270_v27 = vld [vmem:[#allocation54 + $0x70] ss:$8 sps:$4 sm:$0xff]   ;;  %v18272_v31 = vld [vmem:[#allocation54 + $0x74] ss:$8 sps:$4 sm:$0xff]  }
0x17a2   : > { %12496 = vst [vmem:[#allocation14] sm:$0xff] %v12495_v49  ;;  %13759 = vmatprep.subr.bf16.mxu0 %v18272_v31 }
0x17a3   : > { %v12488_v47 = vor.u32 %v12486_v34, %v12485_v9  ;;  %v12490_v15 = vrot.slane %v12485_v9, 4  ;;  %v18273_v9 = vld [vmem:[#allocation54 + $0x60] ss:$8 sps:$4 sm:$0xff]   ;;  %v18276_v34 = vld [vmem:[#allocation54 + $0x50] ss:$8 sps:$4 sm:$0xff]  }
0x17a5   : > { %v12489_v22 = vsel %vm20773_vm3, %v12481_v13, %v12488_v47  ;;  %v12499_v40 = vsel %vm19850_vm11, %v12490_v15, %v12498_v36  ;;  %v18278_v36 = vld [vmem:[#allocation54 + $0x54] ss:$8 sps:$4 sm:$0xff]   ;;  %v18279_v13 = vld [vmem:[#allocation54 + $0x100] ss:$8 sps:$4 sm:$0xff]   ;;  %v18281_v47 = vld [vmem:[#allocation54 + $0x104] ss:$8 sps:$4 sm:$0xff]  }
0x17a6   : > { %12497 = vst.msk [vmem:[#allocation14 + $0x8] sm:$0xff] %vm20774_vm12, %v12489_v22  ;;  %12500 = vst [vmem:[#allocation14 + $0x10] sm:$0x11] %v12499_v40  ;;  %v18282_v15 = vld [vmem:[#allocation54 + $0x40] ss:$8 sps:$4 sm:$0xff]  }
0x17a7   : > { %v18284_v22 = vld [vmem:[#allocation54 + $0x44] ss:$8 sps:$4 sm:$0xff]   ;;  %v18285_v40 = vld [vmem:[#allocation54 + $0xf0] ss:$8 sps:$4 sm:$0xff]  }
0x17a9   : > { %v13423_v7 = vld [vmem:[#allocation14] sm:$0xee] }
0x17ad   : > { %v20409_v41 = vld [vmem:[#allocation14 + $0x8] sm:$0xff]  ;;  %v13225_v45 = vld [vmem:[#allocation14 + $0x10] sm:$0x11] }
0x17ae   : > { %v16023_v50 = vcombine.low %v12495_v49, %v20409_v41  ;;  %v16024_v53 = vcombine.high %v12495_v49, %v20409_v41  ;;  %v20413_v51 = vcombine.low %v13225_v45, %v13225_v45  ;;  %v16047_v52 = vcombine.high %v13225_v45, %v13225_v45  ;;  %v18275_v49 = vld [vmem:[#allocation54 + $0x64] ss:$8 sps:$4 sm:$0xff]   ;;  %v18290_v45 = vld [vmem:[#allocation54 + $0x34] ss:$8 sps:$4 sm:$0xff]  }
0x17af   : > { %v16068_v11 = vcombine.high %v13423_v7, %v20409_v41  ;;  %v16067_v21 = vcombine.low %v13423_v7, %v20409_v41  ;;  %v18287_v41 = vld [vmem:[#allocation54 + $0xf4] ss:$8 sps:$4 sm:$0xff]   ;;  %v18294_v7 = vld [vmem:[#allocation54 + $0x20] ss:$8 sps:$4 sm:$0xff]  }
0x17b0   : > { %16043 = vmatprep.mubr.msk.bf16.mxu1 %vm20775_vm5, %v16024_v53  ;;  %v13452_v35 = vrot.slane %v16047_v52, 1  ;;  %v13273_v8 = vshll.u32 %v16024_v53, 16  ;;  %v13278_v28 = vshll.u32 %v16047_v52, 16  ;;  %v13261_v48 = vshll.u32 %v16023_v50, 16  ;;  %v18299_v52 = vld [vmem:[#allocation54 + $0xd4] ss:$8 sps:$4 sm:$0xff]   ;;  %vm20791_vm5 = vmmov %vm20778_vm1 }
0x17b1   : > { %13209 = vmatmul.mubr.bf16.vlgmr.msra.gmra.mxu1 %v16023_v50  ;;  %v13451_v57 = vrot.slane %v16068_v11, 1  ;;  %v13266_v55 = vshll.u32 %v20413_v51, 16  ;;  %v13271_v59 = vshrl.u32 %v16024_v53, 16  ;;  %v13259_v62 = vshrl.u32 %v16023_v50, 16  ;;  %v18293_v50 = vld [vmem:[#allocation54 + $0xe4] ss:$8 sps:$4 sm:$0xff]  }
0x17b2   : > { %13549 = vmatpush1.bf16.msra.mxu1 %v18236_v37  ;;  %v13275_v60 = vrot.slane %v13273_v8, 1  ;;  %v13263_v1 = vrot.slane %v13261_v48, 1  ;;  %v13280_v10 = vrot.slane %v13278_v28, 1  ;;  %v13448_v23 = vrot.slane %v16067_v21, 1  ;;  %v18288_v53 = vld [vmem:[#allocation54 + $0x30] ss:$8 sps:$4 sm:$0xff]  }
0x17b3   : > { %v13453_v61 = vsel %vm20776_vm10, %v13451_v57, %v13452_v35  ;;  %13550 = vmatprep.subr.bf16.mxu1 %v18248_v54  ;;  %v13268_v5 = vrot.slane %v13266_v55, 1  ;;  %v13449_v25 = vrot.slane %v20413_v51, 1  ;;  %v18291_v37 = vld [vmem:[#allocation54 + $0xe0] ss:$8 sps:$4 sm:$0xff]   ;;  %v18296_v51 = vld [vmem:[#allocation54 + $0x24] ss:$8 sps:$4 sm:$0xff]   ;;  %vm20792_vm10 = vmmov %vm20778_vm1 }
0x17b4   : > { %16087 = vmatprep.mubr.msk.bf16.mxu1 %vm20777_vm6, %v13453_v61  ;;  %v13276_v6 = vor.u32 %v13275_v60, %v13271_v59  ;;  %v13264_v3 = vor.u32 %v13263_v1, %v13259_v62  ;;  %v18297_v11 = vld [vmem:[#allocation54 + $0xd0] ss:$8 sps:$4 sm:$0xff]   ;;  %v18302_v54 = vld [vmem:[#allocation54 + $0x14] ss:$8 sps:$4 sm:$0xff]   ;;  %v18305_v35 = vld [vmem:[#allocation54 + $0xc4] ss:$8 sps:$4 sm:$0xff]  }
0x17b5   : > { %v13450_v29 = vsel %vm20780_vm14, %v13448_v23, %v13449_v25  ;;  %v18300_v8 = vld [vmem:[#allocation54 + $0x10] ss:$8 sps:$4 sm:$0xff]   ;;  %v18303_v28 = vld [vmem:[#allocation54 + $0xc0] ss:$8 sps:$4 sm:$0xff]   ;;  %v18308_v57 = vld [vmem:[#allocation54 + $0x4] ss:$8 sps:$4 sm:$0xff]  }
0x17b6   : > { %13551 = vmatpush1.bf16.msra.mxu1 %v18246_v58  ;;  %v13281_v12 = vsel %vm20763_vm7, %v13276_v6, %v13280_v10  ;;  %v13269_v14 = vsel %vm20779_vm8, %v13264_v3, %v13268_v5  ;;  %v18311_v48 = vld [vmem:[#allocation54 + $0xb4] ss:$8 sps:$4 sm:$0xff]   ;;  %v18306_v55 = vld [vmem:[#allocation54] ss:$8 sps:$4 sm:$0xff]   ;;  %v18309_v58 = vld [vmem:[#allocation54 + $0xb0] ss:$8 sps:$4 sm:$0xff]   ;;  %v12658_v5 = vpop.f32.mrf.mxu0 }
0x17b7   : > { %16066 = vmatprep.mubr.msk.bf16.mxu0 %vm20778_vm1, %v13281_v12  ;;  %13552 = vmatprep.subr.bf16.mxu1 %v18251_v33  ;;  %v18314_v59 = vld [vmem:[#allocation54 + $0x84] ss:$8 sps:$4 sm:$0xff]   ;;  %v18312_v61 = vld [vmem:[#allocation54 + $0x80] ss:$8 sps:$4 sm:$0xff]   ;;  %v18323_v1 = vld [vmem:[#allocation54 + $0x194] ss:$8 sps:$4 sm:$0xff]  }
0x17b8   : > { %13409 = vmatmul.mubr.bf16.vlgmr.msra.gmra.mxu0 %v13269_v14  ;;  %v18317_v60 = vld [vmem:[#allocation54 + $0xa4] ss:$8 sps:$4 sm:$0xff]   ;;  %v18315_v62 = vld [vmem:[#allocation54 + $0xa0] ss:$8 sps:$4 sm:$0xff]   ;;  %v18320_v33 = vld [vmem:[#allocation54 + $0x94] ss:$8 sps:$4 sm:$0xff]   ;;  %v12660_v12 = vpop.f32.mrf.mxu0  ;;  %v12869_v14 = vpop.f32.mrf.mxu1 }
0x17b9   : > { %13760 = vmatpush1.bf16.msra.mxu0 %v18270_v27  ;;  %v18318_v6 = vld [vmem:[#allocation54 + $0x90] ss:$8 sps:$4 sm:$0xff]   ;;  %v18330_v10 = vld [vmem:[#allocation54 + $0x114] ss:$8 sps:$4 sm:$0xff]   ;;  %vm20793_vm6 = vmmov %vm20778_vm1 }
0x17ba   : > { %13553 = vmatpush1.bf16.msra.mxu1 %v18249_v43  ;;  %13761 = vmatprep.subr.bf16.mxu0 %v18275_v49  ;;  %v18328_v3 = vld [vmem:[#allocation54 + $0x110] ss:$8 sps:$4 sm:$0xff]   ;;  %v12662_v43 = vpop.f32.mrf.mxu0 }
0x17bb   : > { %13554 = vmatprep.subr.bf16.mxu1 %v18254_v63 }
0x17bc   : > { %v12664_v63 = vpop.f32.mrf.mxu0 }
0x17bd   : > { %13762 = vmatpush1.bf16.msra.mxu0 %v18273_v9 }
0x17be   : > { %13555 = vmatpush1.bf16.msra.mxu1 %v18252_v44  ;;  %13763 = vmatprep.subr.bf16.mxu0 %v18278_v36  ;;  %v12871_v44 = vpop.f32.mrf.mxu1 }
0x17bf   : > { %13556 = vmatprep.subr.bf16.mxu1 %v18257_v17 }
0x17c1   : > { %13764 = vmatpush1.bf16.msra.mxu0 %v18276_v34 }
0x17c2   : > { %13557 = vmatpush1.bf16.msra.mxu1 %v18255_v38  ;;  %13765 = vmatprep.subr.bf16.mxu0 %v18284_v22  ;;  %v12873_v38 = vpop.f32.mrf.mxu1 }
0x17c3   : > { %13558 = vmatprep.subr.bf16.mxu1 %v18260_v26 }
0x17c5   : > { %13766 = vmatpush1.bf16.msra.mxu0 %v18282_v15 }
0x17c6   : > { %13559 = vmatpush1.bf16.msra.mxu1 %v18258_v18  ;;  %13767 = vmatprep.subr.bf16.mxu0 %v18290_v45  ;;  %v12501_v18 = vld [vmem:[%s20781_s13] sm:$0x3]  ;;  %s20488_s13 = scalar_lea.sflag [#allocation17], %s1825_s4 }
0x17c7   : > { %13560 = vmatprep.subr.bf16.mxu1 %v18263_v39  ;;  %v12875_v39 = vpop.f32.mrf.mxu1 }
0x17c9   : > { %13768 = vmatpush1.bf16.msra.mxu0 %v18288_v53 }
0x17ca   : > { %13561 = vmatpush1.bf16.msra.mxu1 %v18261_v16  ;;  %13769 = vmatprep.subr.bf16.mxu0 %v18296_v51 }
0x17cb   : > { %13562 = vmatprep.subr.bf16.mxu1 %v18266_v42  ;;  %v12671_v42 = vrot.slane %v12501_v18, %v19879_v30 }
0x17cd   : > { %13770 = vmatpush1.bf16.msra.mxu0 %v18294_v7  ;;  %v12680_v27 = vadd.f32 %v12671_v42, %v12662_v43 }
0x17ce   : > { %13563 = vmatpush1.bf16.msra.mxu1 %v18264_v19  ;;  %13771 = vmatprep.subr.bf16.mxu0 %v18302_v54 }
0x17cf   : > { %13578 = vmatprep.subr.bf16.mxu1 %v18269_v24  ;;  %v12675_v24 = vrot.slane %v12501_v18, %v19882_v32  ;;  %v12880_v15 = vadd.f32 %v12873_v38, %v12680_v27 }
0x17d1   : > { %13772 = vmatpush1.bf16.msra.mxu0 %v18300_v8  ;;  %v12681_v34 = vadd.f32 %v12675_v24, %v12664_v63 }
0x17d2   : > { %13579 = vmatpush2.bf16.msra.mxu1 %v18267_v20  ;;  %13773 = vmatprep.subr.bf16.mxu0 %v18308_v57  ;;  %v12678_v20 = vadd.f32 %v12671_v42, %v12658_v5  ;;  %v13633_v42 = vld [vmem:[#allocation2 + $0x10] sm:$0x11] }
0x17d3   : > { %13970 = vmatprep.subr.bf16.mxu1 %v18281_v47 }
0x17d4   : > { %v12878_v31 = vadd.f32 %v12869_v14, %v12678_v20 }
0x17d5   : > { %13581 = vmatmul.mubr.bf16.vlgmr.msra.gmra.mxu1 %v13450_v29  ;;  %13774 = vmatpush1.bf16.msra.mxu0 %v18306_v55  ;;  %v12679_v29 = vadd.f32 %v12675_v24, %v12660_v12 }
0x17d6   : > { %13971 = vmatpush1.bf16.msra.mxu1 %v18279_v13  ;;  %13789 = vmatprep.subr.bf16.mxu0 %v18314_v59 }
0x17d7   : > { %13972 = vmatprep.subr.bf16.mxu1 %v18287_v41  ;;  %v12879_v13 = vadd.f32 %v12871_v44, %v12679_v29  ;;  %v13629_v44 = vld [vmem:[#allocation2] sm:$0xff] }
0x17d8   : > { %v13041_v17 = vpop.f32.mrf.mxu0 }
0x17d9   : > { %13790 = vmatpush2.bf16.msra.mxu0 %v18312_v61  ;;  %v13050_v36 = vadd.f32 %v13041_v17, %v12878_v31 }
0x17da   : > { %13973 = vmatpush1.bf16.msra.mxu1 %v18285_v40  ;;  %14142 = vmatprep.subr.bf16.mxu0 %v18323_v1  ;;  %v13043_v26 = vpop.f32.mrf.mxu0 }
0x17db   : > { %13974 = vmatprep.subr.bf16.mxu1 %v18293_v50  ;;  %v13051_v47 = vadd.f32 %v13043_v26, %v12879_v13  ;;  %v12881_v50 = vadd.f32 %v12875_v39, %v12681_v34 }
0x17dc   : > { %v13045_v16 = vpop.f32.mrf.mxu0 }
0x17dd   : > { %v13052_v45 = vadd.f32 %v13045_v16, %v12880_v15 }
0x17de   : > { %13975 = vmatpush1.bf16.msra.mxu1 %v18291_v37  ;;  %v13047_v21 = vpop.f32.mrf.mxu0 }
0x17df   : > { %13976 = vmatprep.subr.bf16.mxu1 %v18299_v52  ;;  %v13053_v52 = vadd.f32 %v13047_v21, %v12881_v50  ;;  %v18336_v50 = vld [vmem:[#allocation54 + $0x174] ss:$8 sps:$4 sm:$0xff]  }
0x17e2   : > { %13977 = vmatpush1.bf16.msra.mxu1 %v18297_v11 }
0x17e3   : > { %13978 = vmatprep.subr.bf16.mxu1 %v18305_v35 }
0x17e6   : > { %13979 = vmatpush1.bf16.msra.mxu1 %v18303_v28 }
0x17e7   : > { %13980 = vmatprep.subr.bf16.mxu1 %v18311_v48 }
0x17ea   : > { %13981 = vmatpush1.bf16.msra.mxu1 %v18309_v58 }
0x17eb   : > { %13982 = vmatprep.subr.bf16.mxu1 %v18317_v60 }
0x17ee   : > { %13983 = vmatpush1.bf16.msra.mxu1 %v18315_v62 }
0x17ef   : > { %13984 = vmatprep.subr.bf16.mxu1 %v18320_v33 }
0x17f2   : > { %13985 = vmatpush1.bf16.msra.mxu1 %v18318_v6 }
0x17f3   : > { %14000 = vmatprep.subr.bf16.mxu1 %v18330_v10 }
0x17f6   : > { %14001 = vmatpush2.bf16.msra.mxu1 %v18328_v3 }
0x17f7   : > { %14277 = vmatprep.subr.bf16.mxu1 %v19238_v0 }
0x1871   : > { %v13210_v19 = vpop.f32.mrf.mxu1 }
0x1872   : > { %v13219_v22 = vadd.f32 %v13210_v19, %v13050_v36 }
0x1873   : > { %v13212_v23 = vpop.f32.mrf.mxu1 }
0x1874   : > { %v13220_v53 = vadd.f32 %v13212_v23, %v13051_v47  ;;  %v18331_v47 = vld [vmem:[#allocation54 + $0x180] ss:$8 sps:$4 sm:$0xff]  }
0x1875   : > { %v13214_v49 = vpop.f32.mrf.mxu1 }
0x1876   : > { %v13221_v7 = vadd.f32 %v13214_v49, %v13052_v45 }
0x1877   : > { %v13216_v40 = vpop.f32.mrf.mxu1 }
0x1878   : > { %v13410_v25 = vpop.f32.mrf.mxu0  ;;  %v13222_v28 = vadd.f32 %v13216_v40, %v13053_v52 }
0x1879   : > { %v13419_v37 = vadd.f32 %v13410_v25, %v13219_v22  ;;  %v18321_v25 = vld [vmem:[#allocation54 + $0x190] ss:$8 sps:$4 sm:$0xff]  }
0x187a   : > { %v13412_v9 = vpop.f32.mrf.mxu0 }
0x187b   : > { %v13420_v11 = vadd.f32 %v13412_v9, %v13220_v53 }
0x187c   : > { %v13414_v41 = vpop.f32.mrf.mxu0 }
0x187d   : > { %v13421_v57 = vadd.f32 %v13414_v41, %v13221_v7 }
0x187e   : > { %v13416_v35 = vpop.f32.mrf.mxu0 }
0x187f   : > { %v13422_v58 = vadd.f32 %v13416_v35, %v13222_v28  ;;  %v18339_v35 = vld [vmem:[#allocation54 + $0x164] ss:$8 sps:$4 sm:$0xff]   ;;  %v18342_v28 = vld [vmem:[#allocation54 + $0x154] ss:$8 sps:$4 sm:$0xff]  }
0x1895   : > { %v13582_v51 = vpop.f32.mrf.mxu1 }
0x1896   : > { %v13591_v54 = vadd.f32 %v13582_v51, %v13419_v37 }
0x1897   : > { %v13584_v8 = vpop.f32.mrf.mxu1 }
0x1898   : > { %v13592_v48 = vadd.f32 %v13584_v8, %v13420_v11  ;;  %v13595_v59 = vmax.f32 %v13591_v54, 0.0  ;;  %v18334_v11 = vld [vmem:[#allocation54 + $0x170] ss:$8 sps:$4 sm:$0xff]   ;;  %v18337_v8 = vld [vmem:[#allocation54 + $0x160] ss:$8 sps:$4 sm:$0xff]  }
0x1899   : > { %v13586_v55 = vpop.f32.mrf.mxu1 }
0x189a   : > { %v13596_v60 = vmax.f32 %v13592_v48, 0.0  ;;  %v13593_v61 = vadd.f32 %v13586_v55, %v13421_v57  ;;  %v18340_v57 = vld [vmem:[#allocation54 + $0x150] ss:$8 sps:$4 sm:$0xff]   ;;  %v18345_v48 = vld [vmem:[#allocation54 + $0x144] ss:$8 sps:$4 sm:$0xff]  }
0x189b   : > { %v13588_v62 = vpop.f32.mrf.mxu1  ;;  %v18343_v55 = vld [vmem:[#allocation54 + $0x140] ss:$8 sps:$4 sm:$0xff]  }
0x189c   : > { %v16189_v1 = vpack.c.bf16 %v13596_v60, %v13595_v59  ;;  %v13594_v33 = vadd.f32 %v13588_v62, %v13422_v58  ;;  %v13597_v10 = vmax.f32 %v13593_v61, 0.0  ;;  %v18348_v58 = vld [vmem:[#allocation54 + $0x134] ss:$8 sps:$4 sm:$0xff]   ;;  %v18346_v59 = vld [vmem:[#allocation54 + $0x130] ss:$8 sps:$4 sm:$0xff]  }
0x189d   : > { %v18351_v60 = vld [vmem:[#allocation54 + $0x124] ss:$8 sps:$4 sm:$0xff]   ;;  %v18349_v61 = vld [vmem:[#allocation54 + $0x120] ss:$8 sps:$4 sm:$0xff]  }
0x189e   : > { %v13610_v6 = vshrl.u32 %v16189_v1, 16  ;;  %v13598_v3 = vmax.f32 %v13594_v33, 0.0  ;;  %v13613_v12 = vshll.u32 %v16189_v1, 16  ;;  %v18354_v62 = vld [vmem:[#allocation54 + $0x1a4] ss:$8 sps:$4 sm:$0xff]  }
0x189f   : > { %v18352_v33 = vld [vmem:[#allocation54 + $0x1a0] ss:$8 sps:$4 sm:$0xff]  }
0x18a0   : > { %v13612_v5 = vrot.slane %v13610_v6, 7  ;;  %v16190_v43 = vpack.c.bf16 %v13598_v3, %v13597_v10 }
0x18a2   : > { %v13615_v14 = vor.u32 %v13613_v12, %v13612_v5  ;;  %v13618_v63 = vshrl.u32 %v16190_v43, 16  ;;  %v13621_v26 = vshll.u32 %v16190_v43, 16  ;;  %v13616_v18 = vrot.slane %v13612_v5, 4  ;;  %v18355_v5 = vld [vmem:[%s19487_s25 + $0x38] sm:$0xff]   ;;  %v18356_v12 = vld [vmem:[%s19487_s25 + $0x30] sm:$0xff]   ;;  %v18357_v43 = vld [vmem:[%s19487_s25 + $0x28] sm:$0xff]  }
0x18a4   : > { %v13630_v17 = vsel %vm20772_vm15, %v13615_v14, %v13629_v44  ;;  %v13620_v38 = vrot.slane %v13618_v63, 7  ;;  %vm20788_vm15 = vmmov %vm20783_vm4  ;;  %v18358_v14 = vld [vmem:[%s19487_s25 + $0x20] sm:$0xff]   ;;  %v18359_v63 = vld [vmem:[%s19487_s25 + $0x18] sm:$0xff]  }
0x18a5   : > { %13631 = vst [vmem:[#allocation2] sm:$0xff] %v13630_v17  ;;  %v18360_v44 = vld [vmem:[%s19487_s25 + $0x10] sm:$0xff]  }
0x18a6   : > { %v13623_v39 = vor.u32 %v13621_v26, %v13620_v38  ;;  %v13625_v16 = vrot.slane %v13620_v38, 4  ;;  %v18362_v38 = vld [vmem:[%s19487_s25] sm:$0xff]  }
0x18a7   : > { %v18363_v26 = vld [vmem:[%s19487_s25 + $0x40] sm:$0xff]  }
0x18a8   : > { %v13624_v19 = vsel %vm20773_vm3, %v13616_v18, %v13623_v39  ;;  %v13634_v24 = vsel %vm19850_vm11, %v13625_v16, %v13633_v42  ;;  %vm20782_vm11 = vmmov %vm20778_vm1 }
0x18a9   : > { %13632 = vst.msk [vmem:[#allocation2 + $0x8] sm:$0xff] %vm20774_vm12, %v13624_v19  ;;  %13635 = vst [vmem:[#allocation2 + $0x10] sm:$0x11] %v13634_v24  ;;  %v13636_v24 = vld [vmem:[%s19482_s29] sm:$0x3] }
0x18aa   : > { %vm20789_vm3 = vmmov %vm20778_vm1 }
0x18ab   : > { %vm20790_vm12 = vmmov %vm20778_vm1 }
0x18ac   : > { %v14017_v2 = vld [vmem:[#allocation2] sm:$0xee] }
0x18b0   : > { %v20438_v21 = vld [vmem:[#allocation2 + $0x8] sm:$0xff]  ;;  %v13819_v56 = vld [vmem:[#allocation2 + $0x10] sm:$0x11] }
0x18b1   : > { %v16090_v20 = vcombine.low %v13630_v17, %v20438_v21  ;;  %v16091_v23 = vcombine.high %v13630_v17, %v20438_v21  ;;  %v20442_v29 = vcombine.low %v13819_v56, %v13819_v56  ;;  %v16114_v27 = vcombine.high %v13819_v56, %v13819_v56  ;;  %v18361_v17 = vld [vmem:[%s19487_s25 + $0x8] sm:$0xff]  }
0x18b2   : > { %v16135_v31 = vcombine.high %v14017_v2, %v20438_v21  ;;  %v16134_v1 = vcombine.low %v14017_v2, %v20438_v21  ;;  %v13810_v21 = vrot.slane %v13636_v24, %v19882_v32  ;;  %v13806_v56 = vrot.slane %v13636_v24, %v19879_v30 }
0x18b3   : > { %16110 = vmatprep.mubr.msk.bf16.mxu0 %vm20782_vm11, %v16091_v23  ;;  %v14046_v4 = vrot.slane %v16114_v27, 1  ;;  %v13867_v49 = vshll.u32 %v16091_v23, 16  ;;  %v13872_v9 = vshll.u32 %v16114_v27, 16  ;;  %v13855_v36 = vshll.u32 %v16090_v20, 16 }
0x18b4   : > { %13792 = vmatmul.mubr.bf16.vlgmr.msra.gmra.mxu0 %v16090_v20  ;;  %v14045_v34 = vrot.slane %v16135_v31, 1  ;;  %v13860_v13 = vshll.u32 %v20442_v29, 16  ;;  %v13865_v15 = vshrl.u32 %v16091_v23, 16  ;;  %v13853_v41 = vshrl.u32 %v16090_v20, 16 }
0x18b5   : > { %14143 = vmatpush1.bf16.msra.mxu0 %v18321_v25  ;;  %v13869_v22 = vrot.slane %v13867_v49, 1  ;;  %v13857_v45 = vrot.slane %v13855_v36, 1  ;;  %v13874_v37 = vrot.slane %v13872_v9, 1  ;;  %v14042_v6 = vrot.slane %v16134_v1, 1 }
0x18b6   : > { %v14047_v40 = vsel %vm20783_vm4, %v14045_v34, %v14046_v4  ;;  %14144 = vmatprep.subr.bf16.mxu0 %v18333_v46  ;;  %v13862_v52 = vrot.slane %v13860_v13, 1  ;;  %v14043_v10 = vrot.slane %v20442_v29, 1 }
0x18b7   : > { %16154 = vmatprep.mubr.msk.bf16.mxu0 %vm20784_vm13, %v14047_v40  ;;  %v13870_v53 = vor.u32 %v13869_v22, %v13865_v15  ;;  %v13858_v51 = vor.u32 %v13857_v45, %v13853_v41 }
0x18b8   : > { %v14044_v3 = vsel %vm20788_vm15, %v14042_v6, %v14043_v10 }
0x18b9   : > { %14145 = vmatpush1.bf16.msra.mxu0 %v18331_v47  ;;  %v13875_v7 = vsel %vm20785_vm9, %v13870_v53, %v13874_v37  ;;  %v13863_v54 = vsel %vm20787_vm0, %v13858_v51, %v13862_v52  ;;  %v16155_v37 = vld [vmem:[%s19492_s27] ss:$0 sm:$0xff] }
0x18ba   : > { %16133 = vmatprep.mubr.msk.bf16.mxu1 %vm20786_vm2, %v13875_v7  ;;  %14146 = vmatprep.subr.bf16.mxu0 %v18336_v50 }
0x18bb   : > { %14003 = vmatmul.mubr.bf16.vlgmr.msra.gmra.mxu1 %v13863_v54 }
0x18bc   : > { %14278 = vmatpush1.bf16.msra.mxu1 %v18355_v5 }
0x18bd   : > { %14147 = vmatpush1.bf16.msra.mxu0 %v18334_v11  ;;  %14279 = vmatprep.subr.bf16.mxu1 %v19238_v0 }
0x18be   : > { %14148 = vmatprep.subr.bf16.mxu0 %v18339_v35 }
0x18c0   : > { %14280 = vmatpush1.bf16.msra.mxu1 %v18356_v12 }
0x18c1   : > { %14149 = vmatpush1.bf16.msra.mxu0 %v18337_v8  ;;  %14281 = vmatprep.subr.bf16.mxu1 %v19238_v0 }
0x18c2   : > { %14150 = vmatprep.subr.bf16.mxu0 %v18342_v28 }
0x18c4   : > { %14282 = vmatpush1.bf16.msra.mxu1 %v18357_v43 }
0x18c5   : > { %14151 = vmatpush1.bf16.msra.mxu0 %v18340_v57  ;;  %14283 = vmatprep.subr.bf16.mxu1 %v19238_v0 }
0x18c6   : > { %14152 = vmatprep.subr.bf16.mxu0 %v18345_v48 }
0x18c8   : > { %14284 = vmatpush1.bf16.msra.mxu1 %v18358_v14 }
0x18c9   : > { %14153 = vmatpush1.bf16.msra.mxu0 %v18343_v55  ;;  %14285 = vmatprep.subr.bf16.mxu1 %v19238_v0 }
0x18ca   : > { %14154 = vmatprep.subr.bf16.mxu0 %v18348_v58 }
0x18cc   : > { %14286 = vmatpush1.bf16.msra.mxu1 %v18359_v63 }
0x18cd   : > { %14155 = vmatpush1.bf16.msra.mxu0 %v18346_v59  ;;  %14287 = vmatprep.subr.bf16.mxu1 %v19238_v0 }
0x18ce   : > { %14156 = vmatprep.subr.bf16.mxu0 %v18351_v60 }
0x18d0   : > { %14288 = vmatpush1.bf16.msra.mxu1 %v18360_v44 }
0x18d1   : > { %14157 = vmatpush1.bf16.msra.mxu0 %v18349_v61  ;;  %14289 = vmatprep.subr.bf16.mxu1 %v19238_v0 }
0x18d2   : > { %14172 = vmatprep.subr.bf16.mxu0 %v18354_v62 }
0x18d4   : > { %14290 = vmatpush1.bf16.msra.mxu1 %v18361_v17 }
0x18d5   : > { %14173 = vmatpush2.bf16.msra.mxu0 %v18352_v33  ;;  %14291 = vmatprep.subr.bf16.mxu1 %v19238_v0 }
0x18d8   : > { %14175 = vmatmul.mubr.bf16.vlgmr.msra.gmra.mxu0 %v14044_v3  ;;  %14292 = vmatpush1.bf16.msra.mxu1 %v18362_v38 }
0x18d9   : > { %14307 = vmatprep.subr.bf16.mxu1 %v19238_v0 }
0x18dc   : > { %14308 = vmatpush2.bf16.msra.mxu1 %v18363_v26 }
0x1974   : > { %v13793_v18 = vpop.f32.mrf.mxu0 }
0x1975   : > { %v13813_v2 = vadd.f32 %v13806_v56, %v13793_v18 }
0x1976   : > { %v13795_v39 = vpop.f32.mrf.mxu0 }
0x1977   : > { %v13814_v29 = vadd.f32 %v13810_v21, %v13795_v39 }
0x1978   : > { %v13797_v42 = vpop.f32.mrf.mxu0 }
0x1979   : > { %v13815_v27 = vadd.f32 %v13806_v56, %v13797_v42 }
0x197a   : > { %v13799_v20 = vpop.f32.mrf.mxu0 }
0x197b   : > { %v14004_v16 = vpop.f32.mrf.mxu1  ;;  %v13816_v0 = vadd.f32 %v13810_v21, %v13799_v20 }
0x197c   : > { %v14013_v9 = vadd.f32 %v14004_v16, %v13813_v2 }
0x197d   : > { %v14006_v19 = vpop.f32.mrf.mxu1 }
0x197e   : > { %v14014_v4 = vadd.f32 %v14006_v19, %v13814_v29 }
0x197f   : > { %v14008_v23 = vpop.f32.mrf.mxu1 }
0x1980   : > { %v14015_v49 = vadd.f32 %v14008_v23, %v13815_v27 }
0x1981   : > { %v14010_v31 = vpop.f32.mrf.mxu1 }
0x1982   : > { %v14016_v36 = vadd.f32 %v14010_v31, %v13816_v0 }
0x1998   : > { %v14176_v25 = vpop.f32.mrf.mxu0 }
0x1999   : > { %v14185_v47 = vadd.f32 %v14176_v25, %v14013_v9 }
0x199a   : > { %v14178_v46 = vpop.f32.mrf.mxu0 }
0x199b   : > { %v14186_v13 = vadd.f32 %v14178_v46, %v14014_v4  ;;  %v14189_v45 = vmax.f32 %v14185_v47, 0.0 }
0x199c   : > { %v14180_v34 = vpop.f32.mrf.mxu0 }
0x199d   : > { %v14187_v32 = vadd.f32 %v14180_v34, %v14015_v49  ;;  %v14190_v40 = vmax.f32 %v14186_v13, 0.0 }
0x199e   : > { %v14182_v30 = vpop.f32.mrf.mxu0 }
0x199f   : > { %v14188_v15 = vadd.f32 %v14182_v30, %v14016_v36  ;;  %v14191_v22 = vmax.f32 %v14187_v32, 0.0 }
0x19a1   : > { %v14192_v41 = vmax.f32 %v14188_v15, 0.0  ;;  %v14193_v53 = vpack.c.bf16 %v14191_v22, %v14189_v45 }
0x19a3   : > { %v14194_v50 = vpack.c.bf16 %v14192_v41, %v14190_v40 }
0x19a5   : > { %16165 = vmatprep.mubr.msk.bf16.mxu1 %vm20789_vm3, %v14194_v50 }
0x19a6   : > { %14310 = vmatmul.mubr.bf16.vlgmr.msra.gmra.mxu1 %v14193_v53 }
0x1a66   : > { %v14311_v51 = vpop.f32.mrf.mxu1 }
0x1a67   : > { %v14312_v52 = vadd.f32 %v16155_v37, %v14311_v51 }
0x1a68   : > { %v14313_v7 = vpop.f32.mrf.mxu1 }
0x1a69   : > { %14318 = vst.msk [vmem:[%s1827_s10] sm:$0xff] %vm20790_vm12, %v14312_v52  ;;  %14322 = vrot.lane.b32.xlu0 %v14312_v52, %s19240_s11 }
0x1a6a   : > { %v14314_v11 = vpop.f32.mrf.mxu1 }
0x1a6b   : > { %v14315_v54 = vadd.f32 %v16155_v37, %v14314_v11 }
0x1a6c   : > { %v14316_v35 = vpop.f32.mrf.mxu1 }
0x1a6d   : > { %14319 = vst.msk [vmem:[%s1827_s10 + $0x8] sm:$0xff] %vm20791_vm5, %v14315_v54  ;;  %14324 = vrot.lane.b32.xlu0 %v14315_v54, %s19240_s11  ;;  %s19045_s11 = sshll.u32 %s19241_s15, 4  ;;  %s19046_s11 = int_to_ptr.vmem [resolvable:$false] %s19045_s11 }
0x1a6e   : > { %s19047_s2 = scalar_lea.vmem %s19046_s11, 1024  ;;  %p19048_p12 = scmp.lt.s32.totalorder %s20482_s1, %s19046_s11 }
0x1a6f   : > { %p19049_p11 = scmp.lt.s32.totalorder %s19047_s2, %s19041_s7 }
0x1a71   : > { %p19050_p9 = por %p19049_p11, %p19048_p12 }
0x1a73   : > { %p19051_p5 = pnand %p19050_p9, %p19044_p8 }
0x1adb   : > { %v14323_v8 = vpop.permute.xlu0 %14322 }
0x1adc   : > { %16166 = vst.msk [vmem:[%s1827_s10 + $0x10] sm:$0xff] %vm20792_vm10, %v14323_v8 }
0x1adf   : > { %v14325_v28 = vpop.permute.xlu0 %14324 }
0x1ae0   : > { %16167 = vst.msk [vmem:[%s1827_s10 + $0x18] sm:$0xff] %vm20793_vm6, %v14325_v28 }
0x1ae1   : > { %19054 = shalt.err (!%p19051_p5)
}
0x1ae2   : > { %s19055_s4 = scalar_lea.hbm %s20485_s22, 512  ;;  %s19059_s10 = scalar_lea.hbm %s19497_s8, 1024 }
0x1ae3   : > { %p19056_p6 = scmp.ne.s32.totalorder %s20485_s22, %s19055_s4  ;;  %p19060_p1 = scmp.lt.s32.totalorder %s20485_s22, %s19497_s8 }
0x1ae4   : > { %p19061_p2 = scmp.lt.s32.totalorder %s19059_s10, %s19055_s4 }
0x1ae5   : > { %p19057_p10 = pnand %p19056_p6, %p20794_p4 }
0x1ae6   : > { %p19062_p3 = por %p19061_p2, %p19060_p1 }
0x1ae7   : > { %p19058_p0 = pneg %p19057_p10 }
0x1ae9   : > { %p19063_p13 = pnand %p19062_p3, %p19058_p0 }
0x1aeb   : > { %19066 = shalt.err (!%p19063_p13)
}
0x1aec   : > { %s19242_s2 = smov 128   ;;  %s19243_s26 = smov 8  }
0x1aed   : > { %16297 = dma.vmem_to_hbm [thread:$0]  (%p20794_p4), %s20482_s1, 512, %s20485_s22, %s20488_s13, %s19242_s2, %s19242_s2, %s19243_s26  }
0x1aee PF: > { %s20795_s7 = sld [smem:[#allocation111_spill]] }
0x1aef   : > { %s20796_s15 = sld [smem:[#allocation109_spill]] }
0x1af0   : > { %s20797_s11 = sld [smem:[#allocation114_spill]] }
0x1af4   : > { %p16434_p7 = scmp.ge.s32.totalorder %s20795_s7, 2 }
0x1af5   : > { %s14360_s3 = sand.u32 1, %s20796_s15  }
0x1af6   : > { %p20798_p8 = scmp.ne.s32.totalorder %s20797_s11, 0  ;;  %s14361_s4 = scalar_lea.sflag [#allocation17], %s14360_s3 }
0x1af8   : > { %p16379_p12 = pnand %p16434_p7, %p20798_p8 }
0x1afa   : > { %p16380_p11 = pneg %p16379_p12 }
0x1afc   : > { %19140 = dma.done.wait (%p16380_p11), %s14361_s4, 512  }
0x1afd   : > { %19142 = vsyncadd (%p16380_p11), %s14361_s4, 4294966784  ;;  %s20799_s11 = sld [smem:[#allocation112_spill]]  ;;  %s20802_s7 = smov %s19149_s0 }
0x1afe   : > { %s20800_s10 = sld [smem:[#allocation110_spill]] }
0x1aff   : > { %s20801_s5 = sld [smem:[#allocation113_spill]] }
0x1b03   : > { %p123_p9 = scmp.ge.s32.totalorder %s20799_s11, 4  }
0x1b04   : > { %s20803_s0 = smov %s20800_s10 }
0x1b05   : > { %s20804_s10 = smov %s20801_s5  ;;  %125 = sbr.rel (!%p123_p9) target bundleno = 107 (0x6b), region = 452 }
0x1b0a   :  { %14366 = vsyncpa [#allocation16], 1 }
0x1b0b   :  { %14368 = vsyncpa [#allocation16 + $0x1], 1 }
0x1b0c   :  { %14369 = vsyncpa [#allocation19], 1 }
0x1b0d   :  { %14370 = vsyncpa [#allocation22], 1 }
0x1b0e   :  { %14371 = vsyncpa [#allocation25], 1 }
0x1b0f   :  { %14372 = vsyncpa [#allocation28], 1 }
0x1b10   :  { %14373 = vsyncpa [#allocation31], 1 }
0x1b11   :  { %14374 = vsyncpa [#allocation34], 1 }
0x1b12   :  { %14375 = vsyncpa [#allocation37], 1 }
0x1b13   :  { %14376 = vsyncpa [#allocation40], 1 }
0x1b14   :  { %14377 = vsyncpa [#allocation43], 1 }
0x1b15   :  { %14378 = vsyncpa [#allocation46], 1 }
0x1b16   :  { %14379 = vsyncpa [#allocation49], 1 }
0x1b17   :  { %14380 = vsyncpa [#allocation52], 1 }
0x1b18   :  { %14381 = vsyncpa [#allocation55], 1 }
0x1b19   :  { %14382 = vsyncpa [#allocation17], 1 }
0x1b1a   :  { %14384 = vsyncpa [#allocation17 + $0x1], 1 }

</bundles_post_ra>
